<compile_context>
chip_gen: v5e
topology: v5e:2x2
jax: 0.10.0
libtpu: 0.0.40
codegen_flags: <defaults>
</compile_context>

<pallas_src>
import functools
import math

import jax
import jax.numpy as jnp
from jax import lax
from jax.experimental import pallas as pl
from jax.experimental.pallas import tpu as pltpu


# ----------------------------------------------------------------------------
# Fused Pallas kernel: full DnCNN stack + fuse epilogue, one batch element/step
# ----------------------------------------------------------------------------
def _dncnn_fused_kernel(x_ref, gan_ref, w_ref, bias_ref,
                        out_ref, phi_ref, buf_a, buf_b, *,
                        H, W, num_layers, margin):
    """One grid step = one image.

    x_ref, gan_ref : (1, C, L)               L = H*(W+2), row-padded flat spatial
    w_ref          : (num_layers, Cp, 9*Cp)  packed conv weights (BN scale folded)
    bias_ref       : (num_layers, Cp, 1)     folded BN bias (0 if no BN)
    out_ref,phi_ref: (1, C, L)
    buf_a, buf_b   : (Cp, FLAT) VMEM ping-pong activation buffers; the margin,
                     the 2 gap lanes per row and the tail are the conv's zeros.
    """
    Wp = W + 2
    L = H * Wp
    c_img = x_ref.shape[1]

    # Zero both activation buffers: their never-written lanes ARE the padding.
    # (Scratch persists across grid steps, so stale activations must be wiped.)
    buf_a[...] = jnp.zeros_like(buf_a)
    buf_b[...] = jnp.zeros_like(buf_b)

    # Place the input image into buffer A's interior (the 2 gap lanes per row
    # are already zero because the wrapper right-padded each row with zeros).
    buf_a[pl.ds(0, c_img), pl.ds(margin, L)] = x_ref[0]

    # Lanes whose column index is >= W are inter-row padding -> force to zero
    # after every ReLU layer (bias would otherwise make them nonzero).
    col = lax.broadcasted_iota(jnp.int32, (1, L), 1) % Wp
    valid = (col < W).astype(jnp.float32)

    # Tap order matches the packed weights: t = dy*3 + dx.
    shifts = [margin + (dy - 1) * Wp + (dx - 1)
              for dy in range(3) for dx in range(3)]

    bufs = (buf_a, buf_b)
    for layer in range(num_layers):
        src = bufs[layer % 2][...]                          # (Cp, FLAT)
        # im2col operand (9*Cp, L): 9 static lane-shifted slices, then one
        # deep MXU matmul per layer (K = 9*Cp).
        patches = jnp.concatenate([src[:, s:s + L] for s in shifts], axis=0)
        acc = jnp.dot(w_ref[layer], patches,
                      preferred_element_type=jnp.float32)   # (Cp, L)
        acc = acc + bias_ref[layer]                          # folded BN bias

        if layer < num_layers - 1:
            acc = jnp.maximum(acc, 0.0) * valid              # ReLU + re-zero pad
            bufs[(layer + 1) % 2][:, pl.ds(margin, L)] = acc
        else:
            # Last conv (no ReLU) + fused epilogue: out = (1-phi)*x + phi*gan.
            phi = acc[0:c_img, :]                            # (C, L)
            x_w = x_ref[0]
            g_w = gan_ref[0]
            out_ref[0] = (1.0 - phi) * x_w + phi * g_w
            phi_ref[0] = phi


# ----------------------------------------------------------------------------
# Parameter packing (done once, outside the kernel)
# ----------------------------------------------------------------------------
def pack_dncnn(params, c_scr):
    """Pack per-layer (3,3,Cin,Cout) weights into aligned (Cp, 9*Cp) matrices
    (zero-padded), with the eval-mode BN scale folded into the rows, plus a
    (Cp,1) bias column."""
    w_all, b_all = [], []
    for p in params:
        w = p["w"].astype(jnp.float32)                       # (3,3,cin,cout)
        cin, cout = w.shape[2], w.shape[3]
        scale = p["scale"].astype(jnp.float32)               # (cout,)
        w = w * scale[None, None, None, :]                   # fold BN scale
        wt = jnp.transpose(w, (3, 0, 1, 2)).reshape(cout, 9, cin)
        wt = jnp.pad(wt, ((0, c_scr - cout), (0, 0), (0, c_scr - cin)))
        w_all.append(wt.reshape(c_scr, 9 * c_scr))           # [o, t*Cp + c]
        b_all.append(jnp.pad(p["bias"].astype(jnp.float32), (0, c_scr - cout)))
    n = len(params)
    return jnp.stack(w_all), jnp.stack(b_all).reshape(n, c_scr, 1)


# ----------------------------------------------------------------------------
# Wrapper: full_model.forward (extend_input=False) -> (out, phi) in NCHW
# ----------------------------------------------------------------------------
def full_model_forward(params, x_nchw, gan_nchw):
    N, C, H, W = x_nchw.shape
    Wp = W + 2
    L = H * Wp
    num_layers = len(params)
    c_scr = 8 * ((max(max(p["w"].shape[2], p["w"].shape[3])
                      for p in params) + 7) // 8)
    margin = 128 * ((Wp + 1 + 127) // 128)                   # lane-aligned margin
    flat = 128 * ((margin + L + Wp + 2 + 127) // 128)        # scratch lane extent

    # Row-padded flat spatial layout (only the tiny C=3 input/gan are padded;
    # no per-layer HBM padding of the 32-channel feature maps).
    xw = jnp.pad(x_nchw.astype(jnp.float32),
                 ((0, 0), (0, 0), (0, 0), (0, 2))).reshape(N, C, L)
    gw = jnp.pad(gan_nchw.astype(jnp.float32),
                 ((0, 0), (0, 0), (0, 0), (0, 2))).reshape(N, C, L)
    w_all, b_all = pack_dncnn(params, c_scr)

    kern = functools.partial(_dncnn_fused_kernel, H=H, W=W,
                             num_layers=num_layers, margin=margin)

    out_w, phi_w = pl.pallas_call(
        kern,
        out_shape=(jax.ShapeDtypeStruct((N, C, L), jnp.float32),
                   jax.ShapeDtypeStruct((N, C, L), jnp.float32)),
        grid=(N,),
        in_specs=[
            pl.BlockSpec((1, C, L), lambda n: (n, 0, 0)),                      # x
            pl.BlockSpec((1, C, L), lambda n: (n, 0, 0)),                      # gan
            pl.BlockSpec((num_layers, c_scr, 9 * c_scr), lambda n: (0, 0, 0)), # W
            pl.BlockSpec((num_layers, c_scr, 1), lambda n: (0, 0, 0)),         # bias
        ],
        out_specs=(pl.BlockSpec((1, C, L), lambda n: (n, 0, 0)),
                   pl.BlockSpec((1, C, L), lambda n: (n, 0, 0))),
        scratch_shapes=[pltpu.VMEM((c_scr, flat), jnp.float32),
                        pltpu.VMEM((c_scr, flat), jnp.float32)],
        compiler_params=pltpu.CompilerParams(
            dimension_semantics=("parallel",)),
    )(xw, gw, w_all, b_all)

    out = out_w.reshape(N, C, H, Wp)[..., :W]
    phi = phi_w.reshape(N, C, H, Wp)[..., :W]
    return out, phi


# ----------------------------------------------------------------------------
# DnCNN parameter init (kaiming convs, eval-mode BN folded into scale/bias)
# ----------------------------------------------------------------------------
def init_dncnn_params(key, channels=3, features=32, num_layers=4):
    params = []
    keys = jax.random.split(key, num_layers + (num_layers - 2))
    ki = 0

    def kaiming(k, cin, cout):
        std = math.sqrt(2.0 / (cin * 3 * 3))  # fan_in, a=0
        return jax.random.normal(k, (3, 3, cin, cout), jnp.float32) * std

    # first layer: conv + ReLU
    params.append(dict(w=kaiming(keys[ki], channels, features),
                       scale=jnp.ones((features,), jnp.float32),
                       bias=jnp.zeros((features,), jnp.float32),
                       relu=True)); ki += 1
    # middle layers: conv + BN + ReLU (eval-mode BN folded: mean=0, var=1)
    eps = 1e-4
    for _ in range(num_layers - 2):
        w = kaiming(keys[ki], features, features); ki += 1
        gamma = jnp.clip(
            jax.random.normal(keys[ki], (features,), jnp.float32)
            * math.sqrt(2.0 / 9.0 / 64.0), -0.025, 0.025); ki += 1
        scale = gamma / jnp.sqrt(1.0 + eps)
        params.append(dict(w=w, scale=scale,
                           bias=jnp.zeros((features,), jnp.float32), relu=True))
    # last layer: conv only
    params.append(dict(w=kaiming(keys[ki], features, channels),
                       scale=jnp.ones((channels,), jnp.float32),
                       bias=jnp.zeros((channels,), jnp.float32), relu=False))
    return params


# ----------------------------------------------------------------------------
# Pure-JAX reference (correctness check)
# ----------------------------------------------------------------------------
def _conv3x3_ref(x_nhwc, w_hwio, scale, bias, relu):
    y = lax.conv_general_dilated(
        x_nhwc, w_hwio, window_strides=(1, 1), padding="SAME",
        dimension_numbers=("NHWC", "HWIO", "NHWC"))
    y = y * scale[None, None, None, :] + bias[None, None, None, :]
    return jnp.maximum(y, 0.0) if relu else y


def full_model_ref(params, x_nchw, gan_nchw):
    x = jnp.transpose(x_nchw, (0, 2, 3, 1))
    gan = jnp.transpose(gan_nchw, (0, 2, 3, 1))
    h = x
    for p in params:
        h = _conv3x3_ref(h, p["w"], p["scale"], p["bias"], p["relu"])
    out = (1.0 - h) * x + h * gan
    return (jnp.transpose(out, (0, 3, 1, 2)), jnp.transpose(h, (0, 3, 1, 2)))


# ----------------------------------------------------------------------------
if __name__ == "__main__":
    key = jax.random.PRNGKey(0)
    k_par, k_x, k_gan = jax.random.split(key, 3)

    N, C, H, W = 2, 3, 16, 16           # model_channels = 3 (non-'col', no extend)
    params = init_dncnn_params(k_par, channels=C, features=32, num_layers=4)

    x = jax.random.normal(k_x, (N, C, H, W), jnp.float32)
    gan = jax.random.normal(k_gan, (N, C, H, W), jnp.float32)

    out, phi = full_model_forward(params, x, gan)
    out = jax.block_until_ready(out)
    phi = jax.block_until_ready(phi)

    out_ref, phi_ref = full_model_ref(params, x, gan)
    assert out.shape == (N, C, H, W) and phi.shape == (N, C, H, W)
    assert jnp.allclose(out, out_ref, rtol=1e-4, atol=1e-4)
    assert jnp.allclose(phi, phi_ref, rtol=1e-4, atol=1e-4)

    print("KERNEL_OK")
</pallas_src>

<mosaic_0001>
module attributes {stable_mosaic.version = 11 : i64} {
  func.func @_dncnn_fused_kernel(%arg0: i32, %arg1: memref<1x3x288xf32, #tpu.memory_space<vmem>>, %arg2: memref<1x3x288xf32, #tpu.memory_space<vmem>>, %arg3: memref<4x32x288xf32, #tpu.memory_space<vmem>>, %arg4: memref<4x32x1xf32, #tpu.memory_space<vmem>>, %arg5: memref<1x3x288xf32, #tpu.memory_space<vmem>>, %arg6: memref<1x3x288xf32, #tpu.memory_space<vmem>>, %arg7: memref<32x512xf32, #tpu.memory_space<vmem>>, %arg8: memref<32x512xf32, #tpu.memory_space<vmem>>) attributes {dimension_semantics = [#tpu.dimension_semantics<parallel>], iteration_bounds = array<i64: 2>, scalar_prefetch = 0 : i64, scratch_operands = 2 : i64, tpu.core_type = #tpu.core_type<tc>, window_params = [{transform_indices = @transform_0, window_bounds = array<i64: 1, 3, 288>}, {transform_indices = @transform_1, window_bounds = array<i64: 1, 3, 288>}, {pipeline_mode = #tpu.pipeline_mode<synchronous>, transform_indices = @transform_2, window_bounds = array<i64: 4, 32, 288>}, {pipeline_mode = #tpu.pipeline_mode<synchronous>, transform_indices = @transform_3, window_bounds = array<i64: 4, 32, 1>}, {transform_indices = @transform_4, window_bounds = array<i64: 1, 3, 288>}, {transform_indices = @transform_5, window_bounds = array<i64: 1, 3, 288>}]} {
    %cst = arith.constant 0.000000e+00 : f32
    %0 = vector.broadcast %cst : f32 to vector<32x512xf32>
    %c0 = arith.constant 0 : index
    %c0_0 = arith.constant 0 : index
    %1 = vector.load %arg7[%c0, %c0_0] : memref<32x512xf32, #tpu.memory_space<vmem>>, vector<32x512xf32>
    tpu.vector_store %arg7[%c0, %c0_0], %0 {strides = array<i32>} : memref<32x512xf32, #tpu.memory_space<vmem>>, vector<32x512xf32>,
    %cst_1 = arith.constant 0.000000e+00 : f32
    %2 = vector.broadcast %cst_1 : f32 to vector<32x512xf32>
    %c0_2 = arith.constant 0 : index
    %c0_3 = arith.constant 0 : index
    %3 = vector.load %arg8[%c0_2, %c0_3] : memref<32x512xf32, #tpu.memory_space<vmem>>, vector<32x512xf32>
    tpu.vector_store %arg8[%c0_2, %c0_3], %2 {strides = array<i32>} : memref<32x512xf32, #tpu.memory_space<vmem>>, vector<32x512xf32>,
    %c0_4 = arith.constant 0 : index
    %c0_5 = arith.constant 0 : index
    %c0_6 = arith.constant 0 : index
    %4 = vector.load %arg1[%c0_4, %c0_5, %c0_6] : memref<1x3x288xf32, #tpu.memory_space<vmem>>, vector<1x3x288xf32>
    %5 = vector.shape_cast %4 : vector<1x3x288xf32> to vector<3x288xf32>
    %c0_7 = arith.constant 0 : index
    %c128 = arith.constant 128 : index
    %6 = vector.load %arg7[%c0_7, %c128] : memref<32x512xf32, #tpu.memory_space<vmem>>, vector<3x288xf32>
    tpu.vector_store %arg7[%c0_7, %c128], %5 {strides = array<i32>} : memref<32x512xf32, #tpu.memory_space<vmem>>, vector<3x288xf32>,
    %7 = tpu.iota {dimensions = array<i32: 1>} : vector<1x288xi32>
    %c18_i32 = arith.constant 18 : i32
    %c0_i32 = arith.constant 0 : i32
    %8 = arith.cmpi eq, %c18_i32, %c0_i32 : i32
    %c1_i32 = arith.constant 1 : i32
    %9 = arith.select %8, %c1_i32, %c18_i32 : i32
    %10 = vector.broadcast %9 : i32 to vector<1x288xi32>
    %11 = arith.remsi %7, %10 : vector<1x288xi32>
    %c0_i32_8 = arith.constant 0 : i32
    %12 = vector.broadcast %c0_i32_8 : i32 to vector<1x288xi32>
    %13 = arith.cmpi ne, %11, %12 : vector<1x288xi32>
    %c0_i32_9 = arith.constant 0 : i32
    %14 = vector.broadcast %c0_i32_9 : i32 to vector<1x288xi32>
    %15 = arith.cmpi slt, %11, %14 : vector<1x288xi32>
    %c0_i32_10 = arith.constant 0 : i32
    %16 = arith.cmpi slt, %9, %c0_i32_10 : i32
    %17 = vector.broadcast %16 : i1 to vector<1x288xi1>
    %18 = vector.broadcast %17 : vector<1x288xi1> to vector<1x288xi1>
    %19 = arith.xori %15, %18 : vector<1x288xi1>
    %20 = arith.andi %19, %13 : vector<1x288xi1>
    %21 = vector.broadcast %9 : i32 to vector<1x288xi32>
    %22 = arith.addi %11, %21 : vector<1x288xi32>
    %23 = arith.select %20, %22, %11 : vector<1x288xi1>, vector<1x288xi32>
    %c16_i32 = arith.constant 16 : i32
    %24 = vector.broadcast %c16_i32 : i32 to vector<1x288xi32>
    %25 = arith.cmpi slt, %23, %24 : vector<1x288xi32>
    %26 = arith.extui %25 : vector<1x288xi1> to vector<1x288xi32>
    %27 = arith.sitofp %26 : vector<1x288xi32> to vector<1x288xf32>
    %c0_11 = arith.constant 0 : index
    %c0_12 = arith.constant 0 : index
    %28 = vector.load %arg7[%c0_11, %c0_12] : memref<32x512xf32, #tpu.memory_space<vmem>>, vector<32x512xf32>
    %29 = vector.extract_strided_slice %28 {offsets = [0, 109], sizes = [32, 288], strides = [1, 1]} : vector<32x512xf32> to vector<32x288xf32>
    %30 = vector.extract_strided_slice %28 {offsets = [0, 110], sizes = [32, 288], strides = [1, 1]} : vector<32x512xf32> to vector<32x288xf32>
    %31 = vector.extract_strided_slice %28 {offsets = [0, 111], sizes = [32, 288], strides = [1, 1]} : vector<32x512xf32> to vector<32x288xf32>
    %32 = vector.extract_strided_slice %28 {offsets = [0, 127], sizes = [32, 288], strides = [1, 1]} : vector<32x512xf32> to vector<32x288xf32>
    %33 = vector.extract_strided_slice %28 {offsets = [0, 128], sizes = [32, 288], strides = [1, 1]} : vector<32x512xf32> to vector<32x288xf32>
    %34 = vector.extract_strided_slice %28 {offsets = [0, 129], sizes = [32, 288], strides = [1, 1]} : vector<32x512xf32> to vector<32x288xf32>
    %35 = vector.extract_strided_slice %28 {offsets = [0, 145], sizes = [32, 288], strides = [1, 1]} : vector<32x512xf32> to vector<32x288xf32>
    %36 = vector.extract_strided_slice %28 {offsets = [0, 146], sizes = [32, 288], strides = [1, 1]} : vector<32x512xf32> to vector<32x288xf32>
    %37 = vector.extract_strided_slice %28 {offsets = [0, 147], sizes = [32, 288], strides = [1, 1]} : vector<32x512xf32> to vector<32x288xf32>
    %38 = tpu.concatenate %29, %30, %31, %32, %33, %34, %35, %36, %37 in 0 : vector<32x288xf32>, vector<32x288xf32>, vector<32x288xf32>, vector<32x288xf32>, vector<32x288xf32>, vector<32x288xf32>, vector<32x288xf32>, vector<32x288xf32>, vector<32x288xf32> -> vector<288x288xf32>
    %c0_13 = arith.constant 0 : index
    %c0_14 = arith.constant 0 : index
    %c0_15 = arith.constant 0 : index
    %39 = vector.load %arg3[%c0_13, %c0_14, %c0_15] : memref<4x32x288xf32, #tpu.memory_space<vmem>>, vector<1x32x288xf32>
    %40 = vector.shape_cast %39 : vector<1x32x288xf32> to vector<32x288xf32>
    %cst_16 = arith.constant dense<0.000000e+00> : vector<32x288xf32>
    %41 = tpu.matmul %40, %38, %cst_16 {dimension_numbers = #tpu.dot_dimension_numbers<[1], [0], [0], [1], [0, 0, 1, 1], [], []>} : vector<32x288xf32>, vector<288x288xf32>, vector<32x288xf32> -> vector<32x288xf32>
    %c0_17 = arith.constant 0 : index
    %c0_18 = arith.constant 0 : index
    %c0_19 = arith.constant 0 : index
    %42 = vector.load %arg4[%c0_17, %c0_18, %c0_19] : memref<4x32x1xf32, #tpu.memory_space<vmem>>, vector<1x32x1xf32>
    %43 = vector.shape_cast %42 : vector<1x32x1xf32> to vector<32x1xf32>
    %44 = vector.broadcast %43 : vector<32x1xf32> to vector<32x288xf32>
    %45 = arith.addf %41, %44 : vector<32x288xf32>
    %cst_20 = arith.constant 0.000000e+00 : f32
    %46 = vector.broadcast %cst_20 : f32 to vector<32x288xf32>
    %47 = arith.maximumf %45, %46 : vector<32x288xf32>
    %48 = vector.broadcast %27 : vector<1x288xf32> to vector<32x288xf32>
    %49 = arith.mulf %47, %48 : vector<32x288xf32>
    %c0_21 = arith.constant 0 : index
    %c128_22 = arith.constant 128 : index
    %50 = vector.load %arg8[%c0_21, %c128_22] : memref<32x512xf32, #tpu.memory_space<vmem>>, vector<32x288xf32>
    tpu.vector_store %arg8[%c0_21, %c128_22], %49 {strides = array<i32>} : memref<32x512xf32, #tpu.memory_space<vmem>>, vector<32x288xf32>,
    %c0_23 = arith.constant 0 : index
    %c0_24 = arith.constant 0 : index
    %51 = vector.load %arg8[%c0_23, %c0_24] : memref<32x512xf32, #tpu.memory_space<vmem>>, vector<32x512xf32>
    %52 = vector.extract_strided_slice %51 {offsets = [0, 109], sizes = [32, 288], strides = [1, 1]} : vector<32x512xf32> to vector<32x288xf32>
    %53 = vector.extract_strided_slice %51 {offsets = [0, 110], sizes = [32, 288], strides = [1, 1]} : vector<32x512xf32> to vector<32x288xf32>
    %54 = vector.extract_strided_slice %51 {offsets = [0, 111], sizes = [32, 288], strides = [1, 1]} : vector<32x512xf32> to vector<32x288xf32>
    %55 = vector.extract_strided_slice %51 {offsets = [0, 127], sizes = [32, 288], strides = [1, 1]} : vector<32x512xf32> to vector<32x288xf32>
    %56 = vector.extract_strided_slice %51 {offsets = [0, 128], sizes = [32, 288], strides = [1, 1]} : vector<32x512xf32> to vector<32x288xf32>
    %57 = vector.extract_strided_slice %51 {offsets = [0, 129], sizes = [32, 288], strides = [1, 1]} : vector<32x512xf32> to vector<32x288xf32>
    %58 = vector.extract_strided_slice %51 {offsets = [0, 145], sizes = [32, 288], strides = [1, 1]} : vector<32x512xf32> to vector<32x288xf32>
    %59 = vector.extract_strided_slice %51 {offsets = [0, 146], sizes = [32, 288], strides = [1, 1]} : vector<32x512xf32> to vector<32x288xf32>
    %60 = vector.extract_strided_slice %51 {offsets = [0, 147], sizes = [32, 288], strides = [1, 1]} : vector<32x512xf32> to vector<32x288xf32>
    %61 = tpu.concatenate %52, %53, %54, %55, %56, %57, %58, %59, %60 in 0 : vector<32x288xf32>, vector<32x288xf32>, vector<32x288xf32>, vector<32x288xf32>, vector<32x288xf32>, vector<32x288xf32>, vector<32x288xf32>, vector<32x288xf32>, vector<32x288xf32> -> vector<288x288xf32>
    %c1 = arith.constant 1 : index
    %c0_25 = arith.constant 0 : index
    %c0_26 = arith.constant 0 : index
    %62 = vector.load %arg3[%c1, %c0_25, %c0_26] : memref<4x32x288xf32, #tpu.memory_space<vmem>>, vector<1x32x288xf32>
    %63 = vector.shape_cast %62 : vector<1x32x288xf32> to vector<32x288xf32>
    %cst_27 = arith.constant dense<0.000000e+00> : vector<32x288xf32>
    %64 = tpu.matmul %63, %61, %cst_27 {dimension_numbers = #tpu.dot_dimension_numbers<[1], [0], [0], [1], [0, 0, 1, 1], [], []>} : vector<32x288xf32>, vector<288x288xf32>, vector<32x288xf32> -> vector<32x288xf32>
    %c1_28 = arith.constant 1 : index
    %c0_29 = arith.constant 0 : index
    %c0_30 = arith.constant 0 : index
    %65 = vector.load %arg4[%c1_28, %c0_29, %c0_30] : memref<4x32x1xf32, #tpu.memory_space<vmem>>, vector<1x32x1xf32>
    %66 = vector.shape_cast %65 : vector<1x32x1xf32> to vector<32x1xf32>
    %67 = vector.broadcast %66 : vector<32x1xf32> to vector<32x288xf32>
    %68 = arith.addf %64, %67 : vector<32x288xf32>
    %cst_31 = arith.constant 0.000000e+00 : f32
    %69 = vector.broadcast %cst_31 : f32 to vector<32x288xf32>
    %70 = arith.maximumf %68, %69 : vector<32x288xf32>
    %71 = vector.broadcast %27 : vector<1x288xf32> to vector<32x288xf32>
    %72 = arith.mulf %70, %71 : vector<32x288xf32>
    %c0_32 = arith.constant 0 : index
    %c128_33 = arith.constant 128 : index
    %73 = vector.load %arg7[%c0_32, %c128_33] : memref<32x512xf32, #tpu.memory_space<vmem>>, vector<32x288xf32>
    tpu.vector_store %arg7[%c0_32, %c128_33], %72 {strides = array<i32>} : memref<32x512xf32, #tpu.memory_space<vmem>>, vector<32x288xf32>,
    %c0_34 = arith.constant 0 : index
    %c0_35 = arith.constant 0 : index
    %74 = vector.load %arg7[%c0_34, %c0_35] : memref<32x512xf32, #tpu.memory_space<vmem>>, vector<32x512xf32>
    %75 = vector.extract_strided_slice %74 {offsets = [0, 109], sizes = [32, 288], strides = [1, 1]} : vector<32x512xf32> to vector<32x288xf32>
    %76 = vector.extract_strided_slice %74 {offsets = [0, 110], sizes = [32, 288], strides = [1, 1]} : vector<32x512xf32> to vector<32x288xf32>
    %77 = vector.extract_strided_slice %74 {offsets = [0, 111], sizes = [32, 288], strides = [1, 1]} : vector<32x512xf32> to vector<32x288xf32>
    %78 = vector.extract_strided_slice %74 {offsets = [0, 127], sizes = [32, 288], strides = [1, 1]} : vector<32x512xf32> to vector<32x288xf32>
    %79 = vector.extract_strided_slice %74 {offsets = [0, 128], sizes = [32, 288], strides = [1, 1]} : vector<32x512xf32> to vector<32x288xf32>
    %80 = vector.extract_strided_slice %74 {offsets = [0, 129], sizes = [32, 288], strides = [1, 1]} : vector<32x512xf32> to vector<32x288xf32>
    %81 = vector.extract_strided_slice %74 {offsets = [0, 145], sizes = [32, 288], strides = [1, 1]} : vector<32x512xf32> to vector<32x288xf32>
    %82 = vector.extract_strided_slice %74 {offsets = [0, 146], sizes = [32, 288], strides = [1, 1]} : vector<32x512xf32> to vector<32x288xf32>
    %83 = vector.extract_strided_slice %74 {offsets = [0, 147], sizes = [32, 288], strides = [1, 1]} : vector<32x512xf32> to vector<32x288xf32>
    %84 = tpu.concatenate %75, %76, %77, %78, %79, %80, %81, %82, %83 in 0 : vector<32x288xf32>, vector<32x288xf32>, vector<32x288xf32>, vector<32x288xf32>, vector<32x288xf32>, vector<32x288xf32>, vector<32x288xf32>, vector<32x288xf32>, vector<32x288xf32> -> vector<288x288xf32>
    %c2 = arith.constant 2 : index
    %c0_36 = arith.constant 0 : index
    %c0_37 = arith.constant 0 : index
    %85 = vector.load %arg3[%c2, %c0_36, %c0_37] : memref<4x32x288xf32, #tpu.memory_space<vmem>>, vector<1x32x288xf32>
    %86 = vector.shape_cast %85 : vector<1x32x288xf32> to vector<32x288xf32>
    %cst_38 = arith.constant dense<0.000000e+00> : vector<32x288xf32>
    %87 = tpu.matmul %86, %84, %cst_38 {dimension_numbers = #tpu.dot_dimension_numbers<[1], [0], [0], [1], [0, 0, 1, 1], [], []>} : vector<32x288xf32>, vector<288x288xf32>, vector<32x288xf32> -> vector<32x288xf32>
    %c2_39 = arith.constant 2 : index
    %c0_40 = arith.constant 0 : index
    %c0_41 = arith.constant 0 : index
    %88 = vector.load %arg4[%c2_39, %c0_40, %c0_41] : memref<4x32x1xf32, #tpu.memory_space<vmem>>, vector<1x32x1xf32>
    %89 = vector.shape_cast %88 : vector<1x32x1xf32> to vector<32x1xf32>
    %90 = vector.broadcast %89 : vector<32x1xf32> to vector<32x288xf32>
    %91 = arith.addf %87, %90 : vector<32x288xf32>
    %cst_42 = arith.constant 0.000000e+00 : f32
    %92 = vector.broadcast %cst_42 : f32 to vector<32x288xf32>
    %93 = arith.maximumf %91, %92 : vector<32x288xf32>
    %94 = vector.broadcast %27 : vector<1x288xf32> to vector<32x288xf32>
    %95 = arith.mulf %93, %94 : vector<32x288xf32>
    %c0_43 = arith.constant 0 : index
    %c128_44 = arith.constant 128 : index
    %96 = vector.load %arg8[%c0_43, %c128_44] : memref<32x512xf32, #tpu.memory_space<vmem>>, vector<32x288xf32>
    tpu.vector_store %arg8[%c0_43, %c128_44], %95 {strides = array<i32>} : memref<32x512xf32, #tpu.memory_space<vmem>>, vector<32x288xf32>,
    %c0_45 = arith.constant 0 : index
    %c0_46 = arith.constant 0 : index
    %97 = vector.load %arg8[%c0_45, %c0_46] : memref<32x512xf32, #tpu.memory_space<vmem>>, vector<32x512xf32>
    %98 = vector.extract_strided_slice %97 {offsets = [0, 109], sizes = [32, 288], strides = [1, 1]} : vector<32x512xf32> to vector<32x288xf32>
    %99 = vector.extract_strided_slice %97 {offsets = [0, 110], sizes = [32, 288], strides = [1, 1]} : vector<32x512xf32> to vector<32x288xf32>
    %100 = vector.extract_strided_slice %97 {offsets = [0, 111], sizes = [32, 288], strides = [1, 1]} : vector<32x512xf32> to vector<32x288xf32>
    %101 = vector.extract_strided_slice %97 {offsets = [0, 127], sizes = [32, 288], strides = [1, 1]} : vector<32x512xf32> to vector<32x288xf32>
    %102 = vector.extract_strided_slice %97 {offsets = [0, 128], sizes = [32, 288], strides = [1, 1]} : vector<32x512xf32> to vector<32x288xf32>
    %103 = vector.extract_strided_slice %97 {offsets = [0, 129], sizes = [32, 288], strides = [1, 1]} : vector<32x512xf32> to vector<32x288xf32>
    %104 = vector.extract_strided_slice %97 {offsets = [0, 145], sizes = [32, 288], strides = [1, 1]} : vector<32x512xf32> to vector<32x288xf32>
    %105 = vector.extract_strided_slice %97 {offsets = [0, 146], sizes = [32, 288], strides = [1, 1]} : vector<32x512xf32> to vector<32x288xf32>
    %106 = vector.extract_strided_slice %97 {offsets = [0, 147], sizes = [32, 288], strides = [1, 1]} : vector<32x512xf32> to vector<32x288xf32>
    %107 = tpu.concatenate %98, %99, %100, %101, %102, %103, %104, %105, %106 in 0 : vector<32x288xf32>, vector<32x288xf32>, vector<32x288xf32>, vector<32x288xf32>, vector<32x288xf32>, vector<32x288xf32>, vector<32x288xf32>, vector<32x288xf32>, vector<32x288xf32> -> vector<288x288xf32>
    %c3 = arith.constant 3 : index
    %c0_47 = arith.constant 0 : index
    %c0_48 = arith.constant 0 : index
    %108 = vector.load %arg3[%c3, %c0_47, %c0_48] : memref<4x32x288xf32, #tpu.memory_space<vmem>>, vector<1x32x288xf32>
    %109 = vector.shape_cast %108 : vector<1x32x288xf32> to vector<32x288xf32>
    %cst_49 = arith.constant dense<0.000000e+00> : vector<32x288xf32>
    %110 = tpu.matmul %109, %107, %cst_49 {dimension_numbers = #tpu.dot_dimension_numbers<[1], [0], [0], [1], [0, 0, 1, 1], [], []>} : vector<32x288xf32>, vector<288x288xf32>, vector<32x288xf32> -> vector<32x288xf32>
    %c3_50 = arith.constant 3 : index
    %c0_51 = arith.constant 0 : index
    %c0_52 = arith.constant 0 : index
    %111 = vector.load %arg4[%c3_50, %c0_51, %c0_52] : memref<4x32x1xf32, #tpu.memory_space<vmem>>, vector<1x32x1xf32>
    %112 = vector.shape_cast %111 : vector<1x32x1xf32> to vector<32x1xf32>
    %113 = vector.broadcast %112 : vector<32x1xf32> to vector<32x288xf32>
    %114 = arith.addf %110, %113 : vector<32x288xf32>
    %115 = vector.extract_strided_slice %114 {offsets = [0, 0], sizes = [3, 288], strides = [1, 1]} : vector<32x288xf32> to vector<3x288xf32>
    %c0_53 = arith.constant 0 : index
    %c0_54 = arith.constant 0 : index
    %c0_55 = arith.constant 0 : index
    %116 = vector.load %arg1[%c0_53, %c0_54, %c0_55] : memref<1x3x288xf32, #tpu.memory_space<vmem>>, vector<1x3x288xf32>
    %117 = vector.shape_cast %116 : vector<1x3x288xf32> to vector<3x288xf32>
    %c0_56 = arith.constant 0 : index
    %c0_57 = arith.constant 0 : index
    %c0_58 = arith.constant 0 : index
    %118 = vector.load %arg2[%c0_56, %c0_57, %c0_58] : memref<1x3x288xf32, #tpu.memory_space<vmem>>, vector<1x3x288xf32>
    %119 = vector.shape_cast %118 : vector<1x3x288xf32> to vector<3x288xf32>
    %cst_59 = arith.constant 1.000000e+00 : f32
    %120 = vector.broadcast %cst_59 : f32 to vector<3x288xf32>
    %121 = arith.subf %120, %115 : vector<3x288xf32>
    %122 = arith.mulf %121, %117 : vector<3x288xf32>
    %123 = arith.mulf %115, %119 : vector<3x288xf32>
    %124 = arith.addf %122, %123 : vector<3x288xf32>
    %c0_60 = arith.constant 0 : index
    %c0_61 = arith.constant 0 : index
    %c0_62 = arith.constant 0 : index
    %125 = vector.load %arg5[%c0_60, %c0_61, %c0_62] : memref<1x3x288xf32, #tpu.memory_space<vmem>>, vector<1x3x288xf32>
    %126 = vector.shape_cast %125 : vector<1x3x288xf32> to vector<3x288xf32>
    %127 = vector.shape_cast %124 : vector<3x288xf32> to vector<1x3x288xf32>
    tpu.vector_store %arg5[%c0_60, %c0_61, %c0_62], %127 {strides = array<i32>} : memref<1x3x288xf32, #tpu.memory_space<vmem>>, vector<1x3x288xf32>,
    %c0_63 = arith.constant 0 : index
    %c0_64 = arith.constant 0 : index
    %c0_65 = arith.constant 0 : index
    %128 = vector.load %arg6[%c0_63, %c0_64, %c0_65] : memref<1x3x288xf32, #tpu.memory_space<vmem>>, vector<1x3x288xf32>
    %129 = vector.shape_cast %128 : vector<1x3x288xf32> to vector<3x288xf32>
    %130 = vector.shape_cast %115 : vector<3x288xf32> to vector<1x3x288xf32>
    tpu.vector_store %arg6[%c0_63, %c0_64, %c0_65], %130 {strides = array<i32>} : memref<1x3x288xf32, #tpu.memory_space<vmem>>, vector<1x3x288xf32>,
    return
  }
  func.func @transform_0(%arg0: i32) -> (i32, i32, i32) {
    %c0_i32 = arith.constant 0 : i32
    %c0_i32_0 = arith.constant 0 : i32
    %c0_i32_1 = arith.constant 0 : i32
    return %arg0, %c0_i32, %c0_i32_0 : i32, i32, i32
  }
  func.func @transform_1(%arg0: i32) -> (i32, i32, i32) {
    %c0_i32 = arith.constant 0 : i32
    %c0_i32_0 = arith.constant 0 : i32
    %c0_i32_1 = arith.constant 0 : i32
    return %arg0, %c0_i32, %c0_i32_0 : i32, i32, i32
  }
  func.func @transform_2(%arg0: i32) -> (i32, i32, i32) {
    %c0_i32 = arith.constant 0 : i32
    %c0_i32_0 = arith.constant 0 : i32
    %c0_i32_1 = arith.constant 0 : i32
    %c0_i32_2 = arith.constant 0 : i32
    return %c0_i32, %c0_i32_0, %c0_i32_1 : i32, i32, i32
  }
  func.func @transform_3(%arg0: i32) -> (i32, i32, i32) {
    %c0_i32 = arith.constant 0 : i32
    %c0_i32_0 = arith.constant 0 : i32
    %c0_i32_1 = arith.constant 0 : i32
    %c0_i32_2 = arith.constant 0 : i32
    return %c0_i32, %c0_i32_0, %c0_i32_1 : i32, i32, i32
  }
  func.func @transform_4(%arg0: i32) -> (i32, i32, i32) {
    %c0_i32 = arith.constant 0 : i32
    %c0_i32_0 = arith.constant 0 : i32
    %c0_i32_1 = arith.constant 0 : i32
    return %arg0, %c0_i32, %c0_i32_0 : i32, i32, i32
  }
  func.func @transform_5(%arg0: i32) -> (i32, i32, i32) {
    %c0_i32 = arith.constant 0 : i32
    %c0_i32_0 = arith.constant 0 : i32
    %c0_i32_1 = arith.constant 0 : i32
    return %arg0, %c0_i32, %c0_i32_0 : i32, i32, i32
  }
}

</mosaic_0001>

<bundles_post_ra>
// kernel: tpu_custom_call.1
= control target key start
LH: loop header
LB: loop body
LE: loop exit
PB: predicated region body
PF: predicated region fallthrough
CT: control target
= control target key end

     0   :  { %11 = vsyncpa [#allocation5], 0  ;;  %s7967_s18 = smov 0   ;;  %s13093_s0 = inlined_call_operand.vmem [shape: f32[2,3,288], index: 0, kind: input, shape index: {}]   ;;  %s13094_s1 = inlined_call_operand.vmem [shape: f32[2,3,288], index: 1, kind: input, shape index: {}]   ;;  %s13095_s2 = inlined_call_operand.hbm [shape: f32[4,32,288], index: 2, kind: input, shape index: {}]   ;;  %s13096_s3 = inlined_call_operand.vmem [shape: f32[4,32,1], index: 3, kind: input, shape index: {}]   ;;  %s13097_s4 = inlined_call_operand.vmem [shape: f32[2,3,288], index: 4, kind: output, shape index: {0}]   ;;  %s13098_s5 = inlined_call_operand.vmem [shape: f32[2,3,288], index: 5, kind: output, shape index: {1}]  }
   0x1 LB: > { %s179_s21 = sshll.u32 %s13095_s2, 4  ;;  %s5246_s22 = sadd.s32 4294967295, %s7921_s18   ;;  %s7921_s18 = sphi %s7967_s18, %s17_s18   ;;  %s180_s21 = int_to_ptr.hbm [resolvable:$true] %s179_s21 }
   0x2   : > { %p5248_p0 = scmp.ge.s32.totalorder %s7921_s18, 1  ;;  %p168_p1 = scmp.lt.s32.totalorder %s7921_s18, 3 }
   0x3   : > { %p5331_p2 = scmp.eq.s32.totalorder %s5246_s22, 0  ;;  %s7923_s23 = smov [#allocation4]  }
   0x4   : > { %p169_p3 = pnand %p5248_p0, %p168_p1  ;;  %s181_s24 = sshll.u32 %s7923_s23, 4  ;;  %s182_s24 = int_to_ptr.vmem [resolvable:$true] %s181_s24 }
   0x5   : > { %s7924_s25 = smov 384   ;;  %s7925_s26 = smov 24  }
   0x6   : > { %p5327_p4 = pneg %p169_p3  ;;  %216 = sbr.rel (%p169_p3) target bundleno = 2608 (0xa30), region = 36 }
   0x8   : > { %p5328_p5 = pnand %p5331_p2, %p5327_p4 }
   0xa   : > { %5330 = dma.hbm_to_vmem [thread:$0]  (!%p5328_p5), %s180_s21, 6144, %s182_s24, [#allocation5], %s7924_s25, %s7924_s25, %s7925_s26  }
   0xb   : > { %7916 = dma.done.wait (%p5331_p2), [#allocation5], 6144  }
   0xc   : > { %7918 = vsyncadd (%p5331_p2), [#allocation5], 4294961152  ;;  %v7926_v0 = vmov 0.0   ;;  %p255_p6 = scmp.lt.s32.totalorder %s5246_s22, 1  ;;  %s7927_s27 = smov 127   ;;  %vm13145_vm0 = vcmask 256000   ;;  %v324_v20 = vlaneseq }
   0xd   : > { %283 = vst [vmem:[#allocation2 + $0x40] sm:$0xff] %v7926_v0  ;;  %5366 = vrot.lane.b32.xlu2 %v7926_v0, %s7927_s27  ;;  %5356 = vrot.lane.b32.xlu1 %v7926_v0, %s7927_s27  ;;  %s7928_s7 = smov 126   ;;  %s7929_s8 = smov 110   ;;  %v13099_v18 = vmov 0   ;;  %v784_v32 = vld [vmem:[%s13096_s3 + $0x8] sm:$0xff]  ;;  %v786_v45 = vld [vmem:[%s13096_s3 + $0x18] sm:$0xff] }
   0xe   : > { %276 = vst [vmem:[#allocation2 + $0x8] sm:$0xff] %v7926_v0  ;;  %5376 = vrot.lane.b32.xlu0 %v7926_v0, %s7927_s27  ;;  %s13768_s22 = smov (!%p255_p6, %s5246_s22), 1  ;;  %s7930_s9 = smov 109   ;;  %5627 = vset.pattern.permute.xlu2 %v13099_v18  ;;  %v8113_v22 = vand.u32 127, %v324_v20  ;;  %v785_v48 = vld [vmem:[%s13096_s3 + $0x10] sm:$0xff]  ;;  %v783_v61 = vld [vmem:[%s13096_s3] sm:$0xff] }
   0xf   : > { %277 = vst [vmem:[#allocation2 + $0x10] sm:$0xff] %v7926_v0  ;;  %s7990_s28 = smul.u32 12, %s13768_s22  ;;  %s7931_s10 = smov 108   ;;  %5626 = vset.pattern.permute.xlu1 %v13099_v18  ;;  %5625 = vset.pattern.permute.xlu0 %v13099_v18  ;;  %vm503_vm3 = vcmask 1039360   ;;  %vm548_vm4 = vcmask 1031168   ;;  %vm593_vm5 = vcmask 900096  }
  0x10   : > { %278 = vst [vmem:[#allocation2 + $0x18] sm:$0xff] %v7926_v0  ;;  %s7932_s11 = smov 92   ;;  %s7933_s12 = smov 91   ;;  %v327_v24 = vadd.s32 256, %v8113_v22  ;;  %vm630_vm6 = vcmask 891904   ;;  %vm663_vm7 = vcmask 883712  }
  0x11   : > { %282 = vst [vmem:[#allocation2 + $0x38] sm:$0xff] %v7926_v0  ;;  %s8002_s6 = scalar_lea.vmem %s13093_s0, %s7990_s28  ;;  %s7935_s13 = smov 90   ;;  %vm696_vm8 = vcmask 752640   ;;  %vm729_vm9 = vcmask 744448   ;;  %vm762_vm10 = vcmask 736256   ;;  %vm1095_vm11 = vcmask 154624  }
  0x12   : > { %286 = vst [vmem:[#allocation2 + $0x58] sm:$0xff] %v7926_v0  ;;  %v307_v1 = vld [vmem:[%s8002_s6] sm:$0x77]  ;;  %v308_v2 = vld [vmem:[%s8002_s6 + $0x8] sm:$0x7]  ;;  %v389_v25 = vand.u32 65535, %v327_v24 }
  0x13   : > { %290 = vst [vmem:[#allocation2 + $0x78] sm:$0xff] %v7926_v0  ;;  %v390_v28 = vshrl.u32 %v327_v24, 16  ;;  %s7936_s21 = smov 19   ;;  %vm1312_vm12 = vcmask 261120  }
  0x14   : > { %294 = vst [vmem:[#allocation3 + $0x18] sm:$0xff] %v7926_v0  ;;  %v392_v30 = vmul.u32 14564, %v389_v25  ;;  %v393_v31 = vmul.u32 58254, %v389_v25 }
  0x15   : > { %5371 = vrot.lane.b32.xlu2 %v7926_v0, %s7927_s27  ;;  %5361 = vrot.lane.b32.xlu1 %v7926_v0, %s7927_s27  ;;  %298 = vst [vmem:[#allocation3 + $0x38] sm:$0xff] %v7926_v0  ;;  %v394_v33 = vmul.u32 14564, %v390_v28  ;;  %v395_v34 = vmul.u32 58254, %v390_v28 }
  0x16   : > { %302 = vst [vmem:[#allocation3 + $0x58] sm:$0xff] %v7926_v0  ;;  %v396_v35 = vshll.u32 %v393_v31, 16  ;;  %v397_v43 = vshrl.u32 %v393_v31, 16 }
  0x17   : > { %306 = vst [vmem:[#allocation3 + $0x78] sm:$0xff] %v7926_v0  ;;  %v398_v36 = vshll.u32 %v394_v33, 16  ;;  %v399_v46 = vshrl.u32 %v394_v33, 16 }
  0x18   : > { %311 = vst [vmem:[#allocation1] ss:$2 sm:$0xff] %v307_v1  ;;  %vm400_vm1 = vc.u32 %v392_v30, %v396_v35  ;;  %v402_v38 = vadd.s32 %v396_v35, %v392_v30 }
  0x19   : > { %313 = vst [vmem:[#allocation1 + $0x10] ss:$2 sm:$0xff] %v308_v2  ;;  %v401_v37 = vsel %vm400_vm1, 1, %v13099_v18 }
  0x1a   : > { %13359 = vst [vmem:[#allocation7_spill] sm:$0xff] %v8113_v22  ;;  %v403_v39 = vadd.s32 %v401_v37, %v395_v34  ;;  %vm404_vm2 = vc.u32 %v402_v38, %v398_v36 }
  0x1b   : > { %v405_v44 = vsel %vm404_vm2, 1, %v13099_v18 }
  0x1c   : > { %v407_v47 = vadd.s32 %v405_v44, %v403_v39 }
  0x1d   : > { %5391 = vrot.lane.b32.xlu2 %v7926_v0, %s7928_s7  ;;  %5381 = vrot.lane.b32.xlu1 %v7926_v0, %s7927_s27 }
  0x1e   : > { %v408_v49 = vadd.s32 %v407_v47, %v397_v43 }
  0x1f   : > { %v314_v3 = vld.sshfl [vmem:[#allocation1] sm:$0xff pattern:$0x75316420]  ;;  %v315_v4 = vld.sshfl [vmem:[#allocation1 + $0x8] sm:$0xff pattern:$0x75316420] }
  0x20   : > { %320 = vst [vmem:[#allocation2 + $0x8] sm:$0x7] %v314_v3  ;;  %v316_v5 = vld.sshfl [vmem:[#allocation1 + $0x10] sm:$0xff pattern:$0x75316420]  ;;  %v409_v50 = vadd.s32 %v408_v49, %v399_v46 }
  0x21   : > { %321 = vst [vmem:[#allocation2 + $0x10] sm:$0x7] %v315_v4 }
  0x22   : > { %323 = vst.msk [vmem:[#allocation2 + $0x18] sm:$0x7] %vm13145_vm0, %v316_v5  ;;  %v410_v53 = vshrl.u32 %v409_v50, 4 }
  0x24   : > { %v411_v55 = vmul.u32 18, %v410_v53 }
  0x25   : > { %5386 = vrot.lane.b32.xlu1 %v7926_v0, %s7928_s7 }
  0x26   : > { %v8155_v56 = vsub.s32 %v327_v24, %v411_v55 }
  0x27   : > { %v440_v6 = vld [vmem:[#allocation2 + $0x8] sm:$0xff] }
  0x28   : > { %v8017_v7 = vpack.i.bf16 %v440_v6, %v7926_v0  ;;  %v441_v8 = vld [vmem:[#allocation2 + $0x10] sm:$0xff]  ;;  %13360 = vst [vmem:[#allocation8_spill] sm:$0xff] %v8155_v56 }
  0x29   : > { %v442_v9 = vld [vmem:[#allocation2 + $0x18] sm:$0xff]  ;;  %v8061_v12 = vpack.i.bf16 %v441_v8, %v440_v6 }
  0x2a   : > { %5396 = vrot.lane.b32.xlu0 %v8017_v7, %s7927_s27  ;;  %5406 = vrot.lane.b32.xlu2 %v8017_v7, %s7928_s7  ;;  %v8025_v10 = vpack.i.bf16 %v442_v9, %v441_v8  ;;  %v5480_v11 = vpack.i.bf16 0.0, %v442_v9 }
  0x2d   : > { %5421 = vrot.lane.b32.xlu1 %v7926_v0, %s7928_s7 }
  0x32   : > { %5401 = vrot.lane.b32.xlu0 %v8025_v10, %s7927_s27  ;;  %5426 = vrot.lane.b32.xlu2 %v7926_v0, %s7928_s7 }
  0x35   : > { %5436 = vrot.lane.b32.xlu1 %v8017_v7, %s7929_s8 }
  0x3a   : > { %5411 = vrot.lane.b32.xlu0 %v8025_v10, %s7928_s7  ;;  %5441 = vrot.lane.b32.xlu2 %v8025_v10, %s7929_s8 }
  0x3d   : > { %5451 = vrot.lane.b32.xlu1 %v7926_v0, %s7929_s8 }
  0x42   : > { %5416 = vrot.lane.b32.xlu0 %v7926_v0, %s7928_s7  ;;  %5456 = vrot.lane.b32.xlu2 %v7926_v0, %s7929_s8 }
  0x45   : > { %5466 = vrot.lane.b32.xlu1 %v7926_v0, %s7929_s8 }
  0x4a   : > { %5431 = vrot.lane.b32.xlu0 %v7926_v0, %s7928_s7  ;;  %5471 = vrot.lane.b32.xlu2 %v7926_v0, %s7929_s8 }
  0x4d   : > { %5481 = vrot.lane.b32.xlu1 %v5480_v11, %s7930_s9 }
  0x52   : > { %5446 = vrot.lane.b32.xlu0 %v7926_v0, %s7929_s8  ;;  %5486 = vrot.lane.b32.xlu2 %v7926_v0, %s7930_s9 }
  0x55   : > { %5496 = vrot.lane.b32.xlu1 %v7926_v0, %s7930_s9 }
  0x5a   : > { %5461 = vrot.lane.b32.xlu0 %v7926_v0, %s7929_s8  ;;  %5501 = vrot.lane.b32.xlu2 %v7926_v0, %s7930_s9 }
  0x5d   : > { %5511 = vrot.lane.b32.xlu1 %v5480_v11, %s7931_s10 }
  0x62   : > { %5476 = vrot.lane.b32.xlu0 %v8061_v12, %s7930_s9  ;;  %5516 = vrot.lane.b32.xlu2 %v7926_v0, %s7931_s10 }
  0x65   : > { %5526 = vrot.lane.b32.xlu1 %v7926_v0, %s7931_s10 }
  0x67   : > { %v8069_v13 = vpop.permute.xlu2 %5366 }
  0x68   : > { %v5368_v33 = vunpack.i.l.bf16 %v8069_v13 }
  0x6a   : > { %5491 = vrot.lane.b32.xlu0 %v7926_v0, %s7930_s9  ;;  %5531 = vrot.lane.b32.xlu2 %v7926_v0, %s7931_s10 }
  0x6d   : > { %5541 = vrot.lane.b32.xlu1 %v5480_v11, %s7932_s11 }
  0x6f   : > { %v8076_v14 = vpop.permute.xlu2 %5371 }
  0x70   : > { %v5373_v34 = vunpack.i.l.bf16 %v8076_v14 }
  0x72   : > { %5506 = vrot.lane.b32.xlu0 %v8061_v12, %s7931_s10  ;;  %5546 = vrot.lane.b32.xlu2 %v7926_v0, %s7932_s11 }
  0x75   : > { %5556 = vrot.lane.b32.xlu1 %v7926_v0, %s7932_s11 }
  0x77   : > { %v8089_v15 = vpop.permute.xlu2 %5391 }
  0x7a   : > { %5521 = vrot.lane.b32.xlu0 %v7926_v0, %s7931_s10  ;;  %5561 = vrot.lane.b32.xlu2 %v7926_v0, %s7932_s11 }
  0x7d   : > { %5571 = vrot.lane.b32.xlu1 %v5480_v11, %s7933_s12 }
  0x7f   : > { %v8091_v16 = vpop.permute.xlu1 %5356 }
  0x80   : > { %v8122_v26 = vpop.permute.xlu0 %5376  ;;  %v5359_v46 = vunpack.i.h.bf16 %v8091_v16  ;;  %v5358_v47 = vunpack.i.l.bf16 %v8091_v16 }
  0x81   : > { %v5378_v30 = vunpack.i.l.bf16 %v8122_v26 }
  0x82   : > { %5536 = vrot.lane.b32.xlu0 %v8061_v12, %s7932_s11  ;;  %5576 = vrot.lane.b32.xlu2 %v7926_v0, %s7933_s12  ;;  %v507_v55 = vsel %vm503_vm3, %v5358_v47, %v5359_v46 }
  0x84   : > { %v8103_v19 = vpop.permute.xlu2 %5406 }
  0x85   : > { %5586 = vrot.lane.b32.xlu1 %v7926_v0, %s7933_s12 }
  0x87   : > { %v8099_v17 = vpop.permute.xlu1 %5361 }
  0x88   : > { %v5363_v8 = vunpack.i.l.bf16 %v8099_v17 }
  0x8a   : > { %5551 = vrot.lane.b32.xlu0 %v7926_v0, %s7932_s11  ;;  %5591 = vrot.lane.b32.xlu2 %v7926_v0, %s7933_s12 }
  0x8c   : > { %v8115_v23 = vpop.permute.xlu2 %5426 }
  0x8d   : > { %5601 = vrot.lane.b32.xlu1 %v5480_v11, %s7935_s13 }
  0x8f   : > { %v8111_v21 = vpop.permute.xlu1 %5381 }
  0x92   : > { %5566 = vrot.lane.b32.xlu0 %v8061_v12, %s7933_s12  ;;  %5606 = vrot.lane.b32.xlu2 %v7926_v0, %s7935_s13 }
  0x94   : > { %v8128_v29 = vpop.permute.xlu2 %5441 }
  0x95   : > { %5616 = vrot.lane.b32.xlu1 %v7926_v0, %s7935_s13 }
  0x97   : > { %v8126_v27 = vpop.permute.xlu1 %5386 }
  0x9a   : > { %5581 = vrot.lane.b32.xlu0 %v7926_v0, %s7933_s12  ;;  %5621 = vrot.lane.b32.xlu2 %v7926_v0, %s7935_s13 }
  0x9c   : > { %v5397_v41 = vpop.permute.xlu0 %5396  ;;  %v8140_v42 = vpop.permute.xlu2 %5456 }
  0x9d   : > { %794 = vperm.xlu1 %5626, %v784_v32   ;;  %v5399_v62 = vunpack.i.h.bf16 %v5397_v41  ;;  %v5398_v63 = vunpack.i.l.bf16 %v5397_v41  ;;  %v5369_v32 = vunpack.i.h.bf16 %v8069_v13 }
  0x9f   : > { %v8138_v40 = vpop.permute.xlu1 %5421  ;;  %v504_v5 = vsel %vm503_vm3, %v5398_v63, %v5399_v62  ;;  %v510_v39 = vsel %vm503_vm3, %v5368_v33, %v5369_v32  ;;  %v511_v13 = vsel %vm503_vm3, %v5369_v32, %v5373_v34  ;;  %v5409_v33 = vunpack.i.h.bf16 %v8103_v19 }
  0xa2   : > { %5596 = vrot.lane.b32.xlu0 %v8061_v12, %s7935_s13  ;;  %799 = vperm.xlu2 %5627, %v785_v48   ;;  %v5384_v48 = vunpack.i.h.bf16 %v8111_v21 }
  0xa4   : > { %v5402_v52 = vpop.permute.xlu0 %5401  ;;  %v8153_v54 = vpop.permute.xlu2 %5471 }
  0xa5   : > { %804 = vperm.xlu1 %5626, %v786_v45   ;;  %v5403_v60 = vunpack.i.l.bf16 %v5402_v52  ;;  %v5404_v9 = vunpack.i.h.bf16 %v5402_v52  ;;  %v5688_v45 = vpack.i.bf16 %v511_v13, %v510_v39 }
  0xa7   : > { %v8151_v51 = vpop.permute.xlu1 %5436  ;;  %v505_v2 = vsel %vm503_vm3, %v5399_v62, %v5403_v60  ;;  %v506_v25 = vsel %vm503_vm3, %v5403_v60, %v5404_v9  ;;  %v5423_v60 = vunpack.i.l.bf16 %v8138_v40 }
  0xa8   : > { %v5668_v6 = vpack.i.bf16 %v505_v2, %v504_v5  ;;  %v5673_v31 = vpack.i.bf16 %v5404_v9, %v506_v25  ;;  %v5374_v2 = vunpack.i.h.bf16 %v8076_v14  ;;  %v5393_v5 = vunpack.i.l.bf16 %v8089_v15 }
  0xaa   : > { %5611 = vrot.lane.b32.xlu0 %v7926_v0, %s7935_s13  ;;  %5629 = vrot.lane.b32.xlu2 %v8017_v7, %s7936_s21  ;;  %v5364_v7 = vunpack.i.h.bf16 %v8099_v17  ;;  %v5379_v17 = vunpack.i.h.bf16 %v8122_v26  ;;  %v512_v14 = vsel %vm503_vm3, %v5373_v34, %v5374_v2 }
  0xac   : > { %v8165_v58 = vpop.permute.xlu0 %5411  ;;  %v8167_v59 = vpop.permute.xlu2 %5486  ;;  %v509_v12 = vsel %vm503_vm3, %v5363_v8, %v5364_v7  ;;  %v513_v26 = vsel %vm503_vm3, %v5378_v30, %v5379_v17 }
  0xad   : > { %5639 = vrot.lane.b32.xlu1 %v7926_v0, %s7936_s21  ;;  %v5683_v28 = vpack.i.bf16 %v5364_v7, %v509_v12  ;;  %v5414_v43 = vunpack.i.h.bf16 %v8165_v58  ;;  %v5413_v44 = vunpack.i.l.bf16 %v8165_v58  ;;  %v508_v58 = vsel %vm503_vm3, %v5359_v46, %v5363_v8 }
  0xae   : > { %v5678_v62 = vpack.i.bf16 %v508_v58, %v507_v55  ;;  %v5388_v7 = vunpack.i.l.bf16 %v8126_v27  ;;  %v5394_v55 = vunpack.i.h.bf16 %v8089_v15  ;;  %v5443_v58 = vunpack.i.l.bf16 %v8128_v29 }
  0xaf   : > { %v8163_v57 = vpop.permute.xlu1 %5451  ;;  %v551_v50 = vsel %vm548_vm4, %v5413_v44, %v5414_v43 }
  0xb2   : > { %789 = vperm.xlu0 %5625, %v783_v61   ;;  %5644 = vrot.lane.b32.xlu2 %v7926_v0, %s7936_s21 }
  0xb4   : > { %v8179_v3 = vpop.permute.xlu0 %5416  ;;  %v8181_v4 = vpop.permute.xlu2 %5501 }
  0xb5   : > { %5654 = vrot.lane.b32.xlu1 %v7926_v0, %s7936_s21  ;;  %v5418_v61 = vunpack.i.l.bf16 %v8179_v3 }
  0xb7   : > { %v8176_v1 = vpop.permute.xlu1 %5466 }
  0xba   : > { %5634 = vrot.lane.b32.xlu0 %v8025_v10, %s7936_s21  ;;  %5659 = vrot.lane.b32.xlu2 %v7926_v0, %s7936_s21  ;;  %v5383_v10 = vunpack.i.l.bf16 %v8111_v21  ;;  %v5713_v21 = vpack.i.bf16 %v5414_v43, %v551_v50  ;;  %v550_v43 = vsel %vm548_vm4, %v5409_v33, %v5413_v44  ;;  %v5438_v44 = vunpack.i.l.bf16 %v8151_v51 }
  0xbc   : > { %v8194_v20 = vpop.permute.xlu0 %5431  ;;  %v8196_v24 = vpop.permute.xlu2 %5516  ;;  %v514_v36 = vsel %vm503_vm3, %v5379_v17, %v5383_v10  ;;  %v515_v16 = vsel %vm503_vm3, %v5383_v10, %v5384_v48 }
  0xbd   : > { %5669 = vrot.lane.b32.xlu1 %v5668_v6, %s7936_s21  ;;  %v5698_v41 = vpack.i.bf16 %v514_v36, %v513_v26  ;;  %v5703_v63 = vpack.i.bf16 %v5384_v48, %v515_v16  ;;  %v5389_v6 = vunpack.i.h.bf16 %v8126_v27  ;;  %v5434_v30 = vunpack.i.h.bf16 %v8194_v20 }
  0xbe   : > { %v5433_v10 = vunpack.i.l.bf16 %v8194_v20  ;;  %v5408_v26 = vunpack.i.l.bf16 %v8103_v19  ;;  %v5424_v36 = vunpack.i.h.bf16 %v8138_v40  ;;  %v5453_v40 = vunpack.i.l.bf16 %v8163_v57 }
  0xbf   : > { %v8191_v11 = vpop.permute.xlu1 %5481  ;;  %v553_v27 = vsel %vm548_vm4, %v5389_v6, %v5393_v5  ;;  %v5439_v16 = vunpack.i.h.bf16 %v8151_v51 }
  0xc0   : > { %v560_v39 = vsel %vm548_vm4, %v5433_v10, %v5434_v30  ;;  %v557_v19 = vsel %vm548_vm4, %v5423_v60, %v5424_v36 }
  0xc1   : > { %v5733_v50 = vpack.i.bf16 %v5424_v36, %v557_v19  ;;  %v595_v51 = vsel %vm593_vm5, %v5439_v16, %v5443_v58 }
  0xc2   : > { %5649 = vrot.lane.b32.xlu0 %v7926_v0, %s7936_s21  ;;  %5674 = vrot.lane.b32.xlu2 %v5673_v31, %s7936_s21  ;;  %v5693_v31 = vpack.i.bf16 %v5374_v2, %v512_v14  ;;  %v5428_v14 = vunpack.i.l.bf16 %v8115_v23 }
  0xc4   : > { %v8213_v37 = vpop.permute.xlu0 %5446  ;;  %v8215_v38 = vpop.permute.xlu2 %5531 }
  0xc5   : > { %5684 = vrot.lane.b32.xlu1 %v5683_v28, %s7936_s21  ;;  %v552_v28 = vsel %vm548_vm4, %v5388_v7, %v5389_v6  ;;  %v5449_v46 = vunpack.i.h.bf16 %v8213_v37  ;;  %v5448_v47 = vunpack.i.l.bf16 %v8213_v37 }
  0xc6   : > { %v5718_v32 = vpack.i.bf16 %v553_v27, %v552_v28  ;;  %v5454_v28 = vunpack.i.h.bf16 %v8163_v57 }
  0xc7   : > { %v8209_v35 = vpop.permute.xlu1 %5496  ;;  %v597_v37 = vsel %vm593_vm5, %v5448_v47, %v5449_v46 }
  0xca   : > { %5664 = vrot.lane.b32.xlu0 %v7926_v0, %s7936_s21  ;;  %5689 = vrot.lane.b32.xlu2 %v5688_v45, %s7936_s21  ;;  %v5419_v0 = vunpack.i.h.bf16 %v8179_v3  ;;  %v5743_v45 = vpack.i.bf16 %v5434_v30, %v560_v39  ;;  %v5444_v39 = vunpack.i.h.bf16 %v8128_v29 }
  0xcc   : > { %v8231_v52 = vpop.permute.xlu0 %5461  ;;  %v8233_v53 = vpop.permute.xlu2 %5546  ;;  %v555_v3 = vsel %vm548_vm4, %v5418_v61, %v5419_v0  ;;  %v556_v9 = vsel %vm548_vm4, %v5419_v0, %v5423_v60  ;;  %v598_v60 = vsel %vm593_vm5, %v5449_v46, %v5453_v40  ;;  %v554_v61 = vsel %vm548_vm4, %v5393_v5, %v5394_v55 }
  0xcd   : > { %5699 = vrot.lane.b32.xlu1 %v5698_v41, %s7936_s21  ;;  %v5728_v17 = vpack.i.bf16 %v556_v9, %v555_v3  ;;  %v549_v41 = vsel %vm548_vm4, %v5408_v26, %v5409_v33  ;;  %v5464_v2 = vunpack.i.h.bf16 %v8231_v52  ;;  %v5463_v6 = vunpack.i.l.bf16 %v8231_v52 }
  0xce   : > { %v5708_v48 = vpack.i.bf16 %v550_v43, %v549_v41  ;;  %v5723_v7 = vpack.i.bf16 %v5394_v55, %v554_v61  ;;  %v5429_v9 = vunpack.i.h.bf16 %v8115_v23  ;;  %v599_v23 = vsel %vm593_vm5, %v5453_v40, %v5454_v28 }
  0xcf   : > { %v8228_v49 = vpop.permute.xlu1 %5511  ;;  %v602_v27 = vsel %vm593_vm5, %v5463_v6, %v5464_v2  ;;  %v5763_v36 = vpack.i.bf16 %v5454_v28, %v599_v23  ;;  %v5473_v41 = vunpack.i.l.bf16 %v8153_v54  ;;  %v5469_v43 = vunpack.i.h.bf16 %v8176_v1 }
  0xd0   : > { %v558_v30 = vsel %vm548_vm4, %v5428_v14, %v5429_v9  ;;  %v596_v29 = vsel %vm593_vm5, %v5443_v58, %v5444_v39  ;;  %v5474_v28 = vunpack.i.h.bf16 %v8153_v54 }
  0xd1   : > { %v604_v47 = vsel %vm593_vm5, %v5469_v43, %v5473_v41 }
  0xd2   : > { %5679 = vrot.lane.b32.xlu0 %v5678_v62, %s7936_s21  ;;  %5704 = vrot.lane.b32.xlu2 %v5703_v63, %s7936_s21  ;;  %v594_v62 = vsel %vm593_vm5, %v5438_v44, %v5439_v16  ;;  %v5758_v63 = vpack.i.bf16 %v598_v60, %v597_v37  ;;  %v5459_v16 = vunpack.i.h.bf16 %v8140_v42  ;;  %v5458_v44 = vunpack.i.l.bf16 %v8140_v42 }
  0xd3   : > { %v5748_v3 = vpack.i.bf16 %v595_v51, %v594_v62  ;;  %v5488_v37 = vunpack.i.l.bf16 %v8167_v59  ;;  %v5483_v60 = vunpack.i.l.bf16 %v8191_v11 }
  0xd4   : > { %v8252_v12 = vpop.permute.xlu0 %5476  ;;  %v8254_v25 = vpop.permute.xlu2 %5561  ;;  %v601_v42 = vsel %vm593_vm5, %v5459_v16, %v5463_v6 }
  0xd5   : > { %5714 = vrot.lane.b32.xlu1 %v5713_v21, %s7936_s21  ;;  %v5479_v57 = vunpack.i.h.bf16 %v8252_v12  ;;  %v5478_v33 = vunpack.i.l.bf16 %v8252_v12 }
  0xd7   : > { %v8248_v8 = vpop.permute.xlu1 %5526  ;;  %v631_v12 = vsel %vm630_vm6, %v5478_v33, %v5479_v57 }
  0xda   : > { %5694 = vrot.lane.b32.xlu0 %v5693_v31, %s7936_s21  ;;  %5719 = vrot.lane.b32.xlu2 %v5718_v32, %s7936_s21  ;;  %v559_v31 = vsel %vm548_vm4, %v5429_v9, %v5433_v10  ;;  %v5773_v32 = vpack.i.bf16 %v5464_v2, %v602_v27  ;;  %v5468_v10 = vunpack.i.l.bf16 %v8176_v1  ;;  %v5489_v1 = vunpack.i.h.bf16 %v8167_v59 }
  0xdb   : > { %v5738_v26 = vpack.i.bf16 %v559_v31, %v558_v30  ;;  %v632_v59 = vsel %vm630_vm6, %v5479_v57, %v5483_v60  ;;  %v605_v57 = vsel %vm593_vm5, %v5473_v41, %v5474_v28 }
  0xdc   : > { %v8270_v13 = vpop.permute.xlu0 %5491  ;;  %v8272_v20 = vpop.permute.xlu2 %5576  ;;  %v603_v46 = vsel %vm593_vm5, %v5468_v10, %v5469_v43  ;;  %v634_v61 = vsel %vm630_vm6, %v5488_v37, %v5489_v1  ;;  %v5793_v14 = vpack.i.bf16 %v5483_v60, %v632_v59  ;;  %v5504_v43 = vunpack.i.h.bf16 %v8181_v4 }
  0xdd   : > { %5729 = vrot.lane.b32.xlu1 %v5728_v17, %s7936_s21  ;;  %v5778_v55 = vpack.i.bf16 %v604_v47, %v603_v46  ;;  %v5803_v2 = vpack.i.bf16 %v5489_v1, %v634_v61  ;;  %v5494_v27 = vunpack.i.h.bf16 %v8270_v13  ;;  %v5493_v30 = vunpack.i.l.bf16 %v8270_v13 }
  0xde   : > { %v5484_v10 = vunpack.i.h.bf16 %v8191_v11  ;;  %v5514_v60 = vunpack.i.h.bf16 %v8228_v49 }
  0xdf   : > { %v8267_v34 = vpop.permute.xlu1 %5541  ;;  %v635_v54 = vsel %vm630_vm6, %v5493_v30, %v5494_v27 }
  0xe0   : > { %v633_v47 = vsel %vm630_vm6, %v5484_v10, %v5488_v37 }
  0xe2   : > { %5709 = vrot.lane.b32.xlu0 %v5708_v48, %s7936_s21  ;;  %5734 = vrot.lane.b32.xlu2 %v5733_v50, %s7936_s21  ;;  %v5788_v48 = vpack.i.bf16 %v631_v12, %v5478_v33  ;;  %v5753_v50 = vpack.i.bf16 %v5444_v39, %v596_v29  ;;  %v5808_v39 = vpack.i.bf16 %v635_v54, %v5493_v30 }
  0xe4   : > { %v8291_v0 = vpop.permute.xlu0 %5506  ;;  %v8293_v15 = vpop.permute.xlu2 %5591 }
  0xe5   : > { %5744 = vrot.lane.b32.xlu1 %v5743_v45, %s7936_s21  ;;  %v5509_v13 = vunpack.i.h.bf16 %v8291_v0 }
  0xe7   : > { %v8287_v21 = vpop.permute.xlu1 %5556 }
  0xea   : > { %5724 = vrot.lane.b32.xlu0 %v5723_v7, %s7936_s21  ;;  %5749 = vrot.lane.b32.xlu2 %v5748_v3, %s7936_s21  ;;  %v5503_v7 = vunpack.i.l.bf16 %v8181_v4  ;;  %v5499_v3 = vunpack.i.h.bf16 %v8209_v35 }
  0xec   : > { %v8309_v17 = vpop.permute.xlu0 %5521  ;;  %v8311_v52 = vpop.permute.xlu2 %5606  ;;  %v637_v31 = vsel %vm630_vm6, %v5499_v3, %v5503_v7 }
  0xed   : > { %5759 = vrot.lane.b32.xlu1 %v5758_v63, %s7936_s21  ;;  %v600_v63 = vsel %vm593_vm5, %v5458_v44, %v5459_v16  ;;  %v5818_v33 = vpack.i.bf16 %v637_v31, %v5499_v3  ;;  %v5524_v4 = vunpack.i.h.bf16 %v8309_v17  ;;  %v5523_v11 = vunpack.i.l.bf16 %v8309_v17 }
  0xee   : > { %v5768_v9 = vpack.i.bf16 %v601_v42, %v600_v63  ;;  %v5518_v16 = vunpack.i.l.bf16 %v8196_v24  ;;  %v5498_v44 = vunpack.i.l.bf16 %v8209_v35  ;;  %v5534_v35 = vunpack.i.h.bf16 %v8215_v38 }
  0xef   : > { %v8306_v5 = vpop.permute.xlu1 %5571  ;;  %v668_v61 = vsel %vm663_vm7, %v5523_v11, %v5524_v4  ;;  %v5533_v3 = vunpack.i.l.bf16 %v8215_v38 }
  0xf0   : > { %v636_v42 = vsel %vm630_vm6, %v5494_v27, %v5498_v44  ;;  %v666_v59 = vsel %vm663_vm7, %v5514_v60, %v5518_v16 }
  0xf1   : > { %v671_v27 = vsel %vm663_vm7, %v5533_v3, %v5534_v35 }
  0xf2   : > { %5739 = vrot.lane.b32.xlu0 %v5738_v26, %s7936_s21  ;;  %5764 = vrot.lane.b32.xlu2 %v5763_v36, %s7936_s21  ;;  %v5513_v26 = vunpack.i.l.bf16 %v8228_v49  ;;  %v5783_v36 = vpack.i.bf16 %v5474_v28, %v605_v57  ;;  %v5813_v49 = vpack.i.bf16 %v5498_v44, %v636_v42  ;;  %v5863_v54 = vpack.i.bf16 %v5534_v35, %v671_v27 }
  0xf3   : > { %v5549_v44 = vunpack.i.h.bf16 %v8233_v53  ;;  %v5543_v27 = vunpack.i.l.bf16 %v8267_v34 }
  0xf4   : > { %v8328_v45 = vpop.permute.xlu0 %5536  ;;  %v8330_v40 = vpop.permute.xlu2 %5621  ;;  %v665_v12 = vsel %vm663_vm7, %v5509_v13, %v5513_v26 }
  0xf5   : > { %5774 = vrot.lane.b32.xlu1 %v5773_v32, %s7936_s21  ;;  %v5833_v1 = vpack.i.bf16 %v5513_v26, %v665_v12 }
  0xf7   : > { %v8325_v19 = vpop.permute.xlu1 %5586 }
  0xfa   : > { %5754 = vrot.lane.b32.xlu0 %v5753_v50, %s7936_s21  ;;  %5779 = vrot.lane.b32.xlu2 %v5778_v55, %s7936_s21  ;;  %v5798_v50 = vpack.i.bf16 %v633_v47, %v5484_v10  ;;  %v5538_v10 = vunpack.i.l.bf16 %v8328_v45 }
  0xfc   : > { %v8346_v62 = vpop.permute.xlu0 %5551  ;;  %v8348_v51 = vpop.permute.xlu2 %799 }
  0xfd   : > { %5789 = vrot.lane.b32.xlu1 %v5788_v48, %s7936_s21  ;;  %13361 = vst [vmem:[#allocation9_spill] sm:$0xff] %v8348_v51  ;;  %v638_v48 = vsel %vm630_vm6, %v5503_v7, %v5504_v43  ;;  %v5838_v7 = vpack.i.bf16 %v666_v59, %v5514_v60  ;;  %v5529_v60 = vunpack.i.h.bf16 %v8248_v8 }
  0xfe   : > { %v5823_v55 = vpack.i.bf16 %v5504_v43, %v638_v48  ;;  %v5539_v43 = vunpack.i.h.bf16 %v8328_v45  ;;  %v5554_v45 = vunpack.i.h.bf16 %v8346_v62 }
  0xff   : > { %v8343_v58 = vpop.permute.xlu1 %5601 }
 0x102   : > { %5769 = vrot.lane.b32.xlu0 %v5768_v9, %s7936_s21  ;;  %5794 = vrot.lane.b32.xlu2 %v5793_v14, %s7936_s21  ;;  %v5508_v9 = vunpack.i.l.bf16 %v8291_v0  ;;  %v5528_v14 = vunpack.i.l.bf16 %v8248_v8  ;;  %v5548_v0 = vunpack.i.l.bf16 %v8233_v53 }
 0x104   : > { %v8364_v23 = vpop.permute.xlu0 %5566  ;;  %v8366_v32 = vpop.permute.xlu2 %5629  ;;  %v664_v57 = vsel %vm663_vm7, %v5508_v9, %v5509_v13  ;;  %v669_v38 = vsel %vm663_vm7, %v5524_v4, %v5528_v14  ;;  %v700_v35 = vsel %vm696_vm8, %v5548_v0, %v5549_v44 }
 0x105   : > { %5804 = vrot.lane.b32.xlu1 %v5803_v2, %s7936_s21  ;;  %v5848_v2 = vpack.i.bf16 %v668_v61, %v5523_v11  ;;  %v5828_v26 = vpack.i.bf16 %v664_v57, %v5508_v9  ;;  %v5558_v11 = vunpack.i.l.bf16 %v8287_v21  ;;  %v5569_v53 = vunpack.i.h.bf16 %v8364_v23 }
 0x106   : > { %v5568_v8 = vunpack.i.l.bf16 %v8364_v23  ;;  %v5883_v9 = vpack.i.bf16 %v5549_v44, %v700_v35  ;;  %v5559_v57 = vunpack.i.h.bf16 %v8287_v21 }
 0x107   : > { %v8361_v6 = vpop.permute.xlu1 %5616  ;;  %v702_v61 = vsel %vm696_vm8, %v5554_v45, %v5558_v11 }
 0x10a   : > { %5784 = vrot.lane.b32.xlu0 %v5783_v36, %s7936_s21  ;;  %5809 = vrot.lane.b32.xlu2 %v5808_v39, %s7936_s21  ;;  %v5853_v36 = vpack.i.bf16 %v5528_v14, %v669_v38  ;;  %v5519_v39 = vunpack.i.h.bf16 %v8196_v24  ;;  %v697_v24 = vsel %vm696_vm8, %v5538_v10, %v5539_v43  ;;  %v5563_v14 = vunpack.i.l.bf16 %v8254_v25 }
 0x10b   : > { %v730_v38 = vsel %vm729_vm9, %v5568_v8, %v5569_v53 }
 0x10c   : > { %v8380_v29 = vpop.permute.xlu0 %5581  ;;  %v8382_v46 = vpop.permute.xlu2 %5644 }
 0x10d   : > { %5819 = vrot.lane.b32.xlu1 %v5818_v33, %s7936_s21  ;;  %v5544_v33 = vunpack.i.h.bf16 %v8267_v34  ;;  %v5579_v34 = vunpack.i.h.bf16 %v8272_v20  ;;  %v5583_v35 = vunpack.i.l.bf16 %v8380_v29 }
 0x10f   : > { %v8377_v41 = vpop.permute.xlu1 %794  ;;  %v699_v12 = vsel %vm696_vm8, %v5544_v33, %v5548_v0  ;;  %v698_v0 = vsel %vm696_vm8, %v5539_v43, %v5543_v27 }
 0x110   : > { %13362 = vst [vmem:[#allocation10_spill] sm:$0xff] %v8377_v41  ;;  %v5878_v4 = vpack.i.bf16 %v699_v12, %v5544_v33  ;;  %v703_v33 = vsel %vm696_vm8, %v5559_v57, %v5563_v14  ;;  %v5873_v21 = vpack.i.bf16 %v5543_v27, %v698_v0  ;;  %v5573_v12 = vunpack.i.l.bf16 %v8306_v5 }
 0x111   : > { %v5603_v27 = vunpack.i.l.bf16 %v8343_v58  ;;  %v5594_v0 = vunpack.i.h.bf16 %v8293_v15 }
 0x112   : > { %5799 = vrot.lane.b32.xlu0 %v5798_v50, %s7936_s21  ;;  %5824 = vrot.lane.b32.xlu2 %v5823_v55, %s7936_s21  ;;  %v5868_v55 = vpack.i.bf16 %v697_v24, %v5538_v10  ;;  %v5553_v10 = vunpack.i.l.bf16 %v8346_v62  ;;  %v5593_v62 = vunpack.i.l.bf16 %v8293_v15 }
 0x114   : > { %v8397_v63 = vpop.permute.xlu0 %5596  ;;  %v8399_v17 = vpop.permute.xlu2 %5659 }
 0x115   : > { %5834 = vrot.lane.b32.xlu1 %v5833_v1, %s7936_s21  ;;  %v667_v1 = vsel %vm663_vm7, %v5518_v16, %v5519_v39 }
 0x116   : > { %v5843_v50 = vpack.i.bf16 %v5519_v39, %v667_v1  ;;  %v5578_v39 = vunpack.i.l.bf16 %v8272_v20  ;;  %v731_v20 = vsel %vm729_vm9, %v5569_v53, %v5573_v12 }
 0x117   : > { %v8394_v37 = vpop.permute.xlu1 %804 }
 0x118   : > { %13363 = vst [vmem:[#allocation11_spill] sm:$0xff] %v8394_v37  ;;  %v733_v1 = vsel %vm729_vm9, %v5578_v39, %v5579_v34 }
 0x11a   : > { %5814 = vrot.lane.b32.xlu0 %v5813_v49, %s7936_s21  ;;  %5839 = vrot.lane.b32.xlu2 %v5838_v7, %s7936_s21  ;;  %v5893_v49 = vpack.i.bf16 %v5558_v11, %v702_v61  ;;  %v701_v11 = vsel %vm696_vm8, %v5553_v10, %v5554_v45  ;;  %v5564_v61 = vunpack.i.h.bf16 %v8254_v25 }
 0x11b   : > { %v5888_v44 = vpack.i.bf16 %v701_v11, %v5553_v10  ;;  %v737_v10 = vsel %vm729_vm9, %v5593_v62, %v5594_v0 }
 0x11c   : > { %v8413_v30 = vpop.permute.xlu0 %5611  ;;  %v8415_v31 = vpop.permute.xlu2 %5674  ;;  %v5943_v11 = vpack.i.bf16 %v5594_v0, %v737_v10 }
 0x11d   : > { %5849 = vrot.lane.b32.xlu1 %v5848_v2, %s7936_s21  ;;  %v670_v2 = vsel %vm663_vm7, %v5529_v60, %v5533_v3  ;;  %v5614_v15 = vunpack.i.h.bf16 %v8413_v30 }
 0x11e   : > { %v5858_v7 = vpack.i.bf16 %v670_v2, %v5529_v60  ;;  %v5913_v60 = vpack.i.bf16 %v5573_v12, %v731_v20  ;;  %v5584_v2 = vunpack.i.h.bf16 %v8380_v29  ;;  %v5599_v29 = vunpack.i.h.bf16 %v8397_v63 }
 0x11f   : > { %v8410_v28 = vpop.permute.xlu1 %5639  ;;  %v5608_v20 = vunpack.i.l.bf16 %v8311_v52 }
 0x120   : > { %v734_v25 = vsel %vm729_vm9, %v5583_v35, %v5584_v2 }
 0x122   : > { %5829 = vrot.lane.b32.xlu0 %v5828_v26, %s7936_s21  ;;  %5854 = vrot.lane.b32.xlu2 %v5853_v36, %s7936_s21  ;;  %v5908_v26 = vpack.i.bf16 %v730_v38, %v5568_v8  ;;  %v5898_v36 = vpack.i.bf16 %v703_v33, %v5559_v57  ;;  %v5928_v38 = vpack.i.bf16 %v734_v25, %v5583_v35  ;;  %v5574_v33 = vunpack.i.h.bf16 %v8306_v5 }
 0x123   : > { %v5613_v5 = vunpack.i.l.bf16 %v8413_v30 }
 0x124   : > { %v8430_v47 = vpop.permute.xlu0 %789  ;;  %v8432_v48 = vpop.permute.xlu2 %5689 }
 0x125   : > { %5864 = vrot.lane.b32.xlu1 %v5863_v54, %s7936_s21  ;;  %13364 = vst [vmem:[#allocation12_spill] sm:$0xff] %v8430_v47 }
 0x127   : > { %v8427_v13 = vpop.permute.xlu1 %5654 }
 0x12a   : > { %5844 = vrot.lane.b32.xlu0 %v5843_v50, %s7936_s21  ;;  %5869 = vrot.lane.b32.xlu2 %v5868_v55, %s7936_s21  ;;  %v5923_v50 = vpack.i.bf16 %v5579_v34, %v733_v1  ;;  %v5589_v55 = vunpack.i.h.bf16 %v8325_v19 }
 0x12c   : > { %v8446_v42 = vpop.permute.xlu0 %5634  ;;  %v8448_v59 = vpop.permute.xlu2 %5704 }
 0x12d   : > { %5879 = vrot.lane.b32.xlu1 %v5878_v4, %s7936_s21  ;;  %13365 = vst [vmem:[#allocation13_spill] sm:$0xff] %v8446_v42 }
 0x12f   : > { %v8443_v16 = vpop.permute.xlu1 %5669 }
 0x132   : > { %5859 = vrot.lane.b32.xlu0 %v5858_v7, %s7936_s21  ;;  %5884 = vrot.lane.b32.xlu2 %v5883_v9, %s7936_s21  ;;  %v704_v7 = vsel %vm696_vm8, %v5563_v14, %v5564_v61 }
 0x133   : > { %v5903_v57 = vpack.i.bf16 %v5564_v61, %v704_v7 }
 0x134   : > { %v8463_v23 = vpop.permute.xlu0 %5649  ;;  %v8465_v54 = vpop.permute.xlu2 %5719 }
 0x135   : > { %5894 = vrot.lane.b32.xlu1 %v5893_v49, %s7936_s21  ;;  %v736_v49 = vsel %vm729_vm9, %v5589_v55, %v5593_v62  ;;  %v767_v62 = vsel %vm762_vm10, %v5613_v5, %v5614_v15 }
 0x136   : > { %v5938_v9 = vpack.i.bf16 %v736_v49, %v5589_v55  ;;  %v5604_v55 = vunpack.i.h.bf16 %v8343_v58  ;;  %v5968_v35 = vpack.i.bf16 %v767_v62, %v5613_v5  ;;  %v5624_v49 = vunpack.i.h.bf16 %v8330_v40 }
 0x137   : > { %v8460_v3 = vpop.permute.xlu1 %5684  ;;  %v5609_v5 = vunpack.i.h.bf16 %v8311_v52  ;;  %v5619_v62 = vunpack.i.h.bf16 %v8361_v6 }
 0x138   : > { %v765_v58 = vsel %vm762_vm10, %v5604_v55, %v5608_v20 }
 0x13a   : > { %5874 = vrot.lane.b32.xlu0 %v5873_v21, %s7936_s21  ;;  %5899 = vrot.lane.b32.xlu2 %v5898_v36, %s7936_s21  ;;  %v732_v36 = vsel %vm729_vm9, %v5574_v33, %v5578_v39 }
 0x13b   : > { %v5918_v1 = vpack.i.bf16 %v732_v36, %v5574_v33 }
 0x13c   : > { %v8479_v24 = vpop.permute.xlu0 %5664  ;;  %v8481_v4 = vpop.permute.xlu2 %5734 }
 0x13d   : > { %5909 = vrot.lane.b32.xlu1 %v5908_v26, %s7936_s21  ;;  %v764_v26 = vsel %vm762_vm10, %v5599_v29, %v5603_v27 }
 0x13e   : > { %v5953_v12 = vpack.i.bf16 %v5603_v27, %v764_v26  ;;  %v5598_v27 = vunpack.i.l.bf16 %v8397_v63 }
 0x13f   : > { %v8476_v43 = vpop.permute.xlu1 %5699 }
 0x140   : > { %v763_v36 = vsel %vm762_vm10, %v5598_v27, %v5599_v29  ;;  %v766_v29 = vsel %vm762_vm10, %v5608_v20, %v5609_v5 }
 0x141   : > { %v5948_v63 = vpack.i.bf16 %v763_v36, %v5598_v27 }
 0x142   : > { %5889 = vrot.lane.b32.xlu0 %v5888_v44, %s7936_s21  ;;  %5914 = vrot.lane.b32.xlu2 %v5913_v60, %s7936_s21 }
 0x144   : > { %v8496_v53 = vpop.permute.xlu0 %5679  ;;  %v8498_v8 = vpop.permute.xlu2 %5749 }
 0x145   : > { %5924 = vrot.lane.b32.xlu1 %v5923_v50, %s7936_s21  ;;  %v5588_v50 = vunpack.i.l.bf16 %v8325_v19 }
 0x147   : > { %v8493_v45 = vpop.permute.xlu1 %5714  ;;  %v735_v60 = vsel %vm729_vm9, %v5584_v2, %v5588_v50  ;;  %v5623_v2 = vunpack.i.l.bf16 %v8330_v40 }
 0x148   : > { %v5933_v25 = vpack.i.bf16 %v5588_v50, %v735_v60 }
 0x149   : > { %v770_v0 = vsel %vm762_vm10, %v5623_v2, %v5624_v49 }
 0x14a   : > { %5904 = vrot.lane.b32.xlu0 %v5903_v57, %s7936_s21  ;;  %5929 = vrot.lane.b32.xlu2 %v5928_v38, %s7936_s21  ;;  %v5618_v57 = vunpack.i.l.bf16 %v8361_v6  ;;  %v5983_v10 = vpack.i.bf16 %v5624_v49, %v770_v0  ;;  %v5751_v0 = vunpack.i.l.bf16 %v8498_v8 }
 0x14c   : > { %v8512_v34 = vpop.permute.xlu0 %5694  ;;  %v8514_v21 = vpop.permute.xlu2 %5764  ;;  %v768_v40 = vsel %vm762_vm10, %v5614_v15, %v5618_v57  ;;  %v5272_v15 = vld [vmem:[%s13096_s3 + $0x20] sm:$0xff] }
 0x14d   : > { %5939 = vrot.lane.b32.xlu1 %v5938_v9, %s7936_s21  ;;  %v5958_v9 = vpack.i.bf16 %v765_v58, %v5604_v55  ;;  %v5963_v55 = vpack.i.bf16 %v5609_v5, %v766_v29  ;;  %v769_v58 = vsel %vm762_vm10, %v5619_v62, %v5623_v2 }
 0x14f   : > { %v8509_v14 = vpop.permute.xlu1 %5729 }
 0x152   : > { %5919 = vrot.lane.b32.xlu0 %v5918_v1, %s7936_s21  ;;  %5944 = vrot.lane.b32.xlu2 %v5943_v11, %s7936_s21 }
 0x154   : > { %v8529_v44 = vpop.permute.xlu0 %5709  ;;  %v8531_v30 = vpop.permute.xlu2 %5779 }
 0x155   : > { %5954 = vrot.lane.b32.xlu1 %v5953_v12, %s7936_s21  ;;  %v5782_v61 = vunpack.i.h.bf16 %v8531_v30  ;;  %v5781_v19 = vunpack.i.l.bf16 %v8531_v30  ;;  %v5973_v12 = vpack.i.bf16 %v5618_v57, %v768_v40  ;;  %v5752_v57 = vunpack.i.h.bf16 %v8498_v8 }
 0x157   : > { %v8526_v39 = vpop.permute.xlu1 %5744  ;;  %v1141_v7 = vsel %vm1095_vm11, %v5781_v19, %v5782_v61  ;;  %v1132_v5 = vsel %vm1095_vm11, %v5751_v0, %v5752_v57  ;;  %v13114_v0 = vunpack.i.l.bf16 %v8514_v21 }
 0x158   : > { %1325 = vmatpush.msra.mxu0 %v1141_v7 }
 0x15a   : > { %5934 = vrot.lane.b32.xlu0 %v5933_v25, %s7936_s21  ;;  %5959 = vrot.lane.b32.xlu2 %v5958_v9, %s7936_s21 }
 0x15c   : > { %v8550_v33 = vpop.permute.xlu0 %5724  ;;  %v8552_v26 = vpop.permute.xlu2 %5794 }
 0x15d   : > { %5969 = vrot.lane.b32.xlu1 %v5968_v35, %s7936_s21  ;;  %v5978_v35 = vpack.i.bf16 %v769_v58, %v5619_v62  ;;  %v5712_v58 = vunpack.i.h.bf16 %v8529_v44 }
 0x15f   : > { %v8547_v38 = vpop.permute.xlu1 %5759 }
 0x160   : > { %v5762_v6 = vunpack.i.h.bf16 %v8547_v38  ;;  %v5761_v25 = vunpack.i.l.bf16 %v8547_v38 }
 0x162   : > { %5949 = vrot.lane.b32.xlu0 %v5948_v63, %s7936_s21  ;;  %5974 = vrot.lane.b32.xlu2 %v5973_v12, %s7936_s21  ;;  %v5732_v63 = vunpack.i.h.bf16 %v8509_v14  ;;  %v5731_v12 = vunpack.i.l.bf16 %v8509_v14 }
 0x164   : > { %v8562_v11 = vpop.permute.xlu0 %5739  ;;  %v8564_v50 = vpop.permute.xlu2 %5809  ;;  %v1126_v14 = vsel %vm1095_vm11, %v5731_v12, %v5732_v63  ;;  %v1136_v12 = vsel %vm1095_vm11, %v5762_v6, %v13114_v0 }
 0x165   : > { %5984 = vrot.lane.b32.xlu1 %v5983_v10, %s7936_s21  ;;  %13366 = vst [vmem:[#allocation14_spill] sm:$0xff] %v8564_v50  ;;  %v5742_v36 = vunpack.i.h.bf16 %v8562_v11  ;;  %v5741_v40 = vunpack.i.l.bf16 %v8562_v11  ;;  %v1135_v10 = vsel %vm1095_vm11, %v5761_v25, %v5762_v6  ;;  %v5721_v11 = vunpack.i.l.bf16 %v8465_v54 }
 0x166   : > { %v5672_v6 = vunpack.i.h.bf16 %v8443_v16 }
 0x167   : > { %v8560_v1 = vpop.permute.xlu1 %5774  ;;  %v1129_v62 = vsel %vm1095_vm11, %v5741_v40, %v5742_v36 }
 0x16a   : > { %5964 = vrot.lane.b32.xlu0 %v5963_v55, %s7936_s21  ;;  %1966 = vperm.xlu2 %5627, %v5272_v15   ;;  %v5722_v15 = vunpack.i.h.bf16 %v8465_v54  ;;  %v5702_v54 = vunpack.i.h.bf16 %v8476_v43 }
 0x16c   : > { %v8574_v60 = vpop.permute.xlu0 %5754  ;;  %v8576_v19 = vpop.permute.xlu2 %5824 }
 0x16d   : > { %13368 = vst [vmem:[#allocation16_spill] sm:$0xff] %v8576_v19 }
 0x16f   : > { %v8572_v52 = vpop.permute.xlu1 %5789 }
 0x170   : > { %13367 = vst [vmem:[#allocation15_spill] sm:$0xff] %v8572_v52 }
 0x172   : > { %5979 = vrot.lane.b32.xlu0 %v5978_v35, %s7936_s21  ;;  %v5711_v35 = vunpack.i.l.bf16 %v8529_v44  ;;  %v1123_v44 = vsel %vm1095_vm11, %v5721_v11, %v5722_v15 }
 0x174   : > { %v5770_v49 = vpop.permute.xlu0 %5769  ;;  %v8582_v7 = vpop.permute.xlu2 %5839 }
 0x175   : > { %13369 = vst [vmem:[#allocation17_spill] sm:$0xff] %v8582_v7  ;;  %v5772_v9 = vunpack.i.h.bf16 %v5770_v49  ;;  %v5771_v27 = vunpack.i.l.bf16 %v5770_v49  ;;  %v13115_v49 = vunpack.i.l.bf16 %v8560_v1 }
 0x177   : > { %v8580_v20 = vpop.permute.xlu1 %5804  ;;  %v1138_v2 = vsel %vm1095_vm11, %v5771_v27, %v5772_v9  ;;  %v5701_v27 = vunpack.i.l.bf16 %v8476_v43  ;;  %v1139_v40 = vsel %vm1095_vm11, %v5772_v9, %v13115_v49  ;;  %v5691_v43 = vunpack.i.l.bf16 %v8432_v48 }
 0x178   : > { %1326 = vmatpush.msra.mxu0 %v1138_v2  ;;  %v13113_v2 = vunpack.i.l.bf16 %v8574_v60 }
 0x179   : > { %v1117_v9 = vsel %vm1095_vm11, %v5701_v27, %v5702_v54  ;;  %v13111_v27 = vunpack.i.l.bf16 %v8481_v4 }
 0x17a   : > { %1327 = vmatpush.msra.mxu0 %v1135_v10  ;;  %v1120_v10 = vsel %vm1095_vm11, %v5711_v35, %v5712_v58  ;;  %v1133_v35 = vsel %vm1095_vm11, %v5752_v57, %v13113_v2  ;;  %v5661_v57 = vunpack.i.l.bf16 %v8399_v17 }
 0x17c   : > { %v8597_v29 = vpop.permute.xlu0 %5784  ;;  %1328 = vmatpush.msra.mxu0 %v1132_v5  ;;  %v8599_v8 = vpop.permute.xlu2 %5854 }
 0x17d   : > { %v13117_v55 = vunpack.i.l.bf16 %v8597_v29 }
 0x17e   : > { %1329 = vmatpush.msra.mxu0 %v1129_v62  ;;  %v5682_v62 = vunpack.i.h.bf16 %v8496_v53 }
 0x17f   : > { %v8594_v38 = vpop.permute.xlu1 %5819  ;;  %v1142_v25 = vsel %vm1095_vm11, %v5782_v61, %v13117_v55  ;;  %v5692_v61 = vunpack.i.h.bf16 %v8432_v48  ;;  %v13112_v48 = vunpack.i.l.bf16 %v8526_v39 }
 0x180   : > { %13370 = vst [vmem:[#allocation18_spill] sm:$0xff] %v8594_v38  ;;  %1330 = vmatpush.msra.mxu0 %v1126_v14  ;;  %1412 = vmatpush.msra.mxu3 %v1142_v25  ;;  %v5681_v14 = vunpack.i.l.bf16 %v8496_v53  ;;  %v5671_v25 = vunpack.i.l.bf16 %v8443_v16  ;;  %v1127_v16 = vsel %vm1095_vm11, %v5732_v63, %v13111_v27  ;;  %v5642_v63 = vunpack.i.h.bf16 %v8410_v28 }
 0x181   : > { %v1130_v53 = vsel %vm1095_vm11, %v5742_v36, %v13112_v48  ;;  %v5652_v36 = vunpack.i.h.bf16 %v8463_v23 }
 0x182   : > { %1331 = vmatpush.msra.mxu0 %v1123_v44  ;;  %1413 = vmatpush.msra.mxu3 %v1139_v40  ;;  %v13101_v44 = vunpack.i.l.bf16 %v8550_v33  ;;  %v1114_v40 = vsel %vm1095_vm11, %v5691_v43, %v5692_v61  ;;  %v1108_v43 = vsel %vm1095_vm11, %v5671_v25, %v5672_v6 }
 0x184   : > { %v8630_v5 = vpop.permute.xlu0 %5799  ;;  %1332 = vmatpush.msra.mxu0 %v1120_v10  ;;  %1414 = vmatpush.msra.mxu3 %v1136_v12  ;;  %v8633_v11 = vpop.permute.xlu2 %5869  ;;  %v1111_v10 = vsel %vm1095_vm11, %v5681_v14, %v5682_v62  ;;  %v5662_v12 = vunpack.i.h.bf16 %v8399_v17  ;;  %v1124_v14 = vsel %vm1095_vm11, %v5722_v15, %v13101_v44  ;;  %v5641_v17 = vunpack.i.l.bf16 %v8410_v28 }
 0x185   : > { %13371 = vst [vmem:[#allocation19_spill] sm:$0xff] %v8630_v5  ;;  %v5631_v28 = vunpack.i.l.bf16 %v8366_v32 }
 0x186   : > { %1333 = vmatpush.msra.mxu0 %v1117_v9  ;;  %1415 = vmatpush.msra.mxu3 %v1133_v35  ;;  %v5651_v35 = vunpack.i.l.bf16 %v8463_v23  ;;  %v13108_v23 = vunpack.i.l.bf16 %v8512_v34  ;;  %v1099_v44 = vsel %vm1095_vm11, %v5641_v17, %v5642_v63 }
 0x187   : > { %v8622_v30 = vpop.permute.xlu1 %5834 }
 0x188   : > { %1334 = vmatpush.msra.mxu0 %v1114_v40  ;;  %1416 = vmatpush.msra.mxu3 %v1130_v53  ;;  %v13110_v40 = vunpack.i.l.bf16 %v8493_v45  ;;  %v1102_v18 = vsel %vm1095_vm11, %v5651_v35, %v5652_v36 }
 0x18a   : > { %1335 = vmatpush.msra.mxu0 %v1111_v10  ;;  %1417 = vmatpush.msra.mxu3 %v1127_v16  ;;  %v13109_v10 = vunpack.i.l.bf16 %v8448_v59  ;;  %v1105_v16 = vsel %vm1095_vm11, %v5661_v57, %v5662_v12  ;;  %v1121_v15 = vsel %vm1095_vm11, %v5712_v58, %v13110_v40  ;;  %v13102_v57 = vunpack.i.l.bf16 %v8460_v3 }
 0x18b   : > { %v1115_v58 = vsel %vm1095_vm11, %v5692_v61, %v13108_v23 }
 0x18c   : > { %v8666_v53 = vpop.permute.xlu0 %5814  ;;  %1336 = vmatpush.msra.mxu0 %v1108_v43  ;;  %1418 = vmatpush.msra.mxu3 %v1124_v14  ;;  %v8668_v25 = vpop.permute.xlu2 %5884  ;;  %v1118_v43 = vsel %vm1095_vm11, %v5702_v54, %v13109_v10  ;;  %v5632_v14 = vunpack.i.h.bf16 %v8366_v32  ;;  %v13107_v54 = vunpack.i.l.bf16 %v8415_v31  ;;  %v1112_v17 = vsel %vm1095_vm11, %v5682_v62, %v13102_v57 }
 0x18e   : > { %1337 = vmatpush.msra.mxu0 %v1105_v16  ;;  %1419 = vmatpush.msra.mxu3 %v1121_v15  ;;  %v8687_v16 = vld [vmem:[#allocation4] sm:$0xff]  ;;  %v1096_v32 = vsel %vm1095_vm11, %v5631_v28, %v5632_v14  ;;  %v13104_v28 = vunpack.i.l.bf16 %v8382_v46 }
 0x18f   : > { %v8656_v9 = vpop.permute.xlu1 %5849  ;;  %13372 = vst [vmem:[#allocation20_spill] sm:$0xff] %v8687_v16 }
 0x190   : > { %1338 = vmatpush.msra.mxu0 %v1102_v18  ;;  %1420 = vmatpush.msra.mxu3 %v1118_v43  ;;  %v13106_v18 = vunpack.i.l.bf16 %v8479_v24  ;;  %v1109_v43 = vsel %vm1095_vm11, %v5672_v6, %v13107_v54  ;;  %v1100_v6 = vsel %vm1095_vm11, %v5642_v63, %v13104_v28 }
 0x192   : > { %1339 = vmatpush.msra.mxu0 %v1099_v44  ;;  %1421 = vmatpush.msra.mxu3 %v1115_v58  ;;  %v13103_v44 = vunpack.i.l.bf16 %v8427_v13  ;;  %v1106_v62 = vsel %vm1095_vm11, %v5662_v12, %v13106_v18  ;;  %v13105_v58 = vunpack.i.l.bf16 %v8446_v42 }
 0x194   : > { %v8697_v15 = vpop.permute.xlu0 %5829  ;;  %1340 = vmatpush.msra.mxu0 %v1096_v32  ;;  %1422 = vmatpush.msra.mxu3 %v1112_v17  ;;  %v8699_v61 = vpop.permute.xlu2 %5899  ;;  %v1103_v32 = vsel %vm1095_vm11, %v5652_v36, %v13103_v44  ;;  %v8714_v17 = vld [vmem:[#allocation4 + $0x18] sm:$0xff]  ;;  %v1097_v36 = vsel %vm1095_vm11, %v5632_v14, %v13105_v58 }
 0x195   : > { %13373 = vst [vmem:[#allocation21_spill] sm:$0xff] %v8697_v15  ;;  %1341 = vmatmul.f32.vlgmr.msra.gmra.mxu0 %v8687_v16  ;;  %v13378_v47 = vunpack.i.h.bf16 %v8699_v61 }
 0x196   : > { %1423 = vmatpush.msra.mxu3 %v1109_v43  ;;  %13374 = vst [vmem:[#allocation22_spill] sm:$0xff] %v8714_v17 }
 0x197   : > { %v8689_v35 = vpop.permute.xlu1 %5864 }
 0x198   : > { %1424 = vmatpush.msra.mxu3 %v1106_v62  ;;  %v8730_v62 = vld [vmem:[#allocation4 + $0x30] sm:$0xff] }
 0x199   : > { %13375 = vst [vmem:[#allocation23_spill] sm:$0xff] %v8730_v62 }
 0x19a   : > { %1425 = vmatpush.msra.mxu3 %v1103_v32 }
 0x19c   : > { %v8721_v43 = vpop.permute.xlu0 %5844  ;;  %1426 = vmatpush.msra.mxu3 %v1100_v6  ;;  %v8723_v12 = vpop.permute.xlu2 %5914  ;;  %v8740_v6 = vld [vmem:[#allocation4 + $0x48] sm:$0xff] }
 0x19d   : > { %1344 = vmatmul.f32.gmra.mxu0 %v8714_v17  ;;  %13377 = vst [vmem:[#allocation25_spill] sm:$0xff] %v8740_v6 }
 0x19e   : > { %1427 = vmatpush.msra.mxu3 %v1097_v36 }
 0x19f   : > { %v8716_v57 = vpop.permute.xlu1 %5879  ;;  %1428 = vmatmul.f32.vlgmr.msra.gmra.mxu3 %v8687_v16 }
 0x1a0   : > { %v5881_v41 = vunpack.i.l.bf16 %v8716_v57 }
 0x1a4   : > { %v8734_v44 = vpop.permute.xlu0 %5859  ;;  %v8736_v63 = vpop.permute.xlu2 %5929 }
 0x1a5   : > { %13376 = vst [vmem:[#allocation24_spill] sm:$0xff] %v8734_v44  ;;  %1347 = vmatmul.f32.gmra.mxu0 %v8730_v62  ;;  %v13122_v2 = vunpack.i.h.bf16 %v8736_v63  ;;  %v5931_v0 = vunpack.i.l.bf16 %v8736_v63 }
 0x1a7   : > { %v8732_v32 = vpop.permute.xlu1 %5894  ;;  %1431 = vmatmul.f32.gmra.mxu3 %v8714_v17  ;;  %v13380_v17 = vunpack.i.h.bf16 %v8716_v57 }
 0x1a9   : > { %v1171_v16 = vsel %vm1095_vm11, %v5881_v41, %v13380_v17  ;;  %v5841_v17 = vunpack.i.l.bf16 %v8582_v7 }
 0x1ac   : > { %v8744_v14 = vpop.permute.xlu0 %5874  ;;  %v8746_v36 = vpop.permute.xlu2 %5944 }
 0x1ad   : > { %1350 = vmatmul.f32.gmra.mxu0 %v8740_v6  ;;  %v5947_v58 = vunpack.i.h.bf16 %v8746_v36  ;;  %v13116_v18 = vunpack.i.l.bf16 %v8746_v36 }
 0x1af   : > { %v8742_v28 = vpop.permute.xlu1 %5909  ;;  %1434 = vmatmul.f32.gmra.mxu3 %v8730_v62  ;;  %v1191_v54 = vsel %vm1095_vm11, %v13116_v18, %v5947_v58  ;;  %v1186_v58 = vsel %vm1095_vm11, %v5931_v0, %v13122_v2  ;;  %v5851_v62 = vunpack.i.l.bf16 %v8656_v9 }
 0x1b0   : > { %1528 = vmatpush.msrb.mxu3 %v1191_v54  ;;  %v13128_v55 = vunpack.i.h.bf16 %v8742_v28  ;;  %v5911_v56 = vunpack.i.l.bf16 %v8742_v28 }
 0x1b2   : > { %v1180_v2 = vsel %vm1095_vm11, %v5911_v56, %v13128_v55 }
 0x1b4   : > { %v8757_v10 = vpop.permute.xlu0 %5889 }
 0x1b7   : > { %v8755_v23 = vpop.permute.xlu1 %5924  ;;  %1437 = vmatmul.f32.gmra.mxu3 %v8740_v6 }
 0x1bc   : > { %v8766_v49 = vpop.permute.xlu0 %5904 }
 0x1bf   : > { %v8760_v40 = vpop.permute.xlu1 %5939 }
 0x1c0   : > { %v13123_v27 = vunpack.i.h.bf16 %v8760_v40  ;;  %v5941_v48 = vunpack.i.l.bf16 %v8760_v40 }
 0x1c2   : > { %v1189_v54 = vsel %vm1095_vm11, %v5941_v48, %v13123_v27  ;;  %v5901_v48 = vunpack.i.l.bf16 %v8699_v61  ;;  %v13379_v27 = vunpack.i.h.bf16 %v8757_v10 }
 0x1c3   : > { %1354 = vmatpush.msra.mxu1 %v1189_v54 }
 0x1c4   : > { %v8774_v18 = vpop.permute.xlu0 %5919  ;;  %v1177_v22 = vsel %vm1095_vm11, %v5901_v48, %v13378_v47  ;;  %v5917_v47 = vunpack.i.h.bf16 %v8723_v12  ;;  %v5907_v48 = vunpack.i.h.bf16 %v8766_v49 }
 0x1c5   : > { %1355 = vmatpush.msra.mxu1 %v1186_v58  ;;  %v13127_v37 = vunpack.i.h.bf16 %v8774_v18  ;;  %v5921_v51 = vunpack.i.l.bf16 %v8774_v18  ;;  %v5891_v58 = vunpack.i.l.bf16 %v8757_v10 }
 0x1c7   : > { %v1183_v54 = vsel %vm1095_vm11, %v5921_v51, %v13127_v37  ;;  %v5927_v37 = vunpack.i.h.bf16 %v8755_v23  ;;  %v1174_v6 = vsel %vm1095_vm11, %v5891_v58, %v13379_v27  ;;  %v8808_v51 = vpop.permute.xlu1 %5954  ;;  %v13381_v58 = vunpack.i.h.bf16 %v8633_v11 }
 0x1c8   : > { %1356 = vmatpush.msra.mxu1 %v1183_v54  ;;  %v5871_v54 = vunpack.i.l.bf16 %v8633_v11  ;;  %v13384_v27 = vunpack.i.h.bf16 %v8734_v44 }
 0x1ca   : > { %1357 = vmatpush.msra.mxu1 %v1180_v2 }
 0x1cc   : > { %v8798_v0 = vpop.permute.xlu0 %5934  ;;  %1358 = vmatpush.msra.mxu1 %v1177_v22  ;;  %v5861_v22 = vunpack.i.l.bf16 %v8734_v44  ;;  %v13390_v44 = vunpack.i.h.bf16 %v8697_v15 }
 0x1cd   : > { %v5937_v2 = vunpack.i.h.bf16 %v8798_v0  ;;  %v13135_v55 = vunpack.i.l.bf16 %v8798_v0 }
 0x1ce   : > { %1359 = vmatpush.msra.mxu1 %v1174_v6  ;;  %v1168_v6 = vsel %vm1095_vm11, %v5871_v54, %v13381_v58  ;;  %v1165_v42 = vsel %vm1095_vm11, %v5861_v22, %v13384_v27  ;;  %v13385_v54 = vunpack.i.l.bf16 %v8766_v49 }
 0x1cf   : > { %v1188_v56 = vsel %vm1095_vm11, %v13135_v55, %v5937_v2  ;;  %v13382_v2 = vunpack.i.l.bf16 %v8755_v23 }
 0x1d0   : > { %1529 = vmatpush.msrb.mxu3 %v1188_v56  ;;  %1360 = vmatpush.msra.mxu1 %v1171_v16  ;;  %v5897_v16 = vunpack.i.h.bf16 %v8732_v32  ;;  %v13383_v56 = vunpack.i.l.bf16 %v8723_v12 }
 0x1d1   : > { %v1185_v55 = vsel %vm1095_vm11, %v13382_v2, %v5927_v37  ;;  %v5887_v37 = vunpack.i.h.bf16 %v8668_v25  ;;  %v13387_v2 = vunpack.i.h.bf16 %v8582_v7  ;;  %v8876_v7 = vpop.permute.xlu2 %5959 }
 0x1d2   : > { %1530 = vmatpush.msrb.mxu3 %v1185_v55  ;;  %1361 = vmatpush.msra.mxu1 %v1168_v6  ;;  %v1182_v58 = vsel %vm1095_vm11, %v13383_v56, %v5917_v47  ;;  %v5831_v6 = vunpack.i.l.bf16 %v8697_v15  ;;  %v1179_v47 = vsel %vm1095_vm11, %v13385_v54, %v5907_v48  ;;  %v13386_v56 = vunpack.i.h.bf16 %v8656_v9 }
 0x1d3   : > { %v5877_v55 = vunpack.i.h.bf16 %v8744_v14  ;;  %v13388_v48 = vunpack.i.l.bf16 %v8732_v32 }
 0x1d4   : > { %v8840_v41 = vpop.permute.xlu0 %5949  ;;  %1531 = vmatpush.msrb.mxu3 %v1182_v58  ;;  %1362 = vmatpush.msra.mxu1 %v1165_v42  ;;  %v1162_v22 = vsel %vm1095_vm11, %v5851_v62, %v13386_v56  ;;  %v1159_v42 = vsel %vm1095_vm11, %v5841_v17, %v13387_v2  ;;  %v5821_v58 = vunpack.i.l.bf16 %v8594_v38  ;;  %v5811_v56 = vunpack.i.l.bf16 %v8564_v50 }
 0x1d5   : > { %v1176_v54 = vsel %vm1095_vm11, %v13388_v48, %v5897_v16  ;;  %v5867_v17 = vunpack.i.h.bf16 %v8689_v35  ;;  %v1156_v16 = vsel %vm1095_vm11, %v5831_v6, %v13390_v44  ;;  %v5857_v48 = vunpack.i.h.bf16 %v8599_v8 }
 0x1d6   : > { %1532 = vmatpush.msrb.mxu3 %v1179_v47  ;;  %1363 = vmatpush.msra.mxu1 %v1162_v22  ;;  %v8862_v47 = vpop.permute.xlu1 %5969  ;;  %v13389_v22 = vunpack.i.l.bf16 %v8668_v25  ;;  %v13391_v2 = vunpack.i.l.bf16 %v8744_v14  ;;  %v5847_v62 = vunpack.i.h.bf16 %v8721_v43  ;;  %v5787_v6 = vunpack.i.h.bf16 %v8597_v29 }
 0x1d8   : > { %1533 = vmatpush.msrb.mxu3 %v1176_v54  ;;  %1364 = vmatpush.msra.mxu1 %v1159_v42  ;;  %v1173_v27 = vsel %vm1095_vm11, %v13389_v22, %v5887_v37  ;;  %v5801_v54 = vunpack.i.l.bf16 %v8630_v5  ;;  %v1170_v37 = vsel %vm1095_vm11, %v13391_v2, %v5877_v55  ;;  %v13392_v22 = vunpack.i.h.bf16 %v8594_v38 }
 0x1d9   : > { %v5791_v42 = vunpack.i.l.bf16 %v8572_v52  ;;  %v13394_v2 = vunpack.i.l.bf16 %v8689_v35  ;;  %v13396_v55 = vunpack.i.h.bf16 %v8630_v5  ;;  %v13398_v38 = vunpack.i.h.bf16 %v8572_v52 }
 0x1da   : > { %1534 = vmatpush.msrb.mxu3 %v1173_v27  ;;  %1365 = vmatpush.msra.mxu1 %v1156_v16  ;;  %v1153_v44 = vsel %vm1095_vm11, %v5821_v58, %v13392_v22  ;;  %v13393_v27 = vunpack.i.h.bf16 %v8564_v50  ;;  %v5777_v22 = vunpack.i.h.bf16 %v8560_v1  ;;  %v5757_v5 = vunpack.i.h.bf16 %v8574_v60 }
 0x1db   : > { %v1167_v58 = vsel %vm1095_vm11, %v13394_v2, %v5867_v17  ;;  %v1147_v50 = vsel %vm1095_vm11, %v5801_v54, %v13396_v55  ;;  %v5827_v17 = vunpack.i.h.bf16 %v8576_v19  ;;  %v5972_v54 = vunpack.i.h.bf16 %v8862_v47 }
 0x1dc   : > { %v8885_v15 = vpop.permute.xlu0 %5964  ;;  %1535 = vmatpush.msrb.mxu3 %v1170_v37  ;;  %1366 = vmatpush.msra.mxu1 %v1153_v44  ;;  %v1150_v16 = vsel %vm1095_vm11, %v5811_v56, %v13393_v27  ;;  %v5837_v37 = vunpack.i.h.bf16 %v8622_v30  ;;  %v13395_v44 = vunpack.i.l.bf16 %v8599_v8 }
 0x1de   : > { %1536 = vmatpush.msrb.mxu3 %v1167_v58  ;;  %1367 = vmatpush.msra.mxu1 %v1150_v16  ;;  %v1164_v27 = vsel %vm1095_vm11, %v13395_v44, %v5857_v48  ;;  %v8908_v58 = vld [vmem:[#allocation4 + $0x8] sm:$0xff]  ;;  %v13397_v16 = vunpack.i.l.bf16 %v8721_v43  ;;  %v1144_v48 = vsel %vm1095_vm11, %v5791_v42, %v13398_v38  ;;  %v5817_v44 = vunpack.i.h.bf16 %v8666_v53  ;;  %v8918_v55 = vpop.permute.xlu1 %5984 }
 0x1df   : > { %v13401_v42 = vunpack.i.l.bf16 %v8560_v1 }
 0x1e0   : > { %1537 = vmatpush.msrb.mxu3 %v1164_v27  ;;  %1368 = vmatpush.msra.mxu1 %v1147_v50  ;;  %v1161_v56 = vsel %vm1095_vm11, %v13397_v16, %v5847_v62  ;;  %v5767_v50 = vunpack.i.h.bf16 %v8514_v21  ;;  %v13399_v27 = vunpack.i.l.bf16 %v8622_v30  ;;  %v13400_v62 = vunpack.i.l.bf16 %v8597_v29  ;;  %v8937_v29 = vpop.permute.xlu2 %5974 }
 0x1e1   : > { %v1140_v16 = vsel %vm1095_vm11, %v13401_v42, %v5777_v22  ;;  %v13144_v22 = vunpack.i.l.bf16 %v8918_v55  ;;  %v5797_v42 = vunpack.i.h.bf16 %v8552_v26 }
 0x1e2   : > { %1538 = vmatpush.msrb.mxu3 %v1161_v56  ;;  %1369 = vmatpush.msra.mxu1 %v1144_v48  ;;  %v1158_v2 = vsel %vm1095_vm11, %v13399_v27, %v5837_v37  ;;  %v1143_v38 = vsel %vm1095_vm11, %v13400_v62, %v5787_v6  ;;  %v5807_v56 = vunpack.i.h.bf16 %v8580_v20  ;;  %v13402_v37 = vunpack.i.l.bf16 %v8576_v19 }
 0x1e3   : > { %1370 = vmatmul.f32.vlgmr.msra.gmra.mxu1 %v8908_v58  ;;  %v5971_v6 = vunpack.i.l.bf16 %v8862_v47  ;;  %v5961_v47 = vunpack.i.l.bf16 %v8876_v7  ;;  %v5747_v48 = vunpack.i.h.bf16 %v8526_v39  ;;  %v5976_v19 = vunpack.i.l.bf16 %v8937_v29 }
 0x1e4   : > { %v5980_v52 = vpop.permute.xlu0 %5979  ;;  %1539 = vmatpush.msrb.mxu3 %v1158_v2  ;;  %v1155_v27 = vsel %vm1095_vm11, %v13402_v37, %v5827_v17  ;;  %1499 = vmatpush.msrb.mxu1 %v1143_v38  ;;  %v13403_v2 = vunpack.i.l.bf16 %v8666_v53  ;;  %v5962_v38 = vunpack.i.h.bf16 %v8876_v7  ;;  %v5952_v7 = vunpack.i.h.bf16 %v8840_v41 }
 0x1e5   : > { %v5982_v1 = vunpack.i.h.bf16 %v5980_v52  ;;  %v5981_v62 = vunpack.i.l.bf16 %v5980_v52 }
 0x1e6   : > { %1540 = vmatpush.msrb.mxu3 %v1155_v27  ;;  %v1152_v17 = vsel %vm1095_vm11, %v13403_v2, %v5817_v44  ;;  %1500 = vmatpush.msrb.mxu1 %v1140_v16  ;;  %v5966_v27 = vunpack.i.l.bf16 %v8885_v15  ;;  %v13404_v44 = vunpack.i.l.bf16 %v8514_v21  ;;  %v1198_v2 = vsel %vm1095_vm11, %v5971_v6, %v5972_v54 }
 0x1e7   : > { %v1201_v52 = vsel %vm1095_vm11, %v5981_v62, %v5982_v1  ;;  %v1202_v37 = vsel %vm1095_vm11, %v5982_v1, %v13144_v22  ;;  %v5951_v62 = vunpack.i.l.bf16 %v8840_v41  ;;  %v13405_v1 = vunpack.i.l.bf16 %v8580_v20 }
 0x1e8   : > { %1395 = vmatpush.msra.mxu2 %v1201_v52  ;;  %1541 = vmatpush.msrb.mxu3 %v1152_v17  ;;  %v1137_v16 = vsel %vm1095_vm11, %v13404_v44, %v5767_v50  ;;  %v1199_v21 = vsel %vm1095_vm11, %v5972_v54, %v5976_v19  ;;  %v13406_v50 = vunpack.i.l.bf16 %v8574_v60  ;;  %v8971_v52 = vld [vmem:[#allocation4 + $0x20] sm:$0xff]  ;;  %v5737_v41 = vunpack.i.h.bf16 %v8481_v4 }
 0x1e9   : > { %1482 = vmatpush.msrb.mxu0 %v1202_v37  ;;  %v1149_v22 = vsel %vm1095_vm11, %v13405_v1, %v5807_v56  ;;  %1501 = vmatpush.msrb.mxu1 %v1137_v16  ;;  %v1195_v6 = vsel %vm1095_vm11, %v5961_v47, %v5962_v38  ;;  %v13407_v56 = vunpack.i.l.bf16 %v8552_v26  ;;  %v1196_v60 = vsel %vm1095_vm11, %v5962_v38, %v5966_v27 }
 0x1ea   : > { %1396 = vmatpush.msra.mxu2 %v1198_v2  ;;  %1542 = vmatpush.msrb.mxu3 %v1149_v22  ;;  %v1134_v17 = vsel %vm1095_vm11, %v13406_v50, %v5757_v5  ;;  %v5956_v22 = vunpack.i.l.bf16 %v8808_v51  ;;  %v8982_v5 = vld [vmem:[#allocation4 + $0x10] sm:$0xff]  ;;  %v5727_v54 = vunpack.i.h.bf16 %v8550_v33  ;;  %v1192_v47 = vsel %vm1095_vm11, %v5951_v62, %v5952_v7 }
 0x1eb   : > { %1483 = vmatpush.msrb.mxu0 %v1199_v21  ;;  %v1146_v37 = vsel %vm1095_vm11, %v13407_v56, %v5797_v42  ;;  %1502 = vmatpush.msrb.mxu1 %v1134_v17  ;;  %v13408_v42 = vunpack.i.l.bf16 %v8526_v39  ;;  %v5717_v38 = vunpack.i.h.bf16 %v8493_v45  ;;  %v13409_v2 = vunpack.i.l.bf16 %v8746_v36 }
 0x1ec   : > { %1397 = vmatpush.msra.mxu2 %v1195_v6  ;;  %1543 = vmatpush.msrb.mxu3 %v1146_v37  ;;  %v1193_v16 = vsel %vm1095_vm11, %v5952_v7, %v5956_v22  ;;  %v13410_v62 = vunpack.i.h.bf16 %v8760_v40  ;;  %v13411_v39 = vunpack.i.l.bf16 %v8481_v4  ;;  %v5707_v7 = vunpack.i.h.bf16 %v8448_v59  ;;  %v9016_v4 = vld [vmem:[#allocation4 + $0x38] sm:$0xff]  ;;  %v9027_v37 = vld [vmem:[#allocation4 + $0x28] sm:$0xff] }
 0x1ed   : > { %1484 = vmatpush.msrb.mxu0 %v1196_v60  ;;  %1373 = vmatmul.f32.gmra.mxu1 %v8971_v52  ;;  %v1131_v44 = vsel %vm1095_vm11, %v13408_v42, %v5747_v48  ;;  %v13412_v21 = vunpack.i.l.bf16 %v8798_v0  ;;  %v13413_v50 = vunpack.i.h.bf16 %v8736_v63  ;;  %v13414_v36 = vunpack.i.l.bf16 %v8550_v33 }
 0x1ee   : > { %1398 = vmatpush.msra.mxu2 %v1192_v47  ;;  %1503 = vmatpush.msrb.mxu1 %v1131_v44  ;;  %v1190_v1 = vsel %vm1095_vm11, %v13410_v62, %v13409_v2  ;;  %v1128_v48 = vsel %vm1095_vm11, %v13411_v39, %v5737_v41  ;;  %v5697_v41 = vunpack.i.h.bf16 %v8512_v34  ;;  %v13415_v0 = vunpack.i.l.bf16 %v8755_v23 }
 0x1ef   : > { %5260 = vmatmul.msk.f32.vlgmr.msra.gmra.mxu2 %vm1312_vm12, %v8982_v5  ;;  %1485 = vmatpush.msrb.mxu0 %v1193_v16  ;;  %v1187_v17 = vsel %vm1095_vm11, %v13413_v50, %v13412_v21  ;;  %v1125_v40 = vsel %vm1095_vm11, %v13414_v36, %v5727_v54  ;;  %v13416_v63 = vunpack.i.h.bf16 %v8774_v18  ;;  %v13417_v33 = vunpack.i.l.bf16 %v8493_v45  ;;  %v9071_v21 = vld [vmem:[#allocation4 + $0x40] sm:$0xff] }
 0x1f0   : > { %1441 = vmatpush.msrb.mxu2 %v1190_v1  ;;  %1504 = vmatpush.msrb.mxu1 %v1128_v48  ;;  %v5687_v60 = vunpack.i.h.bf16 %v8460_v3  ;;  %v13418_v54 = vunpack.i.l.bf16 %v8723_v12  ;;  %v13419_v47 = vunpack.i.h.bf16 %v8742_v28  ;;  %v13420_v18 = vunpack.i.l.bf16 %v8448_v59 }
 0x1f1   : > { %1544 = vmatmul.f32.vlgmr.msrb.gmra.mxu3 %v8908_v58  ;;  %5264 = vmatmul.msk.f32.vlgmr.msrb.gmra.mxu0 %vm1312_vm12, %v8982_v5  ;;  %v1184_v6 = vsel %vm1095_vm11, %v13416_v63, %v13415_v0  ;;  %v1122_v56 = vsel %vm1095_vm11, %v13417_v33, %v5717_v38  ;;  %v5677_v42 = vunpack.i.h.bf16 %v8415_v31  ;;  %v13421_v44 = vunpack.i.l.bf16 %v8766_v49  ;;  %v13435_v63 = vld [vmem:[#allocation24_spill] sm:$0xff] }
 0x1f2   : > { %1442 = vmatpush.msrb.mxu2 %v1187_v17  ;;  %1505 = vmatpush.msrb.mxu1 %v1125_v40  ;;  %v1181_v23 = vsel %vm1095_vm11, %v13419_v47, %v13418_v54  ;;  %v1119_v45 = vsel %vm1095_vm11, %v13420_v18, %v5707_v7  ;;  %v13422_v12 = vunpack.i.h.bf16 %v8699_v61  ;;  %v13423_v16 = vunpack.i.l.bf16 %v8512_v34  ;;  %v781_v34 = vld [vmem:[#allocation4 + $0x50] sm:$0xff] }
 0x1f3   : > { %v5667_v59 = vunpack.i.h.bf16 %v8479_v24  ;;  %v13424_v2 = vunpack.i.l.bf16 %v8732_v32  ;;  %v13425_v62 = vunpack.i.h.bf16 %v8757_v10  ;;  %v13426_v49 = vunpack.i.l.bf16 %v8460_v3  ;;  %v13442_v47 = vld [vmem:[#allocation17_spill] sm:$0xff] }
 0x1f4   : > { %1443 = vmatpush.msrb.mxu2 %v1184_v6  ;;  %1506 = vmatpush.msrb.mxu1 %v1122_v56  ;;  %v1178_v28 = vsel %vm1095_vm11, %v13422_v12, %v13421_v44  ;;  %v1116_v38 = vsel %vm1095_vm11, %v13423_v16, %v5697_v41  ;;  %v5657_v39 = vunpack.i.h.bf16 %v8427_v13  ;;  %v13427_v32 = vunpack.i.l.bf16 %v8668_v25 }
 0x1f5   : > { %1376 = vmatmul.f32.gmra.mxu1 %v9016_v4  ;;  %v1175_v1 = vsel %vm1095_vm11, %v13425_v62, %v13424_v2  ;;  %v1113_v61 = vsel %vm1095_vm11, %v13426_v49, %v5687_v60  ;;  %v13428_v10 = vunpack.i.h.bf16 %v8716_v57  ;;  %v13429_v3 = vunpack.i.l.bf16 %v8415_v31  ;;  %v13433_v31 = vld [vmem:[#allocation13_spill] sm:$0xff] }
 0x1f6   : > { %1444 = vmatpush.msrb.mxu2 %v1181_v23  ;;  %1507 = vmatpush.msrb.mxu1 %v1119_v45  ;;  %v5647_v50 = vunpack.i.h.bf16 %v8382_v46  ;;  %v13430_v17 = vunpack.i.l.bf16 %v8744_v14  ;;  %v13431_v36 = vunpack.i.h.bf16 %v8633_v11  ;;  %v13432_v57 = vunpack.i.l.bf16 %v8479_v24 }
 0x1f7   : > { %5261 = vmatmul.msk.f32.gmra.mxu2 %vm1312_vm12, %v9027_v37  ;;  %v1172_v48 = vsel %vm1095_vm11, %v13428_v10, %v13427_v32  ;;  %v1110_v7 = vsel %vm1095_vm11, %v13429_v3, %v5677_v42  ;;  %v5637_v41 = vunpack.i.h.bf16 %v13433_v31  ;;  %v13434_v0 = vunpack.i.l.bf16 %v8689_v35  ;;  %v13446_v42 = vld [vmem:[#allocation21_spill] sm:$0xff]  ;;  %v13457_v32 = vld [vmem:[#allocation19_spill] sm:$0xff] }
 0x1f8   : > { %1445 = vmatpush.msrb.mxu2 %v1178_v28  ;;  %1508 = vmatpush.msrb.mxu1 %v1116_v38  ;;  %v1169_v25 = vsel %vm1095_vm11, %v13431_v36, %v13430_v17  ;;  %v1107_v40 = vsel %vm1095_vm11, %v13432_v57, %v5667_v59  ;;  %v13436_v14 = vunpack.i.h.bf16 %v13435_v63  ;;  %v13437_v6 = vunpack.i.l.bf16 %v8427_v13  ;;  %v13448_v28 = vld [vmem:[#allocation20_spill] sm:$0xff]  ;;  %v13451_v38 = vld [vmem:[#allocation18_spill] sm:$0xff] }
 0x1f9   : > { %1547 = vmatmul.f32.gmra.mxu3 %v8971_v52  ;;  %5265 = vmatmul.msk.f32.gmra.mxu0 %vm1312_vm12, %v9027_v37  ;;  %v13438_v24 = vunpack.i.l.bf16 %v8599_v8  ;;  %v13439_v56 = vunpack.i.h.bf16 %v8656_v9  ;;  %v13440_v54 = vunpack.i.l.bf16 %v8382_v46  ;;  %v13441_v13 = vunpack.i.l.bf16 %v8721_v43  ;;  %v782_v46 = vld [vmem:[#allocation4 + $0x58] sm:$0xff]  ;;  %v13449_v43 = vld [vmem:[#allocation16_spill] sm:$0xff] }
 0x1fa   : > { %1446 = vmatpush.msrb.mxu2 %v1175_v1  ;;  %1509 = vmatpush.msrb.mxu1 %v1113_v61  ;;  %v1166_v11 = vsel %vm1095_vm11, %v13436_v14, %v13434_v0  ;;  %v1104_v33 = vsel %vm1095_vm11, %v13437_v6, %v5657_v39  ;;  %v13443_v23 = vunpack.i.h.bf16 %v13442_v47  ;;  %v13444_v9 = vunpack.i.l.bf16 %v13433_v31  ;;  %v13454_v1 = vld [vmem:[#allocation14_spill] sm:$0xff] }
 0x1fb   : > { %v1163_v60 = vsel %vm1095_vm11, %v13439_v56, %v13438_v24  ;;  %v1101_v35 = vsel %vm1095_vm11, %v13440_v54, %v5647_v50  ;;  %v13445_v45 = vunpack.i.l.bf16 %v8622_v30  ;;  %v13447_v44 = vunpack.i.h.bf16 %v13446_v42  ;;  %v13462_v36 = vld [vmem:[#allocation22_spill] sm:$0xff] }
 0x1fc   : > { %1447 = vmatpush.msrb.mxu2 %v1172_v48  ;;  %1510 = vmatpush.msrb.mxu1 %v1110_v7  ;;  %v1160_v8 = vsel %vm1095_vm11, %v13443_v23, %v13441_v13  ;;  %v1098_v18 = vsel %vm1095_vm11, %v13444_v9, %v5637_v41  ;;  %v13450_v16 = vunpack.i.l.bf16 %v13449_v43  ;;  %v13452_v59 = vunpack.i.h.bf16 %v13451_v38  ;;  %v13460_v7 = vld [vmem:[#allocation15_spill] sm:$0xff] }
 0x1fd   : > { %1379 = vmatmul.f32.gmra.mxu1 %v781_v34  ;;  %v1157_v12 = vsel %vm1095_vm11, %v13447_v44, %v13445_v45  ;;  %v13453_v62 = vunpack.i.l.bf16 %v8666_v53  ;;  %v13455_v30 = vunpack.i.h.bf16 %v13454_v1  ;;  %v5987_v61 = vunpack.i.h.bf16 %v8918_v55  ;;  %v13464_v41 = vld [vmem:[#allocation23_spill] sm:$0xff] }
 0x1fe   : > { %1448 = vmatpush.msrb.mxu2 %v1169_v25  ;;  %1511 = vmatpush.msrb.mxu1 %v1107_v40  ;;  %v1154_v2 = vsel %vm1095_vm11, %v13452_v59, %v13450_v16  ;;  %v13456_v39 = vunpack.i.l.bf16 %v8580_v20  ;;  %v13458_v10 = vunpack.i.h.bf16 %v13457_v32  ;;  %v5977_v3 = vunpack.i.h.bf16 %v8937_v29  ;;  %v13468_v59 = vld [vmem:[#allocation12_spill] sm:$0xff] }
 0x1ff   : > { %5262 = vmatmul.msk.f32.gmra.mxu2 %vm1312_vm12, %v9071_v21  ;;  %v1151_v49 = vsel %vm1095_vm11, %v13455_v30, %v13453_v62  ;;  %v13459_v53 = vunpack.i.l.bf16 %v8552_v26  ;;  %v13461_v50 = vunpack.i.h.bf16 %v13460_v7  ;;  %v5967_v25 = vunpack.i.h.bf16 %v8885_v15 }
 0x200   : > { %1449 = vmatpush.msrb.mxu2 %v1166_v11  ;;  %1512 = vmatpush.msrb.mxu1 %v1104_v33  ;;  %v1148_v48 = vsel %vm1095_vm11, %v13458_v10, %v13456_v39  ;;  %v13463_v20 = vunpack.i.l.bf16 %v8918_v55  ;;  %v5957_v40 = vunpack.i.h.bf16 %v8808_v51  ;;  %v1200_v26 = vsel %vm1095_vm11, %v5976_v19, %v5977_v3  ;;  %v13466_v19 = vld [vmem:[#allocation7_spill] sm:$0xff] }
 0x201   : > { %1550 = vmatmul.f32.gmra.mxu3 %v9016_v4  ;;  %5266 = vmatmul.msk.f32.gmra.mxu0 %vm1312_vm12, %v9071_v21  ;;  %v1145_v17 = vsel %vm1095_vm11, %v13461_v50, %v13459_v53  ;;  %v1197_v31 = vsel %vm1095_vm11, %v5966_v27, %v5967_v25  ;;  %v331_v15 = vand.u32 65535, %v13466_v19  ;;  %v332_v51 = vshrl.u32 %v13466_v19, 16 }
 0x202   : > { %1450 = vmatpush.msrb.mxu2 %v1163_v60  ;;  %1513 = vmatpush.msrb.mxu1 %v1101_v35  ;;  %v1203_v57 = vsel %vm1095_vm11, %v13463_v20, %v5987_v61  ;;  %v1194_v55 = vsel %vm1095_vm11, %v5956_v22, %v5957_v40  ;;  %v9174_v56 = vadd.s32 128, %v13466_v19 }
 0x203   : > { %v335_v29 = vmul.u32 58254, %v331_v15  ;;  %v334_v27 = vmul.u32 14564, %v331_v15  ;;  %v13471_v15 = vld [vmem:[#allocation9_spill] sm:$0xff] }
 0x204   : > { %1451 = vmatpush.msrb.mxu2 %v1160_v8  ;;  %1514 = vmatpush.msrb.mxu1 %v1098_v18  ;;  %v360_v54 = vand.u32 65535, %v9174_v56  ;;  %v361_v13 = vshrl.u32 %v9174_v56, 16 }
 0x205   : > { %1515 = vmatmul.f32.vlgmr.msrb.gmra.mxu1 %v13448_v28  ;;  %v338_v22 = vshll.u32 %v335_v29, 16  ;;  %v339_v11 = vshrl.u32 %v335_v29, 16 }
 0x206   : > { %1452 = vmatpush.msrb.mxu2 %v1157_v12  ;;  %v364_v47 = vmul.u32 58254, %v360_v54  ;;  %v363_v8 = vmul.u32 14564, %v360_v54  ;;  %v365_v9 = vmul.u32 14564, %v361_v13  ;;  %v366_v28 = vmul.u32 58254, %v361_v13 }
 0x207   : > { %5263 = vmatmul.msk.f32.gmra.mxu2 %vm1312_vm12, %v782_v46  ;;  %vm342_vm13 = vc.u32 %v334_v27, %v338_v22 }
 0x208   : > { %1453 = vmatpush.msrb.mxu2 %v1154_v2  ;;  %v367_v18 = vshll.u32 %v364_v47, 16  ;;  %v369_v42 = vshll.u32 %v365_v9, 16  ;;  %v368_v39 = vshrl.u32 %v364_v47, 16  ;;  %v370_v7 = vshrl.u32 %v365_v9, 16 }
 0x209   : > { %1553 = vmatmul.f32.gmra.mxu3 %v781_v34  ;;  %5267 = vmatmul.msk.f32.gmra.mxu0 %vm1312_vm12, %v782_v46 }
 0x20a   : > { %1454 = vmatpush.msrb.mxu2 %v1151_v49  ;;  %vm371_vm2 = vc.u32 %v363_v8, %v367_v18  ;;  %v373_v44 = vadd.s32 %v367_v18, %v363_v8 }
 0x20c   : > { %1455 = vmatpush.msrb.mxu2 %v1148_v48  ;;  %v9182_v48 = vld [vmem:[#allocation2 + $0x40] sm:$0xff] }
 0x20d   : > { %1518 = vmatmul.f32.gmra.mxu1 %v13462_v36 }
 0x20e   : > { %1456 = vmatpush.msrb.mxu2 %v1145_v17  ;;  %v13470_v17 = vld [vmem:[#allocation10_spill] sm:$0xff] }
 0x20f   : > { %1457 = vmatmul.f32.vlgmr.msrb.gmra.mxu2 %v8908_v58  ;;  %v13465_v58 = vld [vmem:[#allocation25_spill] sm:$0xff] }
 0x210   : > { %1569 = vmatpush.msra.mxu2 %v1203_v57 }
 0x212   : > { %1570 = vmatpush.msra.mxu2 %v1200_v26 }
 0x214   : > { %1571 = vmatpush.msra.mxu2 %v1197_v31 }
 0x215   : > { %1521 = vmatmul.f32.gmra.mxu1 %v13464_v41 }
 0x216   : > { %1572 = vmatpush.msra.mxu2 %v1194_v55 }
 0x217   : > { %1460 = vmatmul.f32.gmra.mxu2 %v8971_v52  ;;  %v336_v52 = vmul.u32 14564, %v332_v51 }
 0x219   : > { %v340_v0 = vshll.u32 %v336_v52, 16  ;;  %v341_v33 = vshrl.u32 %v336_v52, 16 }
 0x21d   : > { %1524 = vmatmul.f32.gmra.mxu1 %v13465_v58 }
 0x21f   : > { %1463 = vmatmul.f32.gmra.mxu2 %v9016_v4  ;;  %v344_v4 = vadd.s32 %v338_v22, %v334_v27 }
 0x221   : > { %vm346_vm14 = vc.u32 %v344_v4, %v340_v0 }
 0x222   : > { %v1429_v22 = vpop.f32.mrf.mxu3 }
 0x223   : > { %v1430_v9 = vadd.f32 %v1429_v22, %v13468_v59 }
 0x227   : > { %1466 = vmatmul.f32.gmra.mxu2 %v781_v34  ;;  %v337_v34 = vmul.u32 58254, %v332_v51 }
 0x22f   : > { %5268 = vmatmul.msk.f32.vlgmr.msra.gmra.mxu2 %vm1312_vm12, %v8982_v5  ;;  %v13467_v5 = vmov 0  }
 0x230   : > { %v343_v63 = vsel %vm342_vm13, 1, %v13467_v5  ;;  %v347_v14 = vsel %vm346_vm14, 1, %v13467_v5  ;;  %v372_v43 = vsel %vm371_vm2, 1, %v13467_v5  ;;  %vm375_vm14 = vc.u32 %v373_v44, %v369_v42 }
 0x231   : > { %v374_v38 = vadd.s32 %v372_v43, %v366_v28  ;;  %v376_v62 = vsel %vm375_vm14, 1, %v13467_v5 }
 0x233   : > { %v378_v32 = vadd.s32 %v376_v62, %v374_v38 }
 0x235   : > { %v379_v50 = vadd.s32 %v378_v32, %v368_v39 }
 0x237   : > { %5269 = vmatmul.msk.f32.gmra.mxu2 %vm1312_vm12, %v9027_v37  ;;  %v345_v37 = vadd.s32 %v343_v63, %v337_v34  ;;  %v380_v31 = vadd.s32 %v379_v50, %v370_v7 }
 0x239   : > { %v349_v6 = vadd.s32 %v347_v14, %v345_v37 }
 0x23b   : > { %v350_v24 = vadd.s32 %v349_v6, %v339_v11  ;;  %v13472_v11 = vld [vmem:[#allocation11_spill] sm:$0xff] }
 0x23f   : > { %5270 = vmatmul.msk.f32.gmra.mxu2 %vm1312_vm12, %v9071_v21  ;;  %v351_v21 = vadd.s32 %v350_v24, %v341_v33 }
 0x241   : > { %v352_v60 = vshrl.u32 %v351_v21, 4 }
 0x243   : > { %v353_v35 = vmul.u32 18, %v352_v60 }
 0x245   : > { %v354_v23 = vsub.s32 %v13466_v19, %v353_v35  ;;  %v381_v19 = vshrl.u32 %v380_v31, 4 }
 0x247   : > { %5271 = vmatmul.msk.f32.gmra.mxu2 %vm1312_vm12, %v782_v46  ;;  %v1342_v46 = vpop.f32.mrf.mxu0  ;;  %vm415_vm15 = vcmp.ne.s32.totalorder %v354_v23, 0  ;;  %vm418_vm1 = vcmp.lt.s32.totalorder %v354_v23, 0  ;;  %v424_v12 = vadd.s32 18, %v354_v23  ;;  %v382_v4 = vmul.u32 18, %v381_v19 }
 0x248   : > { %vm421_vm13 = vmand %vm418_vm1, %vm415_vm15  ;;  %v1343_v2 = vadd.f32 %v1342_v46, %v13468_v59 }
 0x249   : > { %v427_v16 = vsel %vm421_vm13, %v424_v12, %v354_v23  ;;  %v383_v14 = vsub.s32 %v9174_v56, %v382_v4  ;;  %v1432_v56 = vpop.f32.mrf.mxu3 }
 0x24a   : > { %vm430_vm0 = vcmp.lt.s32.totalorder %v427_v16, 16 }
 0x24b   : > { %v9185_v3 = vsel %vm430_vm0, 1.0, %v9182_v48  ;;  %vm416_vm0 = vcmp.ne.s32.totalorder %v383_v14, 0  ;;  %vm419_vm15 = vcmp.lt.s32.totalorder %v383_v14, 0  ;;  %v425_v13 = vadd.s32 18, %v383_v14 }
 0x24c   : > { %13469 = vst [vmem:[#allocation13_spill] sm:$0xff] %v9185_v3  ;;  %vm422_vm1 = vmand %vm419_vm15, %vm416_vm0 }
 0x24d   : > { %v428_v23 = vsel %vm422_vm1, %v425_v13, %v383_v14 }
 0x24e   : > { %vm431_vm2 = vcmp.lt.s32.totalorder %v428_v23, 16 }
 0x24f   : > { %v1345_v1 = vpop.f32.mrf.mxu0  ;;  %v9242_v12 = vsel %vm431_vm2, 1.0, %v9182_v48 }
 0x250   : > { %v1346_v36 = vadd.f32 %v1345_v1, %v13470_v17  ;;  %13473 = vst [vmem:[#allocation24_spill] sm:$0xff] %v9242_v12 }
 0x251   : > { %v1435_v42 = vpop.f32.mrf.mxu3 }
 0x257   : > { %v1348_v40 = vpop.f32.mrf.mxu0 }
 0x258   : > { %v1349_v51 = vadd.f32 %v1348_v40, %v13471_v15 }
 0x25f   : > { %v1351_v5 = vpop.f32.mrf.mxu0 }
 0x260   : > { %v1371_v45 = vpop.f32.mrf.mxu1  ;;  %v1352_v6 = vadd.f32 %v1351_v5, %v13472_v11 }
 0x261   : > { %v1372_v30 = vadd.f32 %v1371_v45, %v1343_v2  ;;  %v9246_v2 = vpop.f32.mrf.mxu3 }
 0x26a   : > { %v1374_v61 = vpop.f32.mrf.mxu1 }
 0x26b   : > { %v1375_v20 = vadd.f32 %v1374_v61, %v1346_v36 }
 0x26e   : > { %v1487_v46 = vpop.f32.mrf.mxu0 }
 0x272   : > { %v1400_v49 = vpop.f32.mrf.mxu2  ;;  %v1377_v41 = vpop.f32.mrf.mxu1 }
 0x273   : > { %v1401_v10 = vadd.f32 %v1400_v49, %v1372_v30  ;;  %v1378_v27 = vadd.f32 %v1377_v41, %v1349_v51  ;;  %v13474_v49 = vld [vmem:[#allocation8_spill] sm:$0xff]  ;;  %v1433_v41 = vadd.f32 %v1432_v56, %v13470_v17 }
 0x274   : > { %v1545_v30 = vpop.f32.mrf.mxu3  ;;  %vm417_vm13 = vcmp.ne.s32.totalorder %v13474_v49, 0  ;;  %vm420_vm14 = vcmp.lt.s32.totalorder %v13474_v49, 0  ;;  %v426_v39 = vadd.s32 18, %v13474_v49 }
 0x275   : > { %v1586_v53 = vmax.f32 %v1401_v10, 0.0  ;;  %vm423_vm0 = vmand %vm420_vm14, %vm417_vm13 }
 0x276   : > { %v1490_v36 = vpop.f32.mrf.mxu0 }
 0x277   : > { %v1598_v25 = vmul.f32 %v9185_v3, %v1586_v53  ;;  %v429_v53 = vsel %vm423_vm0, %v426_v39, %v13474_v49 }
 0x278   : > { %vm432_vm15 = vcmp.lt.s32.totalorder %v429_v53, 16 }
 0x279   : > { %v9190_v57 = vpack.i.bf16 %v1598_v25, %v9182_v48  ;;  %v9258_v40 = vsel %vm432_vm15, 1.0, %v9182_v48 }
 0x27a   : > { %v1403_v26 = vpop.f32.mrf.mxu2  ;;  %v1380_v37 = vpop.f32.mrf.mxu1  ;;  %13475 = vst [vmem:[#allocation17_spill] sm:$0xff] %v9258_v40 }
 0x27b   : > { %v1404_v55 = vadd.f32 %v1403_v26, %v1375_v20  ;;  %5999 = vrot.lane.b32.xlu0 %v9190_v57, %s7929_s8  ;;  %5994 = vrot.lane.b32.xlu1 %v9190_v57, %s7928_s7  ;;  %v1381_v24 = vadd.f32 %v1380_v37, %v1352_v6 }
 0x27c   : > { %5989 = vrot.lane.b32.xlu2 %v9190_v57, %s7927_s27  ;;  %v1548_v50 = vpop.f32.mrf.mxu3 }
 0x27d   : > { %v1589_v58 = vmax.f32 %v1404_v55, 0.0 }
 0x27e   : > { %v1493_v4 = vpop.f32.mrf.mxu0 }
 0x27f   : > { %v9200_v29 = vmul.f32 %v9185_v3, %v1589_v58  ;;  %v1436_v58 = vadd.f32 %v1435_v42, %v13471_v15 }
 0x281   : > { %v9204_v52 = vpack.i.bf16 %v9200_v29, %v9182_v48 }
 0x282   : > { %v1406_v0 = vpop.f32.mrf.mxu2  ;;  %v1516_v1 = vpop.f32.mrf.mxu1 }
 0x283   : > { %v1407_v34 = vadd.f32 %v1406_v0, %v1378_v27  ;;  %6009 = vrot.lane.b32.xlu0 %v9204_v52, %s7928_s7  ;;  %6004 = vrot.lane.b32.xlu1 %v9204_v52, %s7927_s27  ;;  %v1517_v32 = vadd.f32 %v1516_v1, %v13468_v59  ;;  %v9290_v1 = vpop.permute.xlu2 %1966 }
 0x284   : > { %6014 = vrot.lane.b32.xlu2 %v9204_v52, %s7929_s8  ;;  %v1551_v0 = vpop.f32.mrf.mxu3  ;;  %13476 = vst [vmem:[#allocation21_spill] sm:$0xff] %v9290_v1 }
 0x285   : > { %v1592_v63 = vmax.f32 %v1407_v34, 0.0  ;;  %v1546_v7 = vadd.f32 %v1545_v30, %v1517_v32 }
 0x287   : > { %v9215_v33 = vmul.f32 %v9185_v3, %v1592_v63 }
 0x289   : > { %v9219_v21 = vpack.i.bf16 %v9215_v33, %v9182_v48 }
 0x28a   : > { %v1409_v60 = vpop.f32.mrf.mxu2  ;;  %v1519_v10 = vpop.f32.mrf.mxu1 }
 0x28b   : > { %v1410_v54 = vadd.f32 %v1409_v60, %v1381_v24  ;;  %6019 = vrot.lane.b32.xlu0 %v9219_v21, %s7927_s27  ;;  %6029 = vrot.lane.b32.xlu1 %v9219_v21, %s7929_s8  ;;  %v1520_v26 = vadd.f32 %v1519_v10, %v13470_v17  ;;  %v1439_v10 = vadd.f32 %v9246_v2, %v13472_v11 }
 0x28c   : > { %6024 = vrot.lane.b32.xlu2 %v9219_v21, %s7928_s7 }
 0x28d   : > { %v1595_v35 = vmax.f32 %v1410_v54, 0.0  ;;  %v1549_v19 = vadd.f32 %v1548_v50, %v1520_v26 }
 0x28f   : > { %v9228_v47 = vmul.f32 %v9185_v3, %v1595_v35 }
 0x291   : > { %v9232_v8 = vpack.i.bf16 %v9228_v47, %v9182_v48 }
 0x292   : > { %v1458_v18 = vpop.f32.mrf.mxu2  ;;  %v1522_v55 = vpop.f32.mrf.mxu1 }
 0x293   : > { %6044 = vrot.lane.b32.xlu0 %v9232_v8, %s7929_s8  ;;  %6039 = vrot.lane.b32.xlu1 %v9232_v8, %s7928_s7  ;;  %v1459_v45 = vadd.f32 %v1458_v18, %v1430_v9  ;;  %v1523_v34 = vadd.f32 %v1522_v55, %v13471_v15  ;;  %v1554_v9 = vpop.f32.mrf.mxu3 }
 0x294   : > { %6034 = vrot.lane.b32.xlu2 %v9232_v8, %s7927_s27 }
 0x295   : > { %v1488_v44 = vadd.f32 %v1487_v46, %v1459_v45  ;;  %v1552_v6 = vadd.f32 %v1551_v0, %v1523_v34 }
 0x297   : > { %v1587_v28 = vmax.f32 %v1488_v44, 0.0 }
 0x299   : > { %v1599_v43 = vmul.f32 %v9242_v12, %v1587_v28 }
 0x29a   : > { %v1461_v16 = vpop.f32.mrf.mxu2  ;;  %v1525_v60 = vpop.f32.mrf.mxu1 }
 0x29b   : > { %v6048_v38 = vpack.i.bf16 %v1599_v43, %v1598_v25  ;;  %v1462_v27 = vadd.f32 %v1461_v16, %v1433_v41  ;;  %v1526_v15 = vadd.f32 %v1525_v60, %v13472_v11  ;;  %v5275_v41 = vld [vmem:[%s13096_s3 + $0x38] sm:$0xff] }
 0x29d   : > { %6049 = vrot.lane.b32.xlu2 %v6048_v38, %s7930_s9  ;;  %v1491_v63 = vadd.f32 %v1490_v36, %v1462_v27  ;;  %v1555_v44 = vadd.f32 %v1554_v9, %v1526_v15 }
 0x29f   : > { %v1590_v56 = vmax.f32 %v1491_v63, 0.0 }
 0x2a1   : > { %v1602_v18 = vmul.f32 %v9242_v12, %v1590_v56 }
 0x2a2   : > { %v1464_v62 = vpop.f32.mrf.mxu2 }
 0x2a3   : > { %v1465_v22 = vadd.f32 %v1464_v62, %v1436_v58 }
 0x2a5   : > { %6054 = vrot.lane.b32.xlu2 %v6048_v38, %s7931_s10  ;;  %v1494_v37 = vadd.f32 %v1493_v4, %v1465_v22 }
 0x2a7   : > { %v1593_v35 = vmax.f32 %v1494_v37, 0.0  ;;  %v5273_v37 = vld [vmem:[%s13096_s3 + $0x28] sm:$0xff] }
 0x2a9   : > { %v1605_v46 = vmul.f32 %v9242_v12, %v1593_v35 }
 0x2aa   : > { %v9251_v61 = vpop.f32.mrf.mxu2 }
 0x2ab   : > { %v6113_v62 = vpack.i.bf16 %v1605_v46, %v9215_v33  ;;  %v1468_v53 = vadd.f32 %v9251_v61, %v1439_v10 }
 0x2ad   : > { %6059 = vrot.lane.b32.xlu2 %v6048_v38, %s7932_s11 }
 0x2b2   : > { %v1574_v25 = vpop.f32.mrf.mxu2 }
 0x2b3   : > { %v1575_v20 = vadd.f32 %v1574_v25, %v1546_v7  ;;  %v1496_v7 = vpop.f32.mrf.mxu0 }
 0x2b4   : > { %v1497_v36 = vadd.f32 %v1496_v7, %v1468_v53 }
 0x2b5   : > { %v1588_v31 = vmax.f32 %v1575_v20, 0.0  ;;  %6064 = vrot.lane.b32.xlu2 %v6048_v38, %s7933_s12 }
 0x2b6   : > { %v1596_v26 = vmax.f32 %v1497_v36, 0.0 }
 0x2b7   : > { %v1600_v59 = vmul.f32 %v9258_v40, %v1588_v31 }
 0x2b8   : > { %v1608_v2 = vmul.f32 %v9242_v12, %v1596_v26 }
 0x2b9   : > { %1612 = vst.msk [vmem:[#allocation3 + $0x18] sm:$0xff] %vm1312_vm12, %v1600_v59 }
 0x2ba   : > { %v1577_v51 = vpop.f32.mrf.mxu2 }
 0x2bb   : > { %v1578_v48 = vadd.f32 %v1577_v51, %v1549_v19 }
 0x2bd   : > { %v1591_v5 = vmax.f32 %v1578_v48, 0.0  ;;  %6069 = vrot.lane.b32.xlu2 %v6048_v38, %s7935_s13 }
 0x2bf   : > { %v1603_v17 = vmul.f32 %v9258_v40, %v1591_v5 }
 0x2c0   : > { %v1625_v14 = vld [vmem:[#allocation3 + $0x18] sm:$0xff] }
 0x2c1   : > { %1615 = vst.msk [vmem:[#allocation3 + $0x38] sm:$0xff] %vm1312_vm12, %v1603_v17  ;;  %v9270_v24 = vpack.i.bf16 %v1625_v14, %v1599_v43  ;;  %v6088_v28 = vpack.i.bf16 %v9200_v29, %v1625_v14  ;;  %v5274_v17 = vld [vmem:[%s13096_s3 + $0x30] sm:$0xff] }
 0x2c2   : > { %v1580_v54 = vpop.f32.mrf.mxu2 }
 0x2c3   : > { %v1581_v13 = vadd.f32 %v1580_v54, %v1552_v6  ;;  %6074 = vrot.lane.b32.xlu0 %v9270_v24, %s7927_s27  ;;  %6084 = vrot.lane.b32.xlu1 %v9270_v24, %s7929_s8 }
 0x2c5   : > { %v1594_v23 = vmax.f32 %v1581_v13, 0.0  ;;  %6079 = vrot.lane.b32.xlu2 %v9270_v24, %s7928_s7 }
 0x2c7   : > { %v1606_v45 = vmul.f32 %v9258_v40, %v1594_v23 }
 0x2c8   : > { %v1629_v42 = vld [vmem:[#allocation3 + $0x38] sm:$0xff] }
 0x2c9   : > { %1618 = vst.msk [vmem:[#allocation3 + $0x58] sm:$0xff] %vm1312_vm12, %v1606_v45  ;;  %v9284_v43 = vpack.i.bf16 %v1629_v42, %v1602_v18 }
 0x2ca   : > { %v1583_v16 = vpop.f32.mrf.mxu2 }
 0x2cb   : > { %v1584_v38 = vadd.f32 %v1583_v16, %v1555_v44  ;;  %6089 = vrot.lane.b32.xlu0 %v6088_v28, %s7930_s9  ;;  %6144 = vrot.lane.b32.xlu1 %v9284_v43, %s7928_s7 }
 0x2cd   : > { %v1597_v30 = vmax.f32 %v1584_v38, 0.0  ;;  %6114 = vrot.lane.b32.xlu2 %v6113_v62, %s7930_s9 }
 0x2cf   : > { %v1609_v49 = vmul.f32 %v9258_v40, %v1597_v30 }
 0x2d0   : > { %v1633_v50 = vld [vmem:[#allocation3 + $0x58] sm:$0xff] }
 0x2d1   : > { %1621 = vst.msk [vmem:[#allocation3 + $0x78] sm:$0xff] %vm1312_vm12, %v1609_v49  ;;  %v6183_v20 = vpack.i.bf16 %v1633_v50, %v1605_v46  ;;  %v6193_v31 = vpack.i.bf16 %v9228_v47, %v1633_v50 }
 0x2d3   : > { %6094 = vrot.lane.b32.xlu0 %v6088_v28, %s7931_s10  ;;  %6154 = vrot.lane.b32.xlu1 %v9284_v43, %s7930_s9 }
 0x2d5   : > { %6119 = vrot.lane.b32.xlu2 %v6113_v62, %s7931_s10 }
 0x2d6   : > { %v9299_v29 = vpop.permute.xlu2 %5989 }
 0x2d7   : > { %v5992_v14 = vunpack.i.h.bf16 %v9299_v29  ;;  %v5991_v6 = vunpack.i.l.bf16 %v9299_v29 }
 0x2d8   : > { %v1637_v11 = vld [vmem:[#allocation3 + $0x78] sm:$0xff] }
 0x2d9   : > { %v9337_v59 = vpack.i.bf16 %v1637_v11, %v1608_v2  ;;  %v1686_v13 = vsel %vm503_vm3, %v5991_v6, %v5992_v14 }
 0x2db   : > { %6099 = vrot.lane.b32.xlu0 %v6088_v28, %s7932_s11  ;;  %6159 = vrot.lane.b32.xlu1 %v9284_v43, %s7931_s10 }
 0x2dd   : > { %6124 = vrot.lane.b32.xlu2 %v6113_v62, %s7932_s11 }
 0x2de   : > { %v9305_v33 = vpop.permute.xlu2 %6014 }
 0x2e3   : > { %6104 = vrot.lane.b32.xlu0 %v6088_v28, %s7933_s12  ;;  %6164 = vrot.lane.b32.xlu1 %v9284_v43, %s7932_s11 }
 0x2e5   : > { %6129 = vrot.lane.b32.xlu2 %v6113_v62, %s7933_s12 }
 0x2e6   : > { %v9311_v39 = vpop.permute.xlu2 %6024 }
 0x2eb   : > { %6109 = vrot.lane.b32.xlu0 %v6088_v28, %s7935_s13  ;;  %6169 = vrot.lane.b32.xlu1 %v9284_v43, %s7933_s12 }
 0x2ed   : > { %6134 = vrot.lane.b32.xlu2 %v6113_v62, %s7935_s13  ;;  %v9352_v47 = vpop.permute.xlu0 %5999  ;;  %v9354_v58 = vpop.permute.xlu1 %5994 }
 0x2ee   : > { %v9317_v32 = vpop.permute.xlu2 %6034  ;;  %v5997_v30 = vunpack.i.h.bf16 %v9354_v58  ;;  %v5996_v49 = vunpack.i.l.bf16 %v9354_v58 }
 0x2f0   : > { %v1730_v36 = vsel %vm548_vm4, %v5996_v49, %v5997_v30 }
 0x2f3   : > { %6149 = vrot.lane.b32.xlu0 %v9284_v43, %s7929_s8  ;;  %6174 = vrot.lane.b32.xlu1 %v9284_v43, %s7935_s13 }
 0x2f5   : > { %6139 = vrot.lane.b32.xlu2 %v9284_v43, %s7927_s27  ;;  %v9365_v27 = vpop.permute.xlu0 %6009  ;;  %v9367_v22 = vpop.permute.xlu1 %6004 }
 0x2f7   : > { %v9328_v25 = vpop.permute.xlu2 %6049 }
 0x2f8   : > { %v6052_v9 = vunpack.i.h.bf16 %v9328_v25  ;;  %v6051_v18 = vunpack.i.l.bf16 %v9328_v25 }
 0x2fa   : > { %v1810_v42 = vsel %vm630_vm6, %v6051_v18, %v6052_v9 }
 0x2fb   : > { %6184 = vrot.lane.b32.xlu0 %v6183_v20, %s7928_s7  ;;  %6179 = vrot.lane.b32.xlu1 %v6183_v20, %s7927_s27  ;;  %v6313_v28 = vpack.i.bf16 %v1810_v42, %v6051_v18 }
 0x2fd   : > { %6189 = vrot.lane.b32.xlu2 %v6183_v20, %s7929_s8  ;;  %v9375_v0 = vpop.permute.xlu0 %6019  ;;  %v9377_v4 = vpop.permute.xlu1 %6029 }
 0x2fe   : > { %v6022_v25 = vunpack.i.h.bf16 %v9375_v0 }
 0x2ff   : > { %v9334_v61 = vpop.permute.xlu2 %6054 }
 0x303   : > { %6194 = vrot.lane.b32.xlu0 %v6193_v31, %s7930_s9  ;;  %6229 = vrot.lane.b32.xlu1 %v9337_v59, %s7929_s8 }
 0x305   : > { %6224 = vrot.lane.b32.xlu2 %v9337_v59, %s7928_s7  ;;  %v9388_v34 = vpop.permute.xlu0 %6044  ;;  %v9390_v5 = vpop.permute.xlu1 %6039 }
 0x307   : > { %v9344_v55 = vpop.permute.xlu2 %6059 }
 0x30b   : > { %6199 = vrot.lane.b32.xlu0 %v6193_v31, %s7931_s10  ;;  %6234 = vrot.lane.b32.xlu1 %v9337_v59, %s7930_s9 }
 0x30d   : > { %1981 = vperm.xlu2 %5627, %v5275_v41   ;;  %v6007_v41 = vunpack.i.h.bf16 %v9367_v22 }
 0x30f   : > { %v9356_v19 = vpop.permute.xlu2 %6064 }
 0x313   : > { %6204 = vrot.lane.b32.xlu0 %v6193_v31, %s7932_s11  ;;  %6239 = vrot.lane.b32.xlu1 %v9337_v59, %s7931_s10 }
 0x315   : > { %6269 = vrot.lane.b32.xlu2 %v9204_v52, %s7936_s21 }
 0x317   : > { %v9363_v51 = vpop.permute.xlu2 %6069 }
 0x31b   : > { %6209 = vrot.lane.b32.xlu0 %v6193_v31, %s7933_s12  ;;  %6244 = vrot.lane.b32.xlu1 %v9337_v59, %s7932_s11 }
 0x31d   : > { %6284 = vrot.lane.b32.xlu2 %v6183_v20, %s7936_s21 }
 0x31f   : > { %v9373_v48 = vpop.permute.xlu2 %6079 }
 0x320   : > { %v6081_v38 = vunpack.i.l.bf16 %v9373_v48 }
 0x322   : > { %v1731_v53 = vsel %vm548_vm4, %v5997_v30, %v6081_v38 }
 0x323   : > { %6214 = vrot.lane.b32.xlu0 %v6193_v31, %s7935_s13  ;;  %6249 = vrot.lane.b32.xlu1 %v9337_v59, %s7933_s12  ;;  %v6303_v26 = vpack.i.bf16 %v1731_v53, %v1730_v36  ;;  %v6012_v31 = vunpack.i.h.bf16 %v9365_v27 }
 0x327   : > { %v9382_v52 = vpop.permute.xlu2 %6114 }
 0x32b   : > { %6219 = vrot.lane.b32.xlu0 %v9337_v59, %s7927_s27  ;;  %6254 = vrot.lane.b32.xlu1 %v9337_v59, %s7935_s13 }
 0x32f   : > { %v9392_v63 = vpop.permute.xlu2 %6119 }
 0x333   : > { %1971 = vperm.xlu0 %5625, %v5273_v37   ;;  %1976 = vperm.xlu1 %5626, %v5274_v17  }
 0x335   : > { %v9402_v60 = vpop.permute.xlu0 %6074  ;;  %v9404_v54 = vpop.permute.xlu1 %6084 }
 0x336   : > { %v6076_v56 = vunpack.i.l.bf16 %v9402_v60  ;;  %v6086_v62 = vunpack.i.l.bf16 %v9404_v54  ;;  %v6087_v53 = vunpack.i.h.bf16 %v9404_v54 }
 0x337   : > { %v9407_v35 = vpop.permute.xlu2 %6124 }
 0x338   : > { %v1687_v15 = vsel %vm503_vm3, %v5992_v14, %v6076_v56  ;;  %v1776_v54 = vsel %vm593_vm5, %v6086_v62, %v6087_v53 }
 0x339   : > { %v6298_v23 = vpack.i.bf16 %v1687_v15, %v1686_v13 }
 0x33b   : > { %6259 = vrot.lane.b32.xlu0 %v9190_v57, %s7936_s21  ;;  %6264 = vrot.lane.b32.xlu1 %v9270_v24, %s7936_s21 }
 0x33c   : > { %6299 = vrot.lane.b32.xlu2 %v6298_v23, %s7936_s21 }
 0x33d   : > { %v9418_v46 = vpop.permute.xlu0 %6089  ;;  %v9420_v45 = vpop.permute.xlu1 %6144 }
 0x33e   : > { %v6146_v11 = vunpack.i.l.bf16 %v9420_v45  ;;  %v6092_v18 = vunpack.i.h.bf16 %v9418_v46  ;;  %v6091_v49 = vunpack.i.l.bf16 %v9418_v46 }
 0x33f   : > { %v9425_v44 = vpop.permute.xlu2 %6129 }
 0x340   : > { %v1734_v17 = vsel %vm548_vm4, %v6012_v31, %v6146_v11 }
 0x343   : > { %6274 = vrot.lane.b32.xlu0 %v9284_v43, %s7936_s21  ;;  %6279 = vrot.lane.b32.xlu1 %v9219_v21, %s7936_s21  ;;  %v6002_v21 = vunpack.i.h.bf16 %v9352_v47  ;;  %v6001_v43 = vunpack.i.l.bf16 %v9352_v47  ;;  %v6006_v47 = vunpack.i.l.bf16 %v9367_v22  ;;  %v6077_v22 = vunpack.i.h.bf16 %v9402_v60 }
 0x344   : > { %6314 = vrot.lane.b32.xlu2 %v6313_v28, %s7936_s21 }
 0x345   : > { %v9432_v57 = vpop.permute.xlu0 %6094  ;;  %v9434_v24 = vpop.permute.xlu1 %6154  ;;  %v1774_v50 = vsel %vm593_vm5, %v6001_v43, %v6002_v21 }
 0x346   : > { %v6156_v23 = vunpack.i.l.bf16 %v9434_v24 }
 0x347   : > { %v9436_v16 = vpop.permute.xlu2 %6134 }
 0x348   : > { %v1812_v43 = vsel %vm630_vm6, %v6092_v18, %v6156_v23 }
 0x349   : > { %v6333_v60 = vpack.i.bf16 %v1812_v43, %v6092_v18 }
 0x34b   : > { %6289 = vrot.lane.b32.xlu0 %v9232_v8, %s7936_s21  ;;  %6294 = vrot.lane.b32.xlu1 %v9337_v59, %s7936_s21  ;;  %v1775_v8 = vsel %vm593_vm5, %v6002_v21, %v6086_v62  ;;  %v6011_v59 = vunpack.i.l.bf16 %v9365_v27  ;;  %v1689_v27 = vsel %vm503_vm3, %v6006_v47, %v6007_v41  ;;  %v1688_v21 = vsel %vm503_vm3, %v6076_v56, %v6077_v22 }
 0x34c   : > { %v6308_v20 = vpack.i.bf16 %v1775_v8, %v1774_v50  ;;  %v6338_v30 = vpack.i.bf16 %v6077_v22, %v1688_v21  ;;  %v6017_v8 = vunpack.i.h.bf16 %v9305_v33  ;;  %v6016_v50 = vunpack.i.l.bf16 %v9305_v33 }
 0x34d   : > { %v9448_v29 = vpop.permute.xlu0 %6099  ;;  %v9450_v10 = vpop.permute.xlu1 %6159  ;;  %v1733_v6 = vsel %vm548_vm4, %v6011_v59, %v6012_v31  ;;  %v6082_v47 = vunpack.i.h.bf16 %v9373_v48  ;;  %v6032_v62 = vunpack.i.h.bf16 %v9377_v4  ;;  %v6116_v48 = vunpack.i.l.bf16 %v9382_v52 }
 0x34e   : > { %v6323_v13 = vpack.i.bf16 %v1734_v17, %v1733_v6  ;;  %v6348_v17 = vpack.i.bf16 %v6087_v53, %v1776_v54  ;;  %v6031_v6 = vunpack.i.l.bf16 %v9377_v4  ;;  %v6147_v53 = vunpack.i.h.bf16 %v9420_v45 }
 0x34f   : > { %v9456_v7 = vpop.permute.xlu2 %6139  ;;  %v6042_v45 = vunpack.i.h.bf16 %v9390_v5 }
 0x350   : > { %v6141_v2 = vunpack.i.l.bf16 %v9456_v7  ;;  %v1780_v4 = vsel %vm593_vm5, %v6031_v6, %v6032_v62 }
 0x352   : > { %v1690_v14 = vsel %vm503_vm3, %v6007_v41, %v6141_v2 }
 0x353   : > { %6309 = vrot.lane.b32.xlu0 %v6308_v20, %s7936_s21  ;;  %6304 = vrot.lane.b32.xlu1 %v6303_v26, %s7936_s21  ;;  %v6318_v15 = vpack.i.bf16 %v1690_v14, %v1689_v27  ;;  %v1811_v20 = vsel %vm630_vm6, %v6052_v9, %v6091_v49  ;;  %v1777_v26 = vsel %vm593_vm5, %v6016_v50, %v6017_v8  ;;  %v6021_v9 = vunpack.i.l.bf16 %v9375_v0 }
 0x354   : > { %v6353_v41 = vpack.i.bf16 %v6091_v49, %v1811_v20  ;;  %v6026_v50 = vunpack.i.l.bf16 %v9311_v39 }
 0x355   : > { %v9468_v58 = vpop.permute.xlu0 %6104  ;;  %v9470_v37 = vpop.permute.xlu1 %6164  ;;  %v1692_v18 = vsel %vm503_vm3, %v6021_v9, %v6022_v25  ;;  %v6142_v9 = vunpack.i.h.bf16 %v9456_v7  ;;  %v6047_v7 = vunpack.i.h.bf16 %v9388_v34 }
 0x357   : > { %v9509_v31 = vpop.permute.xlu2 %6189 }
 0x358   : > { %v6191_v14 = vunpack.i.l.bf16 %v9509_v31 }
 0x35a   : > { %v1781_v0 = vsel %vm593_vm5, %v6032_v62, %v6191_v14 }
 0x35b   : > { %6324 = vrot.lane.b32.xlu0 %v6323_v13, %s7936_s21  ;;  %6319 = vrot.lane.b32.xlu1 %v6318_v15, %s7936_s21  ;;  %v1732_v15 = vsel %vm548_vm4, %v6081_v38, %v6082_v47  ;;  %v6368_v49 = vpack.i.bf16 %v1781_v0, %v1780_v4 }
 0x35c   : > { %v6343_v43 = vpack.i.bf16 %v6082_v47, %v1732_v15 }
 0x35d   : > { %v9485_v42 = vpop.permute.xlu0 %6109  ;;  %v9487_v28 = vpop.permute.xlu1 %6169 }
 0x35f   : > { %v9554_v47 = vpop.permute.xlu2 %6224 }
 0x360   : > { %v6226_v6 = vunpack.i.l.bf16 %v9554_v47 }
 0x363   : > { %6339 = vrot.lane.b32.xlu0 %v6338_v30, %s7936_s21  ;;  %6334 = vrot.lane.b32.xlu1 %v6333_v60, %s7936_s21  ;;  %v6117_v60 = vunpack.i.h.bf16 %v9382_v52  ;;  %v6056_v52 = vunpack.i.l.bf16 %v9334_v61 }
 0x365   : > { %v9499_v36 = vpop.permute.xlu0 %6149  ;;  %v9501_v56 = vpop.permute.xlu1 %6174 }
 0x366   : > { %v6151_v46 = vunpack.i.l.bf16 %v9499_v36  ;;  %v6152_v62 = vunpack.i.h.bf16 %v9499_v36  ;;  %v1691_v36 = vsel %vm503_vm3, %v6141_v2, %v6142_v9  ;;  %v6046_v2 = vunpack.i.l.bf16 %v9388_v34 }
 0x368   : > { %v1778_v59 = vsel %vm593_vm5, %v6017_v8, %v6151_v46  ;;  %v6027_v8 = vunpack.i.h.bf16 %v9311_v39 }
 0x369   : > { %v6328_v33 = vpack.i.bf16 %v1778_v59, %v1777_v26  ;;  %v1814_v26 = vsel %vm630_vm6, %v6116_v48, %v6117_v60 }
 0x36a   : > { %v6373_v39 = vpack.i.bf16 %v1814_v26, %v6116_v48 }
 0x36b   : > { %6354 = vrot.lane.b32.xlu0 %v6353_v41, %s7936_s21  ;;  %6329 = vrot.lane.b32.xlu2 %v6328_v33, %s7936_s21  ;;  %v1735_v41 = vsel %vm548_vm4, %v6146_v11, %v6147_v53  ;;  %v1736_v33 = vsel %vm548_vm4, %v6026_v50, %v6027_v8  ;;  %v6041_v11 = vunpack.i.l.bf16 %v9390_v5  ;;  %v6157_v5 = vunpack.i.h.bf16 %v9434_v24 }
 0x36c   : > { %6349 = vrot.lane.b32.xlu1 %v6348_v17, %s7936_s21 }
 0x36d   : > { %v9521_v27 = vpop.permute.xlu0 %6184  ;;  %v9523_v13 = vpop.permute.xlu1 %6179  ;;  %v1739_v4 = vsel %vm548_vm4, %v6041_v11, %v6042_v45  ;;  %v1813_v50 = vsel %vm630_vm6, %v6156_v23, %v6157_v5 }
 0x36e   : > { %v6181_v22 = vunpack.i.l.bf16 %v9523_v13  ;;  %v6186_v38 = vunpack.i.l.bf16 %v9521_v27  ;;  %v6187_v34 = vunpack.i.h.bf16 %v9521_v27 }
 0x370   : > { %v1693_v21 = vsel %vm503_vm3, %v6022_v25, %v6181_v22  ;;  %v1737_v59 = vsel %vm548_vm4, %v6027_v8, %v6186_v38  ;;  %v6383_v25 = vpack.i.bf16 %v6147_v53, %v1735_v41  ;;  %v6182_v53 = vunpack.i.h.bf16 %v9523_v13 }
 0x371   : > { %v6358_v30 = vpack.i.bf16 %v1693_v21, %v1692_v18  ;;  %v6363_v17 = vpack.i.bf16 %v1737_v59, %v1736_v33  ;;  %v1779_v18 = vsel %vm593_vm5, %v6151_v46, %v6152_v62  ;;  %v1740_v21 = vsel %vm548_vm4, %v6042_v45, %v6226_v6 }
 0x372   : > { %v1694_v26 = vsel %vm503_vm3, %v6181_v22, %v6182_v53  ;;  %v1783_v59 = vsel %vm593_vm5, %v6046_v2, %v6047_v7  ;;  %v6393_v41 = vpack.i.bf16 %v6157_v5, %v1813_v50  ;;  %v1738_v22 = vsel %vm548_vm4, %v6186_v38, %v6187_v34 }
 0x373   : > { %6359 = vrot.lane.b32.xlu0 %v6358_v30, %s7936_s21  ;;  %6344 = vrot.lane.b32.xlu2 %v6343_v43, %s7936_s21  ;;  %v6378_v43 = vpack.i.bf16 %v6142_v9, %v1691_v36  ;;  %v6388_v30 = vpack.i.bf16 %v6152_v62, %v1779_v18  ;;  %v6423_v27 = vpack.i.bf16 %v6187_v34, %v1738_v22  ;;  %v6057_v38 = vunpack.i.h.bf16 %v9334_v61 }
 0x374   : > { %6369 = vrot.lane.b32.xlu1 %v6368_v49, %s7936_s21  ;;  %v6403_v49 = vpack.i.bf16 %v1740_v21, %v1739_v4  ;;  %v6036_v21 = vunpack.i.l.bf16 %v9317_v32 }
 0x375   : > { %v9544_v20 = vpop.permute.xlu0 %6194  ;;  %v6230_v54 = vpop.permute.xlu1 %6229 }
 0x376   : > { %v6231_v48 = vunpack.i.l.bf16 %v6230_v54  ;;  %v6232_v62 = vunpack.i.h.bf16 %v6230_v54 }
 0x378   : > { %v1784_v13 = vsel %vm593_vm5, %v6047_v7, %v6231_v48  ;;  %v1785_v36 = vsel %vm593_vm5, %v6231_v48, %v6232_v62  ;;  %v1842_v48 = vsel %vm663_vm7, %v6056_v52, %v6057_v38 }
 0x379   : > { %v6408_v33 = vpack.i.bf16 %v1784_v13, %v1783_v59  ;;  %v6448_v18 = vpack.i.bf16 %v6232_v62, %v1785_v36  ;;  %v6458_v50 = vpack.i.bf16 %v1842_v48, %v6056_v52  ;;  %v6162_v59 = vunpack.i.h.bf16 %v9450_v10 }
 0x37a   : > { %v6192_v62 = vunpack.i.h.bf16 %v9509_v31  ;;  %v6097_v36 = vunpack.i.h.bf16 %v9432_v57  ;;  %v6122_v31 = vunpack.i.h.bf16 %v9392_v63 }
 0x37b   : > { %6374 = vrot.lane.b32.xlu0 %v6373_v39, %s7936_s21  ;;  %6364 = vrot.lane.b32.xlu2 %v6363_v17, %s7936_s21  ;;  %v6418_v39 = vpack.i.bf16 %v6182_v53, %v1694_v26  ;;  %v6196_v17 = vunpack.i.l.bf16 %v9544_v20 }
 0x37c   : > { %6384 = vrot.lane.b32.xlu1 %v6383_v25, %s7936_s21 }
 0x37d   : > { %v9564_v15 = vpop.permute.xlu0 %6199  ;;  %v9566_v0 = vpop.permute.xlu1 %6234  ;;  %v1815_v25 = vsel %vm630_vm6, %v6117_v60, %v6196_v17  ;;  %v6037_v60 = vunpack.i.h.bf16 %v9317_v32 }
 0x37e   : > { %v6433_v9 = vpack.i.bf16 %v6196_v17, %v1815_v25  ;;  %v6237_v13 = vunpack.i.h.bf16 %v9566_v0  ;;  %v6236_v26 = vunpack.i.l.bf16 %v9566_v0 }
 0x380   : > { %v1817_v17 = vsel %vm630_vm6, %v6236_v26, %v6237_v13 }
 0x383   : > { %6389 = vrot.lane.b32.xlu0 %v6388_v30, %s7936_s21  ;;  %6379 = vrot.lane.b32.xlu2 %v6378_v43, %s7936_s21  ;;  %v9620_v43 = vpop.permute.xlu2 %1981 }
 0x384   : > { %6404 = vrot.lane.b32.xlu1 %v6403_v49, %s7936_s21  ;;  %13477 = vst [vmem:[#allocation20_spill] sm:$0xff] %v9620_v43  ;;  %v1695_v49 = vsel %vm503_vm3, %v6036_v21, %v6037_v60 }
 0x385   : > { %v9583_v46 = vpop.permute.xlu0 %6204  ;;  %v9585_v8 = vpop.permute.xlu1 %6239 }
 0x38b   : > { %6409 = vrot.lane.b32.xlu0 %v6408_v33, %s7936_s21  ;;  %6394 = vrot.lane.b32.xlu2 %v6393_v41, %s7936_s21  ;;  %v6161_v41 = vunpack.i.l.bf16 %v9450_v10  ;;  %v6197_v33 = vunpack.i.h.bf16 %v9544_v20  ;;  %v9643_v25 = vpop.permute.xlu2 %6269  ;;  %v6453_v10 = vpack.i.bf16 %v6237_v13, %v1817_v17  ;;  %v6241_v20 = vunpack.i.l.bf16 %v9585_v8 }
 0x38c   : > { %6419 = vrot.lane.b32.xlu1 %v6418_v39, %s7936_s21  ;;  %v6061_v17 = vunpack.i.l.bf16 %v9344_v55 }
 0x38d   : > { %v9598_v24 = vpop.permute.xlu0 %6209  ;;  %v9600_v23 = vpop.permute.xlu1 %6244  ;;  %v1816_v0 = vsel %vm630_vm6, %v6197_v33, %v6236_v26  ;;  %v1845_v22 = vsel %vm663_vm7, %v6161_v41, %v6162_v59  ;;  %v1844_v21 = vsel %vm663_vm7, %v6097_v36, %v6161_v41 }
 0x38e   : > { %v6468_v48 = vpack.i.bf16 %v1844_v21, %v6097_v36  ;;  %v6121_v21 = vunpack.i.l.bf16 %v9392_v63 }
 0x393   : > { %6424 = vrot.lane.b32.xlu0 %v6423_v27, %s7936_s21  ;;  %v6413_v27 = vpack.i.bf16 %v1816_v0, %v6197_v33  ;;  %v6096_v0 = vunpack.i.l.bf16 %v9432_v57 }
 0x394   : > { %6434 = vrot.lane.b32.xlu1 %v6433_v9, %s7936_s21  ;;  %v6473_v9 = vpack.i.bf16 %v6162_v59, %v1845_v22 }
 0x395   : > { %v9608_v45 = vpop.permute.xlu0 %6214  ;;  %v9610_v11 = vpop.permute.xlu1 %6249  ;;  %v1843_v57 = vsel %vm663_vm7, %v6057_v38, %v6096_v0 }
 0x39c   : > { %6449 = vrot.lane.b32.xlu1 %v6448_v18, %s7936_s21  ;;  %v6202_v18 = vunpack.i.h.bf16 %v9564_v15 }
 0x39d   : > { %v6220_v54 = vpop.permute.xlu0 %6219  ;;  %v9618_v4 = vpop.permute.xlu1 %6254 }
 0x39e   : > { %v6222_v30 = vunpack.i.h.bf16 %v6220_v54  ;;  %v6221_v5 = vunpack.i.l.bf16 %v6220_v54  ;;  %v1782_v54 = vsel %vm593_vm5, %v6191_v14, %v6192_v62  ;;  %v6062_v14 = vunpack.i.h.bf16 %v9344_v55 }
 0x3a0   : > { %v1697_v53 = vsel %vm503_vm3, %v6221_v5, %v6222_v30  ;;  %v1696_v7 = vsel %vm503_vm3, %v6037_v60, %v6221_v5  ;;  %v6428_v5 = vpack.i.bf16 %v6192_v62, %v1782_v54  ;;  %v1874_v55 = vsel %vm696_vm8, %v6061_v17, %v6062_v14 }
 0x3a1   : > { %v6438_v32 = vpack.i.bf16 %v6222_v30, %v1697_v53  ;;  %v6398_v2 = vpack.i.bf16 %v1696_v7, %v1695_v49  ;;  %v1848_v30 = vsel %vm663_vm7, %v6202_v18, %v6241_v20  ;;  %v6227_v49 = vunpack.i.h.bf16 %v9554_v47  ;;  %v9665_v7 = vpop.permute.xlu2 %6284 }
 0x3a2   : > { %v6201_v53 = vunpack.i.l.bf16 %v9564_v15  ;;  %13481 = vst [vmem:[#allocation19_spill] sm:$0xff] %v9665_v7  ;;  %v6498_v36 = vpack.i.bf16 %v1874_v55, %v6061_v17 }
 0x3a3   : > { %6439 = vrot.lane.b32.xlu0 %v6438_v32, %s7936_s21  ;;  %6399 = vrot.lane.b32.xlu2 %v6398_v2, %s7936_s21  ;;  %v6488_v32 = vpack.i.bf16 %v1848_v30, %v6202_v18  ;;  %v6101_v2 = vunpack.i.l.bf16 %v9448_v29  ;;  %v1741_v15 = vsel %vm548_vm4, %v6226_v6, %v6227_v49  ;;  %v6463_v18 = vpack.i.bf16 %v6096_v0, %v1843_v57 }
 0x3a4   : > { %6459 = vrot.lane.b32.xlu1 %v6458_v50, %s7936_s21  ;;  %v1847_v26 = vsel %vm663_vm7, %v6122_v31, %v6201_v53  ;;  %v6443_v41 = vpack.i.bf16 %v6227_v49, %v1741_v15  ;;  %v6167_v30 = vunpack.i.h.bf16 %v9470_v37  ;;  %v6246_v49 = vunpack.i.l.bf16 %v9600_v23 }
 0x3a5   : > { %v9636_v34 = vpop.permute.xlu0 %1971  ;;  %v9638_v39 = vpop.permute.xlu1 %1976  ;;  %v1875_v59 = vsel %vm696_vm8, %v6062_v14, %v6101_v2  ;;  %v6483_v33 = vpack.i.bf16 %v6201_v53, %v1847_v26  ;;  %v1846_v53 = vsel %vm663_vm7, %v6121_v21, %v6122_v31  ;;  %v6242_v14 = vunpack.i.h.bf16 %v9585_v8 }
 0x3a6   : > { %13478 = vst [vmem:[#allocation16_spill] sm:$0xff] %v9636_v34  ;;  %v6503_v22 = vpack.i.bf16 %v6101_v2, %v1875_v59  ;;  %v6478_v2 = vpack.i.bf16 %v1846_v53, %v6121_v21  ;;  %v6171_v26 = vunpack.i.l.bf16 %v9487_v28  ;;  %v6207_v59 = vunpack.i.h.bf16 %v9583_v46 }
 0x3a7   : > { %13479 = vst [vmem:[#allocation18_spill] sm:$0xff] %v9638_v39  ;;  %v6107_v31 = vunpack.i.h.bf16 %v9468_v58  ;;  %v1849_v0 = vsel %vm663_vm7, %v6241_v20, %v6242_v14  ;;  %v6067_v8 = vunpack.i.h.bf16 %v9356_v19  ;;  %v6102_v20 = vunpack.i.h.bf16 %v9448_v29 }
 0x3a8   : > { %v6493_v55 = vpack.i.bf16 %v6242_v14, %v1849_v0  ;;  %v6132_v21 = vunpack.i.h.bf16 %v9425_v44  ;;  %v6131_v29 = vunpack.i.l.bf16 %v9425_v44  ;;  %v6072_v14 = vunpack.i.h.bf16 %v9363_v51 }
 0x3ab   : > { %6454 = vrot.lane.b32.xlu0 %v6453_v10, %s7936_s21  ;;  %6414 = vrot.lane.b32.xlu2 %v6413_v27, %s7936_s21  ;;  %v9684_v10 = vpop.permute.xlu2 %6299  ;;  %v6127_v27 = vunpack.i.h.bf16 %v9407_v35 }
 0x3ac   : > { %6474 = vrot.lane.b32.xlu1 %v6473_v9, %s7936_s21  ;;  %v6126_v9 = vunpack.i.l.bf16 %v9407_v35  ;;  %v6177_v35 = vunpack.i.h.bf16 %v9501_v56 }
 0x3ad   : > { %v9652_v52 = vpop.permute.xlu0 %6259  ;;  %v9654_v60 = vpop.permute.xlu1 %6264 }
 0x3ae   : > { %13480 = vst [vmem:[#allocation14_spill] sm:$0xff] %v9654_v60  ;;  %v1878_v62 = vsel %vm696_vm8, %v6126_v9, %v6127_v27 }
 0x3af   : > { %v6518_v54 = vpack.i.bf16 %v1878_v62, %v6126_v9  ;;  %v1908_v9 = vsel %vm729_vm9, %v6107_v31, %v6171_v26  ;;  %v6106_v62 = vunpack.i.l.bf16 %v9468_v58 }
 0x3b1   : > { %v1907_v58 = vsel %vm729_vm9, %v6067_v8, %v6106_v62 }
 0x3b3   : > { %6469 = vrot.lane.b32.xlu0 %v6468_v48, %s7936_s21  ;;  %6429 = vrot.lane.b32.xlu2 %v6428_v5, %s7936_s21  ;;  %v6166_v5 = vunpack.i.l.bf16 %v9470_v37  ;;  %v6247_v48 = vunpack.i.h.bf16 %v9600_v23  ;;  %v9709_v61 = vpop.permute.xlu2 %6314 }
 0x3b4   : > { %6489 = vrot.lane.b32.xlu1 %v6488_v32, %s7936_s21 }
 0x3b5   : > { %v9673_v50 = vpop.permute.xlu0 %6274  ;;  %v9675_v13 = vpop.permute.xlu1 %6279  ;;  %v1877_v37 = vsel %vm696_vm8, %v6166_v5, %v6167_v30  ;;  %v1881_v32 = vsel %vm696_vm8, %v6246_v49, %v6247_v48 }
 0x3b6   : > { %13482 = vst [vmem:[#allocation15_spill] sm:$0xff] %v9673_v50  ;;  %v6513_v23 = vpack.i.bf16 %v6167_v30, %v1877_v37  ;;  %v6533_v15 = vpack.i.bf16 %v6247_v48, %v1881_v32  ;;  %v1876_v48 = vsel %vm696_vm8, %v6102_v20, %v6166_v5  ;;  %v6543_v37 = vpack.i.bf16 %v6106_v62, %v1907_v58 }
 0x3b7   : > { %v6508_v32 = vpack.i.bf16 %v1876_v48, %v6102_v20  ;;  %v6252_v62 = vunpack.i.h.bf16 %v9610_v11 }
 0x3bb   : > { %6484 = vrot.lane.b32.xlu0 %v6483_v33, %s7936_s21  ;;  %6444 = vrot.lane.b32.xlu2 %v6443_v41, %s7936_s21 }
 0x3bc   : > { %6504 = vrot.lane.b32.xlu1 %v6503_v22, %s7936_s21  ;;  %v1880_v22 = vsel %vm696_vm8, %v6207_v59, %v6246_v49 }
 0x3bd   : > { %v9691_v47 = vpop.permute.xlu0 %6289  ;;  %v9693_v6 = vpop.permute.xlu1 %6294  ;;  %v6528_v57 = vpack.i.bf16 %v1880_v22, %v6207_v59  ;;  %v1910_v59 = vsel %vm729_vm9, %v6131_v29, %v6132_v21 }
 0x3be   : > { %v6558_v0 = vpack.i.bf16 %v1910_v59, %v6131_v29  ;;  %v6217_v29 = vunpack.i.h.bf16 %v9608_v45 }
 0x3c3   : > { %6499 = vrot.lane.b32.xlu0 %v6498_v36, %s7936_s21  ;;  %6464 = vrot.lane.b32.xlu2 %v6463_v18, %s7936_s21  ;;  %v6548_v36 = vpack.i.bf16 %v1908_v9, %v6107_v31  ;;  %v6211_v18 = vunpack.i.l.bf16 %v9598_v24 }
 0x3c4   : > { %6519 = vrot.lane.b32.xlu1 %v6518_v54, %s7936_s21 }
 0x3c5   : > { %v9712_v38 = vpop.permute.xlu0 %6309  ;;  %v9714_v63 = vpop.permute.xlu1 %6304  ;;  %v1911_v49 = vsel %vm729_vm9, %v6132_v21, %v6211_v18 }
 0x3c6   : > { %v9724_v41 = vpop.permute.xlu2 %6329 }
 0x3cb   : > { %6514 = vrot.lane.b32.xlu0 %v6513_v23, %s7936_s21  ;;  %6479 = vrot.lane.b32.xlu2 %v6478_v2, %s7936_s21  ;;  %v6206_v2 = vunpack.i.l.bf16 %v9583_v46  ;;  %v6563_v23 = vpack.i.bf16 %v6211_v18, %v1911_v49 }
 0x3cc   : > { %6534 = vrot.lane.b32.xlu1 %v6533_v15, %s7936_s21  ;;  %v6071_v15 = vunpack.i.l.bf16 %v9363_v51 }
 0x3cd   : > { %v9728_v33 = vpop.permute.xlu0 %6324  ;;  %v9730_v17 = vpop.permute.xlu1 %6319  ;;  %v1879_v44 = vsel %vm696_vm8, %v6127_v27, %v6206_v2  ;;  %v6176_v27 = vunpack.i.l.bf16 %v9501_v56  ;;  %v6172_v56 = vunpack.i.h.bf16 %v9487_v28  ;;  %v6137_v28 = vunpack.i.h.bf16 %v9436_v16 }
 0x3ce   : > { %v9754_v53 = vpop.permute.xlu2 %6344  ;;  %v1938_v31 = vsel %vm762_vm10, %v6071_v15, %v6072_v14  ;;  %v6523_v22 = vpack.i.bf16 %v6206_v2, %v1879_v44 }
 0x3d3   : > { %6529 = vrot.lane.b32.xlu0 %v6528_v57, %s7936_s21  ;;  %6494 = vrot.lane.b32.xlu2 %v6493_v55, %s7936_s21  ;;  %v6066_v55 = vunpack.i.l.bf16 %v9356_v19  ;;  %v6578_v57 = vpack.i.bf16 %v1938_v31, %v6071_v15 }
 0x3d4   : > { %6549 = vrot.lane.b32.xlu1 %v6548_v36, %s7936_s21  ;;  %v6251_v36 = vunpack.i.l.bf16 %v9610_v11  ;;  %v1941_v11 = vsel %vm762_vm10, %v6176_v27, %v6177_v35 }
 0x3d5   : > { %v9747_v54 = vpop.permute.xlu0 %6339  ;;  %v9749_v30 = vpop.permute.xlu1 %6334  ;;  %v1906_v20 = vsel %vm729_vm9, %v6066_v55, %v6067_v8  ;;  %v6593_v49 = vpack.i.bf16 %v6177_v35, %v1941_v11  ;;  %v6112_v8 = vunpack.i.h.bf16 %v9485_v42  ;;  %v5289_v11 = vld [vmem:[%s13096_s3 + $0x48] sm:$0xff] }
 0x3d6   : > { %v9774_v9 = vpop.permute.xlu2 %6364  ;;  %v1913_v19 = vsel %vm729_vm9, %v6251_v36, %v6252_v62  ;;  %v6538_v58 = vpack.i.bf16 %v1906_v20, %v6066_v55 }
 0x3d7   : > { %v6573_v48 = vpack.i.bf16 %v6252_v62, %v1913_v19  ;;  %v1940_v15 = vsel %vm762_vm10, %v6112_v8, %v6176_v27 }
 0x3db   : > { %6544 = vrot.lane.b32.xlu0 %v6543_v37, %s7936_s21  ;;  %6509 = vrot.lane.b32.xlu2 %v6508_v32, %s7936_s21  ;;  %v6256_v37 = vunpack.i.l.bf16 %v9618_v4 }
 0x3dc   : > { %6564 = vrot.lane.b32.xlu1 %v6563_v23, %s7936_s21  ;;  %v1909_v23 = vsel %vm729_vm9, %v6171_v26, %v6172_v56  ;;  %v6212_v26 = vunpack.i.h.bf16 %v9598_v24  ;;  %v6111_v24 = vunpack.i.l.bf16 %v9485_v42 }
 0x3dd   : > { %v9763_v5 = vpop.permute.xlu0 %6354  ;;  %v1944_v44 = vsel %vm762_vm10, %v6217_v29, %v6256_v37  ;;  %v6553_v31 = vpack.i.bf16 %v6172_v56, %v1909_v23  ;;  %v6332_v23 = vunpack.i.h.bf16 %v9724_v41 }
 0x3de   : > { %v9769_v46 = vpop.permute.xlu1 %6349  ;;  %v9793_v32 = vpop.permute.xlu2 %6379  ;;  %v6608_v55 = vpack.i.bf16 %v1944_v44, %v6217_v29  ;;  %v1912_v27 = vsel %vm729_vm9, %v6212_v26, %v6251_v36  ;;  %v1939_v42 = vsel %vm762_vm10, %v6072_v14, %v6111_v24  ;;  %v6136_v14 = vunpack.i.l.bf16 %v9436_v16 }
 0x3df   : > { %v6568_v19 = vpack.i.bf16 %v1912_v27, %v6212_v26 }
 0x3e3   : > { %6559 = vrot.lane.b32.xlu0 %v6558_v0, %s7936_s21  ;;  %6524 = vrot.lane.b32.xlu2 %v6523_v22, %s7936_s21  ;;  %v6588_v0 = vpack.i.bf16 %v1940_v15, %v6112_v8  ;;  %v6216_v22 = vunpack.i.l.bf16 %v9608_v45  ;;  %v6331_v15 = vunpack.i.l.bf16 %v9724_v41  ;;  %v13483_v41 = vunpack.i.h.bf16 %v9712_v38 }
 0x3e4   : > { %6579 = vrot.lane.b32.xlu1 %v6578_v57, %s7936_s21 }
 0x3e5   : > { %v9784_v18 = vpop.permute.xlu0 %6359  ;;  %v1943_v35 = vsel %vm762_vm10, %v6137_v28, %v6216_v22  ;;  %v2311_v27 = vsel %vm1095_vm11, %v6331_v15, %v6332_v23  ;;  %v5291_v15 = vld [vmem:[%s13096_s3 + $0x58] sm:$0xff] }
 0x3e6   : > { %v9788_v21 = vpop.permute.xlu1 %6369  ;;  %v9817_v57 = vpop.permute.xlu2 %6394  ;;  %v6603_v20 = vpack.i.bf16 %v6216_v22, %v1943_v35  ;;  %v13150_v22 = vunpack.i.h.bf16 %v9712_v38 }
 0x3e7   : > { %v6372_v36 = vunpack.i.h.bf16 %v9788_v21  ;;  %v6371_v56 = vunpack.i.l.bf16 %v9788_v21 }
 0x3e9   : > { %v2314_v51 = vsel %vm1095_vm11, %v6371_v56, %v6372_v36  ;;  %v13146_v56 = vunpack.i.h.bf16 %v9728_v33 }
 0x3eb   : > { %6574 = vrot.lane.b32.xlu0 %v6573_v48, %s7936_s21  ;;  %6539 = vrot.lane.b32.xlu2 %v6538_v58, %s7936_s21 }
 0x3ec   : > { %6594 = vrot.lane.b32.xlu1 %v6593_v49, %s7936_s21 }
 0x3ed   : > { %v9800_v2 = vpop.permute.xlu0 %6374 }
 0x3ee   : > { %v9806_v59 = vpop.permute.xlu1 %6384 }
 0x3f3   : > { %6589 = vrot.lane.b32.xlu0 %v6588_v0, %s7936_s21  ;;  %6554 = vrot.lane.b32.xlu2 %v6553_v31, %s7936_s21  ;;  %v5288_v31 = vld [vmem:[%s13096_s3 + $0x40] sm:$0xff]  ;;  %v6583_v0 = vpack.i.bf16 %v6111_v24, %v1939_v42 }
 0x3f4   : > { %6609 = vrot.lane.b32.xlu1 %v6608_v55, %s7936_s21  ;;  %v6311_v55 = vunpack.i.l.bf16 %v9712_v38  ;;  %v5290_v38 = vld [vmem:[%s13096_s3 + $0x50] sm:$0xff] }
 0x3f5   : > { %v9819_v62 = vpop.permute.xlu0 %6389 }
 0x3f6   : > { %v9823_v45 = vpop.permute.xlu1 %6404  ;;  %v2308_v24 = vsel %vm1095_vm11, %v6311_v55, %v13150_v22  ;;  %v6257_v55 = vunpack.i.h.bf16 %v9618_v4  ;;  %v13154_v22 = vunpack.i.l.bf16 %v9769_v46 }
 0x3f7   : > { %v13148_v26 = vunpack.i.h.bf16 %v9823_v45  ;;  %v6406_v35 = vunpack.i.l.bf16 %v9823_v45 }
 0x3f9   : > { %v2305_v42 = vsel %vm1095_vm11, %v6406_v35, %v13148_v26  ;;  %v13151_v26 = vunpack.i.l.bf16 %v9819_v62 }
 0x3fb   : > { %6604 = vrot.lane.b32.xlu0 %v6603_v20, %s7936_s21  ;;  %6569 = vrot.lane.b32.xlu2 %v6568_v19, %s7936_s21  ;;  %v13147_v19 = vunpack.i.h.bf16 %v9774_v9  ;;  %v2312_v21 = vsel %vm1095_vm11, %v6332_v23, %v13151_v26  ;;  %v2309_v23 = vsel %vm1095_vm11, %v13483_v41, %v13154_v22  ;;  %v6271_v26 = vunpack.i.l.bf16 %v9643_v25 }
 0x3fc   : > { %3146 = vperm.xlu1 %5626, %v5289_v11   ;;  %v6366_v11 = vunpack.i.l.bf16 %v9774_v9  ;;  %v6261_v41 = vunpack.i.l.bf16 %v9652_v52 }
 0x3fd   : > { %v9831_v58 = vpop.permute.xlu0 %6409  ;;  %v9833_v48 = vpop.permute.xlu2 %6399 }
 0x3fe   : > { %v6412_v49 = vunpack.i.h.bf16 %v9831_v58  ;;  %v6411_v8 = vunpack.i.l.bf16 %v9831_v58  ;;  %v9839_v29 = vpop.permute.xlu1 %6419  ;;  %v1942_v58 = vsel %vm762_vm10, %v6136_v14, %v6137_v28  ;;  %v2302_v28 = vsel %vm1095_vm11, %v6366_v11, %v13147_v19 }
 0x3ff   : > { %v6401_v35 = vunpack.i.l.bf16 %v9833_v48  ;;  %v6362_v11 = vunpack.i.h.bf16 %v9784_v18 }
 0x400   : > { %v2317_v44 = vsel %vm1095_vm11, %v6411_v8, %v6412_v49  ;;  %v6326_v8 = vunpack.i.l.bf16 %v9728_v33 }
 0x401   : > { %2500 = vmatpush.msra.mxu0 %v2317_v44  ;;  %v6598_v44 = vpack.i.bf16 %v1942_v58, %v6136_v14  ;;  %v6361_v58 = vunpack.i.l.bf16 %v9784_v18 }
 0x402   : > { %v2299_v14 = vsel %vm1095_vm11, %v6326_v8, %v13146_v56  ;;  %v6321_v56 = vunpack.i.l.bf16 %v9730_v17 }
 0x403   : > { %3141 = vperm.xlu0 %5625, %v5288_v31   ;;  %2501 = vmatpush.msra.mxu0 %v2314_v51  ;;  %v13149_v31 = vunpack.i.h.bf16 %v9714_v63  ;;  %v6402_v51 = vunpack.i.h.bf16 %v9833_v48 }
 0x404   : > { %6584 = vrot.lane.b32.xlu2 %v6583_v0, %s7936_s21  ;;  %v6306_v0 = vunpack.i.l.bf16 %v9714_v63 }
 0x405   : > { %v9862_v20 = vpop.permute.xlu2 %6414  ;;  %2502 = vmatpush.msra.mxu0 %v2311_v27  ;;  %v9892_v27 = vpop.permute.xlu0 %6424  ;;  %v2293_v19 = vsel %vm1095_vm11, %v6401_v35, %v6402_v51  ;;  %v6291_v35 = vunpack.i.l.bf16 %v9691_v47 }
 0x406   : > { %v9866_v16 = vpop.permute.xlu1 %6434 }
 0x407   : > { %2503 = vmatpush.msra.mxu0 %v2308_v24 }
 0x409   : > { %2504 = vmatpush.msra.mxu0 %v2305_v42 }
 0x40b   : > { %3156 = vperm.xlu0 %5625, %v5291_v15   ;;  %2505 = vmatpush.msra.mxu0 %v2302_v28  ;;  %v2296_v15 = vsel %vm1095_vm11, %v6306_v0, %v13149_v31  ;;  %v6301_v0 = vunpack.i.l.bf16 %v9684_v10  ;;  %v2290_v31 = vsel %vm1095_vm11, %v6361_v58, %v6362_v11 }
 0x40c   : > { %6599 = vrot.lane.b32.xlu2 %v6598_v44, %s7936_s21  ;;  %v1945_v44 = vsel %vm762_vm10, %v6256_v37, %v6257_v55  ;;  %v6302_v37 = vunpack.i.h.bf16 %v9684_v10 }
 0x40d   : > { %v9894_v24 = vpop.permute.xlu2 %6429  ;;  %2506 = vmatpush.msra.mxu0 %v2299_v14  ;;  %v6322_v14 = vunpack.i.h.bf16 %v9730_v17  ;;  %v13156_v17 = vunpack.i.l.bf16 %v9673_v50 }
 0x40e   : > { %v9898_v42 = vpop.permute.xlu1 %6449  ;;  %v13152_v8 = vunpack.i.l.bf16 %v9894_v24 }
 0x40f   : > { %v13166_v28 = vunpack.i.l.bf16 %v9898_v42  ;;  %2507 = vmatpush.msra.mxu0 %v2296_v15  ;;  %v6613_v15 = vpack.i.bf16 %v6257_v55, %v1945_v44  ;;  %v2287_v55 = vsel %vm1095_vm11, %v6321_v56, %v6322_v14  ;;  %v6281_v44 = vunpack.i.l.bf16 %v9675_v13 }
 0x410   : > { %v2284_v56 = vsel %vm1095_vm11, %v6301_v0, %v6302_v37  ;;  %v13484_v0 = vunpack.i.h.bf16 %v9823_v45  ;;  %v13163_v45 = vunpack.i.l.bf16 %v9754_v53 }
 0x411   : > { %2508 = vmatpush.msra.mxu0 %v2293_v19  ;;  %v2318_v4 = vsel %vm1095_vm11, %v6412_v49, %v13166_v28  ;;  %v2315_v19 = vsel %vm1095_vm11, %v6372_v36, %v13152_v8  ;;  %v6292_v49 = vunpack.i.h.bf16 %v9691_v47  ;;  %v6282_v36 = vunpack.i.h.bf16 %v9675_v13 }
 0x412   : > { %2587 = vmatpush.msrb.mxu2 %v2318_v4 }
 0x413   : > { %2509 = vmatpush.msra.mxu0 %v2290_v31  ;;  %v2281_v8 = vsel %vm1095_vm11, %v6291_v35, %v6292_v49  ;;  %v2278_v35 = vsel %vm1095_vm11, %v6281_v44, %v6282_v36  ;;  %v13486_v44 = vunpack.i.h.bf16 %v9728_v33  ;;  %v13160_v33 = vunpack.i.l.bf16 %v9793_v32 }
 0x414   : > { %6614 = vrot.lane.b32.xlu2 %v6613_v15, %s7936_s21  ;;  %2588 = vmatpush.msrb.mxu2 %v2315_v19  ;;  %v13165_v19 = vunpack.i.l.bf16 %v9892_v27 }
 0x415   : > { %v9934_v58 = vpop.permute.xlu0 %6439  ;;  %v9936_v31 = vpop.permute.xlu2 %6444  ;;  %2510 = vmatpush.msra.mxu0 %v2287_v55  ;;  %v6272_v55 = vunpack.i.h.bf16 %v9643_v25  ;;  %v6262_v25 = vunpack.i.h.bf16 %v9652_v52  ;;  %v2288_v48 = vsel %vm1095_vm11, %v6322_v14, %v13160_v33 }
 0x416   : > { %v13153_v4 = vunpack.i.l.bf16 %v9936_v31  ;;  %v9946_v15 = vpop.permute.xlu1 %6459  ;;  %2589 = vmatpush.msrb.mxu2 %v2312_v21  ;;  %v13162_v52 = vunpack.i.l.bf16 %v9934_v58 }
 0x417   : > { %2511 = vmatpush.msra.mxu0 %v2284_v56  ;;  %v13164_v56 = vunpack.i.l.bf16 %v9806_v59  ;;  %v2276_v47 = vsel %vm1095_vm11, %v6272_v55, %v13156_v17 }
 0x418   : > { %2590 = vmatpush.msrb.mxu2 %v2309_v23  ;;  %v2306_v21 = vsel %vm1095_vm11, %v13484_v0, %v13153_v4  ;;  %v2275_v0 = vsel %vm1095_vm11, %v6271_v26, %v6272_v55  ;;  %v2272_v26 = vsel %vm1095_vm11, %v6261_v41, %v6262_v25  ;;  %v2294_v41 = vsel %vm1095_vm11, %v6402_v51, %v13162_v52  ;;  %v10027_v51 = vld [vmem:[#allocation4 + $0x78] sm:$0xff] }
 0x419   : > { %2512 = vmatpush.msra.mxu0 %v2281_v8  ;;  %v13485_v8 = vunpack.i.h.bf16 %v9774_v9  ;;  %v9993_v9 = vld [vmem:[#allocation4 + $0x60] sm:$0xff]  ;;  %13489 = vst [vmem:[#allocation23_spill] sm:$0xff] %v10027_v51 }
 0x41a   : > { %2591 = vmatpush.msrb.mxu2 %v2306_v21  ;;  %v2300_v21 = vsel %vm1095_vm11, %v13486_v44, %v13164_v56  ;;  %13487 = vst [vmem:[#allocation22_spill] sm:$0xff] %v9993_v9  ;;  %v13158_v44 = vunpack.i.l.bf16 %v9693_v6 }
 0x41b   : > { %2513 = vmatpush.msra.mxu0 %v2278_v35  ;;  %v2303_v23 = vsel %vm1095_vm11, %v13485_v8, %v13165_v19  ;;  %v13488_v8 = vunpack.i.h.bf16 %v9714_v63 }
 0x41c   : > { %3151 = vperm.xlu2 %5627, %v5290_v38   ;;  %2592 = vmatpush.msrb.mxu2 %v2303_v23  ;;  %v13161_v38 = vunpack.i.l.bf16 %v9839_v29  ;;  %v2282_v14 = vsel %vm1095_vm11, %v6292_v49, %v13158_v44 }
 0x41d   : > { %v9984_v4 = vpop.permute.xlu0 %6454  ;;  %v9986_v22 = vpop.permute.xlu2 %6464  ;;  %2514 = vmatpush.msra.mxu0 %v2275_v0  ;;  %v2297_v23 = vsel %vm1095_vm11, %v13488_v8, %v13163_v45  ;;  %v13159_v0 = vunpack.i.l.bf16 %v9747_v54 }
 0x41e   : > { %v9995_v35 = vpop.permute.xlu1 %6474  ;;  %2593 = vmatpush.msrb.mxu2 %v2300_v21  ;;  %v2291_v63 = vsel %vm1095_vm11, %v6362_v11, %v13161_v38  ;;  %v13157_v11 = vunpack.i.l.bf16 %v9665_v7 }
 0x41f   : > { %2515 = vmatpush.msra.mxu0 %v2272_v26  ;;  %v2285_v18 = vsel %vm1095_vm11, %v6302_v37, %v13159_v0 }
 0x420   : > { %2516 = vmatmul.f32.vlgmr.msra.gmra.mxu0 %v9993_v9  ;;  %2594 = vmatpush.msrb.mxu2 %v2297_v23  ;;  %v13155_v23 = vunpack.i.l.bf16 %v9654_v60  ;;  %v2279_v10 = vsel %vm1095_vm11, %v6282_v36, %v13157_v11 }
 0x422   : > { %2595 = vmatpush.msrb.mxu2 %v2294_v41  ;;  %v2273_v13 = vsel %vm1095_vm11, %v6262_v25, %v13155_v23 }
 0x424   : > { %2596 = vmatpush.msrb.mxu2 %v2291_v63  ;;  %v10057_v63 = vld [vmem:[#allocation4 + $0x90] sm:$0xff] }
 0x425   : > { %v10018_v21 = vpop.permute.xlu0 %6469  ;;  %v10020_v26 = vpop.permute.xlu2 %6479  ;;  %13490 = vst [vmem:[#allocation25_spill] sm:$0xff] %v10057_v63 }
 0x426   : > { %v10029_v8 = vpop.permute.xlu1 %6489  ;;  %2597 = vmatpush.msrb.mxu2 %v2288_v48  ;;  %v6481_v7 = vunpack.i.l.bf16 %v10020_v26 }
 0x428   : > { %2519 = vmatmul.f32.gmra.mxu0 %v10027_v51  ;;  %2598 = vmatpush.msrb.mxu2 %v2285_v18  ;;  %v10070_v18 = vld [vmem:[#allocation4 + $0xa8] sm:$0xff] }
 0x429   : > { %13491 = vst [vmem:[#allocation7_spill] sm:$0xff] %v10070_v18 }
 0x42a   : > { %2599 = vmatpush.msrb.mxu2 %v2282_v14 }
 0x42c   : > { %2600 = vmatpush.msrb.mxu2 %v2279_v10 }
 0x42d   : > { %v10050_v37 = vpop.permute.xlu0 %6484  ;;  %v10052_v41 = vpop.permute.xlu2 %6494 }
 0x42e   : > { %v10059_v49 = vpop.permute.xlu1 %6504  ;;  %2601 = vmatpush.msrb.mxu2 %v2276_v47 }
 0x430   : > { %2522 = vmatmul.f32.gmra.mxu0 %v10057_v63  ;;  %2602 = vmatpush.msrb.mxu2 %v2273_v13 }
 0x431   : > { %2603 = vmatmul.f32.vlgmr.msrb.gmra.mxu2 %v9993_v9 }
 0x435   : > { %v10066_v36 = vpop.permute.xlu0 %6499  ;;  %v10068_v48 = vpop.permute.xlu2 %6509 }
 0x436   : > { %v10072_v55 = vpop.permute.xlu1 %6519 }
 0x438   : > { %2525 = vmatmul.f32.gmra.mxu0 %v10070_v18 }
 0x439   : > { %2606 = vmatmul.f32.gmra.mxu2 %v10027_v51 }
 0x43d   : > { %v10076_v14 = vpop.permute.xlu0 %6514  ;;  %v10078_v25 = vpop.permute.xlu2 %6524 }
 0x43e   : > { %v10080_v10 = vpop.permute.xlu1 %6534 }
 0x441   : > { %2609 = vmatmul.f32.gmra.mxu2 %v10057_v63 }
 0x445   : > { %v10083_v47 = vpop.permute.xlu0 %6529  ;;  %v10085_v13 = vpop.permute.xlu2 %6539 }
 0x446   : > { %v10087_v23 = vpop.permute.xlu1 %6549  ;;  %v6541_v39 = vunpack.i.l.bf16 %v10085_v13  ;;  %v6531_v3 = vunpack.i.l.bf16 %v10083_v47  ;;  %v13493_v9 = vunpack.i.h.bf16 %v10083_v47 }
 0x447   : > { %v6552_v28 = vunpack.i.h.bf16 %v10087_v23  ;;  %v6551_v40 = vunpack.i.l.bf16 %v10087_v23 }
 0x449   : > { %2612 = vmatmul.f32.gmra.mxu2 %v10070_v18  ;;  %v2359_v1 = vsel %vm1095_vm11, %v6551_v40, %v6552_v28  ;;  %v13492_v40 = vunpack.i.h.bf16 %v10085_v13 }
 0x44b   : > { %v2356_v23 = vsel %vm1095_vm11, %v6541_v39, %v13492_v40  ;;  %v6502_v39 = vunpack.i.h.bf16 %v10066_v36  ;;  %v6501_v40 = vunpack.i.l.bf16 %v10066_v36  ;;  %v6432_v36 = vunpack.i.h.bf16 %v9894_v24 }
 0x44d   : > { %v10090_v17 = vpop.permute.xlu0 %6544  ;;  %v10092_v11 = vpop.permute.xlu2 %6554 }
 0x44e   : > { %v6565_v44 = vpop.permute.xlu1 %6564 }
 0x44f   : > { %v6567_v51 = vunpack.i.h.bf16 %v6565_v44  ;;  %v6566_v43 = vunpack.i.l.bf16 %v6565_v44  ;;  %v6547_v44 = vunpack.i.h.bf16 %v10090_v17 }
 0x455   : > { %v6560_v0 = vpop.permute.xlu0 %6559  ;;  %v6570_v33 = vpop.permute.xlu2 %6569 }
 0x456   : > { %v6562_v38 = vunpack.i.h.bf16 %v6560_v0  ;;  %v6561_v52 = vunpack.i.l.bf16 %v6560_v0  ;;  %v6572_v45 = vunpack.i.h.bf16 %v6570_v33  ;;  %v6571_v56 = vunpack.i.l.bf16 %v6570_v33  ;;  %v10094_v19 = vpop.permute.xlu1 %6579 }
 0x458   : > { %v2365_v12 = vsel %vm1095_vm11, %v6571_v56, %v6572_v45  ;;  %v2362_v34 = vsel %vm1095_vm11, %v6561_v52, %v6562_v38  ;;  %v6557_v56 = vunpack.i.h.bf16 %v10092_v11 }
 0x459   : > { %2529 = vmatpush.msra.mxu1 %v2365_v12  ;;  %v6511_v12 = vunpack.i.l.bf16 %v10068_v48 }
 0x45b   : > { %2530 = vmatpush.msra.mxu1 %v2362_v34  ;;  %v6521_v34 = vunpack.i.l.bf16 %v10072_v55 }
 0x45d   : > { %v6575_v18 = vpop.permute.xlu0 %6574  ;;  %2531 = vmatpush.msra.mxu1 %v2359_v1  ;;  %v6556_v1 = vunpack.i.l.bf16 %v10092_v11  ;;  %v6492_v11 = vunpack.i.h.bf16 %v10029_v8 }
 0x45e   : > { %v6577_v52 = vunpack.i.h.bf16 %v6575_v18  ;;  %v6576_v0 = vunpack.i.l.bf16 %v6575_v18  ;;  %v10111_v63 = vpop.permute.xlu2 %6584  ;;  %v10113_v33 = vpop.permute.xlu1 %6594  ;;  %v2353_v18 = vsel %vm1095_vm11, %v6531_v3, %v13493_v9  ;;  %v13494_v3 = vunpack.i.h.bf16 %v10072_v55 }
 0x45f   : > { %2532 = vmatpush.msra.mxu1 %v2356_v23  ;;  %v6546_v23 = vunpack.i.l.bf16 %v10090_v17  ;;  %v2363_v9 = vsel %vm1095_vm11, %v6562_v38, %v6566_v43  ;;  %v13495_v17 = vunpack.i.h.bf16 %v10068_v48  ;;  %v2360_v38 = vsel %vm1095_vm11, %v6552_v28, %v6556_v1 }
 0x460   : > { %v2366_v60 = vsel %vm1095_vm11, %v6572_v45, %v6576_v0  ;;  %v2367_v50 = vsel %vm1095_vm11, %v6576_v0, %v6577_v52  ;;  %v2350_v45 = vsel %vm1095_vm11, %v6521_v34, %v13494_v3  ;;  %v6471_v0 = vunpack.i.l.bf16 %v10018_v21 }
 0x461   : > { %2533 = vmatpush.msra.mxu1 %v2353_v18  ;;  %2616 = vmatpush.msrb.mxu0 %v2366_v60  ;;  %v2364_v60 = vsel %vm1095_vm11, %v6566_v43, %v6567_v51  ;;  %v2347_v34 = vsel %vm1095_vm11, %v6511_v12, %v13495_v17  ;;  %v6537_v18 = vunpack.i.h.bf16 %v10080_v10  ;;  %v6536_v3 = vunpack.i.l.bf16 %v10080_v10 }
 0x462   : > { %2703 = vmatpush.msra.mxu2 %v2367_v50  ;;  %v6491_v50 = vunpack.i.l.bf16 %v10029_v8  ;;  %v2361_v43 = vsel %vm1095_vm11, %v6556_v1, %v6557_v56  ;;  %v2344_v51 = vsel %vm1095_vm11, %v6501_v40, %v6502_v39  ;;  %v6526_v12 = vunpack.i.l.bf16 %v10078_v25 }
 0x463   : > { %2534 = vmatpush.msra.mxu1 %v2350_v45  ;;  %2617 = vmatpush.msrb.mxu0 %v2363_v9  ;;  %v6527_v45 = vunpack.i.h.bf16 %v10078_v25  ;;  %v13496_v10 = vunpack.i.h.bf16 %v10085_v13  ;;  %v2358_v17 = vsel %vm1095_vm11, %v6546_v23, %v6547_v44  ;;  %v6517_v25 = vunpack.i.h.bf16 %v10076_v14 }
 0x464   : > { %2704 = vmatpush.msra.mxu2 %v2364_v60  ;;  %v2341_v13 = vsel %vm1095_vm11, %v6491_v50, %v6492_v11  ;;  %v13497_v44 = vunpack.i.h.bf16 %v10083_v47  ;;  %v6506_v50 = vunpack.i.l.bf16 %v10059_v49  ;;  %v13498_v47 = vunpack.i.h.bf16 %v10020_v26 }
 0x465   : > { %v10148_v52 = vpop.permute.xlu0 %6589  ;;  %2535 = vmatpush.msra.mxu1 %v2347_v34  ;;  %2618 = vmatpush.msrb.mxu0 %v2360_v38  ;;  %v2357_v60 = vsel %vm1095_vm11, %v13496_v10, %v6546_v23  ;;  %v6516_v38 = vunpack.i.l.bf16 %v10076_v14  ;;  %v13505_v8 = vunpack.i.l.bf16 %v9898_v42 }
 0x466   : > { %v10156_v9 = vpop.permute.xlu2 %6599  ;;  %2705 = vmatpush.msra.mxu2 %v2361_v43  ;;  %v10158_v28 = vpop.permute.xlu1 %6609  ;;  %v2354_v23 = vsel %vm1095_vm11, %v13497_v44, %v6536_v3  ;;  %v6592_v43 = vunpack.i.h.bf16 %v10148_v52  ;;  %v6591_v10 = vunpack.i.l.bf16 %v10148_v52  ;;  %v13499_v44 = vunpack.i.h.bf16 %v10072_v55 }
 0x467   : > { %v6602_v56 = vunpack.i.h.bf16 %v10156_v9  ;;  %v6601_v1 = vunpack.i.l.bf16 %v10156_v9  ;;  %v6612_v40 = vunpack.i.h.bf16 %v10158_v28  ;;  %v6611_v34 = vunpack.i.l.bf16 %v10158_v28  ;;  %2536 = vmatpush.msra.mxu1 %v2344_v51  ;;  %2619 = vmatpush.msrb.mxu0 %v2357_v60 }
 0x468   : > { %2706 = vmatpush.msra.mxu2 %v2358_v17  ;;  %v2355_v51 = vsel %vm1095_vm11, %v6536_v3, %v6537_v18  ;;  %v6507_v60 = vunpack.i.h.bf16 %v10059_v49  ;;  %v2338_v17 = vsel %vm1095_vm11, %v6481_v7, %v13498_v47  ;;  %v6582_v18 = vunpack.i.h.bf16 %v10094_v19 }
 0x469   : > { %2537 = vmatpush.msra.mxu1 %v2341_v13  ;;  %2620 = vmatpush.msrb.mxu0 %v2354_v23  ;;  %v2377_v14 = vsel %vm1095_vm11, %v6611_v34, %v6612_v40  ;;  %v2351_v13 = vsel %vm1095_vm11, %v13499_v44, %v6526_v12  ;;  %v6581_v3 = vunpack.i.l.bf16 %v10094_v19  ;;  %v2352_v34 = vsel %vm1095_vm11, %v6526_v12, %v6527_v45  ;;  %v1955_v19 = vld [vmem:[#allocation4 + $0xa0] sm:$0xff] }
 0x46a   : > { %2707 = vmatpush.msra.mxu2 %v2355_v51  ;;  %2570 = vmatpush.msra.mxu3 %v2377_v14  ;;  %v2374_v49 = vsel %vm1095_vm11, %v6601_v1, %v6602_v56  ;;  %v6416_v23 = vunpack.i.l.bf16 %v9862_v20  ;;  %v6496_v7 = vunpack.i.l.bf16 %v10052_v41  ;;  %v13500_v55 = vunpack.i.h.bf16 %v10018_v21 }
 0x46b   : > { %2538 = vmatpush.msra.mxu1 %v2338_v17  ;;  %2621 = vmatpush.msrb.mxu0 %v2351_v13  ;;  %v13501_v14 = vunpack.i.h.bf16 %v10068_v48  ;;  %v6377_v45 = vunpack.i.h.bf16 %v9800_v2  ;;  %v6497_v12 = vunpack.i.h.bf16 %v10052_v41  ;;  %v2349_v1 = vsel %vm1095_vm11, %v6516_v38, %v6517_v25 }
 0x46c   : > { %2708 = vmatpush.msra.mxu2 %v2352_v34  ;;  %v2335_v51 = vsel %vm1095_vm11, %v6471_v0, %v13500_v55  ;;  %2571 = vmatpush.msra.mxu3 %v2374_v49  ;;  %v2371_v17 = vsel %vm1095_vm11, %v6591_v10, %v6592_v43  ;;  %v6376_v44 = vunpack.i.l.bf16 %v9800_v2  ;;  %v6452_v0 = vunpack.i.h.bf16 %v9898_v42  ;;  %v10226_v55 = vld [vmem:[#allocation4 + $0x70] sm:$0xff] }
 0x46d   : > { %v2348_v47 = vsel %vm1095_vm11, %v13501_v14, %v6516_v38  ;;  %2539 = vmatpush.msra.mxu1 %v2335_v51  ;;  %v13502_v48 = vunpack.i.h.bf16 %v9946_v15  ;;  %v13503_v13 = vunpack.i.l.bf16 %v9946_v15  ;;  %v2345_v41 = vsel %vm1095_vm11, %v6502_v39, %v6506_v50 }
 0x46e   : > { %2622 = vmatpush.msrb.mxu0 %v2348_v47  ;;  %2709 = vmatpush.msra.mxu2 %v2349_v1  ;;  %v6487_v25 = vunpack.i.h.bf16 %v10050_v37  ;;  %v6486_v38 = vunpack.i.l.bf16 %v10050_v37  ;;  %v2346_v10 = vsel %vm1095_vm11, %v6506_v50, %v6507_v60  ;;  %v2368_v49 = vsel %vm1095_vm11, %v6581_v3, %v6582_v18 }
 0x46f   : > { %v2332_v34 = vsel %vm1095_vm11, %v13503_v13, %v13502_v48  ;;  %2572 = vmatpush.msra.mxu3 %v2371_v17  ;;  %v6336_v51 = vunpack.i.l.bf16 %v9749_v30  ;;  %v13504_v39 = vunpack.i.h.bf16 %v9862_v20  ;;  %v2342_v37 = vsel %vm1095_vm11, %v6492_v11, %v6496_v7 }
 0x470   : > { %2540 = vmatpush.msra.mxu1 %v2332_v34  ;;  %2623 = vmatpush.msrb.mxu0 %v2345_v41  ;;  %v6317_v60 = vunpack.i.h.bf16 %v9709_v61  ;;  %v6477_v50 = vunpack.i.h.bf16 %v9995_v35  ;;  %v6476_v3 = vunpack.i.l.bf16 %v9995_v35  ;;  %v2343_v47 = vsel %vm1095_vm11, %v6496_v7, %v6497_v12  ;;  %v10259_v41 = vpop.permute.xlu0 %6604 }
 0x471   : > { %2710 = vmatpush.msra.mxu2 %v2346_v10  ;;  %v2329_v14 = vsel %vm1095_vm11, %v6416_v23, %v13504_v39  ;;  %2573 = vmatpush.msra.mxu3 %v2368_v49  ;;  %v6316_v1 = vunpack.i.l.bf16 %v9709_v61  ;;  %v6392_v17 = vunpack.i.h.bf16 %v9819_v62  ;;  %v10242_v23 = vpop.permute.xlu2 %6614  ;;  %v2319_v11 = vsel %vm1095_vm11, %v13505_v8, %v6452_v0 }
 0x472   : > { %2541 = vmatpush.msra.mxu1 %v2329_v14  ;;  %2624 = vmatpush.msrb.mxu0 %v2342_v37  ;;  %v2326_v35 = vsel %vm1095_vm11, %v6376_v44, %v6377_v45  ;;  %v6467_v7 = vunpack.i.h.bf16 %v9986_v22  ;;  %v6466_v12 = vunpack.i.l.bf16 %v9986_v22  ;;  %v13506_v48 = vunpack.i.h.bf16 %v10020_v26  ;;  %v10280_v37 = vld [vmem:[#allocation4 + $0x68] sm:$0xff] }
 0x473   : > { %2711 = vmatpush.msra.mxu2 %v2343_v47  ;;  %5276 = vmatmul.msk.f32.vlgmr.msra.gmra.mxu3 %vm1312_vm12, %v10226_v55  ;;  %v2340_v34 = vsel %vm1095_vm11, %v6486_v38, %v6487_v25  ;;  %v6352_v42 = vunpack.i.h.bf16 %v9769_v46  ;;  %v13507_v44 = vunpack.i.l.bf16 %v9894_v24  ;;  %v13508_v22 = vunpack.i.h.bf16 %v9749_v30 }
 0x474   : > { %2674 = vmatpush.msrb.mxu3 %v2319_v11  ;;  %2542 = vmatpush.msra.mxu1 %v2326_v35  ;;  %v2339_v13 = vsel %vm1095_vm11, %v13506_v48, %v6486_v38  ;;  %v6456_v26 = vunpack.i.l.bf16 %v9984_v4  ;;  %v6616_v49 = vunpack.i.l.bf16 %v10242_v23  ;;  %v13509_v25 = vunpack.i.h.bf16 %v10018_v21  ;;  %v10293_v11 = vld [vmem:[#allocation4 + $0x88] sm:$0xff] }
 0x475   : > { %2625 = vmatpush.msrb.mxu0 %v2339_v13  ;;  %2712 = vmatpush.msra.mxu2 %v2340_v34  ;;  %v2316_v0 = vsel %vm1095_vm11, %v13507_v44, %v6432_v36  ;;  %v2323_v10 = vsel %vm1095_vm11, %v6336_v51, %v13508_v22  ;;  %v2337_v39 = vsel %vm1095_vm11, %v6476_v3, %v6477_v50  ;;  %v6457_v24 = vunpack.i.h.bf16 %v9984_v4 }
 0x476   : > { %2675 = vmatpush.msrb.mxu3 %v2316_v0  ;;  %2543 = vmatpush.msra.mxu1 %v2323_v10  ;;  %v2336_v38 = vsel %vm1095_vm11, %v13509_v25, %v6476_v3  ;;  %v13510_v36 = vunpack.i.l.bf16 %v9819_v62  ;;  %v2320_v14 = vsel %vm1095_vm11, %v6316_v1, %v6317_v60  ;;  %v6447_v21 = vunpack.i.h.bf16 %v9936_v31  ;;  %v1951_v25 = vld [vmem:[#allocation4 + $0x80] sm:$0xff] }
 0x477   : > { %2626 = vmatpush.msrb.mxu0 %v2336_v38  ;;  %2713 = vmatpush.msra.mxu2 %v2337_v39  ;;  %v6606_v47 = vunpack.i.l.bf16 %v10259_v41  ;;  %v13511_v4 = vunpack.i.h.bf16 %v9946_v15  ;;  %v2334_v62 = vsel %vm1095_vm11, %v6466_v12, %v6467_v7  ;;  %v6437_v3 = vunpack.i.h.bf16 %v9866_v16 }
 0x478   : > { %v2313_v51 = vsel %vm1095_vm11, %v13510_v36, %v6392_v17  ;;  %2544 = vmatpush.msra.mxu1 %v2320_v14  ;;  %v6436_v17 = vunpack.i.l.bf16 %v9866_v16  ;;  %v13512_v1 = vunpack.i.l.bf16 %v9769_v46  ;;  %v6427_v35 = vunpack.i.h.bf16 %v9892_v27 }
 0x479   : > { %2676 = vmatpush.msrb.mxu3 %v2313_v51  ;;  %v2333_v50 = vsel %vm1095_vm11, %v13511_v4, %v6466_v12  ;;  %2714 = vmatpush.msra.mxu2 %v2334_v62  ;;  %v2378_v15 = vsel %vm1095_vm11, %v6612_v40, %v6616_v49  ;;  %v13513_v16 = vunpack.i.h.bf16 %v9862_v20  ;;  %v6397_v46 = vunpack.i.h.bf16 %v9817_v57  ;;  %v1958_v62 = vld [vmem:[#allocation4 + $0xb8] sm:$0xff] }
 0x47a   : > { %2627 = vmatpush.msrb.mxu0 %v2333_v50  ;;  %v2310_v8 = vsel %vm1095_vm11, %v13512_v1, %v6352_v42  ;;  %2545 = vmatmul.f32.vlgmr.msra.gmra.mxu1 %v10280_v37  ;;  %v6396_v12 = vunpack.i.l.bf16 %v9817_v57  ;;  %v6387_v48 = vunpack.i.h.bf16 %v9806_v59  ;;  %v2331_v13 = vsel %vm1095_vm11, %v6456_v26, %v6457_v24 }
 0x47b   : > { %2677 = vmatpush.msrb.mxu3 %v2310_v8  ;;  %v2330_v7 = vsel %vm1095_vm11, %v13513_v16, %v6456_v26  ;;  %2657 = vmatpush.msrb.mxu1 %v2378_v15  ;;  %v6586_v34 = vunpack.i.l.bf16 %v10111_v63  ;;  %v6596_v28 = vunpack.i.l.bf16 %v10113_v33  ;;  %v2375_v57 = vsel %vm1095_vm11, %v6602_v56, %v6606_v47  ;;  %v13524_v8 = vld [vmem:[#allocation15_spill] sm:$0xff]  ;;  %v13526_v16 = vld [vmem:[#allocation14_spill] sm:$0xff] }
 0x47c   : > { %2628 = vmatpush.msrb.mxu0 %v2330_v7  ;;  %2715 = vmatpush.msra.mxu2 %v2331_v13  ;;  %v13514_v20 = vunpack.i.l.bf16 %v9936_v31  ;;  %v6357_v42 = vunpack.i.h.bf16 %v9763_v5  ;;  %v6356_v44 = vunpack.i.l.bf16 %v9763_v5  ;;  %v2327_v0 = vsel %vm1095_vm11, %v6377_v45, %v6436_v17 }
 0x47d   : > { %5277 = vmatmul.msk.f32.gmra.mxu3 %vm1312_vm12, %v10293_v11  ;;  %2658 = vmatpush.msrb.mxu1 %v2375_v57  ;;  %v2328_v22 = vsel %vm1095_vm11, %v6436_v17, %v6437_v3  ;;  %v2372_v31 = vsel %vm1095_vm11, %v6592_v43, %v6596_v28  ;;  %v13515_v9 = vunpack.i.l.bf16 %v9892_v27  ;;  %v6347_v5 = vunpack.i.h.bf16 %v9754_v53  ;;  %v13522_v3 = vld [vmem:[#allocation19_spill] sm:$0xff] }
 0x47e   : > { %v2307_v40 = vsel %vm1095_vm11, %v13514_v20, %v6447_v21  ;;  %2629 = vmatpush.msrb.mxu0 %v2327_v0  ;;  %2716 = vmatpush.msra.mxu2 %v2328_v22  ;;  %v6617_v10 = vunpack.i.h.bf16 %v10242_v23  ;;  %v13516_v2 = vunpack.i.h.bf16 %v9749_v30  ;;  %v2325_v26 = vsel %vm1095_vm11, %v6396_v12, %v6397_v46  ;;  %v13531_v57 = vld [vmem:[#allocation23_spill] sm:$0xff]  ;;  %v13532_v20 = vld [vmem:[#allocation25_spill] sm:$0xff] }
 0x47f   : > { %2678 = vmatpush.msrb.mxu3 %v2307_v40  ;;  %v2304_v56 = vsel %vm1095_vm11, %v13515_v9, %v6427_v35  ;;  %2659 = vmatpush.msrb.mxu1 %v2372_v31  ;;  %v2369_v27 = vsel %vm1095_vm11, %v6582_v18, %v6586_v34  ;;  %v13517_v52 = vunpack.i.l.bf16 %v9806_v59  ;;  %v6442_v38 = vunpack.i.h.bf16 %v9934_v58  ;;  %v13533_v40 = vld [vmem:[#allocation7_spill] sm:$0xff] }
 0x480   : > { %v2324_v45 = vsel %vm1095_vm11, %v13516_v2, %v6396_v12  ;;  %2717 = vmatpush.msra.mxu2 %v2325_v26  ;;  %v6607_v39 = vunpack.i.h.bf16 %v10259_v41  ;;  %v2321_v30 = vsel %vm1095_vm11, %v6317_v60, %v6356_v44  ;;  %v2322_v24 = vsel %vm1095_vm11, %v6356_v44, %v6357_v42  ;;  %v13535_v26 = vld [vmem:[#allocation13_spill] sm:$0xff] }
 0x481   : > { %2679 = vmatpush.msrb.mxu3 %v2304_v56  ;;  %2630 = vmatpush.msrb.mxu0 %v2324_v45  ;;  %v2301_v43 = vsel %vm1095_vm11, %v13517_v52, %v6387_v48  ;;  %v6422_v59 = vunpack.i.h.bf16 %v9839_v29  ;;  %v6597_v18 = vunpack.i.h.bf16 %v10113_v33  ;;  %v13518_v36 = vunpack.i.l.bf16 %v9754_v53  ;;  %v13536_v52 = vld [vmem:[#allocation16_spill] sm:$0xff] }
 0x482   : > { %2660 = vmatpush.msrb.mxu1 %v2369_v27  ;;  %2718 = vmatpush.msra.mxu2 %v2322_v24  ;;  %v2379_v61 = vsel %vm1095_vm11, %v6616_v49, %v6617_v10  ;;  %v6382_v60 = vunpack.i.h.bf16 %v9793_v32  ;;  %v6587_v14 = vunpack.i.h.bf16 %v10111_v63  ;;  %v13519_v33 = vunpack.i.l.bf16 %v9934_v58  ;;  %v1954_v58 = vld [vmem:[#allocation4 + $0x98] sm:$0xff] }
 0x483   : > { %2680 = vmatpush.msrb.mxu3 %v2301_v43  ;;  %2631 = vmatpush.msrb.mxu0 %v2321_v30  ;;  %v2298_v51 = vsel %vm1095_vm11, %v13518_v36, %v6347_v5  ;;  %v2376_v53 = vsel %vm1095_vm11, %v6606_v47, %v6607_v39  ;;  %v6342_v23 = vunpack.i.h.bf16 %v9747_v54  ;;  %v13520_v49 = vunpack.i.l.bf16 %v9839_v29  ;;  %v7879_v30 = vld [vmem:[#allocation2 + $0x40] sm:$0xff] }
 0x484   : > { %2548 = vmatmul.f32.gmra.mxu1 %v1951_v25  ;;  %2632 = vmatmul.f32.vlgmr.msrb.gmra.mxu0 %v10280_v37  ;;  %v2295_v21 = vsel %vm1095_vm11, %v13519_v33, %v6442_v38  ;;  %v2373_v4 = vsel %vm1095_vm11, %v6596_v28, %v6597_v18  ;;  %v6297_v50 = vunpack.i.h.bf16 %v9693_v6  ;;  %v13521_v41 = vunpack.i.l.bf16 %v9793_v32  ;;  %v13530_v28 = vld [vmem:[#allocation22_spill] sm:$0xff] }
 0x485   : > { %2681 = vmatpush.msrb.mxu3 %v2298_v51  ;;  %2744 = vmatpush.msra.mxu0 %v2379_v61  ;;  %v2292_v63 = vsel %vm1095_vm11, %v13520_v49, %v6422_v59  ;;  %v6287_v29 = vunpack.i.h.bf16 %v13522_v3  ;;  %v13523_v17 = vunpack.i.l.bf16 %v9747_v54  ;;  %v6277_v35 = vunpack.i.h.bf16 %v13524_v8  ;;  %v1957_v54 = vld [vmem:[#allocation4 + $0xb0] sm:$0xff]  ;;  %v13537_v51 = vld [vmem:[#allocation18_spill] sm:$0xff] }
 0x486   : > { %5278 = vmatmul.msk.f32.gmra.mxu3 %vm1312_vm12, %v1955_v19  ;;  %2719 = vmatmul.f32.vlgmr.msra.gmra.mxu2 %v10280_v37  ;;  %v2289_v47 = vsel %vm1095_vm11, %v13521_v41, %v6382_v60  ;;  %v2370_v37 = vsel %vm1095_vm11, %v6586_v34, %v6587_v14  ;;  %v13525_v32 = vunpack.i.l.bf16 %v9693_v6  ;;  %v6267_v7 = vunpack.i.h.bf16 %v13526_v16 }
 0x487   : > { %2682 = vmatpush.msrb.mxu3 %v2295_v21  ;;  %2745 = vmatpush.msra.mxu0 %v2376_v53  ;;  %v2286_v1 = vsel %vm1095_vm11, %v13523_v17, %v6342_v23  ;;  %v13527_v46 = vunpack.i.l.bf16 %v13522_v3  ;;  %v13528_v48 = vunpack.i.l.bf16 %v13524_v8  ;;  %v13529_v6 = vunpack.i.l.bf16 %v13526_v16 }
 0x488   : > { %v2283_v15 = vsel %vm1095_vm11, %v13525_v32, %v6297_v50 }
 0x489   : > { %2683 = vmatpush.msrb.mxu3 %v2292_v63  ;;  %2746 = vmatpush.msra.mxu0 %v2373_v4  ;;  %v2280_v12 = vsel %vm1095_vm11, %v13527_v46, %v6287_v29  ;;  %v2277_v13 = vsel %vm1095_vm11, %v13528_v48, %v6277_v35  ;;  %v2274_v34 = vsel %vm1095_vm11, %v13529_v6, %v6267_v7  ;;  %v13538_v4 = vld [vmem:[#allocation20_spill] sm:$0xff] }
 0x48a   : > { %v13539_v6 = vld [vmem:[#allocation24_spill] sm:$0xff] }
 0x48b   : > { %2684 = vmatpush.msrb.mxu3 %v2289_v47  ;;  %2747 = vmatpush.msra.mxu0 %v2370_v37 }
 0x48c   : > { %2551 = vmatmul.f32.gmra.mxu1 %v1954_v58  ;;  %2635 = vmatmul.f32.gmra.mxu0 %v1951_v25 }
 0x48d   : > { %2685 = vmatpush.msrb.mxu3 %v2286_v1 }
 0x48e   : > { %5279 = vmatmul.msk.f32.gmra.mxu3 %vm1312_vm12, %v1958_v62  ;;  %2722 = vmatmul.f32.gmra.mxu2 %v1951_v25 }
 0x48f   : > { %2686 = vmatpush.msrb.mxu3 %v2283_v15 }
 0x491   : > { %2687 = vmatpush.msrb.mxu3 %v2280_v12 }
 0x493   : > { %2688 = vmatpush.msrb.mxu3 %v2277_v13 }
 0x494   : > { %2554 = vmatmul.f32.gmra.mxu1 %v1957_v54  ;;  %2638 = vmatmul.f32.gmra.mxu0 %v1954_v58 }
 0x495   : > { %2689 = vmatpush.msrb.mxu3 %v2274_v34 }
 0x496   : > { %2690 = vmatmul.f32.vlgmr.msrb.gmra.mxu3 %v13530_v28  ;;  %2725 = vmatmul.f32.gmra.mxu2 %v1954_v58 }
 0x49c   : > { %2641 = vmatmul.f32.gmra.mxu0 %v1957_v54  ;;  %5280 = vmatmul.msk.f32.vlgmr.msrb.gmra.mxu1 %vm1312_vm12, %v10226_v55 }
 0x49d   : > { %v2517_v42 = vpop.f32.mrf.mxu0 }
 0x49e   : > { %2693 = vmatmul.f32.gmra.mxu3 %v13531_v57  ;;  %2728 = vmatmul.f32.gmra.mxu2 %v1957_v54 }
 0x4a4   : > { %5281 = vmatmul.msk.f32.gmra.mxu1 %vm1312_vm12, %v10293_v11  ;;  %5284 = vmatmul.msk.f32.vlgmr.msra.gmra.mxu0 %vm1312_vm12, %v10226_v55  ;;  %v13534_v55 = vld [vmem:[#allocation21_spill] sm:$0xff] }
 0x4a5   : > { %v2520_v44 = vpop.f32.mrf.mxu0  ;;  %v2518_v31 = vadd.f32 %v2517_v42, %v13534_v55 }
 0x4a6   : > { %2696 = vmatmul.f32.gmra.mxu3 %v13532_v20  ;;  %v2521_v43 = vadd.f32 %v2520_v44, %v13536_v52 }
 0x4ac   : > { %5282 = vmatmul.msk.f32.gmra.mxu1 %vm1312_vm12, %v1955_v19  ;;  %5285 = vmatmul.msk.f32.gmra.mxu0 %vm1312_vm12, %v10293_v11 }
 0x4ad   : > { %v2523_v0 = vpop.f32.mrf.mxu0 }
 0x4ae   : > { %2699 = vmatmul.f32.gmra.mxu3 %v13533_v40  ;;  %v2524_v61 = vadd.f32 %v2523_v0, %v13537_v51 }
 0x4b4   : > { %5283 = vmatmul.msk.f32.gmra.mxu1 %vm1312_vm12, %v1958_v62  ;;  %5286 = vmatmul.msk.f32.gmra.mxu0 %vm1312_vm12, %v1955_v19  ;;  %v2604_v22 = vpop.f32.mrf.mxu2 }
 0x4b5   : > { %v2526_v5 = vpop.f32.mrf.mxu0  ;;  %v2605_v1 = vadd.f32 %v2604_v22, %v13534_v55 }
 0x4b6   : > { %v2527_v58 = vadd.f32 %v2526_v5, %v13538_v4 }
 0x4bc   : > { %5287 = vmatmul.msk.f32.gmra.mxu0 %vm1312_vm12, %v1958_v62  ;;  %v2607_v11 = vpop.f32.mrf.mxu2 }
 0x4bd   : > { %v2608_v13 = vadd.f32 %v2607_v11, %v13536_v52 }
 0x4c4   : > { %v2610_v18 = vpop.f32.mrf.mxu2 }
 0x4c5   : > { %v2611_v5 = vadd.f32 %v2610_v18, %v13537_v51 }
 0x4cc   : > { %v2613_v50 = vpop.f32.mrf.mxu2 }
 0x4f6   : > { %v2575_v9 = vpop.f32.mrf.mxu3 }
 0x4f7   : > { %v2546_v56 = vpop.f32.mrf.mxu1 }
 0x4f8   : > { %v2547_v10 = vadd.f32 %v2546_v56, %v2518_v31 }
 0x4fa   : > { %v2576_v2 = vadd.f32 %v2575_v9, %v2547_v10 }
 0x4fc   : > { %v2761_v45 = vmax.f32 %v2576_v2, 0.0  ;;  %v13540_v2 = vld [vmem:[#allocation17_spill] sm:$0xff] }
 0x4fe   : > { %v10417_v27 = vmul.f32 %v13535_v26, %v2761_v45 }
 0x500   : > { %v2578_v25 = vpop.f32.mrf.mxu3  ;;  %2785 = vst [vmem:[#allocation2 + $0x8] sm:$0xff] %v10417_v27  ;;  %v6628_v24 = vpack.i.bf16 %v10417_v27, %v7879_v30 }
 0x501   : > { %v2549_v38 = vpop.f32.mrf.mxu1  ;;  %v2633_v39 = vpop.f32.mrf.mxu0 }
 0x502   : > { %v2550_v19 = vadd.f32 %v2549_v38, %v2521_v43  ;;  %6629 = vrot.lane.b32.xlu1 %v6628_v24, %s7929_s8  ;;  %6624 = vrot.lane.b32.xlu2 %v6628_v24, %s7928_s7  ;;  %v2634_v35 = vadd.f32 %v2633_v39, %v2605_v1 }
 0x503   : > { %6619 = vrot.lane.b32.xlu0 %v6628_v24, %s7927_s27 }
 0x504   : > { %v2579_v59 = vadd.f32 %v2578_v25, %v2550_v19 }
 0x506   : > { %v2764_v36 = vmax.f32 %v2579_v59, 0.0 }
 0x508   : > { %v10427_v60 = vmul.f32 %v13535_v26, %v2764_v36 }
 0x509   : > { %v2552_v14 = vpop.f32.mrf.mxu1  ;;  %v2581_v33 = vpop.f32.mrf.mxu3 }
 0x50a   : > { %v2553_v21 = vadd.f32 %v2552_v14, %v2524_v61  ;;  %v2636_v53 = vpop.f32.mrf.mxu0  ;;  %v6638_v23 = vpack.i.bf16 %v10427_v60, %v7879_v30  ;;  %6634 = vrot.lane.b32.xlu1 %v6628_v24, %s7936_s21  ;;  %v2720_v15 = vpop.f32.mrf.mxu2  ;;  %v2614_v61 = vadd.f32 %v2613_v50, %v13538_v4 }
 0x50b   : > { %v2637_v28 = vadd.f32 %v2636_v53, %v2608_v13  ;;  %v10513_v13 = vpop.permute.xlu1 %3146 }
 0x50c   : > { %v2582_v49 = vadd.f32 %v2581_v33, %v2553_v21  ;;  %6639 = vrot.lane.b32.xlu2 %v6638_v23, %s7927_s27  ;;  %6649 = vrot.lane.b32.xlu0 %v6638_v23, %s7929_s8  ;;  %13543 = vst [vmem:[#allocation9_spill] sm:$0xff] %v10513_v13 }
 0x50e   : > { %v2767_v63 = vmax.f32 %v2582_v49, 0.0 }
 0x510   : > { %v10435_v41 = vmul.f32 %v13535_v26, %v2767_v63 }
 0x511   : > { %v2555_v47 = vpop.f32.mrf.mxu1  ;;  %v2584_v37 = vpop.f32.mrf.mxu3 }
 0x512   : > { %v2556_v62 = vadd.f32 %v2555_v47, %v2527_v58  ;;  %v2639_v3 = vpop.f32.mrf.mxu0  ;;  %v6668_v29 = vpack.i.bf16 %v10435_v41, %v7879_v30  ;;  %6644 = vrot.lane.b32.xlu1 %v6638_v23, %s7928_s7  ;;  %v2723_v22 = vpop.f32.mrf.mxu2 }
 0x513   : > { %v2640_v45 = vadd.f32 %v2639_v3, %v2611_v5 }
 0x514   : > { %v2585_v17 = vadd.f32 %v2584_v37, %v2556_v62  ;;  %6669 = vrot.lane.b32.xlu2 %v6668_v29, %s7929_s8  ;;  %6654 = vrot.lane.b32.xlu0 %v6638_v23, %s7936_s21 }
 0x516   : > { %v2770_v8 = vmax.f32 %v2585_v17, 0.0 }
 0x518   : > { %v10443_v32 = vmul.f32 %v13535_v26, %v2770_v8 }
 0x519   : > { %v2662_v16 = vpop.f32.mrf.mxu1  ;;  %v2691_v7 = vpop.f32.mrf.mxu3 }
 0x51a   : > { %v2642_v46 = vpop.f32.mrf.mxu0  ;;  %v2663_v12 = vadd.f32 %v2662_v16, %v2634_v35  ;;  %6659 = vrot.lane.b32.xlu1 %v6668_v29, %s7927_s27  ;;  %v2692_v48 = vadd.f32 %v2691_v7, %v13534_v55  ;;  %v6688_v42 = vpack.i.bf16 %v10443_v32, %v7879_v30  ;;  %v2726_v59 = vpop.f32.mrf.mxu2 }
 0x51b   : > { %v2643_v21 = vadd.f32 %v2642_v46, %v2614_v61 }
 0x51c   : > { %v2762_v54 = vmax.f32 %v2663_v12, 0.0  ;;  %6674 = vrot.lane.b32.xlu2 %v6668_v29, %s7936_s21  ;;  %6664 = vrot.lane.b32.xlu0 %v6668_v29, %s7928_s7  ;;  %v2721_v57 = vadd.f32 %v2720_v15, %v2692_v48  ;;  %v10496_v12 = vpop.permute.xlu2 %3151 }
 0x51d   : > { %13541 = vst [vmem:[#allocation12_spill] sm:$0xff] %v10496_v12 }
 0x51e   : > { %v2774_v34 = vmul.f32 %v13539_v6, %v2762_v54 }
 0x520   : > { %2786 = vst [vmem:[#allocation2 + $0x10] sm:$0xff] %v2774_v34  ;;  %v6698_v24 = vpack.i.bf16 %v2774_v34, %v10417_v27 }
 0x521   : > { %v2665_v20 = vpop.f32.mrf.mxu1  ;;  %v2694_v40 = vpop.f32.mrf.mxu3 }
 0x522   : > { %v2666_v44 = vadd.f32 %v2665_v20, %v2637_v28  ;;  %v2749_v0 = vpop.f32.mrf.mxu0  ;;  %6689 = vrot.lane.b32.xlu1 %v6688_v42, %s7929_s8  ;;  %v2695_v55 = vadd.f32 %v2694_v40, %v13536_v52  ;;  %v2729_v29 = vpop.f32.mrf.mxu2 }
 0x523   : > { %v2750_v31 = vadd.f32 %v2749_v0, %v2721_v57 }
 0x524   : > { %v2765_v9 = vmax.f32 %v2666_v44, 0.0  ;;  %6684 = vrot.lane.b32.xlu2 %v6688_v42, %s7928_s7  ;;  %6679 = vrot.lane.b32.xlu0 %v6688_v42, %s7927_s27  ;;  %v2724_v43 = vadd.f32 %v2723_v22, %v2695_v55 }
 0x525   : > { %v2763_v56 = vmax.f32 %v2750_v31, 0.0 }
 0x526   : > { %v2777_v10 = vmul.f32 %v13539_v6, %v2765_v9 }
 0x527   : > { %v2775_v11 = vmul.f32 %v13540_v2, %v2763_v56 }
 0x529   : > { %2787 = vst.msk [vmem:[#allocation2 + $0x18] sm:$0xff] %vm1312_vm12, %v2775_v11  ;;  %v2668_v25 = vpop.f32.mrf.mxu1  ;;  %v2697_v38 = vpop.f32.mrf.mxu3 }
 0x52a   : > { %v2669_v39 = vadd.f32 %v2668_v25, %v2640_v45  ;;  %v2752_v30 = vpop.f32.mrf.mxu0  ;;  %6694 = vrot.lane.b32.xlu1 %v6688_v42, %s7936_s21  ;;  %v2698_v18 = vadd.f32 %v2697_v38, %v13537_v51 }
 0x52b   : > { %v2753_v19 = vadd.f32 %v2752_v30, %v2724_v43 }
 0x52c   : > { %v2768_v52 = vmax.f32 %v2669_v39, 0.0  ;;  %6699 = vrot.lane.b32.xlu0 %v6698_v24, %s7930_s9  ;;  %v2727_v27 = vadd.f32 %v2726_v59, %v2698_v18 }
 0x52d   : > { %v2766_v36 = vmax.f32 %v2753_v19, 0.0 }
 0x52e   : > { %v2780_v14 = vmul.f32 %v13539_v6, %v2768_v52 }
 0x52f   : > { %v2778_v33 = vmul.f32 %v13540_v2, %v2766_v36 }
 0x530   : > { %v2800_v53 = vld [vmem:[#allocation2 + $0x18] sm:$0xff] }
 0x531   : > { %2790 = vst.msk [vmem:[#allocation2 + $0x38] sm:$0xff] %vm1312_vm12, %v2778_v33  ;;  %v2671_v23 = vpop.f32.mrf.mxu1  ;;  %v10468_v49 = vpack.i.bf16 %v2800_v53, %v2774_v34  ;;  %v2700_v58 = vpop.f32.mrf.mxu3  ;;  %v6763_v8 = vpack.i.bf16 %v10427_v60, %v2800_v53  ;;  %v6723_v60 = vpack.i.bf16 %v2780_v14, %v10435_v41 }
 0x532   : > { %v2672_v63 = vadd.f32 %v2671_v23, %v2643_v21  ;;  %v2755_v47 = vpop.f32.mrf.mxu0  ;;  %v2701_v50 = vadd.f32 %v2700_v58, %v13538_v4  ;;  %v10505_v41 = vpop.permute.xlu0 %3141 }
 0x533   : > { %v2756_v37 = vadd.f32 %v2755_v47, %v2727_v27  ;;  %6759 = vrot.lane.b32.xlu2 %v10468_v49, %s7929_s8  ;;  %6749 = vrot.lane.b32.xlu1 %v10468_v49, %s7927_s27  ;;  %13542 = vst [vmem:[#allocation10_spill] sm:$0xff] %v10505_v41 }
 0x534   : > { %v2771_v51 = vmax.f32 %v2672_v63, 0.0  ;;  %6704 = vrot.lane.b32.xlu0 %v6698_v24, %s7931_s10  ;;  %v2730_v1 = vadd.f32 %v2729_v29, %v2701_v50 }
 0x535   : > { %v2769_v62 = vmax.f32 %v2756_v37, 0.0 }
 0x536   : > { %v2783_v3 = vmul.f32 %v13539_v6, %v2771_v51 }
 0x537   : > { %v2781_v17 = vmul.f32 %v13540_v2, %v2769_v62 }
 0x538   : > { %v2804_v16 = vld [vmem:[#allocation2 + $0x38] sm:$0xff] }
 0x539   : > { %2793 = vst.msk [vmem:[#allocation2 + $0x58] sm:$0xff] %vm1312_vm12, %v2781_v17  ;;  %v6798_v46 = vpack.i.bf16 %v2804_v16, %v2777_v10 }
 0x53a   : > { %v2758_v35 = vpop.f32.mrf.mxu0  ;;  %v10515_v34 = vpop.permute.xlu0 %3156 }
 0x53b   : > { %v2759_v15 = vadd.f32 %v2758_v35, %v2730_v1  ;;  %6789 = vrot.lane.b32.xlu2 %v10468_v49, %s7936_s21  ;;  %6764 = vrot.lane.b32.xlu1 %v6763_v8, %s7930_s9  ;;  %13544 = vst [vmem:[#allocation11_spill] sm:$0xff] %v10515_v34 }
 0x53c   : > { %6709 = vrot.lane.b32.xlu0 %v6698_v24, %s7932_s11 }
 0x53d   : > { %v2772_v4 = vmax.f32 %v2759_v15, 0.0 }
 0x53f   : > { %v2784_v7 = vmul.f32 %v13540_v2, %v2772_v4 }
 0x540   : > { %v2808_v28 = vld [vmem:[#allocation2 + $0x58] sm:$0xff] }
 0x541   : > { %2796 = vst.msk [vmem:[#allocation2 + $0x78] sm:$0xff] %vm1312_vm12, %v2784_v7  ;;  %v6838_v57 = vpack.i.bf16 %v2808_v28, %v2780_v14  ;;  %v6853_v22 = vpack.i.bf16 %v10443_v32, %v2808_v28 }
 0x543   : > { %6799 = vrot.lane.b32.xlu2 %v6798_v46, %s7928_s7  ;;  %6769 = vrot.lane.b32.xlu1 %v6763_v8, %s7931_s10 }
 0x544   : > { %6714 = vrot.lane.b32.xlu0 %v6698_v24, %s7933_s12 }
 0x548   : > { %v2812_v42 = vld [vmem:[#allocation2 + $0x78] sm:$0xff] }
 0x549   : > { %v6893_v0 = vpack.i.bf16 %v2812_v42, %v2783_v3 }
 0x54b   : > { %6809 = vrot.lane.b32.xlu2 %v6798_v46, %s7930_s9  ;;  %6774 = vrot.lane.b32.xlu1 %v6763_v8, %s7932_s11 }
 0x54c   : > { %6719 = vrot.lane.b32.xlu0 %v6698_v24, %s7935_s13 }
 0x553   : > { %6814 = vrot.lane.b32.xlu2 %v6798_v46, %s7931_s10  ;;  %6779 = vrot.lane.b32.xlu1 %v6763_v8, %s7933_s12 }
 0x554   : > { %6724 = vrot.lane.b32.xlu0 %v6723_v60, %s7930_s9 }
 0x55b   : > { %6819 = vrot.lane.b32.xlu2 %v6798_v46, %s7932_s11  ;;  %6784 = vrot.lane.b32.xlu1 %v6763_v8, %s7935_s13 }
 0x55c   : > { %6729 = vrot.lane.b32.xlu0 %v6723_v60, %s7931_s10  ;;  %v10501_v54 = vpop.permute.xlu2 %6624 }
 0x563   : > { %6824 = vrot.lane.b32.xlu2 %v6798_v46, %s7933_s12  ;;  %6804 = vrot.lane.b32.xlu1 %v6798_v46, %s7929_s8 }
 0x564   : > { %6734 = vrot.lane.b32.xlu0 %v6723_v60, %s7932_s11 }
 0x566   : > { %v10508_v48 = vpop.permute.xlu2 %6639 }
 0x56b   : > { %6829 = vrot.lane.b32.xlu2 %v6798_v46, %s7935_s13  ;;  %6834 = vrot.lane.b32.xlu1 %v6798_v46, %s7936_s21 }
 0x56c   : > { %6739 = vrot.lane.b32.xlu0 %v6723_v60, %s7933_s12 }
 0x56e   : > { %v10517_v20 = vpop.permute.xlu2 %6669 }
 0x573   : > { %6839 = vrot.lane.b32.xlu2 %v6838_v57, %s7927_s27  ;;  %6844 = vrot.lane.b32.xlu1 %v6838_v57, %s7928_s7 }
 0x574   : > { %6744 = vrot.lane.b32.xlu0 %v6723_v60, %s7935_s13  ;;  %v6630_v40 = vpop.permute.xlu1 %6629 }
 0x575   : > { %v6620_v44 = vpop.permute.xlu0 %6619  ;;  %v6632_v52 = vunpack.i.h.bf16 %v6630_v40  ;;  %v6631_v59 = vunpack.i.l.bf16 %v6630_v40 }
 0x576   : > { %v10524_v31 = vpop.permute.xlu2 %6674  ;;  %v6622_v18 = vunpack.i.h.bf16 %v6620_v44  ;;  %v6621_v36 = vunpack.i.l.bf16 %v6620_v44 }
 0x577   : > { %v2949_v27 = vsel %vm593_vm5, %v6631_v59, %v6632_v52 }
 0x578   : > { %v2861_v23 = vsel %vm503_vm3, %v6621_v36, %v6622_v18 }
 0x57b   : > { %6894 = vrot.lane.b32.xlu2 %v6893_v0, %s7929_s8  ;;  %6854 = vrot.lane.b32.xlu1 %v6853_v22, %s7930_s9 }
 0x57c   : > { %6754 = vrot.lane.b32.xlu0 %v10468_v49, %s7928_s7  ;;  %v10529_v9 = vpop.permute.xlu1 %6634 }
 0x57d   : > { %13545 = vst [vmem:[#allocation8_spill] sm:$0xff] %v10529_v9 }
 0x57e   : > { %v10531_v55 = vpop.permute.xlu0 %6649  ;;  %v10536_v32 = vpop.permute.xlu2 %6684 }
 0x583   : > { %6899 = vrot.lane.b32.xlu2 %v6893_v0, %s7930_s9  ;;  %6859 = vrot.lane.b32.xlu1 %v6853_v22, %s7931_s10 }
 0x584   : > { %6794 = vrot.lane.b32.xlu0 %v6798_v46, %s7927_s27  ;;  %v10538_v56 = vpop.permute.xlu1 %6644 }
 0x585   : > { %v6647_v4 = vunpack.i.h.bf16 %v10538_v56  ;;  %v6646_v16 = vunpack.i.l.bf16 %v10538_v56 }
 0x586   : > { %v10540_v5 = vpop.permute.xlu0 %6654 }
 0x587   : > { %13546 = vst [vmem:[#allocation19_spill] sm:$0xff] %v10540_v5  ;;  %v2908_v42 = vsel %vm548_vm4, %v6646_v16, %v6647_v4 }
 0x58b   : > { %6904 = vrot.lane.b32.xlu2 %v6893_v0, %s7931_s10  ;;  %6864 = vrot.lane.b32.xlu1 %v6853_v22, %s7932_s11 }
 0x58c   : > { %6849 = vrot.lane.b32.xlu0 %v6838_v57, %s7929_s8  ;;  %v10547_v11 = vpop.permute.xlu1 %6659 }
 0x58d   : > { %v10545_v10 = vpop.permute.xlu2 %6759 }
 0x58e   : > { %v10549_v45 = vpop.permute.xlu0 %6664  ;;  %v13193_v19 = vunpack.i.l.bf16 %v10545_v10 }
 0x590   : > { %v2950_v33 = vsel %vm593_vm5, %v6632_v52, %v13193_v19 }
 0x591   : > { %v6938_v63 = vpack.i.bf16 %v2950_v33, %v2949_v27 }
 0x593   : > { %6909 = vrot.lane.b32.xlu2 %v6893_v0, %s7932_s11  ;;  %6869 = vrot.lane.b32.xlu1 %v6853_v22, %s7933_s12 }
 0x594   : > { %6879 = vrot.lane.b32.xlu0 %v6838_v57, %s7936_s21  ;;  %v10556_v25 = vpop.permute.xlu1 %6689 }
 0x595   : > { %v10554_v43 = vpop.permute.xlu2 %6789 }
 0x596   : > { %v10558_v38 = vpop.permute.xlu0 %6679 }
 0x59b   : > { %6914 = vrot.lane.b32.xlu2 %v6893_v0, %s7933_s12  ;;  %6874 = vrot.lane.b32.xlu1 %v6853_v22, %s7935_s13 }
 0x59c   : > { %6889 = vrot.lane.b32.xlu0 %v6893_v0, %s7928_s7  ;;  %v10565_v30 = vpop.permute.xlu1 %6694 }
 0x59d   : > { %v10563_v39 = vpop.permute.xlu2 %6799 }
 0x59e   : > { %v10567_v24 = vpop.permute.xlu0 %6699  ;;  %v13190_v15 = vunpack.i.l.bf16 %v10563_v39 }
 0x59f   : > { %v13202_v47 = vunpack.i.h.bf16 %v10567_v24  ;;  %v6701_v37 = vunpack.i.l.bf16 %v10567_v24 }
 0x5a0   : > { %v2909_v28 = vsel %vm548_vm4, %v6647_v4, %v13190_v15  ;;  %v6691_v15 = vunpack.i.l.bf16 %v10556_v25 }
 0x5a1   : > { %v2985_v3 = vsel %vm630_vm6, %v6701_v37, %v13202_v47  ;;  %v6968_v22 = vpack.i.bf16 %v2909_v28, %v2908_v42  ;;  %v6651_v42 = vunpack.i.l.bf16 %v10531_v55 }
 0x5a2   : > { %v6943_v8 = vpack.i.bf16 %v2985_v3, %v6701_v37  ;;  %v6661_v37 = vunpack.i.l.bf16 %v10547_v11 }
 0x5a3   : > { %6919 = vrot.lane.b32.xlu2 %v6893_v0, %s7935_s13  ;;  %6884 = vrot.lane.b32.xlu1 %v6893_v0, %s7927_s27 }
 0x5a5   : > { %v10572_v61 = vpop.permute.xlu2 %6809  ;;  %v10574_v14 = vpop.permute.xlu1 %6749 }
 0x5a6   : > { %v13203_v21 = vunpack.i.l.bf16 %v10574_v14  ;;  %v10580_v53 = vpop.permute.xlu0 %6704  ;;  %v13547_v2 = vunpack.i.l.bf16 %v10574_v14 }
 0x5a8   : > { %v2862_v49 = vsel %vm503_vm3, %v6622_v18, %v13203_v21 }
 0x5a9   : > { %v6928_v58 = vpack.i.bf16 %v2862_v49, %v2861_v23 }
 0x5ab   : > { %6924 = vrot.lane.b32.xlu2 %v6893_v0, %s7936_s21  ;;  %6939 = vrot.lane.b32.xlu1 %v6938_v63, %s7936_s21 }
 0x5ac   : > { %6929 = vrot.lane.b32.xlu0 %v6928_v58, %s7936_s21  ;;  %v6662_v58 = vunpack.i.h.bf16 %v10547_v11  ;;  %v6652_v11 = vunpack.i.h.bf16 %v10531_v55 }
 0x5ad   : > { %v10592_v51 = vpop.permute.xlu2 %6814  ;;  %v10594_v50 = vpop.permute.xlu1 %6764 }
 0x5ae   : > { %v10596_v62 = vpop.permute.xlu0 %6709  ;;  %v13189_v52 = vunpack.i.l.bf16 %v10592_v51  ;;  %v6767_v47 = vunpack.i.h.bf16 %v10594_v50 }
 0x5af   : > { %v13192_v29 = vunpack.i.h.bf16 %v10596_v62  ;;  %v6711_v17 = vunpack.i.l.bf16 %v10596_v62 }
 0x5b1   : > { %v3049_v1 = vsel %vm696_vm8, %v6711_v17, %v13192_v29 }
 0x5b2   : > { %v6953_v35 = vpack.i.bf16 %v3049_v1, %v6711_v17 }
 0x5b4   : > { %6954 = vrot.lane.b32.xlu1 %v6953_v35, %s7936_s21  ;;  %6944 = vrot.lane.b32.xlu0 %v6943_v8, %s7936_s21  ;;  %v2867_v35 = vsel %vm503_vm3, %v6661_v37, %v6662_v58 }
 0x5b5   : > { %v10611_v7 = vpop.permute.xlu2 %6819  ;;  %v10613_v46 = vpop.permute.xlu1 %6769 }
 0x5b6   : > { %v10615_v60 = vpop.permute.xlu0 %6714  ;;  %v6772_v56 = vunpack.i.h.bf16 %v10613_v46 }
 0x5b7   : > { %v13201_v57 = vunpack.i.h.bf16 %v10615_v60  ;;  %v6716_v40 = vunpack.i.l.bf16 %v10615_v60 }
 0x5b8   : > { %v3019_v33 = vsel %vm663_vm7, %v6772_v56, %v13189_v52  ;;  %v6692_v52 = vunpack.i.h.bf16 %v10556_v25 }
 0x5b9   : > { %v3081_v44 = vsel %vm729_vm9, %v6716_v40, %v13201_v57  ;;  %v6983_v27 = vpack.i.bf16 %v3019_v33, %v6772_v56  ;;  %v2952_v33 = vsel %vm593_vm5, %v6651_v42, %v6652_v11  ;;  %v6752_v57 = vunpack.i.h.bf16 %v10574_v14 }
 0x5ba   : > { %v6958_v0 = vpack.i.bf16 %v3081_v44, %v6716_v40  ;;  %v2958_v25 = vsel %vm593_vm5, %v6691_v15, %v6692_v52 }
 0x5bc   : > { %6969 = vrot.lane.b32.xlu1 %v6968_v22, %s7936_s21  ;;  %6959 = vrot.lane.b32.xlu0 %v6958_v0, %s7936_s21 }
 0x5bd   : > { %v10630_v59 = vpop.permute.xlu2 %6824  ;;  %v10632_v18 = vpop.permute.xlu1 %6774 }
 0x5be   : > { %v10634_v36 = vpop.permute.xlu0 %6719  ;;  %v6777_v55 = vunpack.i.h.bf16 %v10632_v18 }
 0x5c4   : > { %6984 = vrot.lane.b32.xlu1 %v6983_v27, %s7936_s21 }
 0x5c5   : > { %v10640_v23 = vpop.permute.xlu2 %6829  ;;  %v10642_v49 = vpop.permute.xlu1 %6779 }
 0x5c6   : > { %v10644_v63 = vpop.permute.xlu0 %6724 }
 0x5c7   : > { %v13187_v28 = vunpack.i.h.bf16 %v10644_v63  ;;  %v6726_v40 = vunpack.i.l.bf16 %v10644_v63 }
 0x5c9   : > { %v2989_v0 = vsel %vm630_vm6, %v6726_v40, %v13187_v28 }
 0x5cd   : > { %v10648_v3 = vpop.permute.xlu2 %6839  ;;  %v10650_v17 = vpop.permute.xlu1 %6784 }
 0x5ce   : > { %v13188_v1 = vunpack.i.l.bf16 %v10648_v3  ;;  %v10653_v8 = vpop.permute.xlu0 %6729 }
 0x5cf   : > { %v13197_v29 = vunpack.i.h.bf16 %v10653_v8  ;;  %v6731_v19 = vunpack.i.l.bf16 %v10653_v8 }
 0x5d0   : > { %v2868_v4 = vsel %vm503_vm3, %v6662_v58, %v13188_v1  ;;  %v7013_v58 = vpack.i.bf16 %v2989_v0, %v6726_v40  ;;  %v6666_v1 = vunpack.i.l.bf16 %v10549_v45 }
 0x5d1   : > { %v6998_v16 = vpack.i.bf16 %v2868_v4, %v2867_v35  ;;  %v13194_v35 = vunpack.i.l.bf16 %v10611_v7  ;;  %v3021_v15 = vsel %vm663_vm7, %v6731_v19, %v13197_v29 }
 0x5d3   : > { %6999 = vrot.lane.b32.xlu1 %v6998_v16, %s7936_s21  ;;  %v3051_v42 = vsel %vm696_vm8, %v6777_v55, %v13194_v35 }
 0x5d4   : > { %v6988_v0 = vpack.i.bf16 %v3051_v42, %v6777_v55 }
 0x5d5   : > { %v10664_v44 = vpop.permute.xlu1 %6804  ;;  %v10680_v4 = vpop.permute.xlu2 %6894 }
 0x5d6   : > { %v13196_v22 = vunpack.i.l.bf16 %v10664_v44  ;;  %v10670_v56 = vpop.permute.xlu0 %6734 }
 0x5d7   : > { %v6736_v6 = vunpack.i.l.bf16 %v10670_v56 }
 0x5d8   : > { %v2953_v27 = vsel %vm593_vm5, %v6652_v11, %v13196_v22  ;;  %v6626_v22 = vunpack.i.l.bf16 %v10501_v54 }
 0x5d9   : > { %v6973_v37 = vpack.i.bf16 %v2953_v27, %v2952_v33 }
 0x5db   : > { %7014 = vrot.lane.b32.xlu1 %v7013_v58, %s7936_s21  ;;  %6974 = vrot.lane.b32.xlu0 %v6973_v37, %s7936_s21  ;;  %v13195_v58 = vunpack.i.l.bf16 %v10680_v4  ;;  %v6667_v37 = vunpack.i.h.bf16 %v10549_v45 }
 0x5dd   : > { %v10682_v16 = vpop.permute.xlu1 %6834  ;;  %v2911_v45 = vsel %vm548_vm4, %v6666_v1, %v6667_v37  ;;  %v6627_v1 = vunpack.i.h.bf16 %v10501_v54  ;;  %v13200_v54 = vunpack.i.h.bf16 %v10580_v53 }
 0x5de   : > { %v10687_v28 = vpop.permute.xlu0 %6739 }
 0x5df   : > { %v13191_v40 = vunpack.i.h.bf16 %v10687_v28  ;;  %v6741_v11 = vunpack.i.l.bf16 %v10687_v28 }
 0x5e1   : > { %v3085_v33 = vsel %vm729_vm9, %v6741_v11, %v13191_v40 }
 0x5e2   : > { %v7028_v27 = vpack.i.bf16 %v3085_v33, %v6741_v11  ;;  %v2959_v11 = vsel %vm593_vm5, %v6692_v52, %v13195_v58 }
 0x5e3   : > { %6989 = vrot.lane.b32.xlu0 %v6988_v0, %s7936_s21  ;;  %v10709_v0 = vpop.permute.xlu2 %6899  ;;  %v7043_v35 = vpack.i.bf16 %v2959_v11, %v2958_v25 }
 0x5e4   : > { %7029 = vrot.lane.b32.xlu1 %v7028_v27, %s7936_s21 }
 0x5e5   : > { %v10701_v55 = vpop.permute.xlu1 %6844 }
 0x5e6   : > { %v13198_v42 = vunpack.i.l.bf16 %v10701_v55  ;;  %v10704_v40 = vpop.permute.xlu0 %6744 }
 0x5e8   : > { %v2912_v33 = vsel %vm548_vm4, %v6667_v37, %v13198_v42 }
 0x5e9   : > { %v7003_v27 = vpack.i.bf16 %v2912_v33, %v2911_v45  ;;  %v7018_v45 = vpack.i.bf16 %v3021_v15, %v6731_v19  ;;  %v2905_v33 = vsel %vm548_vm4, %v6626_v22, %v6627_v1 }
 0x5eb   : > { %7004 = vrot.lane.b32.xlu0 %v7003_v27, %s7936_s21  ;;  %v10730_v11 = vpop.permute.xlu2 %6904  ;;  %v6706_v27 = vunpack.i.l.bf16 %v10580_v53 }
 0x5ec   : > { %7044 = vrot.lane.b32.xlu1 %v7043_v35, %s7936_s21 }
 0x5ed   : > { %v10720_v58 = vpop.permute.xlu1 %6854  ;;  %v3017_v19 = vsel %vm663_vm7, %v6706_v27, %v13200_v54 }
 0x5ee   : > { %v10727_v52 = vpop.permute.xlu0 %6754  ;;  %v6948_v15 = vpack.i.bf16 %v3017_v19, %v6706_v27 }
 0x5ef   : > { %v13199_v37 = vunpack.i.l.bf16 %v10727_v52 }
 0x5f1   : > { %v2906_v35 = vsel %vm548_vm4, %v6627_v1, %v13199_v37 }
 0x5f2   : > { %v6933_v25 = vpack.i.bf16 %v2906_v35, %v2905_v33  ;;  %v6642_v33 = vunpack.i.h.bf16 %v10508_v48  ;;  %v6641_v35 = vunpack.i.l.bf16 %v10508_v48 }
 0x5f3   : > { %7019 = vrot.lane.b32.xlu0 %v7018_v45, %s7936_s21  ;;  %v10747_v42 = vpop.permute.xlu2 %6909 }
 0x5f4   : > { %6934 = vrot.lane.b32.xlu2 %v6933_v25, %s7936_s21  ;;  %v13206_v25 = vunpack.i.l.bf16 %v10747_v42 }
 0x5f5   : > { %v10740_v29 = vpop.permute.xlu1 %6859 }
 0x5f6   : > { %v10745_v22 = vpop.permute.xlu0 %6794 }
 0x5f7   : > { %v13204_v1 = vunpack.i.l.bf16 %v10745_v22 }
 0x5f9   : > { %v2865_v27 = vsel %vm503_vm3, %v6642_v33, %v13204_v1  ;;  %v13208_v1 = vunpack.i.l.bf16 %v10572_v61 }
 0x5fc   : > { %6949 = vrot.lane.b32.xlu2 %v6948_v15, %s7936_s21  ;;  %v2864_v15 = vsel %vm503_vm3, %v6641_v35, %v6642_v33 }
 0x5fd   : > { %v10751_v45 = vpop.permute.xlu1 %6864  ;;  %v6963_v48 = vpack.i.bf16 %v2865_v27, %v2864_v15  ;;  %v6782_v27 = vunpack.i.h.bf16 %v10642_v49 }
 0x5fe   : > { %v6867_v37 = vunpack.i.h.bf16 %v10751_v45 }
 0x600   : > { %v3055_v19 = vsel %vm696_vm8, %v6867_v37, %v13206_v25  ;;  %v2863_v25 = vsel %vm503_vm3, %v13547_v2, %v6752_v57  ;;  %v13548_v2 = vunpack.i.h.bf16 %v10567_v24 }
 0x601   : > { %v7058_v54 = vpack.i.bf16 %v3055_v19, %v6867_v37  ;;  %v2987_v37 = vsel %vm630_vm6, %v6767_v47, %v13208_v1  ;;  %v7068_v33 = vpack.i.bf16 %v6752_v57, %v2863_v25  ;;  %v10780_v19 = vpop.permute.xlu0 %6849  ;;  %v6781_v57 = vunpack.i.l.bf16 %v10642_v49 }
 0x602   : > { %v6978_v35 = vpack.i.bf16 %v2987_v37, %v6767_v47  ;;  %v6682_v37 = vunpack.i.h.bf16 %v10558_v38  ;;  %v13210_v24 = vunpack.i.l.bf16 %v10780_v19  ;;  %v6857_v1 = vunpack.i.h.bf16 %v10720_v58 }
 0x603   : > { %7059 = vrot.lane.b32.xlu1 %v7058_v54, %s7936_s21  ;;  %v6766_v54 = vunpack.i.l.bf16 %v10594_v50 }
 0x604   : > { %6964 = vrot.lane.b32.xlu2 %v6963_v48, %s7936_s21  ;;  %v13207_v48 = vunpack.i.l.bf16 %v10630_v59 }
 0x605   : > { %v10768_v21 = vpop.permute.xlu1 %6869  ;;  %v2986_v14 = vsel %vm630_vm6, %v13548_v2, %v6766_v54  ;;  %v6672_v2 = vunpack.i.h.bf16 %v10517_v20 }
 0x606   : > { %v3083_v47 = vsel %vm729_vm9, %v6782_v27, %v13207_v48  ;;  %v7083_v50 = vpack.i.bf16 %v6766_v54, %v2986_v14  ;;  %v6671_v48 = vunpack.i.l.bf16 %v10517_v20  ;;  %v13549_v54 = vunpack.i.h.bf16 %v10615_v60 }
 0x607   : > { %v6993_v25 = vpack.i.bf16 %v3083_v47, %v6782_v27  ;;  %v2956_v47 = vsel %vm593_vm5, %v6672_v2, %v13210_v24  ;;  %v13212_v24 = vunpack.i.h.bf16 %v10670_v56 }
 0x608   : > { %v3082_v49 = vsel %vm729_vm9, %v13549_v54, %v6781_v57  ;;  %v2955_v60 = vsel %vm593_vm5, %v6671_v48, %v6672_v2  ;;  %v6807_v54 = vunpack.i.h.bf16 %v10664_v44 }
 0x609   : > { %v10806_v14 = vpop.permute.xlu0 %6879  ;;  %v7008_v34 = vpack.i.bf16 %v2956_v47, %v2955_v60 }
 0x60b   : > { %7069 = vrot.lane.b32.xlu1 %v7068_v33, %s7936_s21  ;;  %v6681_v33 = vunpack.i.l.bf16 %v10558_v38 }
 0x60c   : > { %6979 = vrot.lane.b32.xlu2 %v6978_v35, %s7936_s21 }
 0x60d   : > { %v10783_v15 = vpop.permute.xlu1 %6874  ;;  %v2870_v38 = vsel %vm503_vm3, %v6681_v33, %v6682_v37  ;;  %v13213_v33 = vunpack.i.l.bf16 %v10709_v0 }
 0x613   : > { %7084 = vrot.lane.b32.xlu1 %v7083_v50, %s7936_s21 }
 0x614   : > { %6994 = vrot.lane.b32.xlu2 %v6993_v25, %s7936_s21  ;;  %v7098_v25 = vpack.i.bf16 %v6781_v57, %v3082_v49  ;;  %v13550_v57 = vunpack.i.l.bf16 %v10664_v44  ;;  %v3053_v49 = vsel %vm696_vm8, %v6736_v6, %v13212_v24  ;;  %v6872_v44 = vunpack.i.h.bf16 %v10768_v21 }
 0x615   : > { %v10798_v35 = vpop.permute.xlu1 %6884 }
 0x616   : > { %v6886_v27 = vunpack.i.l.bf16 %v10798_v35  ;;  %v2954_v48 = vsel %vm593_vm5, %v13550_v57, %v6807_v54 }
 0x618   : > { %v2871_v50 = vsel %vm503_vm3, %v6682_v37, %v6886_v27  ;;  %v2991_v37 = vsel %vm630_vm6, %v6857_v1, %v13213_v33 }
 0x619   : > { %v7033_v20 = vpack.i.bf16 %v2871_v50, %v2870_v38  ;;  %v7113_v38 = vpack.i.bf16 %v6807_v54, %v2954_v48  ;;  %v7048_v47 = vpack.i.bf16 %v2991_v37, %v6857_v1  ;;  %v10835_v50 = vpop.permute.xlu2 %6914  ;;  %v6687_v1 = vunpack.i.h.bf16 %v10536_v32 }
 0x61a   : > { %v6916_v60 = vunpack.i.l.bf16 %v10835_v50  ;;  %v6686_v54 = vunpack.i.l.bf16 %v10536_v32  ;;  %v13551_v48 = vunpack.i.l.bf16 %v10611_v7  ;;  %v6847_v32 = vunpack.i.h.bf16 %v10701_v55 }
 0x61b   : > { %7099 = vrot.lane.b32.xlu1 %v7098_v25, %s7936_s21  ;;  %7034 = vrot.lane.b32.xlu0 %v7033_v20, %s7936_s21  ;;  %v10837_v25 = vpop.permute.xlu0 %6889  ;;  %v7023_v20 = vpack.i.bf16 %v3053_v49, %v6736_v6 }
 0x61c   : > { %7009 = vrot.lane.b32.xlu2 %v7008_v34, %s7936_s21  ;;  %v6822_v34 = vunpack.i.h.bf16 %v10611_v7  ;;  %v13214_v57 = vunpack.i.l.bf16 %v10837_v25  ;;  %v3087_v6 = vsel %vm729_vm9, %v6872_v44, %v6916_v60  ;;  %v6757_v7 = vunpack.i.h.bf16 %v10727_v52 }
 0x61d   : > { %v10830_v2 = vpop.permute.xlu1 %6939 }
 0x61e   : > { %v3052_v37 = vsel %vm696_vm8, %v13551_v48, %v6822_v34  ;;  %v2915_v49 = vsel %vm548_vm4, %v6687_v1, %v13214_v57  ;;  %v6862_v48 = vunpack.i.h.bf16 %v10740_v29 }
 0x623   : > { %7114 = vrot.lane.b32.xlu1 %v7113_v38, %s7936_s21  ;;  %7049 = vrot.lane.b32.xlu0 %v7048_v47, %s7936_s21  ;;  %v7128_v38 = vpack.i.bf16 %v6822_v34, %v3052_v37  ;;  %v7063_v47 = vpack.i.bf16 %v3087_v6, %v6872_v44  ;;  %v6906_v34 = vunpack.i.l.bf16 %v10730_v11  ;;  %v13552_v44 = vunpack.i.l.bf16 %v10701_v55 }
 0x624   : > { %7024 = vrot.lane.b32.xlu2 %v7023_v20, %s7936_s21  ;;  %v2914_v20 = vsel %vm548_vm4, %v6686_v54, %v6687_v1  ;;  %v13553_v1 = vunpack.i.l.bf16 %v10727_v52  ;;  %v6762_v55 = vunpack.i.h.bf16 %v10545_v10  ;;  %v13554_v52 = vunpack.i.h.bf16 %v10580_v53 }
 0x625   : > { %v7038_v33 = vpack.i.bf16 %v2915_v49, %v2914_v20  ;;  %v2913_v37 = vsel %vm548_vm4, %v13552_v44, %v6847_v32  ;;  %v3023_v6 = vsel %vm663_vm7, %v6862_v48, %v6906_v34  ;;  %v6776_v53 = vunpack.i.l.bf16 %v10632_v18 }
 0x626   : > { %v10857_v24 = vpop.permute.xlu1 %6954  ;;  %v2907_v54 = vsel %vm548_vm4, %v13553_v1, %v6757_v7  ;;  %v7143_v49 = vpack.i.bf16 %v6847_v32, %v2913_v37  ;;  %v7053_v20 = vpack.i.bf16 %v3023_v6, %v6862_v48  ;;  %v6797_v1 = vunpack.i.h.bf16 %v10745_v22 }
 0x62b   : > { %7129 = vrot.lane.b32.xlu1 %v7128_v38, %s7936_s21  ;;  %7064 = vrot.lane.b32.xlu0 %v7063_v47, %s7936_s21  ;;  %v7073_v38 = vpack.i.bf16 %v6757_v7, %v2907_v54  ;;  %v6771_v47 = vunpack.i.l.bf16 %v10613_v46  ;;  %v13555_v7 = vunpack.i.h.bf16 %v10653_v8  ;;  %v6887_v54 = vunpack.i.h.bf16 %v10798_v35  ;;  %v10898_v8 = vpop.permute.xlu2 %6919 }
 0x62c   : > { %7039 = vrot.lane.b32.xlu2 %v7038_v33, %s7936_s21  ;;  %v6861_v33 = vunpack.i.l.bf16 %v10740_v29  ;;  %v13556_v29 = vunpack.i.l.bf16 %v10545_v10  ;;  %v13557_v10 = vunpack.i.l.bf16 %v10745_v22  ;;  %v6802_v22 = vunpack.i.h.bf16 %v10563_v39 }
 0x62d   : > { %v3018_v32 = vsel %vm663_vm7, %v13554_v52, %v6771_v47  ;;  %v6812_v52 = vunpack.i.h.bf16 %v10572_v61 }
 0x62e   : > { %v10878_v57 = vpop.permute.xlu1 %6969  ;;  %v3022_v46 = vsel %vm663_vm7, %v13555_v7, %v6861_v33  ;;  %v2951_v48 = vsel %vm593_vm5, %v13556_v29, %v6762_v55  ;;  %v7088_v44 = vpack.i.bf16 %v6771_v47, %v3018_v32  ;;  %v2872_v47 = vsel %vm503_vm3, %v6886_v27, %v6887_v54 }
 0x62f   : > { %v7158_v37 = vpack.i.bf16 %v6861_v33, %v3022_v46  ;;  %v7078_v6 = vpack.i.bf16 %v6762_v55, %v2951_v48  ;;  %v13558_v33 = vunpack.i.h.bf16 %v10596_v62  ;;  %v7173_v18 = vpack.i.bf16 %v6887_v54, %v2872_v47 }
 0x630   : > { %v6902_v32 = vunpack.i.h.bf16 %v10709_v0  ;;  %v13559_v62 = vunpack.i.l.bf16 %v10572_v61  ;;  %v13560_v46 = vunpack.i.l.bf16 %v10709_v0  ;;  %v10933_v61 = vpop.permute.xlu0 %6929  ;;  %v6817_v0 = vunpack.i.h.bf16 %v10592_v51 }
 0x632   : > { %v2988_v27 = vsel %vm630_vm6, %v13559_v62, %v6812_v52  ;;  %v2992_v29 = vsel %vm630_vm6, %v13560_v46, %v6902_v32 }
 0x633   : > { %7144 = vrot.lane.b32.xlu1 %v7143_v49, %s7936_s21  ;;  %7074 = vrot.lane.b32.xlu0 %v7073_v38, %s7936_s21  ;;  %v2866_v38 = vsel %vm503_vm3, %v13557_v10, %v6797_v1  ;;  %v10926_v48 = vpop.permute.xlu2 %6924  ;;  %v7188_v54 = vpack.i.bf16 %v6902_v32, %v2992_v29 }
 0x634   : > { %7054 = vrot.lane.b32.xlu2 %v7053_v20, %s7936_s21  ;;  %v3050_v20 = vsel %vm696_vm8, %v13558_v33, %v6776_v53  ;;  %v7103_v55 = vpack.i.bf16 %v6797_v1, %v2866_v38  ;;  %v7118_v1 = vpack.i.bf16 %v6812_v52, %v2988_v27  ;;  %v13565_v27 = vunpack.i.l.bf16 %v10780_v19 }
 0x635   : > { %v7093_v7 = vpack.i.bf16 %v6776_v53, %v3050_v20  ;;  %v6917_v53 = vunpack.i.h.bf16 %v10835_v50  ;;  %v6831_v50 = vunpack.i.l.bf16 %v10640_v23 }
 0x636   : > { %v10900_v49 = vpop.permute.xlu1 %6984 }
 0x637   : > { %v3088_v47 = vsel %vm729_vm9, %v6916_v60, %v6917_v53  ;;  %v6842_v60 = vunpack.i.h.bf16 %v10648_v3  ;;  %v13580_v41 = vunpack.i.h.bf16 %v10900_v49 }
 0x638   : > { %v7203_v32 = vpack.i.bf16 %v6917_v53, %v3088_v47  ;;  %v10958_v62 = vpop.permute.xlu0 %6944  ;;  %v6866_v53 = vunpack.i.l.bf16 %v10751_v45 }
 0x639   : > { %13564 = vst [vmem:[#allocation15_spill] sm:$0xff] %v10958_v62 }
 0x63b   : > { %7159 = vrot.lane.b32.xlu1 %v7158_v37, %s7936_s21  ;;  %7089 = vrot.lane.b32.xlu0 %v7088_v44, %s7936_s21  ;;  %v13561_v44 = vunpack.i.l.bf16 %v10563_v39  ;;  %v13562_v39 = vunpack.i.l.bf16 %v10630_v59 }
 0x63c   : > { %7079 = vrot.lane.b32.xlu2 %v7078_v6, %s7936_s21  ;;  %v6827_v6 = vunpack.i.h.bf16 %v10630_v59  ;;  %v6852_v59 = vunpack.i.h.bf16 %v10780_v19  ;;  %v6747_v19 = vunpack.i.h.bf16 %v10704_v40 }
 0x63d   : > { %v2910_v37 = vsel %vm548_vm4, %v13561_v44, %v6802_v22 }
 0x63e   : > { %v7108_v10 = vpack.i.bf16 %v6802_v22, %v2910_v37  ;;  %v3084_v38 = vsel %vm729_vm9, %v13562_v39, %v6827_v6  ;;  %v2957_v46 = vsel %vm593_vm5, %v13565_v27, %v6852_v59  ;;  %v13566_v37 = vunpack.i.l.bf16 %v10648_v3 }
 0x63f   : > { %v7133_v52 = vpack.i.bf16 %v6827_v6, %v3084_v38  ;;  %v7148_v6 = vpack.i.bf16 %v6852_v59, %v2957_v46  ;;  %v6856_v39 = vunpack.i.l.bf16 %v10720_v58  ;;  %v13567_v3 = vunpack.i.h.bf16 %v10670_v56 }
 0x640   : > { %v13568_v58 = vunpack.i.h.bf16 %v10644_v63  ;;  %v6871_v27 = vunpack.i.l.bf16 %v10768_v21  ;;  %v13569_v63 = vunpack.i.l.bf16 %v10837_v25  ;;  %v6907_v21 = vunpack.i.h.bf16 %v10730_v11 }
 0x641   : > { %v3054_v38 = vsel %vm696_vm8, %v13567_v3, %v6866_v53  ;;  %v13572_v3 = vunpack.i.l.bf16 %v10680_v4  ;;  %v6722_v11 = vunpack.i.h.bf16 %v10634_v36 }
 0x642   : > { %v2990_v56 = vsel %vm630_vm6, %v13568_v58, %v6856_v39  ;;  %v6786_v58 = vunpack.i.l.bf16 %v10650_v17 }
 0x643   : > { %7174 = vrot.lane.b32.xlu1 %v7173_v18, %s7936_s21  ;;  %7104 = vrot.lane.b32.xlu0 %v7103_v55, %s7936_s21  ;;  %v13563_v55 = vunpack.i.l.bf16 %v10592_v51 }
 0x644   : > { %7094 = vrot.lane.b32.xlu2 %v7093_v7, %s7936_s21  ;;  %v6787_v7 = vunpack.i.h.bf16 %v10650_v17 }
 0x645   : > { %v10917_v35 = vpop.permute.xlu1 %6999  ;;  %v3020_v18 = vsel %vm663_vm7, %v13563_v55, %v6817_v0  ;;  %v10989_v55 = vpop.permute.xlu0 %6959 }
 0x646   : > { %v7123_v22 = vpack.i.bf16 %v6817_v0, %v3020_v18  ;;  %v3115_v51 = vsel %vm762_vm10, %v6787_v7, %v6831_v50 }
 0x64b   : > { %7189 = vrot.lane.b32.xlu1 %v7188_v54, %s7936_s21  ;;  %7119 = vrot.lane.b32.xlu0 %v7118_v1, %s7936_s21  ;;  %v2869_v1 = vsel %vm503_vm3, %v13566_v37, %v6842_v60  ;;  %v7218_v54 = vpack.i.bf16 %v3115_v51, %v6787_v7  ;;  %v7163_v7 = vpack.i.bf16 %v6866_v53, %v3054_v38  ;;  %v5304_v53 = vld [vmem:[%s13096_s3 + $0x60] sm:$0xff] }
 0x64c   : > { %7109 = vrot.lane.b32.xlu2 %v7108_v10, %s7936_s21  ;;  %v6876_v10 = vunpack.i.l.bf16 %v10783_v15  ;;  %v7138_v0 = vpack.i.bf16 %v6842_v60, %v2869_v1  ;;  %v6892_v60 = vunpack.i.h.bf16 %v10837_v25  ;;  %v7153_v51 = vpack.i.bf16 %v6856_v39, %v2990_v56 }
 0x64d   : > { %v10945_v33 = vpop.permute.xlu1 %7014  ;;  %v11009_v37 = vpop.permute.xlu0 %6974  ;;  %v6897_v25 = vunpack.i.h.bf16 %v10680_v4  ;;  %v3114_v4 = vsel %vm762_vm10, %v6722_v11, %v6786_v58 }
 0x64e   : > { %v10947_v20 = vpop.permute.xlu2 %6934  ;;  %v3118_v45 = vsel %vm762_vm10, %v6747_v19, %v6876_v10  ;;  %v2916_v46 = vsel %vm548_vm4, %v13569_v63, %v6892_v60  ;;  %v13227_v17 = vunpack.i.h.bf16 %v11009_v37 }
 0x64f   : > { %v7233_v59 = vpack.i.bf16 %v6876_v10, %v3118_v45  ;;  %v7178_v10 = vpack.i.bf16 %v6892_v60, %v2916_v46  ;;  %v2960_v38 = vsel %vm593_vm5, %v13572_v3, %v6897_v25  ;;  %v7213_v46 = vpack.i.bf16 %v6786_v58, %v3114_v4 }
 0x650   : > { %v7183_v56 = vpack.i.bf16 %v6897_v25, %v2960_v38  ;;  %v6832_v4 = vunpack.i.h.bf16 %v10640_v23 }
 0x653   : > { %7204 = vrot.lane.b32.xlu1 %v7203_v32, %s7936_s21  ;;  %7134 = vrot.lane.b32.xlu0 %v7133_v52, %s7936_s21 }
 0x654   : > { %7124 = vrot.lane.b32.xlu2 %v7123_v22, %s7936_s21 }
 0x656   : > { %v10967_v29 = vpop.permute.xlu1 %7029  ;;  %v10969_v44 = vpop.permute.xlu2 %6949 }
 0x657   : > { %v6951_v26 = vunpack.i.l.bf16 %v10969_v44 }
 0x65b   : > { %7219 = vrot.lane.b32.xlu1 %v7218_v54, %s7936_s21  ;;  %7149 = vrot.lane.b32.xlu0 %v7148_v6, %s7936_s21  ;;  %v13571_v54 = vunpack.i.h.bf16 %v10687_v28  ;;  %v3024_v28 = vsel %vm663_vm7, %v6906_v34, %v6907_v21 }
 0x65c   : > { %7139 = vrot.lane.b32.xlu2 %v7138_v0, %s7936_s21  ;;  %v7193_v45 = vpack.i.bf16 %v6907_v21, %v3024_v28 }
 0x65d   : > { %v3086_v6 = vsel %vm729_vm9, %v13571_v54, %v6871_v27  ;;  %v6746_v54 = vunpack.i.l.bf16 %v10704_v40 }
 0x65e   : > { %v10987_v47 = vpop.permute.xlu1 %7044  ;;  %v10993_v32 = vpop.permute.xlu2 %6964  ;;  %v7168_v0 = vpack.i.bf16 %v6871_v27, %v3086_v6  ;;  %v13226_v6 = vunpack.i.h.bf16 %v10830_v2 }
 0x65f   : > { %v13230_v18 = vunpack.i.h.bf16 %v10987_v47  ;;  %v7046_v52 = vunpack.i.l.bf16 %v10987_v47  ;;  %v3117_v3 = vsel %vm762_vm10, %v6746_v54, %v6747_v19 }
 0x660   : > { %v7228_v58 = vpack.i.bf16 %v3117_v3, %v6746_v54  ;;  %v6936_v3 = vunpack.i.l.bf16 %v10947_v20 }
 0x661   : > { %v3492_v22 = vsel %vm1095_vm11, %v7046_v52, %v13230_v18  ;;  %v11031_v52 = vpop.permute.xlu0 %6989  ;;  %v11206_v18 = vld [vmem:[#allocation4 + $0xd8] sm:$0xff] }
 0x662   : > { %3675 = vmatpush.msra.mxu1 %v3492_v22  ;;  %13575 = vst [vmem:[#allocation23_spill] sm:$0xff] %v11206_v18 }
 0x663   : > { %7234 = vrot.lane.b32.xlu1 %v7233_v59, %s7936_s21  ;;  %7164 = vrot.lane.b32.xlu0 %v7163_v7, %s7936_s21  ;;  %v6912_v7 = vunpack.i.h.bf16 %v10747_v42  ;;  %v13573_v59 = vunpack.i.l.bf16 %v10747_v42 }
 0x664   : > { %7154 = vrot.lane.b32.xlu2 %v7153_v51, %s7936_s21  ;;  %v6976_v51 = vunpack.i.l.bf16 %v11009_v37 }
 0x665   : > { %v3056_v22 = vsel %vm696_vm8, %v13573_v59, %v6912_v7 }
 0x666   : > { %v11011_v1 = vpop.permute.xlu2 %6979  ;;  %v3486_v25 = vsel %vm1095_vm11, %v6976_v51, %v13227_v17 }
 0x667   : > { %13570 = vst [vmem:[#allocation14_spill] sm:$0xff] %v11011_v1 }
 0x669   : > { %v11056_v21 = vpop.permute.xlu0 %7004 }
 0x66b   : > { %4316 = vperm.xlu1 %5626, %v5304_v53   ;;  %7179 = vrot.lane.b32.xlu0 %v7178_v10, %s7936_s21  ;;  %v6941_v53 = vunpack.i.l.bf16 %v10830_v2  ;;  %v7198_v10 = vpack.i.bf16 %v6912_v7, %v3056_v22  ;;  %v6921_v7 = vunpack.i.l.bf16 %v10898_v8 }
 0x66c   : > { %7169 = vrot.lane.b32.xlu2 %v7168_v0, %s7936_s21  ;;  %v6721_v0 = vunpack.i.l.bf16 %v10634_v36 }
 0x66d   : > { %v3483_v38 = vsel %vm1095_vm11, %v6941_v53, %v13226_v6 }
 0x66e   : > { %v11026_v39 = vpop.permute.xlu2 %6994  ;;  %v3113_v36 = vsel %vm762_vm10, %v6721_v0, %v6722_v11  ;;  %v3116_v11 = vsel %vm762_vm10, %v6831_v50, %v6832_v4 }
 0x66f   : > { %v7208_v59 = vpack.i.bf16 %v3113_v36, %v6721_v0  ;;  %v7223_v50 = vpack.i.bf16 %v6832_v4, %v3116_v11  ;;  %v6877_v0 = vunpack.i.h.bf16 %v10783_v15  ;;  %v13215_v11 = vunpack.i.h.bf16 %v10917_v35 }
 0x671   : > { %v11079_v40 = vpop.permute.xlu0 %7019 }
 0x672   : > { %v7021_v12 = vunpack.i.l.bf16 %v11079_v40 }
 0x673   : > { %7194 = vrot.lane.b32.xlu0 %v7193_v45, %s7936_s21 }
 0x674   : > { %7184 = vrot.lane.b32.xlu2 %v7183_v56, %s7936_s21  ;;  %v6922_v56 = vunpack.i.h.bf16 %v10898_v8  ;;  %v13222_v8 = vunpack.i.h.bf16 %v11056_v21 }
 0x675   : > { %v11038_v34 = vpop.permute.xlu1 %7059 }
 0x676   : > { %v11044_v60 = vpop.permute.xlu2 %7009  ;;  %v3120_v22 = vsel %vm762_vm10, %v6921_v7, %v6922_v56  ;;  %v13235_v17 = vunpack.i.h.bf16 %v11038_v34 }
 0x677   : > { %v13229_v27 = vunpack.i.h.bf16 %v11044_v60  ;;  %v7011_v63 = vunpack.i.l.bf16 %v11044_v60  ;;  %v7243_v53 = vpack.i.bf16 %v6922_v56, %v3120_v22 }
 0x679   : > { %v3489_v42 = vsel %vm1095_vm11, %v7011_v63, %v13229_v27  ;;  %v7006_v63 = vunpack.i.l.bf16 %v11056_v21 }
 0x67a   : > { %3676 = vmatpush.msra.mxu1 %v3489_v42  ;;  %v13221_v42 = vunpack.i.h.bf16 %v10878_v57 }
 0x67b   : > { %7214 = vrot.lane.b32.xlu0 %v7213_v46, %s7936_s21 }
 0x67c   : > { %7199 = vrot.lane.b32.xlu2 %v7198_v10, %s7936_s21  ;;  %3677 = vmatpush.msra.mxu1 %v3486_v25  ;;  %v6971_v10 = vunpack.i.l.bf16 %v10878_v57  ;;  %v13218_v25 = vunpack.i.h.bf16 %v10947_v20 }
 0x67d   : > { %v11064_v28 = vpop.permute.xlu1 %7069 }
 0x67e   : > { %v11072_v45 = vpop.permute.xlu2 %7024  ;;  %3678 = vmatpush.msra.mxu1 %v3483_v38  ;;  %v3477_v38 = vsel %vm1095_vm11, %v7006_v63, %v13222_v8  ;;  %v3474_v4 = vsel %vm1095_vm11, %v6971_v10, %v13221_v42  ;;  %v7001_v63 = vunpack.i.l.bf16 %v10917_v35  ;;  %v13217_v10 = vunpack.i.h.bf16 %v10993_v32 }
 0x67f   : > { %v7026_v27 = vunpack.i.l.bf16 %v11072_v45 }
 0x683   : > { %7229 = vrot.lane.b32.xlu0 %v7228_v58, %s7936_s21 }
 0x684   : > { %7209 = vrot.lane.b32.xlu2 %v7208_v59, %s7936_s21  ;;  %v3119_v59 = vsel %vm762_vm10, %v6877_v0, %v6921_v7  ;;  %v6966_v7 = vunpack.i.l.bf16 %v10993_v32 }
 0x685   : > { %v11082_v19 = vpop.permute.xlu1 %7084 }
 0x686   : > { %v11088_v51 = vpop.permute.xlu2 %7039 }
 0x687   : > { %v13225_v46 = vunpack.i.h.bf16 %v11088_v51  ;;  %v7041_v54 = vunpack.i.l.bf16 %v11088_v51 }
 0x689   : > { %v3480_v23 = vsel %vm1095_vm11, %v7041_v54, %v13225_v46  ;;  %v3471_v54 = vsel %vm1095_vm11, %v6936_v3, %v13218_v25  ;;  %v13234_v46 = vunpack.i.h.bf16 %v10989_v55 }
 0x68a   : > { %3679 = vmatpush.msra.mxu1 %v3480_v23  ;;  %v7238_v23 = vpack.i.bf16 %v3119_v59, %v6877_v0  ;;  %v6696_v0 = vunpack.i.l.bf16 %v10565_v30  ;;  %v3462_v59 = vsel %vm1095_vm11, %v6966_v7, %v13217_v10  ;;  %v6636_v10 = vunpack.i.l.bf16 %v10529_v9 }
 0x68b   : > { %7244 = vrot.lane.b32.xlu0 %v7243_v53, %s7936_s21 }
 0x68c   : > { %7224 = vrot.lane.b32.xlu2 %v7223_v50, %s7936_s21  ;;  %3680 = vmatpush.msra.mxu1 %v3477_v38  ;;  %v13219_v50 = vunpack.i.h.bf16 %v10933_v61  ;;  %v6931_v38 = vunpack.i.l.bf16 %v10933_v61 }
 0x68d   : > { %v11107_v36 = vpop.permute.xlu1 %7099  ;;  %v11109_v58 = vpop.permute.xlu0 %7034 }
 0x68e   : > { %v13216_v15 = vunpack.i.h.bf16 %v11109_v58  ;;  %v7036_v56 = vunpack.i.l.bf16 %v11109_v58  ;;  %v11117_v22 = vpop.permute.xlu2 %7054  ;;  %3681 = vmatpush.msra.mxu1 %v3474_v4  ;;  %v3465_v4 = vsel %vm1095_vm11, %v7001_v63, %v13215_v11  ;;  %v13223_v63 = vunpack.i.h.bf16 %v10524_v31 }
 0x68f   : > { %v13224_v11 = vunpack.i.h.bf16 %v10540_v5  ;;  %v13578_v13 = vunpack.i.h.bf16 %v11117_v22 }
 0x690   : > { %v3468_v53 = vsel %vm1095_vm11, %v7036_v56, %v13216_v15  ;;  %3682 = vmatpush.msra.mxu1 %v3471_v54  ;;  %v13220_v54 = vunpack.i.h.bf16 %v10565_v30  ;;  %v6656_v15 = vunpack.i.l.bf16 %v10540_v5 }
 0x692   : > { %3683 = vmatpush.msra.mxu1 %v3468_v53  ;;  %v3456_v7 = vsel %vm1095_vm11, %v6696_v0, %v13220_v54  ;;  %v13232_v0 = vunpack.i.h.bf16 %v10967_v29 }
 0x694   : > { %7239 = vrot.lane.b32.xlu2 %v7238_v23, %s7936_s21  ;;  %3684 = vmatpush.msra.mxu1 %v3465_v4  ;;  %v6676_v23 = vunpack.i.l.bf16 %v10524_v31  ;;  %v3459_v4 = vsel %vm1095_vm11, %v6931_v38, %v13219_v50 }
 0x695   : > { %v11135_v3 = vpop.permute.xlu1 %7114  ;;  %v11137_v56 = vpop.permute.xlu0 %7049 }
 0x696   : > { %v11144_v53 = vpop.permute.xlu2 %7079  ;;  %3685 = vmatpush.msra.mxu1 %v3462_v59  ;;  %v13228_v59 = vunpack.i.h.bf16 %v10529_v9  ;;  %v3453_v25 = vsel %vm1095_vm11, %v6676_v23, %v13223_v63  ;;  %v13231_v23 = vunpack.i.h.bf16 %v11026_v39  ;;  %v6996_v63 = vunpack.i.l.bf16 %v11026_v39 }
 0x698   : > { %3686 = vmatpush.msra.mxu1 %v3459_v4  ;;  %v3450_v4 = vsel %vm1095_vm11, %v6656_v15, %v13224_v11  ;;  %v3447_v15 = vsel %vm1095_vm11, %v6636_v10, %v13228_v59  ;;  %v7061_v10 = vunpack.i.l.bf16 %v11038_v34  ;;  %v13237_v59 = vunpack.i.h.bf16 %v11072_v45 }
 0x69a   : > { %3687 = vmatpush.msra.mxu1 %v3456_v7  ;;  %v7031_v7 = vunpack.i.l.bf16 %v10967_v29 }
 0x69c   : > { %3688 = vmatpush.msra.mxu1 %v3453_v25  ;;  %v11174_v25 = vld [vmem:[#allocation4 + $0xc0] sm:$0xff]  ;;  %v3537_v6 = vsel %vm1095_vm11, %v7031_v7, %v13232_v0  ;;  %v13253_v0 = vunpack.i.h.bf16 %v10958_v62 }
 0x69d   : > { %v11161_v38 = vpop.permute.xlu1 %7129  ;;  %v11163_v50 = vpop.permute.xlu0 %7064  ;;  %13574 = vst [vmem:[#allocation22_spill] sm:$0xff] %v11174_v25 }
 0x69e   : > { %v13233_v54 = vunpack.i.h.bf16 %v11163_v50  ;;  %v7066_v42 = vunpack.i.l.bf16 %v11163_v50  ;;  %v11172_v8 = vpop.permute.xlu2 %7094  ;;  %3689 = vmatpush.msra.mxu1 %v3450_v4  ;;  %v6961_v4 = vunpack.i.l.bf16 %v10989_v55 }
 0x6a0   : > { %v3540_v11 = vsel %vm1095_vm11, %v7066_v42, %v13233_v54  ;;  %3690 = vmatpush.msra.mxu1 %v3447_v15  ;;  %v3534_v42 = vsel %vm1095_vm11, %v6996_v63, %v13231_v23  ;;  %v13238_v63 = vunpack.i.h.bf16 %v11031_v52  ;;  %v6991_v23 = vunpack.i.l.bf16 %v11031_v52 }
 0x6a1   : > { %3704 = vmatpush.msra.mxu3 %v3540_v11  ;;  %3691 = vmatmul.f32.vlgmr.msra.gmra.mxu1 %v11174_v25  ;;  %v6956_v54 = vunpack.i.l.bf16 %v10857_v24  ;;  %v6946_v25 = vunpack.i.l.bf16 %v10958_v62 }
 0x6a3   : > { %3705 = vmatpush.msra.mxu3 %v3537_v6  ;;  %v3531_v6 = vsel %vm1095_vm11, %v6961_v4, %v13234_v46  ;;  %v3525_v4 = vsel %vm1095_vm11, %v7026_v27, %v13237_v59  ;;  %v7056_v46 = vunpack.i.l.bf16 %v11117_v22  ;;  %v13576_v27 = vunpack.i.h.bf16 %v10857_v24 }
 0x6a5   : > { %v11195_v11 = vpop.permute.xlu1 %7144  ;;  %v11197_v15 = vpop.permute.xlu0 %7074  ;;  %3706 = vmatpush.msra.mxu3 %v3534_v42  ;;  %v3528_v42 = vsel %vm1095_vm11, %v7061_v10, %v13235_v17  ;;  %v3522_v10 = vsel %vm1095_vm11, %v6991_v23, %v13238_v63  ;;  %v6986_v63 = vunpack.i.l.bf16 %v10900_v49  ;;  %v7051_v23 = vunpack.i.l.bf16 %v11137_v56 }
 0x6a6   : > { %v11204_v7 = vpop.permute.xlu2 %7109 }
 0x6a7   : > { %3707 = vmatpush.msra.mxu3 %v3531_v6  ;;  %v11235_v6 = vld [vmem:[#allocation4 + $0xf0] sm:$0xff] }
 0x6a8   : > { %13577 = vst [vmem:[#allocation25_spill] sm:$0xff] %v11235_v6 }
 0x6a9   : > { %3708 = vmatpush.msra.mxu3 %v3528_v42  ;;  %3694 = vmatmul.f32.gmra.mxu1 %v11206_v18  ;;  %v13583_v18 = vunpack.i.h.bf16 %v11137_v56 }
 0x6ab   : > { %3709 = vmatpush.msra.mxu3 %v3525_v4  ;;  %v3519_v4 = vsel %vm1095_vm11, %v6956_v54, %v13576_v27  ;;  %v13579_v54 = vunpack.i.h.bf16 %v11079_v40 }
 0x6ad   : > { %v11224_v42 = vpop.permute.xlu1 %7159  ;;  %v11226_v17 = vpop.permute.xlu0 %7089  ;;  %3710 = vmatpush.msra.mxu3 %v3522_v10  ;;  %v3516_v10 = vsel %vm1095_vm11, %v7056_v46, %v13578_v13  ;;  %v3513_v27 = vsel %vm1095_vm11, %v7021_v12, %v13579_v54  ;;  %v3510_v13 = vsel %vm1095_vm11, %v6986_v63, %v13580_v41  ;;  %v13581_v12 = vunpack.i.h.bf16 %v10969_v44 }
 0x6ae   : > { %v11233_v59 = vpop.permute.xlu2 %7124  ;;  %v13250_v41 = vunpack.i.h.bf16 %v11011_v1  ;;  %v6981_v63 = vunpack.i.l.bf16 %v11011_v1 }
 0x6af   : > { %3711 = vmatpush.msra.mxu3 %v3519_v4  ;;  %v3507_v54 = vsel %vm1095_vm11, %v6951_v26, %v13581_v12  ;;  %v11264_v4 = vld [vmem:[#allocation4 + $0x108] sm:$0xff]  ;;  %v13584_v26 = vunpack.i.h.bf16 %v10945_v33 }
 0x6b0   : > { %13582 = vst [vmem:[#allocation7_spill] sm:$0xff] %v11264_v4 }
 0x6b1   : > { %3712 = vmatpush.msra.mxu3 %v3516_v10  ;;  %3697 = vmatmul.f32.gmra.mxu1 %v11235_v6  ;;  %v7016_v6 = vunpack.i.l.bf16 %v10945_v33 }
 0x6b3   : > { %3713 = vmatpush.msra.mxu3 %v3513_v27  ;;  %v3501_v12 = vsel %vm1095_vm11, %v7016_v6, %v13584_v26 }
 0x6b5   : > { %v11253_v46 = vpop.permute.xlu1 %7174  ;;  %v11255_v10 = vpop.permute.xlu0 %7104  ;;  %3714 = vmatpush.msra.mxu3 %v3510_v13  ;;  %v3504_v13 = vsel %vm1095_vm11, %v7051_v23, %v13583_v18  ;;  %v11284_v18 = vld [vmem:[#allocation4 + $0xc8] sm:$0xff]  ;;  %v3495_v23 = vsel %vm1095_vm11, %v6946_v25, %v13253_v0  ;;  %v13588_v25 = vunpack.i.h.bf16 %v11163_v50  ;;  %v13262_v0 = vunpack.i.l.bf16 %v11107_v36  ;;  %v11322_v50 = vld [vmem:[#allocation4 + $0xf8] sm:$0xff] }
 0x6b6   : > { %v11262_v27 = vpop.permute.xlu2 %7139  ;;  %13585 = vst [vmem:[#allocation21_spill] sm:$0xff] %v11284_v18 }
 0x6b7   : > { %3715 = vmatpush.msra.mxu3 %v3507_v54  ;;  %v3498_v54 = vsel %vm1095_vm11, %v6981_v63, %v13250_v41  ;;  %v11296_v63 = vld [vmem:[#allocation4 + $0xe0] sm:$0xff] }
 0x6b8   : > { %13587 = vst [vmem:[#allocation18_spill] sm:$0xff] %v11296_v63 }
 0x6b9   : > { %3716 = vmatpush.msra.mxu3 %v3504_v13  ;;  %3700 = vmatmul.f32.gmra.mxu1 %v11264_v4 }
 0x6bb   : > { %3717 = vmatpush.msra.mxu3 %v3501_v12 }
 0x6bd   : > { %v11280_v9 = vpop.permute.xlu1 %7189  ;;  %v11282_v5 = vpop.permute.xlu0 %7119  ;;  %3718 = vmatpush.msra.mxu3 %v3498_v54 }
 0x6be   : > { %v11289_v13 = vpop.permute.xlu2 %7154 }
 0x6bf   : > { %3719 = vmatpush.msra.mxu3 %v3495_v23 }
 0x6c0   : > { %3720 = vmatmul.f32.vlgmr.msra.gmra.mxu3 %v11284_v18  ;;  %v13589_v18 = vunpack.i.h.bf16 %v10967_v29 }
 0x6c5   : > { %v11292_v6 = vpop.permute.xlu1 %7204  ;;  %v11294_v26 = vpop.permute.xlu0 %7134 }
 0x6c6   : > { %13586 = vst [vmem:[#allocation16_spill] sm:$0xff] %v11292_v6  ;;  %v7206_v12 = vunpack.i.l.bf16 %v11292_v6  ;;  %v11299_v54 = vpop.permute.xlu2 %7169  ;;  %v13263_v4 = vunpack.i.l.bf16 %v11294_v26 }
 0x6c7   : > { %v7171_v41 = vunpack.i.l.bf16 %v11299_v54 }
 0x6c8   : > { %3723 = vmatmul.f32.gmra.mxu3 %v11296_v63  ;;  %v3541_v23 = vsel %vm1095_vm11, %v13588_v25, %v7206_v12  ;;  %v13590_v63 = vunpack.i.h.bf16 %v11026_v39  ;;  %v13591_v25 = vunpack.i.h.bf16 %v10989_v55  ;;  %v13266_v55 = vunpack.i.l.bf16 %v11144_v53 }
 0x6c9   : > { %3791 = vmatpush.msrb.mxu1 %v3541_v23  ;;  %v3538_v62 = vsel %vm1095_vm11, %v13589_v18, %v7171_v41  ;;  %v13265_v18 = vunpack.i.l.bf16 %v11135_v3 }
 0x6ca   : > { %v3535_v1 = vsel %vm1095_vm11, %v13590_v63, %v13263_v4  ;;  %v3532_v29 = vsel %vm1095_vm11, %v13591_v25, %v13262_v0  ;;  %v13593_v25 = vunpack.i.h.bf16 %v11044_v60  ;;  %v11348_v4 = vld [vmem:[#allocation4 + $0x110] sm:$0xff] }
 0x6cb   : > { %3792 = vmatpush.msrb.mxu1 %v3538_v62 }
 0x6cd   : > { %v11320_v6 = vpop.permute.xlu0 %7149  ;;  %3793 = vmatpush.msrb.mxu1 %v3535_v1  ;;  %v13592_v1 = vunpack.i.h.bf16 %v10987_v47  ;;  %v13594_v47 = vunpack.i.h.bf16 %v11009_v37  ;;  %v7131_v37 = vunpack.i.l.bf16 %v11161_v38 }
 0x6ce   : > { %v11329_v23 = vpop.permute.xlu2 %7184  ;;  %v13267_v39 = vunpack.i.l.bf16 %v11320_v6 }
 0x6cf   : > { %3794 = vmatpush.msrb.mxu1 %v3532_v29  ;;  %v13264_v62 = vunpack.i.l.bf16 %v11329_v23 }
 0x6d0   : > { %3726 = vmatmul.f32.gmra.mxu3 %v11322_v50  ;;  %v3490_v29 = vsel %vm1095_vm11, %v13593_v25, %v13267_v39  ;;  %v13595_v25 = vunpack.i.h.bf16 %v10830_v2  ;;  %v13597_v2 = vunpack.i.h.bf16 %v11072_v45  ;;  %v13271_v45 = vunpack.i.l.bf16 %v11204_v7 }
 0x6d1   : > { %v3493_v63 = vsel %vm1095_vm11, %v13592_v1, %v13264_v62  ;;  %v3487_v1 = vsel %vm1095_vm11, %v13594_v47, %v13265_v18  ;;  %v13596_v47 = vunpack.i.h.bf16 %v11038_v34  ;;  %v13272_v18 = vunpack.i.l.bf16 %v11172_v8 }
 0x6d2   : > { %3762 = vmatpush.msrb.mxu0 %v3493_v63  ;;  %v13598_v34 = vunpack.i.h.bf16 %v11031_v52  ;;  %v13273_v52 = vunpack.i.l.bf16 %v11197_v15 }
 0x6d4   : > { %3763 = vmatpush.msrb.mxu0 %v3490_v29  ;;  %v3484_v29 = vsel %vm1095_vm11, %v13595_v25, %v13266_v55 }
 0x6d5   : > { %v11346_v0 = vpop.permute.xlu0 %7164 }
 0x6d6   : > { %v11355_v63 = vpop.permute.xlu2 %7199  ;;  %3764 = vmatpush.msrb.mxu0 %v3487_v1  ;;  %v13268_v60 = vunpack.i.l.bf16 %v11346_v0 }
 0x6d7   : > { %v13269_v62 = vunpack.i.l.bf16 %v11355_v63 }
 0x6d8   : > { %3729 = vmatmul.f32.gmra.mxu3 %v11348_v4  ;;  %3765 = vmatpush.msrb.mxu0 %v3484_v29  ;;  %v3526_v25 = vsel %vm1095_vm11, %v13597_v2, %v13268_v60  ;;  %v13270_v29 = vunpack.i.l.bf16 %v11195_v11  ;;  %v13599_v2 = vunpack.i.h.bf16 %v10857_v24  ;;  %v13600_v60 = vunpack.i.h.bf16 %v11088_v51 }
 0x6d9   : > { %v3529_v1 = vsel %vm1095_vm11, %v13596_v47, %v13269_v62  ;;  %v3523_v47 = vsel %vm1095_vm11, %v13598_v34, %v7131_v37  ;;  %v13601_v34 = vunpack.i.h.bf16 %v11056_v21  ;;  %v13283_v24 = vunpack.i.l.bf16 %v11253_v46 }
 0x6da   : > { %3795 = vmatpush.msrb.mxu1 %v3529_v1 }
 0x6dc   : > { %3796 = vmatpush.msrb.mxu1 %v3526_v25  ;;  %v3520_v25 = vsel %vm1095_vm11, %v13599_v2, %v13272_v18  ;;  %v13602_v2 = vunpack.i.h.bf16 %v10878_v57  ;;  %v13287_v57 = vunpack.i.l.bf16 %v11233_v59  ;;  %v13605_v18 = vunpack.i.h.bf16 %v11117_v22 }
 0x6dd   : > { %v11377_v55 = vpop.permute.xlu0 %7179 }
 0x6de   : > { %v7181_v39 = vunpack.i.l.bf16 %v11377_v55  ;;  %v11386_v1 = vpop.permute.xlu2 %7209  ;;  %3797 = vmatpush.msrb.mxu1 %v3523_v47  ;;  %v3478_v47 = vsel %vm1095_vm11, %v13601_v34, %v13270_v29  ;;  %v3475_v51 = vsel %vm1095_vm11, %v13602_v2, %v13271_v45  ;;  %v13603_v34 = vunpack.i.h.bf16 %v10947_v20 }
 0x6df   : > { %v13276_v2 = vunpack.i.l.bf16 %v11255_v10 }
 0x6e0   : > { %v3481_v62 = vsel %vm1095_vm11, %v13600_v60, %v7181_v39  ;;  %3798 = vmatpush.msrb.mxu1 %v3520_v25  ;;  %v13274_v25 = vunpack.i.l.bf16 %v11262_v27 }
 0x6e1   : > { %3766 = vmatpush.msrb.mxu0 %v3481_v62  ;;  %v7161_v62 = vunpack.i.l.bf16 %v11224_v42 }
 0x6e3   : > { %3767 = vmatpush.msrb.mxu0 %v3478_v47  ;;  %v3472_v47 = vsel %vm1095_vm11, %v13603_v34, %v13273_v52  ;;  %v13275_v34 = vunpack.i.l.bf16 %v11064_v28  ;;  %v13606_v52 = vunpack.i.h.bf16 %v10917_v35 }
 0x6e5   : > { %v11411_v60 = vpop.permute.xlu0 %7194  ;;  %3768 = vmatpush.msrb.mxu0 %v3475_v51  ;;  %v13604_v51 = vunpack.i.h.bf16 %v11109_v58  ;;  %v3466_v58 = vsel %vm1095_vm11, %v13606_v52, %v13274_v25  ;;  %v13609_v52 = vunpack.i.h.bf16 %v10900_v49 }
 0x6e6   : > { %v7196_v21 = vunpack.i.l.bf16 %v11411_v60  ;;  %v11421_v29 = vpop.permute.xlu2 %7224 }
 0x6e7   : > { %3769 = vmatpush.msrb.mxu0 %v3472_v47  ;;  %v3469_v45 = vsel %vm1095_vm11, %v13604_v51, %v13283_v24  ;;  %v13279_v47 = vunpack.i.l.bf16 %v11226_v17  ;;  %v13607_v51 = vunpack.i.h.bf16 %v11079_v40  ;;  %v3511_v40 = vsel %vm1095_vm11, %v13609_v52, %v13287_v57 }
 0x6e8   : > { %v3517_v20 = vsel %vm1095_vm11, %v13605_v18, %v7196_v21  ;;  %v13277_v18 = vunpack.i.l.bf16 %v10926_v48  ;;  %v13281_v52 = vunpack.i.l.bf16 %v11289_v13  ;;  %v7137_v24 = vunpack.i.h.bf16 %v11294_v26 }
 0x6e9   : > { %3770 = vmatpush.msrb.mxu0 %v3469_v45  ;;  %3799 = vmatpush.msrb.mxu1 %v3517_v20  ;;  %v3514_v22 = vsel %vm1095_vm11, %v13607_v51, %v7161_v62  ;;  %v13278_v45 = vunpack.i.l.bf16 %v11280_v9  ;;  %v13608_v20 = vunpack.i.h.bf16 %v10993_v32  ;;  %v13610_v51 = vunpack.i.h.bf16 %v10933_v61 }
 0x6eb   : > { %3771 = vmatpush.msrb.mxu0 %v3466_v58  ;;  %3800 = vmatpush.msrb.mxu1 %v3514_v22  ;;  %v3463_v35 = vsel %vm1095_vm11, %v13608_v20, %v13276_v2  ;;  %v13280_v58 = vunpack.i.l.bf16 %v10806_v14  ;;  %v3460_v32 = vsel %vm1095_vm11, %v13610_v51, %v13275_v34  ;;  %v13611_v22 = vunpack.i.h.bf16 %v10969_v44 }
 0x6ec   : > { %v13282_v20 = vunpack.i.l.bf16 %v10682_v16  ;;  %v13612_v51 = vunpack.i.h.bf16 %v10565_v30  ;;  %v13284_v2 = vunpack.i.l.bf16 %v10554_v43 }
 0x6ed   : > { %v11459_v25 = vpop.permute.xlu0 %7214  ;;  %3772 = vmatpush.msrb.mxu0 %v3463_v35  ;;  %3801 = vmatpush.msrb.mxu1 %v3511_v40  ;;  %v3508_v49 = vsel %vm1095_vm11, %v13611_v22, %v13279_v47  ;;  %v13613_v22 = vunpack.i.h.bf16 %v11137_v56 }
 0x6ee   : > { %v11474_v35 = vpop.permute.xlu2 %7239  ;;  %v3457_v44 = vsel %vm1095_vm11, %v13612_v51, %v13277_v18  ;;  %v13614_v51 = vunpack.i.h.bf16 %v10524_v31  ;;  %v13616_v18 = vld [vmem:[#allocation16_spill] sm:$0xff] }
 0x6ef   : > { %3773 = vmatpush.msrb.mxu0 %v3460_v32  ;;  %3802 = vmatpush.msrb.mxu1 %v3508_v49  ;;  %v7242_v40 = vunpack.i.h.bf16 %v11474_v35  ;;  %v7241_v61 = vunpack.i.l.bf16 %v11474_v35  ;;  %v3505_v34 = vsel %vm1095_vm11, %v13613_v22, %v13278_v45  ;;  %v13285_v32 = vunpack.i.l.bf16 %v11282_v5  ;;  %v11490_v49 = vpop.permute.xlu1 %7219 }
 0x6f0   : > { %v3454_v56 = vsel %vm1095_vm11, %v13614_v51, %v13280_v58  ;;  %v13286_v22 = vunpack.i.l.bf16 %v11082_v19  ;;  %v7207_v45 = vunpack.i.h.bf16 %v13616_v18  ;;  %v7172_v51 = vunpack.i.h.bf16 %v11299_v54 }
 0x6f1   : > { %3774 = vmatpush.msrb.mxu0 %v3457_v44  ;;  %3803 = vmatpush.msrb.mxu1 %v3505_v34  ;;  %v3552_v30 = vsel %vm1095_vm11, %v7241_v61, %v7242_v40  ;;  %v13615_v34 = vunpack.i.h.bf16 %v10945_v33  ;;  %v13617_v61 = vld [vmem:[#allocation19_spill] sm:$0xff]  ;;  %v7097_v35 = vunpack.i.h.bf16 %v11172_v8 }
 0x6f2   : > { %3745 = vmatpush.msrb.mxu2 %v3552_v30  ;;  %v13618_v47 = vunpack.i.h.bf16 %v13617_v61  ;;  %v13619_v30 = vld [vmem:[#allocation14_spill] sm:$0xff]  ;;  %v7222_v61 = vunpack.i.h.bf16 %v11490_v49 }
 0x6f3   : > { %3775 = vmatpush.msrb.mxu0 %v3454_v56  ;;  %v3502_v44 = vsel %vm1095_vm11, %v13615_v34, %v13281_v52  ;;  %v13620_v33 = vunpack.i.h.bf16 %v13619_v30  ;;  %v13621_v34 = vld [vmem:[#allocation8_spill] sm:$0xff]  ;;  %v13623_v30 = vld [vmem:[#allocation15_spill] sm:$0xff] }
 0x6f4   : > { %3804 = vmatpush.msrb.mxu1 %v3502_v44  ;;  %v3451_v31 = vsel %vm1095_vm11, %v13618_v47, %v13282_v20  ;;  %v13622_v44 = vunpack.i.h.bf16 %v13621_v34  ;;  %v7221_v47 = vunpack.i.l.bf16 %v11490_v49 }
 0x6f5   : > { %v11513_v58 = vpop.permute.xlu0 %7229  ;;  %3776 = vmatpush.msrb.mxu0 %v3451_v31  ;;  %v3499_v56 = vsel %vm1095_vm11, %v13620_v33, %v13285_v32  ;;  %v13624_v33 = vunpack.i.h.bf16 %v13623_v30  ;;  %v13625_v32 = vld [vmem:[#allocation22_spill] sm:$0xff]  ;;  %v7187_v30 = vunpack.i.h.bf16 %v11329_v23 }
 0x6f6   : > { %v3448_v52 = vsel %vm1095_vm11, %v13622_v44, %v13284_v2  ;;  %v7232_v20 = vunpack.i.h.bf16 %v11513_v58  ;;  %v7231_v31 = vunpack.i.l.bf16 %v11513_v58  ;;  %3805 = vmatpush.msrb.mxu1 %v3499_v56  ;;  %v7212_v44 = vunpack.i.h.bf16 %v11386_v1 }
 0x6f7   : > { %3777 = vmatpush.msrb.mxu0 %v3448_v52  ;;  %v3496_v34 = vsel %vm1095_vm11, %v13624_v33, %v13286_v22  ;;  %v7211_v2 = vunpack.i.l.bf16 %v11386_v1  ;;  %v3542_v58 = vsel %vm1095_vm11, %v7206_v12, %v7207_v45  ;;  %v7102_v52 = vunpack.i.h.bf16 %v11107_v36  ;;  %v13626_v33 = vld [vmem:[#allocation21_spill] sm:$0xff] }
 0x6f8   : > { %3806 = vmatpush.msrb.mxu1 %v3496_v34  ;;  %3778 = vmatmul.f32.vlgmr.msrb.gmra.mxu0 %v13625_v32  ;;  %v3549_v56 = vsel %vm1095_vm11, %v7231_v31, %v7232_v20  ;;  %v3539_v34 = vsel %vm1095_vm11, %v7171_v41, %v7172_v51  ;;  %v3546_v18 = vsel %vm1095_vm11, %v7221_v47, %v7222_v61  ;;  %v7152_v12 = vunpack.i.h.bf16 %v11320_v6  ;;  %v11552_v45 = vld [vmem:[#allocation4 + $0xd0] sm:$0xff] }
 0x6f9   : > { %3878 = vmatpush.msra.mxu0 %v3542_v58  ;;  %3746 = vmatpush.msrb.mxu2 %v3549_v56  ;;  %v7202_v31 = vunpack.i.h.bf16 %v11355_v63  ;;  %v7235_v58 = vpop.permute.xlu1 %7234  ;;  %v13627_v56 = vunpack.i.l.bf16 %v11294_v26  ;;  %v3543_v41 = vsel %vm1095_vm11, %v7211_v2, %v7212_v44  ;;  %v13628_v51 = vunpack.i.l.bf16 %v11107_v36 }
 0x6fa   : > { %3807 = vmatmul.f32.vlgmr.msrb.gmra.mxu1 %v13626_v33  ;;  %v13629_v26 = vunpack.i.l.bf16 %v11329_v23  ;;  %v7082_v2 = vunpack.i.h.bf16 %v11144_v53  ;;  %v13630_v36 = vunpack.i.l.bf16 %v11320_v6  ;;  %v7227_v6 = vunpack.i.h.bf16 %v11421_v29 }
 0x6fb   : > { %3879 = vmatpush.msra.mxu0 %v3539_v34  ;;  %3747 = vmatpush.msrb.mxu2 %v3546_v18  ;;  %v3536_v22 = vsel %vm1095_vm11, %v13627_v56, %v7137_v24  ;;  %v3533_v47 = vsel %vm1095_vm11, %v13628_v51, %v7102_v52  ;;  %v7117_v34 = vunpack.i.h.bf16 %v11135_v3  ;;  %v7167_v56 = vunpack.i.h.bf16 %v11346_v0 }
 0x6fc   : > { %v3494_v24 = vsel %vm1095_vm11, %v13629_v26, %v7187_v30  ;;  %v3491_v52 = vsel %vm1095_vm11, %v13630_v36, %v7152_v12  ;;  %v13632_v51 = vunpack.i.l.bf16 %v11355_v63  ;;  %v13633_v63 = vunpack.i.l.bf16 %v11135_v3 }
 0x6fd   : > { %3880 = vmatpush.msra.mxu0 %v3536_v22  ;;  %v7245_v54 = vpop.permute.xlu0 %7244  ;;  %3748 = vmatpush.msrb.mxu2 %v3543_v41  ;;  %v7237_v22 = vunpack.i.h.bf16 %v7235_v58  ;;  %v7236_v41 = vunpack.i.l.bf16 %v7235_v58  ;;  %v7216_v36 = vunpack.i.l.bf16 %v11459_v25 }
 0x6fe   : > { %v7247_v18 = vunpack.i.h.bf16 %v7245_v54  ;;  %v7246_v57 = vunpack.i.l.bf16 %v7245_v54  ;;  %5292 = vmatmul.msk.f32.vlgmr.msrb.gmra.mxu2 %vm1312_vm12, %v11552_v45  ;;  %v13631_v54 = vld [vmem:[#allocation23_spill] sm:$0xff]  ;;  %v3530_v23 = vsel %vm1095_vm11, %v13632_v51, %v7202_v31  ;;  %v3488_v12 = vsel %vm1095_vm11, %v13633_v63, %v7117_v34  ;;  %v13634_v31 = vld [vmem:[#allocation18_spill] sm:$0xff]  ;;  %v11602_v51 = vld [vmem:[#allocation4 + $0xe8] sm:$0xff] }
 0x6ff   : > { %3849 = vmatpush.msra.mxu2 %v3494_v24  ;;  %3881 = vmatpush.msra.mxu0 %v3533_v47  ;;  %v7132_v24 = vunpack.i.h.bf16 %v11161_v38  ;;  %v7226_v47 = vunpack.i.l.bf16 %v11421_v29  ;;  %v7217_v29 = vunpack.i.h.bf16 %v11459_v25  ;;  %v3551_v3 = vsel %vm1095_vm11, %v7236_v41, %v7237_v22 }
 0x700   : > { %3781 = vmatmul.f32.gmra.mxu0 %v13631_v54  ;;  %v3553_v30 = vsel %vm1095_vm11, %v7242_v40, %v7246_v57  ;;  %v3554_v26 = vsel %vm1095_vm11, %v7246_v57, %v7247_v18  ;;  %v7182_v40 = vunpack.i.h.bf16 %v11377_v55  ;;  %v13635_v57 = vunpack.i.l.bf16 %v11346_v0  ;;  %v13638_v55 = vld [vmem:[#allocation25_spill] sm:$0xff] }
 0x701   : > { %3850 = vmatpush.msra.mxu2 %v3491_v52  ;;  %3882 = vmatpush.msra.mxu0 %v3530_v23  ;;  %v3550_v18 = vsel %vm1095_vm11, %v7232_v20, %v7236_v41  ;;  %v13636_v34 = vunpack.i.l.bf16 %v11144_v53  ;;  %v3524_v0 = vsel %vm1095_vm11, %v7131_v37, %v7132_v24  ;;  %v3547_v25 = vsel %vm1095_vm11, %v7222_v61, %v7226_v47 }
 0x702   : > { %3832 = vmatpush.msrb.mxu3 %v3553_v30  ;;  %3919 = vmatpush.msra.mxu1 %v3554_v26  ;;  %v3527_v58 = vsel %vm1095_vm11, %v13635_v57, %v7167_v56  ;;  %v7147_v20 = vunpack.i.h.bf16 %v11195_v11  ;;  %v7197_v22 = vunpack.i.h.bf16 %v11411_v60  ;;  %v3548_v53 = vsel %vm1095_vm11, %v7226_v47, %v7227_v6  ;;  %v3130_v60 = vld [vmem:[#allocation4 + $0x100] sm:$0xff] }
 0x703   : > { %3810 = vmatmul.f32.gmra.mxu1 %v13634_v31  ;;  %3851 = vmatpush.msra.mxu2 %v3488_v12  ;;  %v3485_v52 = vsel %vm1095_vm11, %v13636_v34, %v7082_v2  ;;  %v3482_v38 = vsel %vm1095_vm11, %v7181_v39, %v7182_v40  ;;  %v13637_v37 = vunpack.i.l.bf16 %v11172_v8  ;;  %v7112_v61 = vunpack.i.h.bf16 %v11204_v7 }
 0x704   : > { %3883 = vmatpush.msra.mxu0 %v3527_v58  ;;  %3833 = vmatpush.msrb.mxu3 %v3550_v18  ;;  %v7162_v2 = vunpack.i.h.bf16 %v11224_v42  ;;  %v3544_v56 = vsel %vm1095_vm11, %v7212_v44, %v7216_v36  ;;  %v3545_v41 = vsel %vm1095_vm11, %v7216_v36, %v7217_v29  ;;  %v7077_v39 = vunpack.i.h.bf16 %v11197_v15  ;;  %v13645_v29 = vld [vmem:[#allocation7_spill] sm:$0xff] }
 0x705   : > { %3920 = vmatpush.msra.mxu1 %v3551_v3  ;;  %3852 = vmatpush.msra.mxu2 %v3485_v52  ;;  %v3521_v49 = vsel %vm1095_vm11, %v13637_v37, %v7097_v35  ;;  %v7127_v8 = vunpack.i.h.bf16 %v11233_v59  ;;  %v13639_v23 = vunpack.i.l.bf16 %v11195_v11  ;;  %v3518_v1 = vsel %vm1095_vm11, %v7196_v21, %v7197_v22 }
 0x706   : > { %3884 = vmatpush.msra.mxu0 %v3524_v0  ;;  %3834 = vmatpush.msrb.mxu3 %v3547_v25  ;;  %v7092_v44 = vunpack.i.h.bf16 %v11226_v17  ;;  %v7177_v26 = vunpack.i.h.bf16 %v11253_v46  ;;  %v13640_v24 = vunpack.i.l.bf16 %v11204_v7  ;;  %v3515_v11 = vsel %vm1095_vm11, %v7161_v62, %v7162_v2 }
 0x707   : > { %3921 = vmatpush.msra.mxu1 %v3548_v53  ;;  %5293 = vmatmul.msk.f32.gmra.mxu2 %vm1312_vm12, %v11602_v51  ;;  %v3479_v30 = vsel %vm1095_vm11, %v13639_v23, %v7147_v20  ;;  %v7142_v21 = vunpack.i.h.bf16 %v11262_v27  ;;  %v7192_v6 = vunpack.i.h.bf16 %v11280_v9  ;;  %v13641_v63 = vunpack.i.l.bf16 %v11197_v15 }
 0x708   : > { %3853 = vmatpush.msra.mxu2 %v3482_v38  ;;  %3885 = vmatpush.msra.mxu0 %v3521_v49  ;;  %v3476_v47 = vsel %vm1095_vm11, %v13640_v24, %v7112_v61  ;;  %v13642_v35 = vunpack.i.l.bf16 %v11233_v59  ;;  %v7107_v42 = vunpack.i.h.bf16 %v11255_v10  ;;  %v7157_v62 = vunpack.i.h.bf16 %v11289_v13 }
 0x709   : > { %3835 = vmatpush.msrb.mxu3 %v3544_v56  ;;  %3922 = vmatpush.msra.mxu1 %v3545_v41  ;;  %v3473_v12 = vsel %vm1095_vm11, %v13641_v63, %v7077_v39  ;;  %v13643_v40 = vunpack.i.l.bf16 %v11253_v46  ;;  %v13644_v15 = vunpack.i.l.bf16 %v11226_v17  ;;  %v7072_v59 = vunpack.i.h.bf16 %v11064_v28  ;;  %v11731_v63 = vld [vmem:[#allocation2 + $0x40] sm:$0xff] }
 0x70a   : > { %3784 = vmatmul.f32.gmra.mxu0 %v13638_v55  ;;  %5296 = vmatmul.msk.f32.vlgmr.msrb.gmra.mxu3 %vm1312_vm12, %v11552_v45  ;;  %v3512_v7 = vsel %vm1095_vm11, %v13642_v35, %v7127_v8  ;;  %v7122_v18 = vunpack.i.h.bf16 %v11282_v5  ;;  %v13646_v36 = vunpack.i.l.bf16 %v11262_v27  ;;  %v13647_v3 = vunpack.i.l.bf16 %v11280_v9  ;;  %v3133_v9 = vld [vmem:[#allocation4 + $0x118] sm:$0xff] }
 0x70b   : > { %3854 = vmatpush.msra.mxu2 %v3479_v30  ;;  %3886 = vmatpush.msra.mxu0 %v3518_v1  ;;  %v3470_v57 = vsel %vm1095_vm11, %v13643_v40, %v7177_v26  ;;  %v3509_v58 = vsel %vm1095_vm11, %v13644_v15, %v7092_v44  ;;  %v6927_v34 = vunpack.i.h.bf16 %v10926_v48  ;;  %v7087_v52 = vunpack.i.h.bf16 %v11082_v19 }
 0x70c   : > { %3813 = vmatmul.f32.gmra.mxu1 %v11322_v50  ;;  %v3467_v46 = vsel %vm1095_vm11, %v13646_v36, %v7142_v21  ;;  %v3506_v17 = vsel %vm1095_vm11, %v13647_v3, %v7192_v6  ;;  %v13648_v0 = vunpack.i.l.bf16 %v11255_v10  ;;  %v13649_v27 = vunpack.i.l.bf16 %v11289_v13 }
 0x70d   : > { %3855 = vmatpush.msra.mxu2 %v3476_v47  ;;  %3887 = vmatpush.msra.mxu0 %v3515_v11  ;;  %v6882_v22 = vunpack.i.h.bf16 %v10806_v14  ;;  %v13650_v53 = vunpack.i.l.bf16 %v11064_v28  ;;  %v13651_v37 = vunpack.i.l.bf16 %v11282_v5  ;;  %v6837_v10 = vunpack.i.h.bf16 %v10682_v16  ;;  %v13658_v47 = vld [vmem:[#allocation13_spill] sm:$0xff] }
 0x70e   : > { %v3464_v25 = vsel %vm1095_vm11, %v13648_v0, %v7107_v42  ;;  %v3503_v20 = vsel %vm1095_vm11, %v13649_v27, %v7157_v62  ;;  %v13652_v13 = vunpack.i.l.bf16 %v10926_v48  ;;  %v13653_v2 = vunpack.i.l.bf16 %v11082_v19 }
 0x70f   : > { %3856 = vmatpush.msra.mxu2 %v3473_v12  ;;  %3888 = vmatpush.msra.mxu0 %v3512_v7  ;;  %v3461_v38 = vsel %vm1095_vm11, %v13650_v53, %v7072_v59  ;;  %v3500_v49 = vsel %vm1095_vm11, %v13651_v37, %v7122_v18  ;;  %v6792_v5 = vunpack.i.h.bf16 %v10554_v43  ;;  %v13654_v56 = vunpack.i.l.bf16 %v10806_v14 }
 0x710   : > { %5294 = vmatmul.msk.f32.gmra.mxu2 %vm1312_vm12, %v3130_v60  ;;  %v3458_v61 = vsel %vm1095_vm11, %v13652_v13, %v6927_v34  ;;  %v3497_v28 = vsel %vm1095_vm11, %v13653_v2, %v7087_v52  ;;  %v13655_v48 = vunpack.i.l.bf16 %v10682_v16  ;;  %v13656_v19 = vunpack.i.l.bf16 %v10554_v43  ;;  %v13661_v52 = vld [vmem:[#allocation24_spill] sm:$0xff] }
 0x711   : > { %3857 = vmatpush.msra.mxu2 %v3470_v57  ;;  %3889 = vmatpush.msra.mxu0 %v3509_v58  ;;  %v3455_v41 = vsel %vm1095_vm11, %v13654_v56, %v6882_v22 }
 0x712   : > { %3787 = vmatmul.f32.gmra.mxu0 %v13645_v29  ;;  %5297 = vmatmul.msk.f32.gmra.mxu3 %vm1312_vm12, %v11602_v51  ;;  %v3452_v39 = vsel %vm1095_vm11, %v13655_v48, %v6837_v10  ;;  %v3449_v8 = vsel %vm1095_vm11, %v13656_v19, %v6792_v5 }
 0x713   : > { %3858 = vmatpush.msra.mxu2 %v3467_v46  ;;  %3890 = vmatpush.msra.mxu0 %v3506_v17 }
 0x714   : > { %3816 = vmatmul.f32.gmra.mxu1 %v11348_v4 }
 0x715   : > { %3859 = vmatpush.msra.mxu2 %v3464_v25  ;;  %3891 = vmatpush.msra.mxu0 %v3503_v20 }
 0x717   : > { %3860 = vmatpush.msra.mxu2 %v3461_v38  ;;  %3892 = vmatpush.msra.mxu0 %v3500_v49  ;;  %v13662_v49 = vld [vmem:[#allocation11_spill] sm:$0xff] }
 0x718   : > { %5295 = vmatmul.msk.f32.gmra.mxu2 %vm1312_vm12, %v3133_v9 }
 0x719   : > { %3861 = vmatpush.msra.mxu2 %v3458_v61  ;;  %3893 = vmatpush.msra.mxu0 %v3497_v28 }
 0x71a   : > { %5298 = vmatmul.msk.f32.gmra.mxu3 %vm1312_vm12, %v3130_v60  ;;  %3894 = vmatmul.f32.vlgmr.msra.gmra.mxu0 %v13626_v33 }
 0x71b   : > { %3862 = vmatpush.msra.mxu2 %v3455_v41 }
 0x71c   : > { %5300 = vmatmul.msk.f32.vlgmr.msra.gmra.mxu1 %vm1312_vm12, %v11552_v45 }
 0x71d   : > { %3863 = vmatpush.msra.mxu2 %v3452_v39 }
 0x71e   : > { %v3692_v43 = vpop.f32.mrf.mxu1 }
 0x71f   : > { %3864 = vmatpush.msra.mxu2 %v3449_v8 }
 0x720   : > { %3865 = vmatmul.f32.vlgmr.msra.gmra.mxu2 %v13625_v32 }
 0x722   : > { %5299 = vmatmul.msk.f32.gmra.mxu3 %vm1312_vm12, %v3133_v9  ;;  %3897 = vmatmul.f32.gmra.mxu0 %v13634_v31 }
 0x724   : > { %5301 = vmatmul.msk.f32.gmra.mxu1 %vm1312_vm12, %v11602_v51 }
 0x726   : > { %v3695_v16 = vpop.f32.mrf.mxu1 }
 0x728   : > { %3868 = vmatmul.f32.gmra.mxu2 %v13631_v54 }
 0x72a   : > { %3900 = vmatmul.f32.gmra.mxu0 %v11322_v50  ;;  %v13657_v50 = vld [vmem:[#allocation10_spill] sm:$0xff] }
 0x72b   : > { %v3693_v23 = vadd.f32 %v3692_v43, %v13657_v50 }
 0x72c   : > { %5302 = vmatmul.msk.f32.gmra.mxu1 %vm1312_vm12, %v3130_v60  ;;  %v13659_v60 = vld [vmem:[#allocation9_spill] sm:$0xff] }
 0x72d   : > { %v3696_v21 = vadd.f32 %v3695_v16, %v13659_v60 }
 0x72e   : > { %v3698_v14 = vpop.f32.mrf.mxu1 }
 0x730   : > { %3871 = vmatmul.f32.gmra.mxu2 %v13638_v55 }
 0x732   : > { %3903 = vmatmul.f32.gmra.mxu0 %v11348_v4 }
 0x734   : > { %5303 = vmatmul.msk.f32.gmra.mxu1 %vm1312_vm12, %v3133_v9 }
 0x736   : > { %v3701_v33 = vpop.f32.mrf.mxu1 }
 0x737   : > { %v3702_v10 = vadd.f32 %v3701_v33, %v13662_v49 }
 0x738   : > { %3874 = vmatmul.f32.gmra.mxu2 %v13645_v29  ;;  %v13660_v29 = vld [vmem:[#allocation12_spill] sm:$0xff] }
 0x739   : > { %v3699_v36 = vadd.f32 %v3698_v14, %v13660_v29 }
 0x743   : > { %v3721_v32 = vpop.f32.mrf.mxu3 }
 0x744   : > { %v3722_v30 = vadd.f32 %v3721_v32, %v3693_v23 }
 0x74b   : > { %v3724_v45 = vpop.f32.mrf.mxu3 }
 0x74c   : > { %v3725_v35 = vadd.f32 %v3724_v45, %v3696_v21 }
 0x753   : > { %v3727_v51 = vpop.f32.mrf.mxu3 }
 0x754   : > { %v3728_v34 = vadd.f32 %v3727_v51, %v3699_v36 }
 0x75b   : > { %v3730_v24 = vpop.f32.mrf.mxu3 }
 0x75c   : > { %v3731_v28 = vadd.f32 %v3730_v24, %v3702_v10 }
 0x775   : > { %v3779_v31 = vpop.f32.mrf.mxu0 }
 0x776   : > { %v3780_v6 = vadd.f32 %v3779_v31, %v13657_v50 }
 0x777   : > { %v3808_v54 = vpop.f32.mrf.mxu1 }
 0x778   : > { %v3809_v40 = vadd.f32 %v3808_v54, %v3780_v6 }
 0x77d   : > { %v3782_v1 = vpop.f32.mrf.mxu0 }
 0x77e   : > { %v3783_v46 = vadd.f32 %v3782_v1, %v13659_v60 }
 0x780   : > { %v3811_v4 = vpop.f32.mrf.mxu1 }
 0x781   : > { %v3750_v55 = vpop.f32.mrf.mxu2  ;;  %v3812_v27 = vadd.f32 %v3811_v4, %v3783_v46 }
 0x782   : > { %v3751_v44 = vadd.f32 %v3750_v55, %v3722_v30 }
 0x784   : > { %v3936_v26 = vmax.f32 %v3751_v44, 0.0 }
 0x786   : > { %v11727_v11 = vmul.f32 %v13658_v47, %v3936_v26 }
 0x787   : > { %v3785_v42 = vpop.f32.mrf.mxu0 }
 0x788   : > { %v7258_v12 = vpack.i.bf16 %v11727_v11, %v11731_v63  ;;  %v3786_v13 = vadd.f32 %v3785_v42, %v13660_v29 }
 0x789   : > { %v3814_v57 = vpop.f32.mrf.mxu1 }
 0x78a   : > { %v3753_v7 = vpop.f32.mrf.mxu2  ;;  %7259 = vrot.lane.b32.xlu2 %v7258_v12, %s7929_s8  ;;  %7254 = vrot.lane.b32.xlu0 %v7258_v12, %s7928_s7  ;;  %v3815_v48 = vadd.f32 %v3814_v57, %v3786_v13 }
 0x78b   : > { %v3754_v62 = vadd.f32 %v3753_v7, %v3725_v35  ;;  %7249 = vrot.lane.b32.xlu1 %v7258_v12, %s7927_s27 }
 0x78d   : > { %v3939_v15 = vmax.f32 %v3754_v62, 0.0  ;;  %v3837_v58 = vpop.f32.mrf.mxu3 }
 0x78e   : > { %v3838_v59 = vadd.f32 %v3837_v58, %v3809_v40 }
 0x78f   : > { %v11739_v18 = vmul.f32 %v13658_v47, %v3939_v15  ;;  %v3788_v9 = vpop.f32.mrf.mxu0 }
 0x790   : > { %v3937_v3 = vmax.f32 %v3838_v59, 0.0  ;;  %v3789_v32 = vadd.f32 %v3788_v9, %v13662_v49 }
 0x791   : > { %v7268_v17 = vpack.i.bf16 %v11739_v18, %v11731_v63  ;;  %v3817_v37 = vpop.f32.mrf.mxu1 }
 0x792   : > { %v11746_v0 = vmul.f32 %v13661_v52, %v3937_v3  ;;  %7264 = vrot.lane.b32.xlu2 %v7258_v12, %s7936_s21  ;;  %v3818_v51 = vadd.f32 %v3817_v37, %v3789_v32 }
 0x793   : > { %v3756_v25 = vpop.f32.mrf.mxu2  ;;  %7269 = vrot.lane.b32.xlu0 %v7268_v17, %s7927_s27  ;;  %7279 = vrot.lane.b32.xlu1 %v7268_v17, %s7929_s8 }
 0x794   : > { %v3757_v20 = vadd.f32 %v3756_v25, %v3728_v34  ;;  %v7328_v40 = vpack.i.bf16 %v11746_v0, %v11727_v11 }
 0x795   : > { %v3840_v22 = vpop.f32.mrf.mxu3 }
 0x796   : > { %v3942_v53 = vmax.f32 %v3757_v20, 0.0  ;;  %v3841_v38 = vadd.f32 %v3840_v22, %v3812_v27 }
 0x797   : > { %v3895_v8 = vpop.f32.mrf.mxu0 }
 0x798   : > { %v11754_v61 = vmul.f32 %v13658_v47, %v3942_v53  ;;  %v3940_v2 = vmax.f32 %v3841_v38, 0.0 }
 0x799   : > { %v3924_v14 = vpop.f32.mrf.mxu1 }
 0x79a   : > { %v11757_v5 = vmul.f32 %v13661_v52, %v3940_v2  ;;  %7274 = vrot.lane.b32.xlu2 %v7268_v17, %s7928_s7  ;;  %v7298_v56 = vpack.i.bf16 %v11754_v61, %v11731_v63  ;;  %v11833_v2 = vpop.permute.xlu1 %4316 }
 0x79b   : > { %v3759_v41 = vpop.f32.mrf.mxu2  ;;  %7284 = vrot.lane.b32.xlu1 %v7268_v17, %s7936_s21  ;;  %13665 = vst [vmem:[#allocation16_spill] sm:$0xff] %v11833_v2 }
 0x79c   : > { %v3760_v39 = vadd.f32 %v3759_v41, %v3731_v28  ;;  %7299 = vrot.lane.b32.xlu0 %v7298_v56, %s7929_s8 }
 0x79d   : > { %v3843_v19 = vpop.f32.mrf.mxu3 }
 0x79e   : > { %v3945_v43 = vmax.f32 %v3760_v39, 0.0  ;;  %v3844_v16 = vadd.f32 %v3843_v19, %v3815_v48 }
 0x79f   : > { %v3898_v44 = vpop.f32.mrf.mxu0 }
 0x7a0   : > { %v11766_v33 = vmul.f32 %v13658_v47, %v3945_v43  ;;  %v3943_v45 = vmax.f32 %v3844_v16, 0.0 }
 0x7a1   : > { %v3927_v47 = vpop.f32.mrf.mxu1 }
 0x7a2   : > { %v11769_v31 = vmul.f32 %v13661_v52, %v3943_v45  ;;  %7289 = vrot.lane.b32.xlu2 %v7298_v56, %s7927_s27  ;;  %v7318_v24 = vpack.i.bf16 %v11766_v33, %v11731_v63 }
 0x7a3   : > { %v3866_v54 = vpop.f32.mrf.mxu2  ;;  %7294 = vrot.lane.b32.xlu1 %v7298_v56, %s7928_s7 }
 0x7a4   : > { %v3867_v23 = vadd.f32 %v3866_v54, %v13657_v50  ;;  %7304 = vrot.lane.b32.xlu0 %v7298_v56, %s7936_s21  ;;  %v13663_v50 = vld [vmem:[#allocation17_spill] sm:$0xff] }
 0x7a5   : > { %v3846_v30 = vpop.f32.mrf.mxu3 }
 0x7a6   : > { %v3847_v1 = vadd.f32 %v3846_v30, %v3818_v51  ;;  %v3896_v55 = vadd.f32 %v3895_v8, %v3867_v23 }
 0x7a7   : > { %v3901_v62 = vpop.f32.mrf.mxu0 }
 0x7a8   : > { %v3946_v4 = vmax.f32 %v3847_v1, 0.0  ;;  %v3925_v26 = vadd.f32 %v3924_v14, %v3896_v55 }
 0x7a9   : > { %v3930_v58 = vpop.f32.mrf.mxu1 }
 0x7aa   : > { %v11778_v21 = vmul.f32 %v13661_v52, %v3946_v4  ;;  %v3938_v6 = vmax.f32 %v3925_v26, 0.0  ;;  %7319 = vrot.lane.b32.xlu2 %v7318_v24, %s7929_s8 }
 0x7ab   : > { %v3869_v12 = vpop.f32.mrf.mxu2  ;;  %7309 = vrot.lane.b32.xlu1 %v7318_v24, %s7927_s27 }
 0x7ac   : > { %v3950_v35 = vmul.f32 %v13663_v50, %v3938_v6  ;;  %v3870_v7 = vadd.f32 %v3869_v12, %v13659_v60  ;;  %7314 = vrot.lane.b32.xlu0 %v7318_v24, %s7928_s7 }
 0x7ae   : > { %3962 = vst.msk [vmem:[#allocation3 + $0x18] sm:$0xff] %vm1312_vm12, %v3950_v35  ;;  %v3899_v42 = vadd.f32 %v3898_v44, %v3870_v7 }
 0x7af   : > { %v3904_v52 = vpop.f32.mrf.mxu0 }
 0x7b0   : > { %v3928_v63 = vadd.f32 %v3927_v47, %v3899_v42 }
 0x7b1   : > { %v3933_v27 = vpop.f32.mrf.mxu1 }
 0x7b2   : > { %v3941_v57 = vmax.f32 %v3928_v63, 0.0  ;;  %7324 = vrot.lane.b32.xlu2 %v7318_v24, %s7936_s21 }
 0x7b3   : > { %v3872_v15 = vpop.f32.mrf.mxu2  ;;  %7329 = vrot.lane.b32.xlu1 %v7328_v40, %s7930_s9 }
 0x7b4   : > { %v3953_v59 = vmul.f32 %v13663_v50, %v3941_v57  ;;  %v3873_v60 = vadd.f32 %v3872_v15, %v13660_v29 }
 0x7b5   : > { %v3975_v36 = vld [vmem:[#allocation3 + $0x18] sm:$0xff] }
 0x7b6   : > { %3965 = vst.msk [vmem:[#allocation3 + $0x38] sm:$0xff] %vm1312_vm12, %v3953_v59  ;;  %v3902_v46 = vadd.f32 %v3901_v62, %v3873_v60  ;;  %v7388_v3 = vpack.i.bf16 %v3975_v36, %v11746_v0  ;;  %v7393_v0 = vpack.i.bf16 %v11739_v18, %v3975_v36  ;;  %v7353_v18 = vpack.i.bf16 %v11769_v31, %v11754_v61 }
 0x7b8   : > { %v3931_v17 = vadd.f32 %v3930_v58, %v3902_v46  ;;  %7389 = vrot.lane.b32.xlu0 %v7388_v3, %s7929_s8 }
 0x7ba   : > { %v3944_v11 = vmax.f32 %v3931_v17, 0.0  ;;  %7379 = vrot.lane.b32.xlu2 %v7388_v3, %s7927_s27 }
 0x7bb   : > { %v3875_v34 = vpop.f32.mrf.mxu2  ;;  %7334 = vrot.lane.b32.xlu1 %v7328_v40, %s7931_s10 }
 0x7bc   : > { %v3956_v25 = vmul.f32 %v13663_v50, %v3944_v11  ;;  %v3876_v29 = vadd.f32 %v3875_v34, %v13662_v49 }
 0x7bd   : > { %v3979_v53 = vld [vmem:[#allocation3 + $0x38] sm:$0xff] }
 0x7be   : > { %3968 = vst.msk [vmem:[#allocation3 + $0x58] sm:$0xff] %vm1312_vm12, %v3956_v25  ;;  %v3905_v20 = vadd.f32 %v3904_v52, %v3876_v29  ;;  %v7428_v37 = vpack.i.bf16 %v3979_v53, %v11757_v5 }
 0x7c0   : > { %v3934_v9 = vadd.f32 %v3933_v27, %v3905_v20  ;;  %7419 = vrot.lane.b32.xlu0 %v7388_v3, %s7936_s21 }
 0x7c2   : > { %v3947_v22 = vmax.f32 %v3934_v9, 0.0  ;;  %7394 = vrot.lane.b32.xlu2 %v7393_v0, %s7930_s9 }
 0x7c3   : > { %7339 = vrot.lane.b32.xlu1 %v7328_v40, %s7932_s11 }
 0x7c4   : > { %v3959_v38 = vmul.f32 %v13663_v50, %v3947_v22 }
 0x7c5   : > { %v3983_v13 = vld [vmem:[#allocation3 + $0x58] sm:$0xff] }
 0x7c6   : > { %3971 = vst.msk [vmem:[#allocation3 + $0x78] sm:$0xff] %vm1312_vm12, %v3959_v38  ;;  %v7468_v28 = vpack.i.bf16 %v3983_v13, %v11769_v31  ;;  %v7483_v19 = vpack.i.bf16 %v11766_v33, %v3983_v13 }
 0x7c8   : > { %7429 = vrot.lane.b32.xlu0 %v7428_v37, %s7928_s7 }
 0x7ca   : > { %7399 = vrot.lane.b32.xlu2 %v7393_v0, %s7931_s10 }
 0x7cb   : > { %7344 = vrot.lane.b32.xlu1 %v7328_v40, %s7933_s12 }
 0x7cd   : > { %v3987_v5 = vld [vmem:[#allocation3 + $0x78] sm:$0xff] }
 0x7ce   : > { %v7523_v39 = vpack.i.bf16 %v3987_v5, %v11778_v21 }
 0x7d0   : > { %7439 = vrot.lane.b32.xlu0 %v7428_v37, %s7930_s9 }
 0x7d2   : > { %7404 = vrot.lane.b32.xlu2 %v7393_v0, %s7932_s11 }
 0x7d3   : > { %7349 = vrot.lane.b32.xlu1 %v7328_v40, %s7935_s13 }
 0x7d8   : > { %7444 = vrot.lane.b32.xlu0 %v7428_v37, %s7931_s10 }
 0x7da   : > { %7409 = vrot.lane.b32.xlu2 %v7393_v0, %s7933_s12 }
 0x7db   : > { %7354 = vrot.lane.b32.xlu1 %v7353_v18, %s7930_s9 }
 0x7e0   : > { %7449 = vrot.lane.b32.xlu0 %v7428_v37, %s7932_s11 }
 0x7e2   : > { %7414 = vrot.lane.b32.xlu2 %v7393_v0, %s7935_s13 }
 0x7e3   : > { %7359 = vrot.lane.b32.xlu1 %v7353_v18, %s7931_s10 }
 0x7e4   : > { %v11821_v49 = vpop.permute.xlu2 %7259 }
 0x7e5   : > { %v7262_v62 = vunpack.i.h.bf16 %v11821_v49  ;;  %v7261_v40 = vunpack.i.l.bf16 %v11821_v49 }
 0x7e7   : > { %v4124_v11 = vsel %vm593_vm5, %v7261_v40, %v7262_v62 }
 0x7e8   : > { %7454 = vrot.lane.b32.xlu0 %v7428_v37, %s7933_s12 }
 0x7ea   : > { %7434 = vrot.lane.b32.xlu2 %v7428_v37, %s7929_s8 }
 0x7eb   : > { %7364 = vrot.lane.b32.xlu1 %v7353_v18, %s7932_s11 }
 0x7ec   : > { %v11826_v10 = vpop.permute.xlu2 %7264 }
 0x7ed   : > { %13664 = vst [vmem:[#allocation20_spill] sm:$0xff] %v11826_v10 }
 0x7f0   : > { %7459 = vrot.lane.b32.xlu0 %v7428_v37, %s7935_s13 }
 0x7f2   : > { %7464 = vrot.lane.b32.xlu2 %v7428_v37, %s7936_s21 }
 0x7f3   : > { %7369 = vrot.lane.b32.xlu1 %v7353_v18, %s7933_s12 }
 0x7f4   : > { %v11831_v61 = vpop.permute.xlu2 %7274 }
 0x7f5   : > { %v7277_v38 = vunpack.i.h.bf16 %v11831_v61 }
 0x7f8   : > { %7469 = vrot.lane.b32.xlu0 %v7468_v28, %s7927_s27 }
 0x7fa   : > { %7474 = vrot.lane.b32.xlu2 %v7468_v28, %s7928_s7 }
 0x7fb   : > { %7374 = vrot.lane.b32.xlu1 %v7353_v18, %s7935_s13 }
 0x7fc   : > { %v11839_v56 = vpop.permute.xlu2 %7289  ;;  %v11841_v41 = vpop.permute.xlu0 %7254 }
 0x7fd   : > { %v7250_v48 = vpop.permute.xlu1 %7249 }
 0x7fe   : > { %v7252_v26 = vunpack.i.h.bf16 %v7250_v48  ;;  %v7251_v24 = vunpack.i.l.bf16 %v7250_v48 }
 0x800   : > { %7524 = vrot.lane.b32.xlu0 %v7523_v39, %s7929_s8  ;;  %v4036_v35 = vsel %vm503_vm3, %v7251_v24, %v7252_v26 }
 0x802   : > { %7484 = vrot.lane.b32.xlu2 %v7483_v19, %s7930_s9 }
 0x803   : > { %7384 = vrot.lane.b32.xlu1 %v7388_v3, %s7928_s7 }
 0x804   : > { %v11848_v8 = vpop.permute.xlu2 %7319 }
 0x805   : > { %v11850_v43 = vpop.permute.xlu0 %7269  ;;  %v11852_v16 = vpop.permute.xlu1 %7279 }
 0x808   : > { %7529 = vrot.lane.b32.xlu0 %v7523_v39, %s7930_s9 }
 0x80a   : > { %7489 = vrot.lane.b32.xlu2 %v7483_v19, %s7931_s10 }
 0x80b   : > { %7424 = vrot.lane.b32.xlu1 %v7428_v37, %s7927_s27  ;;  %v7276_v37 = vunpack.i.l.bf16 %v11831_v61 }
 0x80c   : > { %v11857_v14 = vpop.permute.xlu2 %7324 }
 0x80d   : > { %13666 = vst [vmem:[#allocation19_spill] sm:$0xff] %v11857_v14  ;;  %v11859_v32 = vpop.permute.xlu1 %7284 }
 0x80e   : > { %13667 = vst [vmem:[#allocation14_spill] sm:$0xff] %v11859_v32  ;;  %v11861_v33 = vpop.permute.xlu0 %7299 }
 0x810   : > { %7534 = vrot.lane.b32.xlu0 %v7523_v39, %s7931_s10  ;;  %s274_s10 = scalar_lea.vmem %s13098_s5, %s7990_s28 }
 0x812   : > { %7494 = vrot.lane.b32.xlu2 %v7483_v19, %s7932_s11 }
 0x813   : > { %7479 = vrot.lane.b32.xlu1 %v7468_v28, %s7929_s8  ;;  %s264_s8 = scalar_lea.vmem %s13094_s1, %s7990_s28 }
 0x814   : > { %v7380_v45 = vpop.permute.xlu2 %7379 }
 0x815   : > { %v7382_v31 = vunpack.i.h.bf16 %v7380_v45  ;;  %v7381_v54 = vunpack.i.l.bf16 %v7380_v45  ;;  %v11866_v51 = vpop.permute.xlu1 %7294 }
 0x816   : > { %v11872_v1 = vpop.permute.xlu0 %7304 }
 0x817   : > { %v4038_v23 = vsel %vm503_vm3, %v7381_v54, %v7382_v31  ;;  %13668 = vst [vmem:[#allocation8_spill] sm:$0xff] %v11872_v1  ;;  %v4037_v6 = vsel %vm503_vm3, %v7252_v26, %v7381_v54 }
 0x818   : > { %7539 = vrot.lane.b32.xlu0 %v7523_v39, %s7932_s11  ;;  %v11870_v30 = vpack.i.bf16 %v7382_v31, %v4038_v23  ;;  %v7558_v42 = vpack.i.bf16 %v4037_v6, %v4036_v35 }
 0x81a   : > { %7499 = vrot.lane.b32.xlu2 %v7483_v19, %s7933_s12 }
 0x81b   : > { %7509 = vrot.lane.b32.xlu1 %v7468_v28, %s7936_s21 }
 0x81c   : > { %v11876_v55 = vpop.permute.xlu2 %7394 }
 0x81d   : > { %v11878_v44 = vpop.permute.xlu1 %7309  ;;  %v7396_v12 = vunpack.i.l.bf16 %v11876_v55 }
 0x81e   : > { %v11881_v4 = vpop.permute.xlu0 %7314 }
 0x820   : > { %7544 = vrot.lane.b32.xlu0 %v7523_v39, %s7933_s12 }
 0x822   : > { %7504 = vrot.lane.b32.xlu2 %v7483_v19, %s7935_s13 }
 0x823   : > { %7519 = vrot.lane.b32.xlu1 %v7523_v39, %s7928_s7 }
 0x824   : > { %v11885_v47 = vpop.permute.xlu2 %7399 }
 0x825   : > { %v11887_v21 = vpop.permute.xlu1 %7329  ;;  %v13292_v46 = vunpack.i.l.bf16 %v11885_v47 }
 0x826   : > { %v13290_v50 = vunpack.i.h.bf16 %v11887_v21 }
 0x828   : > { %7549 = vrot.lane.b32.xlu0 %v7523_v39, %s7935_s13  ;;  %v11897_v7 = vsel %vm630_vm6, %v13290_v50, %v7396_v12  ;;  %s269_s13 = scalar_lea.vmem %s13097_s4, %s7990_s28 }
 0x82a   : > { %v7390_v63 = vpop.permute.xlu0 %7389  ;;  %7514 = vrot.lane.b32.xlu2 %v7523_v39, %s7927_s27 }
 0x82b   : > { %v7392_v57 = vunpack.i.h.bf16 %v7390_v63  ;;  %v7391_v15 = vunpack.i.l.bf16 %v7390_v63  ;;  %7559 = vrot.lane.b32.xlu1 %v7558_v42, %s7936_s21  ;;  %v7397_v63 = vunpack.i.h.bf16 %v11876_v55 }
 0x82c   : > { %v11903_v58 = vpop.permute.xlu2 %7404 }
 0x82d   : > { %v4126_v59 = vsel %vm593_vm5, %v7391_v15, %v7392_v57  ;;  %v4125_v60 = vsel %vm593_vm5, %v7262_v62, %v7391_v15  ;;  %v7335_v36 = vpop.permute.xlu1 %7334  ;;  %v7406_v20 = vunpack.i.l.bf16 %v11903_v58  ;;  %v7281_v15 = vunpack.i.l.bf16 %v11852_v16 }
 0x82e   : > { %v11908_v3 = vpack.i.bf16 %v7392_v57, %v4126_v59  ;;  %v7337_v17 = vunpack.i.h.bf16 %v7335_v36  ;;  %v7568_v34 = vpack.i.bf16 %v4125_v60, %v4124_v11  ;;  %v7336_v18 = vunpack.i.l.bf16 %v7335_v36 }
 0x82f   : > { %v7282_v57 = vunpack.i.h.bf16 %v11852_v16 }
 0x830   : > { %7554 = vrot.lane.b32.xlu0 %v7523_v39, %s7936_s21  ;;  %v11915_v52 = vsel %vm663_vm7, %v7337_v17, %v13292_v46  ;;  %v4083_v39 = vsel %vm548_vm4, %v7276_v37, %v7277_v38  ;;  %v4192_v19 = vsel %vm663_vm7, %v7336_v18, %v7337_v17 }
 0x831   : > { %v7583_v35 = vpack.i.bf16 %v4192_v19, %v7336_v18  ;;  %v13289_v19 = vunpack.i.h.bf16 %v11859_v32 }
 0x832   : > { %v11917_v25 = vpop.permute.xlu0 %7419  ;;  %7569 = vrot.lane.b32.xlu2 %v7568_v34, %s7936_s21 }
 0x833   : > { %13669 = vst [vmem:[#allocation15_spill] sm:$0xff] %v11917_v25 }
 0x834   : > { %v11920_v29 = vpop.permute.xlu2 %7409 }
 0x835   : > { %v7340_v27 = vpop.permute.xlu1 %7339  ;;  %v7411_v61 = vunpack.i.l.bf16 %v11920_v29 }
 0x836   : > { %v7342_v9 = vunpack.i.h.bf16 %v7340_v27  ;;  %v7341_v0 = vunpack.i.l.bf16 %v7340_v27 }
 0x838   : > { %v4224_v22 = vsel %vm696_vm8, %v7341_v0, %v7342_v9  ;;  %v11927_v53 = vsel %vm696_vm8, %v7342_v9, %v7406_v20 }
 0x839   : > { %v7578_v49 = vpack.i.bf16 %v4224_v22, %v7341_v0  ;;  %v4127_v0 = vsel %vm593_vm5, %v7281_v15, %v7282_v57 }
 0x83a   : > { %v7430_v13 = vpop.permute.xlu0 %7429 }
 0x83b   : > { %v7432_v28 = vunpack.i.h.bf16 %v7430_v13  ;;  %v7431_v5 = vunpack.i.l.bf16 %v7430_v13  ;;  %7579 = vrot.lane.b32.xlu1 %v7578_v49, %s7936_s21  ;;  %v13298_v13 = vunpack.i.h.bf16 %v11885_v47 }
 0x83c   : > { %v11932_v48 = vpop.permute.xlu2 %7414 }
 0x83d   : > { %v4085_v45 = vsel %vm548_vm4, %v7431_v5, %v7432_v28  ;;  %v4084_v31 = vsel %vm548_vm4, %v7277_v38, %v7431_v5  ;;  %v11938_v54 = vpop.permute.xlu1 %7344  ;;  %v7416_v27 = vunpack.i.l.bf16 %v11932_v48 }
 0x83e   : > { %v11941_v23 = vpack.i.bf16 %v7432_v28, %v4085_v45  ;;  %v7593_v26 = vpack.i.bf16 %v4084_v31, %v4083_v39  ;;  %v13293_v24 = vunpack.i.h.bf16 %v11938_v54 }
 0x840   : > { %7594 = vrot.lane.b32.xlu2 %v7593_v26, %s7936_s21  ;;  %v11948_v6 = vsel %vm729_vm9, %v13293_v24, %v7411_v61 }
 0x842   : > { %v7440_v42 = vpop.permute.xlu0 %7439 }
 0x843   : > { %v7442_v62 = vunpack.i.h.bf16 %v7440_v42  ;;  %v7441_v40 = vunpack.i.l.bf16 %v7440_v42  ;;  %7584 = vrot.lane.b32.xlu1 %v7583_v35, %s7936_s21 }
 0x844   : > { %v11954_v59 = vpop.permute.xlu2 %7434 }
 0x845   : > { %v11956_v60 = vpack.i.bf16 %v7396_v12, %v7442_v62  ;;  %v11961_v36 = vsel %vm630_vm6, %v7397_v63, %v7441_v40  ;;  %v11964_v17 = vsel %vm630_vm6, %v7441_v40, %v7442_v62  ;;  %v13294_v11 = vunpack.i.h.bf16 %v11954_v59  ;;  %v11967_v34 = vpop.permute.xlu1 %7349 }
 0x846   : > { %v7436_v12 = vunpack.i.l.bf16 %v11954_v59  ;;  %v13295_v9 = vunpack.i.h.bf16 %v11967_v34 }
 0x848   : > { %v4128_v22 = vsel %vm593_vm5, %v7282_v57, %v7436_v12  ;;  %v11979_v38 = vsel %vm593_vm5, %v7436_v12, %v13294_v11  ;;  %v11984_v37 = vsel %vm762_vm10, %v13295_v9, %v7416_v27  ;;  %v13296_v57 = vunpack.i.h.bf16 %v11903_v58 }
 0x849   : > { %v7598_v18 = vpack.i.bf16 %v4128_v22, %v4127_v0 }
 0x84a   : > { %v11986_v49 = vpop.permute.xlu0 %7444 }
 0x84b   : > { %v13291_v28 = vunpack.i.h.bf16 %v11986_v49  ;;  %v7446_v5 = vunpack.i.l.bf16 %v11986_v49  ;;  %7599 = vrot.lane.b32.xlu1 %v7598_v18, %s7936_s21 }
 0x84c   : > { %v11992_v39 = vpop.permute.xlu2 %7464 }
 0x84d   : > { %13670 = vst [vmem:[#allocation22_spill] sm:$0xff] %v11992_v39  ;;  %v11998_v45 = vsel %vm663_vm7, %v13298_v13, %v7446_v5  ;;  %v12003_v31 = vsel %vm663_vm7, %v7446_v5, %v13291_v28  ;;  %v13288_v26 = vunpack.i.l.bf16 %v11992_v39  ;;  %v12006_v35 = vpop.permute.xlu1 %7354  ;;  %v7412_v28 = vunpack.i.h.bf16 %v11920_v29 }
 0x84f   : > { %v12015_v62 = vsel %vm1095_vm11, %v13289_v19, %v13288_v26 }
 0x850   : > { %13671 = vst [vmem:[#allocation21_spill] sm:$0xff] %v12015_v62 }
 0x852   : > { %v7450_v40 = vpop.permute.xlu0 %7449 }
 0x853   : > { %v7452_v15 = vunpack.i.h.bf16 %v7450_v40  ;;  %v7451_v12 = vunpack.i.l.bf16 %v7450_v40 }
 0x854   : > { %v7475_v0 = vpop.permute.xlu2 %7474 }
 0x855   : > { %v12020_v22 = vpack.i.bf16 %v7406_v20, %v7452_v15  ;;  %v12025_v18 = vsel %vm696_vm8, %v13296_v57, %v7451_v12  ;;  %v12028_v5 = vsel %vm696_vm8, %v7451_v12, %v7452_v15  ;;  %v7477_v26 = vunpack.i.h.bf16 %v7475_v0  ;;  %v12030_v19 = vpop.permute.xlu1 %7359 }
 0x856   : > { %v7476_v40 = vunpack.i.l.bf16 %v7475_v0 }
 0x857   : > { %13672 = vst [vmem:[#allocation23_spill] sm:$0xff] %v12020_v22 }
 0x858   : > { %v4088_v50 = vsel %vm548_vm4, %v7476_v40, %v7477_v26 }
 0x859   : > { %v12035_v42 = vpack.i.bf16 %v7477_v26, %v4088_v50  ;;  %v13299_v50 = vunpack.i.h.bf16 %v12006_v35 }
 0x85a   : > { %v7455_v20 = vpop.permute.xlu0 %7454 }
 0x85b   : > { %v7457_v46 = vunpack.i.h.bf16 %v7455_v20  ;;  %v7456_v24 = vunpack.i.l.bf16 %v7455_v20  ;;  %v7296_v20 = vunpack.i.l.bf16 %v11866_v51 }
 0x85c   : > { %v12038_v11 = vpop.permute.xlu2 %7484 }
 0x85d   : > { %v12040_v15 = vpack.i.bf16 %v7411_v61, %v7457_v46  ;;  %v4258_v12 = vsel %vm729_vm9, %v7412_v28, %v7456_v24  ;;  %v12044_v9 = vsel %vm729_vm9, %v7456_v24, %v7457_v46  ;;  %v13297_v0 = vunpack.i.h.bf16 %v12038_v11  ;;  %v7365_v16 = vpop.permute.xlu1 %7364 }
 0x85e   : > { %v7603_v26 = vpack.i.bf16 %v4258_v12, %v7412_v28  ;;  %v7486_v57 = vunpack.i.l.bf16 %v12038_v11  ;;  %v7297_v24 = vunpack.i.h.bf16 %v11866_v51  ;;  %v7362_v51 = vunpack.i.h.bf16 %v12030_v19 }
 0x85f   : > { %13673 = vst [vmem:[#allocation18_spill] sm:$0xff] %v12040_v15  ;;  %v12052_v29 = vpack.i.bf16 %v13297_v0, %v11915_v52  ;;  %v7417_v52 = vunpack.i.h.bf16 %v11932_v48  ;;  %v7351_v0 = vunpack.i.l.bf16 %v11967_v34  ;;  %v7366_v2 = vunpack.i.l.bf16 %v7365_v16 }
 0x860   : > { %7604 = vrot.lane.b32.xlu1 %v7603_v26, %s7936_s21  ;;  %v12055_v61 = vpack.i.bf16 %v7486_v57, %v7416_v27  ;;  %v4165_v46 = vsel %vm630_vm6, %v13299_v50, %v7486_v57  ;;  %v4087_v26 = vsel %vm548_vm4, %v7297_v24, %v7476_v40  ;;  %v4086_v57 = vsel %vm548_vm4, %v7296_v20, %v7297_v24 }
 0x861   : > { %v12064_v28 = vpack.i.bf16 %v7397_v63, %v4165_v46  ;;  %v7613_v48 = vpack.i.bf16 %v4087_v26, %v4086_v57  ;;  %v7367_v50 = vunpack.i.h.bf16 %v7365_v16  ;;  %v7292_v24 = vunpack.i.h.bf16 %v11839_v56 }
 0x862   : > { %13674 = vst [vmem:[#allocation25_spill] sm:$0xff] %v12055_v61  ;;  %v12066_v12 = vpop.permute.xlu0 %7459  ;;  %v7291_v20 = vunpack.i.l.bf16 %v11839_v56 }
 0x863   : > { %v13303_v27 = vunpack.i.l.bf16 %v12066_v12  ;;  %v4228_v26 = vsel %vm696_vm8, %v7366_v2, %v7367_v50 }
 0x864   : > { %v12072_v13 = vpop.permute.xlu2 %7489  ;;  %v4042_v16 = vsel %vm503_vm3, %v7291_v20, %v7292_v24  ;;  %v7361_v20 = vunpack.i.l.bf16 %v12030_v19  ;;  %v7321_v19 = vunpack.i.l.bf16 %v11848_v8 }
 0x865   : > { %v4290_v55 = vsel %vm762_vm10, %v7417_v52, %v13303_v27  ;;  %v13306_v63 = vunpack.i.l.bf16 %v12072_v13  ;;  %v12080_v46 = vpop.permute.xlu1 %7369  ;;  %v13675_v27 = vunpack.i.h.bf16 %v11885_v47 }
 0x866   : > { %v12082_v40 = vpack.i.bf16 %v7351_v0, %v4290_v55 }
 0x867   : > { %v4197_v39 = vsel %vm663_vm7, %v7362_v51, %v13306_v63  ;;  %v7623_v63 = vpack.i.bf16 %v4228_v26, %v7366_v2  ;;  %v7322_v26 = vunpack.i.h.bf16 %v11848_v8 }
 0x868   : > { %7614 = vrot.lane.b32.xlu1 %v7613_v48, %s7936_s21  ;;  %v12092_v62 = vpack.i.bf16 %v13675_v27, %v4197_v39 }
 0x86a   : > { %v7470_v57 = vpop.permute.xlu0 %7469 }
 0x86b   : > { %v7472_v55 = vunpack.i.h.bf16 %v7470_v57  ;;  %v7471_v25 = vunpack.i.l.bf16 %v7470_v57 }
 0x86c   : > { %v12096_v10 = vpop.permute.xlu2 %7494 }
 0x86d   : > { %v4044_v32 = vsel %vm503_vm3, %v7471_v25, %v7472_v55  ;;  %v4043_v56 = vsel %vm503_vm3, %v7292_v24, %v7471_v25  ;;  %v13310_v48 = vunpack.i.l.bf16 %v12096_v10  ;;  %v12101_v1 = vpop.permute.xlu1 %7374  ;;  %v13676_v25 = vunpack.i.h.bf16 %v11903_v58 }
 0x86e   : > { %v12103_v39 = vpack.i.bf16 %v7472_v55, %v4044_v32  ;;  %v7608_v27 = vpack.i.bf16 %v4043_v56, %v4042_v16  ;;  %v7377_v61 = vunpack.i.h.bf16 %v12101_v1  ;;  %v13311_v57 = vunpack.i.l.bf16 %v12101_v1 }
 0x86f   : > { %v4229_v2 = vsel %vm696_vm8, %v7367_v50, %v13310_v48  ;;  %v7257_v50 = vunpack.i.h.bf16 %v11841_v41  ;;  %v4196_v56 = vsel %vm663_vm7, %v7361_v20, %v7362_v51  ;;  %v7256_v58 = vunpack.i.l.bf16 %v11841_v41 }
 0x870   : > { %7609 = vrot.lane.b32.xlu2 %v7608_v27, %s7936_s21  ;;  %7624 = vrot.lane.b32.xlu1 %v7623_v63, %s7936_s21  ;;  %v12115_v24 = vpack.i.bf16 %v13676_v25, %v4229_v2  ;;  %v4292_v32 = vsel %vm762_vm10, %v13311_v57, %v7377_v61  ;;  %v7372_v2 = vunpack.i.h.bf16 %v12080_v46  ;;  %v13313_v25 = vunpack.i.l.bf16 %v12080_v46 }
 0x871   : > { %v12122_v55 = vpack.i.bf16 %v7417_v52, %v4292_v32  ;;  %v13677_v48 = vunpack.i.h.bf16 %v11967_v34  ;;  %v4133_v52 = vsel %vm593_vm5, %v7321_v19, %v7322_v26  ;;  %v7628_v14 = vpack.i.bf16 %v4196_v56, %v7361_v20 }
 0x872   : > { %v7525_v16 = vpop.permute.xlu0 %7524  ;;  %v4080_v56 = vsel %vm548_vm4, %v7256_v58, %v7257_v50 }
 0x873   : > { %v7527_v63 = vunpack.i.h.bf16 %v7525_v16  ;;  %v7526_v27 = vunpack.i.l.bf16 %v7525_v16  ;;  %v4288_v57 = vsel %vm762_vm10, %v7351_v0, %v13677_v48 }
 0x874   : > { %v12132_v8 = vpop.permute.xlu2 %7499 }
 0x875   : > { %v4134_v32 = vsel %vm593_vm5, %v7322_v26, %v7526_v27  ;;  %v12137_v51 = vsel %vm593_vm5, %v7526_v27, %v7527_v63  ;;  %v12139_v16 = vpack.i.bf16 %v7527_v63, %v4288_v57  ;;  %v12141_v41 = vpop.permute.xlu1 %7384  ;;  %v7501_v0 = vunpack.i.l.bf16 %v12132_v8 }
 0x876   : > { %v7643_v15 = vpack.i.bf16 %v4134_v32, %v4133_v52  ;;  %v13314_v48 = vunpack.i.l.bf16 %v12141_v41  ;;  %v12150_v26 = vsel %vm729_vm9, %v13313_v25, %v7372_v2  ;;  %v13678_v57 = vunpack.i.h.bf16 %v11954_v59 }
 0x877   : > { %v12159_v19 = vsel %vm729_vm9, %v7372_v2, %v7501_v0  ;;  %v13679_v2 = vunpack.i.h.bf16 %v12038_v11  ;;  %v13681_v11 = vunpack.i.h.bf16 %v11938_v54  ;;  %v13684_v63 = vunpack.i.h.bf16 %v11986_v49 }
 0x878   : > { %7644 = vrot.lane.b32.xlu2 %v7643_v15, %s7936_s21  ;;  %7629 = vrot.lane.b32.xlu1 %v7628_v14, %s7936_s21  ;;  %v12156_v20 = vpack.i.bf16 %v13678_v57, %v7501_v0  ;;  %v4081_v27 = vsel %vm548_vm4, %v7257_v50, %v13314_v48  ;;  %v7346_v14 = vunpack.i.l.bf16 %v11938_v54  ;;  %v7492_v54 = vunpack.i.h.bf16 %v12072_v13 }
 0x879   : > { %v7563_v15 = vpack.i.bf16 %v4081_v27, %v4080_v56  ;;  %v7271_v49 = vunpack.i.l.bf16 %v11850_v43 }
 0x87a   : > { %v7530_v52 = vpop.permute.xlu0 %7529 }
 0x87b   : > { %v7532_v32 = vunpack.i.h.bf16 %v7530_v52  ;;  %v7531_v59 = vunpack.i.l.bf16 %v7530_v52  ;;  %7564 = vrot.lane.b32.xlu0 %v7563_v15, %s7936_s21 }
 0x87c   : > { %v12169_v57 = vpop.permute.xlu2 %7504 }
 0x87d   : > { %v12174_v58 = vsel %vm630_vm6, %v13679_v2, %v7531_v59  ;;  %v12177_v0 = vsel %vm630_vm6, %v7531_v59, %v7532_v32  ;;  %v12180_v50 = vpack.i.bf16 %v11984_v37, %v7532_v32  ;;  %v13315_v56 = vunpack.i.h.bf16 %v12169_v57  ;;  %v12183_v27 = vpop.permute.xlu1 %7424 }
 0x87e   : > { %v7506_v15 = vunpack.i.l.bf16 %v12169_v57  ;;  %v4256_v2 = vsel %vm729_vm9, %v7346_v14, %v13681_v11  ;;  %v13682_v37 = vunpack.i.l.bf16 %v11885_v47  ;;  %v13316_v22 = vunpack.i.l.bf16 %v12183_v27 }
 0x87f   : > { %13680 = vst [vmem:[#allocation7_spill] sm:$0xff] %v12180_v50  ;;  %v12194_v59 = vpack.i.bf16 %v13315_v56, %v11897_v7  ;;  %v7573_v25 = vpack.i.bf16 %v4256_v2, %v7346_v14  ;;  %v7272_v7 = vunpack.i.h.bf16 %v11850_v43  ;;  %v7312_v47 = vunpack.i.h.bf16 %v11878_v44 }
 0x880   : > { %v12198_v32 = vpack.i.bf16 %v13682_v37, %v7506_v15  ;;  %v4293_v34 = vsel %vm762_vm10, %v7377_v61, %v7506_v15  ;;  %v7311_v37 = vunpack.i.l.bf16 %v11878_v44  ;;  %v7497_v44 = vunpack.i.h.bf16 %v12096_v10 }
 0x881   : > { %v12203_v52 = vpack.i.bf16 %v4293_v34, %v13684_v63  ;;  %v13685_v34 = vunpack.i.l.bf16 %v12072_v13  ;;  %v4040_v43 = vsel %vm503_vm3, %v7272_v7, %v13316_v22 }
 0x882   : > { %13683 = vst [vmem:[#allocation10_spill] sm:$0xff] %v12198_v32  ;;  %v7535_v48 = vpop.permute.xlu0 %7534  ;;  %v4045_v13 = vsel %vm503_vm3, %v7311_v37, %v7312_v47 }
 0x883   : > { %v7537_v11 = vunpack.i.h.bf16 %v7535_v48  ;;  %v7536_v50 = vunpack.i.l.bf16 %v7535_v48  ;;  %7574 = vrot.lane.b32.xlu0 %v7573_v25, %s7936_s21 }
 0x884   : > { %v12211_v61 = vpop.permute.xlu2 %7514 }
 0x885   : > { %v12216_v63 = vpack.i.bf16 %v13685_v34, %v7537_v11  ;;  %v12219_v48 = vsel %vm663_vm7, %v7492_v54, %v7536_v50  ;;  %v12222_v14 = vsel %vm663_vm7, %v7536_v50, %v7537_v11  ;;  %v12224_v15 = vpop.permute.xlu1 %7479  ;;  %v13318_v25 = vunpack.i.l.bf16 %v12211_v61 }
 0x886   : > { %v4039_v50 = vsel %vm503_vm3, %v7271_v49, %v7272_v7  ;;  %v7481_v22 = vunpack.i.l.bf16 %v12224_v15  ;;  %v7301_v7 = vunpack.i.l.bf16 %v11861_v33 }
 0x887   : > { %13686 = vst [vmem:[#allocation13_spill] sm:$0xff] %v12216_v63  ;;  %v4046_v2 = vsel %vm503_vm3, %v7312_v47, %v13318_v25  ;;  %v7588_v34 = vpack.i.bf16 %v4040_v43, %v4039_v50  ;;  %v7302_v47 = vunpack.i.h.bf16 %v11861_v33 }
 0x888   : > { %v7633_v11 = vpack.i.bf16 %v4046_v2, %v4045_v13 }
 0x889   : > { %v4131_v50 = vsel %vm593_vm5, %v7302_v47, %v7481_v22 }
 0x88a   : > { %v12237_v56 = vpop.permute.xlu0 %7539  ;;  %7634 = vrot.lane.b32.xlu1 %v7633_v11, %s7936_s21  ;;  %v4130_v11 = vsel %vm593_vm5, %v7301_v7, %v7302_v47  ;;  %v7387_v47 = vunpack.i.h.bf16 %v12141_v41 }
 0x88b   : > { %v13317_v32 = vunpack.i.h.bf16 %v12237_v56  ;;  %v7541_v63 = vunpack.i.l.bf16 %v12237_v56  ;;  %7589 = vrot.lane.b32.xlu0 %v7588_v34, %s7936_s21  ;;  %v7618_v33 = vpack.i.bf16 %v4131_v50, %v4130_v11  ;;  %v13688_v11 = vunpack.i.l.bf16 %v12141_v41 }
 0x88c   : > { %v7427_v41 = vunpack.i.h.bf16 %v12183_v27 }
 0x88d   : > { %v12250_v37 = vsel %vm696_vm8, %v7541_v63, %v13317_v32  ;;  %v4230_v49 = vsel %vm696_vm8, %v7497_v44, %v7541_v63  ;;  %v12253_v43 = vpop.permute.xlu1 %7509  ;;  %v7502_v32 = vunpack.i.h.bf16 %v12132_v8  ;;  %v7317_v63 = vunpack.i.h.bf16 %v11881_v4 }
 0x88e   : > { %13687 = vst [vmem:[#allocation9_spill] sm:$0xff] %v12253_v43  ;;  %v7653_v2 = vpack.i.bf16 %v4230_v49, %v7497_v44  ;;  %v7316_v43 = vunpack.i.l.bf16 %v11881_v4 }
 0x890   : > { %7654 = vrot.lane.b32.xlu2 %v7653_v2, %s7936_s21  ;;  %v4089_v7 = vsel %vm548_vm4, %v7316_v43, %v7317_v63  ;;  %v13689_v43 = vunpack.i.h.bf16 %v12169_v57 }
 0x892   : > { %v12260_v34 = vpop.permute.xlu0 %7544 }
 0x893   : > { %v7546_v25 = vunpack.i.l.bf16 %v12260_v34  ;;  %7619 = vrot.lane.b32.xlu0 %v7618_v33, %s7936_s21  ;;  %v4082_v33 = vsel %vm548_vm4, %v13688_v11, %v7387_v47 }
 0x895   : > { %v4262_v44 = vsel %vm729_vm9, %v7502_v32, %v7546_v25  ;;  %v7520_v49 = vpop.permute.xlu1 %7519 }
 0x896   : > { %v7648_v13 = vpack.i.bf16 %v4262_v44, %v7502_v32  ;;  %v7521_v2 = vunpack.i.l.bf16 %v7520_v49  ;;  %v13690_v44 = vunpack.i.l.bf16 %v12101_v1 }
 0x898   : > { %7659 = vrot.lane.b32.xlu2 %v11870_v30, %s7936_s21  ;;  %7649 = vrot.lane.b32.xlu1 %v7648_v13, %s7936_s21  ;;  %v4090_v8 = vsel %vm548_vm4, %v7317_v63, %v7521_v2  ;;  %v7673_v13 = vpack.i.bf16 %v7492_v54, %v11927_v53  ;;  %v7663_v63 = vpack.i.bf16 %v7387_v47, %v4082_v33  ;;  %v7482_v53 = vunpack.i.h.bf16 %v12224_v15 }
 0x899   : > { %v7638_v50 = vpack.i.bf16 %v4090_v8, %v4089_v7  ;;  %v13691_v8 = vunpack.i.l.bf16 %v12183_v27  ;;  %v7522_v54 = vunpack.i.h.bf16 %v7520_v49 }
 0x89a   : > { %v12274_v4 = vpop.permute.xlu0 %7549  ;;  %v4132_v1 = vsel %vm593_vm5, %v7481_v22, %v7482_v53  ;;  %v7356_v22 = vunpack.i.l.bf16 %v12006_v35 }
 0x89b   : > { %v7551_v32 = vunpack.i.l.bf16 %v12274_v4  ;;  %7639 = vrot.lane.b32.xlu0 %v7638_v50, %s7936_s21  ;;  %v4041_v50 = vsel %vm503_vm3, %v13691_v8, %v7427_v41  ;;  %v7713_v27 = vpack.i.bf16 %v4132_v1, %v11948_v6  ;;  %v12320_v6 = vpop.permute.xlu2 %7569  ;;  %v7462_v1 = vunpack.i.h.bf16 %v12066_v12 }
 0x89c   : > { %v7678_v57 = vpack.i.bf16 %v7427_v41, %v4041_v50 }
 0x89d   : > { %v4294_v30 = vsel %vm762_vm10, %v13689_v43, %v7551_v32  ;;  %v12315_v47 = vpop.permute.xlu1 %7559  ;;  %v7547_v43 = vunpack.i.h.bf16 %v12260_v34  ;;  %v13697_v34 = vunpack.i.l.bf16 %v12080_v46 }
 0x89e   : > { %v7778_v7 = vpack.i.bf16 %v13690_v44, %v4294_v30 }
 0x8a0   : > { %7674 = vrot.lane.b32.xlu2 %v7673_v13, %s7936_s21  ;;  %7664 = vrot.lane.b32.xlu1 %v7663_v63, %s7936_s21 }
 0x8a3   : > { %7669 = vrot.lane.b32.xlu0 %v11908_v3, %s7936_s21  ;;  %v4091_v3 = vsel %vm548_vm4, %v7521_v2, %v7522_v54  ;;  %v13695_v2 = vpack.i.bf16 %v12003_v31, %v11998_v45  ;;  %v4263_v45 = vsel %vm729_vm9, %v7546_v25, %v7547_v43  ;;  %vm13765_vm4 = vcmask 256000  }
 0x8a4   : > { %v7733_v15 = vpack.i.bf16 %v7522_v54, %v4091_v3  ;;  %v7738_v63 = vpack.i.bf16 %v13697_v34, %v4263_v45  ;;  %vm13766_vm5 = vmmov %vm13765_vm4 }
 0x8a8   : > { %7704 = vrot.lane.b32.xlu2 %v12035_v42, %s7936_s21  ;;  %7679 = vrot.lane.b32.xlu1 %v7678_v57, %s7936_s21  ;;  %v13692_v42 = vpack.i.bf16 %v12028_v5, %v12025_v18  ;;  %v13694_v18 = vunpack.i.l.bf16 %v12211_v61  ;;  %v7552_v57 = vunpack.i.h.bf16 %v12274_v4  ;;  %v13704_v4 = vunpack.i.l.bf16 %v12066_v12 }
 0x8a9   : > { %v13706_v12 = vpack.i.bf16 %v12177_v0, %v12174_v58 }
 0x8ab   : > { %7684 = vrot.lane.b32.xlu0 %v11941_v23, %s7936_s21  ;;  %v7517_v23 = vunpack.i.h.bf16 %v12211_v61  ;;  %v13696_v61 = vunpack.i.h.bf16 %v11887_v21 }
 0x8ad   : > { %v4047_v5 = vsel %vm503_vm3, %v13694_v18, %v7517_v23  ;;  %v12334_v30 = vpop.permute.xlu1 %7579  ;;  %vm5122_vm3 = vcmask 1043456  }
 0x8ae   : > { %v7728_v33 = vpack.i.bf16 %v7517_v23, %v4047_v5  ;;  %v13708_v23 = vld [vmem:[#allocation18_spill] sm:$0xff] }
 0x8b0   : > { %7719 = vrot.lane.b32.xlu2 %v12115_v24, %s7936_s21  ;;  %7714 = vrot.lane.b32.xlu1 %v7713_v27, %s7936_s21  ;;  %v13693_v24 = vunpack.i.h.bf16 %v12006_v35  ;;  %v12338_v35 = vpop.permute.xlu2 %7594 }
 0x8b2   : > { %v4164_v49 = vsel %vm630_vm6, %v7356_v22, %v13693_v24 }
 0x8b3   : > { %7689 = vrot.lane.b32.xlu0 %v13692_v42, %s7936_s21  ;;  %v7753_v11 = vpack.i.bf16 %v4164_v49, %v7356_v22 }
 0x8b5   : > { %v12350_v44 = vpop.permute.xlu1 %7584 }
 0x8b8   : > { %7724 = vrot.lane.b32.xlu2 %v12092_v62, %s7936_s21  ;;  %7734 = vrot.lane.b32.xlu1 %v7733_v15, %s7936_s21  ;;  %v7331_v62 = vunpack.i.l.bf16 %v11887_v21  ;;  %v13698_v21 = vpack.i.bf16 %v12159_v19, %v12150_v26  ;;  %v13700_v26 = vpack.i.bf16 %v11964_v17, %v11961_v36  ;;  %v13701_v19 = vunpack.i.h.bf16 %v12237_v56 }
 0x8b9   : > { %v13702_v36 = vunpack.i.l.bf16 %v12096_v10 }
 0x8ba   : > { %v4160_v13 = vsel %vm630_vm6, %v7331_v62, %v13696_v61 }
 0x8bb   : > { %7694 = vrot.lane.b32.xlu0 %v13695_v2, %s7936_s21  ;;  %v7768_v31 = vpack.i.bf16 %v4160_v13, %v7331_v62  ;;  %v7828_v17 = vpack.i.bf16 %v13702_v36, %v13701_v19  ;;  %v7571_v62 = vunpack.i.l.bf16 %v12320_v6 }
 0x8bd   : > { %v12368_v50 = vpop.permute.xlu1 %7599 }
 0x8be   : > { %v13339_v49 = vunpack.i.h.bf16 %v12368_v50  ;;  %v7601_v18 = vunpack.i.l.bf16 %v12368_v50 }
 0x8c0   : > { %7729 = vrot.lane.b32.xlu2 %v7728_v33, %s7936_s21  ;;  %7754 = vrot.lane.b32.xlu1 %v7753_v11, %s7936_s21  ;;  %v13338_v33 = vunpack.i.h.bf16 %v12320_v6  ;;  %v4658_v45 = vsel %vm1095_vm11, %v7601_v18, %v13339_v49 }
 0x8c3   : > { %7699 = vrot.lane.b32.xlu0 %v12103_v39, %s7936_s21  ;;  %v13699_v39 = vpack.i.bf16 %v12137_v51, %v12044_v9  ;;  %v7813_v51 = vpack.i.bf16 %v7482_v53, %v7547_v43  ;;  %v12398_v53 = vpop.permute.xlu0 %7554 }
 0x8c8   : > { %7739 = vrot.lane.b32.xlu2 %v7738_v63, %s7936_s21  ;;  %7769 = vrot.lane.b32.xlu1 %v7768_v31, %s7936_s21 }
 0x8ca   : > { %v12352_v41 = vpop.permute.xlu2 %7609 }
 0x8cb   : > { %7709 = vrot.lane.b32.xlu0 %v13698_v21, %s7936_s21  ;;  %v13709_v21 = vld [vmem:[#allocation13_spill] sm:$0xff] }
 0x8d0   : > { %7744 = vrot.lane.b32.xlu2 %v13699_v39, %s7936_s21  ;;  %7784 = vrot.lane.b32.xlu1 %v12122_v55, %s7936_s21 }
 0x8d2   : > { %v12364_v46 = vpop.permute.xlu2 %7644  ;;  %v12380_v55 = vpop.permute.xlu1 %7604 }
 0x8d3   : > { %v7647_v25 = vunpack.i.h.bf16 %v12364_v46  ;;  %v7646_v8 = vunpack.i.l.bf16 %v12364_v46  ;;  %7764 = vrot.lane.b32.xlu0 %v13700_v26, %s7936_s21  ;;  %v12643_v46 = vld [vmem:[#allocation4 + $0x138] sm:$0xff] }
 0x8d5   : > { %v4664_v9 = vsel %vm1095_vm11, %v7646_v8, %v7647_v25  ;;  %v4655_v8 = vsel %vm1095_vm11, %v7571_v62, %v13338_v33 }
 0x8d6   : > { %4847 = vmatpush.msra.mxu3 %v4664_v9 }
 0x8d8   : > { %7749 = vrot.lane.b32.xlu2 %v12052_v29, %s7936_s21  ;;  %7814 = vrot.lane.b32.xlu1 %v7813_v51, %s7936_s21  ;;  %v4295_v29 = vsel %vm762_vm10, %v7551_v32, %v7552_v57  ;;  %v4291_v32 = vsel %vm762_vm10, %v13704_v4, %v7462_v1 }
 0x8d9   : > { %v7853_v56 = vpack.i.bf16 %v7552_v57, %v4295_v29  ;;  %v7596_v57 = vunpack.i.l.bf16 %v12338_v35  ;;  %v13710_v29 = vld [vmem:[#allocation7_spill] sm:$0xff] }
 0x8da   : > { %v12400_v10 = vpop.permute.xlu1 %7614 }
 0x8db   : > { %7779 = vrot.lane.b32.xlu0 %v7778_v7, %s7936_s21  ;;  %v13703_v7 = vpack.i.bf16 %v11979_v38, %v12250_v37  ;;  %v13705_v38 = vpack.i.bf16 %v12222_v14, %v12219_v48  ;;  %v7858_v37 = vpack.i.bf16 %v7462_v1, %v4291_v32  ;;  %v7582_v14 = vunpack.i.h.bf16 %v12334_v30 }
 0x8dc   : > { %v7617_v22 = vunpack.i.h.bf16 %v12400_v10  ;;  %v7616_v9 = vunpack.i.l.bf16 %v12400_v10 }
 0x8de   : > { %v4649_v4 = vsel %vm1095_vm11, %v7616_v9, %v7617_v22 }
 0x8e0   : > { %7759 = vrot.lane.b32.xlu2 %v12064_v28, %s7936_s21  ;;  %7829 = vrot.lane.b32.xlu1 %v7828_v17, %s7936_s21  ;;  %v13336_v17 = vunpack.i.h.bf16 %v12338_v35 }
 0x8e2   : > { %v12417_v54 = vpop.permute.xlu1 %7624 }
 0x8e3   : > { %7794 = vrot.lane.b32.xlu0 %v13703_v7, %s7936_s21  ;;  %v7627_v31 = vunpack.i.h.bf16 %v12417_v54 }
 0x8e8   : > { %7774 = vrot.lane.b32.xlu2 %v12194_v59, %s7936_s21  ;;  %7854 = vrot.lane.b32.xlu1 %v7853_v56, %s7936_s21 }
 0x8ea   : > { %v12406_v28 = vpop.permute.xlu2 %7654  ;;  %v12434_v48 = vpop.permute.xlu1 %7629 }
 0x8eb   : > { %7799 = vrot.lane.b32.xlu0 %v13705_v38, %s7936_s21  ;;  %v13335_v56 = vunpack.i.h.bf16 %v12434_v48  ;;  %v7657_v33 = vunpack.i.h.bf16 %v12406_v28  ;;  %v7656_v49 = vunpack.i.l.bf16 %v12406_v28 }
 0x8ed   : > { %v12415_v27 = vpop.permute.xlu0 %7564 }
 0x8ee   : > { %v7567_v32 = vunpack.i.h.bf16 %v12415_v27  ;;  %v7566_v38 = vunpack.i.l.bf16 %v12415_v27 }
 0x8f0   : > { %7789 = vrot.lane.b32.xlu2 %v12082_v40, %s7936_s21  ;;  %7859 = vrot.lane.b32.xlu1 %v7858_v37, %s7936_s21 }
 0x8f2   : > { %v12422_v59 = vpop.permute.xlu2 %7659 }
 0x8f3   : > { %7804 = vrot.lane.b32.xlu0 %v13706_v12, %s7936_s21 }
 0x8f5   : > { %v12428_v3 = vpop.permute.xlu0 %7574 }
 0x8f8   : > { %7819 = vrot.lane.b32.xlu2 %v12156_v20, %s7936_s21  ;;  %7874 = vrot.lane.b32.xlu1 %v11956_v60, %s7936_s21  ;;  %v13707_v60 = vld [vmem:[#allocation23_spill] sm:$0xff] }
 0x8fa   : > { %v12436_v40 = vpop.permute.xlu2 %7674 }
 0x8fb   : > { %v13321_v42 = vunpack.i.l.bf16 %v12436_v40  ;;  %7809 = vrot.lane.b32.xlu0 %v12139_v16, %s7936_s21 }
 0x8fc   : > { %v12455_v15 = vpop.permute.xlu1 %7634 }
 0x8fd   : > { %v12447_v20 = vsel %vm1095_vm11, %v7582_v14, %v13321_v42  ;;  %v12449_v58 = vpop.permute.xlu0 %7589  ;;  %v7637_v18 = vunpack.i.h.bf16 %v12455_v15 }
 0x900   : > { %7834 = vrot.lane.b32.xlu2 %v13707_v60, %s7936_s21  ;;  %v13711_v60 = vld [vmem:[#allocation10_spill] sm:$0xff] }
 0x902   : > { %v12453_v0 = vpop.permute.xlu2 %7704 }
 0x903   : > { %v13326_v16 = vunpack.i.l.bf16 %v12453_v0  ;;  %7824 = vrot.lane.b32.xlu0 %v13708_v23, %s7936_s21  ;;  %v4646_v23 = vsel %vm1095_vm11, %v7596_v57, %v13336_v17  ;;  %v7561_v57 = vunpack.i.l.bf16 %v12315_v47 }
 0x905   : > { %v12464_v24 = vsel %vm1095_vm11, %v7617_v22, %v13326_v16  ;;  %v12468_v5 = vpop.permute.xlu0 %7619  ;;  %v7636_v22 = vunpack.i.l.bf16 %v12455_v15  ;;  %v4643_v15 = vsel %vm1095_vm11, %v7566_v38, %v7567_v32  ;;  %v13713_v38 = vld [vmem:[#allocation25_spill] sm:$0xff] }
 0x906   : > { %v7622_v2 = vunpack.i.h.bf16 %v12468_v5  ;;  %v7621_v11 = vunpack.i.l.bf16 %v12468_v5  ;;  %v7606_v5 = vunpack.i.l.bf16 %v12380_v55 }
 0x908   : > { %7844 = vrot.lane.b32.xlu2 %v12203_v52, %s7936_s21  ;;  %v4661_v43 = vsel %vm1095_vm11, %v7621_v11, %v7622_v2 }
 0x909   : > { %4848 = vmatpush.msra.mxu3 %v4661_v43  ;;  %v13334_v43 = vunpack.i.h.bf16 %v12352_v41 }
 0x90a   : > { %v12479_v61 = vpop.permute.xlu2 %7719  ;;  %v12481_v13 = vpop.permute.xlu1 %7649 }
 0x90b   : > { %v13325_v52 = vunpack.i.l.bf16 %v12479_v61  ;;  %v7652_v34 = vunpack.i.h.bf16 %v12481_v13  ;;  %v7651_v63 = vunpack.i.l.bf16 %v12481_v13  ;;  %7839 = vrot.lane.b32.xlu0 %v13709_v21, %s7936_s21  ;;  %4849 = vmatpush.msra.mxu3 %v4658_v45  ;;  %v7611_v45 = vunpack.i.l.bf16 %v12352_v41 }
 0x90c   : > { %v7591_v21 = vunpack.i.l.bf16 %v12449_v58 }
 0x90d   : > { %v4712_v39 = vsel %vm1095_vm11, %v7651_v63, %v7652_v34  ;;  %v12503_v26 = vsel %vm1095_vm11, %v7627_v31, %v13325_v52  ;;  %v12506_v51 = vpop.permute.xlu0 %7639  ;;  %4850 = vmatpush.msra.mxu3 %v4655_v8  ;;  %v7592_v63 = vunpack.i.h.bf16 %v12449_v58  ;;  %v13333_v8 = vunpack.i.h.bf16 %v12315_v47  ;;  %v13712_v58 = vld [vmem:[#allocation19_spill] sm:$0xff] }
 0x90e   : > { %4873 = vmatpush.msrb.mxu2 %v4712_v39  ;;  %v13337_v19 = vunpack.i.h.bf16 %v12506_v51  ;;  %v7641_v36 = vunpack.i.l.bf16 %v12506_v51  ;;  %v4640_v39 = vsel %vm1095_vm11, %v7636_v22, %v7637_v18 }
 0x910   : > { %7864 = vrot.lane.b32.xlu2 %v13710_v29, %s7936_s21  ;;  %v4652_v7 = vsel %vm1095_vm11, %v7641_v36, %v13337_v19  ;;  %v12665_v19 = vld [vmem:[#allocation4 + $0x150] sm:$0xff] }
 0x911   : > { %4851 = vmatpush.msra.mxu3 %v4652_v7 }
 0x912   : > { %v12518_v10 = vpop.permute.xlu2 %7724  ;;  %v12520_v1 = vpop.permute.xlu1 %7664 }
 0x913   : > { %v13320_v37 = vunpack.i.l.bf16 %v12518_v10  ;;  %v13324_v12 = vunpack.i.l.bf16 %v12520_v1  ;;  %7849 = vrot.lane.b32.xlu0 %v13711_v60, %s7936_s21  ;;  %4852 = vmatpush.msra.mxu3 %v4649_v4  ;;  %v4637_v4 = vsel %vm1095_vm11, %v7611_v45, %v13334_v43  ;;  %v7326_v60 = vunpack.i.l.bf16 %v13712_v58 }
 0x915   : > { %v12537_v27 = vsel %vm1095_vm11, %v7567_v32, %v13324_v12  ;;  %v12544_v11 = vsel %vm1095_vm11, %v13335_v56, %v13320_v37  ;;  %v12546_v62 = vpop.permute.xlu0 %7669  ;;  %4853 = vmatpush.msra.mxu3 %v4646_v23  ;;  %v13327_v32 = vunpack.i.h.bf16 %v13712_v58  ;;  %v4634_v23 = vsel %vm1095_vm11, %v7591_v21, %v7592_v63  ;;  %v13715_v37 = vld [vmem:[#allocation14_spill] sm:$0xff] }
 0x916   : > { %v4631_v21 = vsel %vm1095_vm11, %v7561_v57, %v13333_v8  ;;  %v13717_v52 = vunpack.i.h.bf16 %v13715_v37  ;;  %v7576_v8 = vunpack.i.l.bf16 %v12428_v3 }
 0x917   : > { %4854 = vmatpush.msra.mxu3 %v4643_v15  ;;  %v4628_v42 = vsel %vm1095_vm11, %v7326_v60, %v13327_v32  ;;  %v12606_v32 = vld [vmem:[#allocation4 + $0x120] sm:$0xff] }
 0x919   : > { %4855 = vmatpush.msra.mxu3 %v4640_v39  ;;  %v13714_v39 = vld [vmem:[#allocation8_spill] sm:$0xff] }
 0x91a   : > { %v12555_v9 = vpop.permute.xlu2 %7729  ;;  %v12557_v36 = vpop.permute.xlu1 %7679 }
 0x91b   : > { %v13323_v29 = vunpack.i.l.bf16 %v12555_v9  ;;  %v13322_v7 = vunpack.i.l.bf16 %v12557_v36  ;;  %7869 = vrot.lane.b32.xlu0 %v13713_v38, %s7936_s21  ;;  %4856 = vmatpush.msra.mxu3 %v4637_v4  ;;  %v13332_v38 = vunpack.i.h.bf16 %v13714_v39  ;;  %v7306_v4 = vunpack.i.l.bf16 %v13714_v39 }
 0x91d   : > { %v12573_v22 = vsel %vm1095_vm11, %v7637_v18, %v13323_v29  ;;  %v12578_v15 = vsel %vm1095_vm11, %v7592_v63, %v13322_v7  ;;  %v12580_v45 = vpop.permute.xlu0 %7684  ;;  %4857 = vmatpush.msra.mxu3 %v4634_v23  ;;  %v7286_v18 = vunpack.i.l.bf16 %v13715_v37  ;;  %v13716_v23 = vld [vmem:[#allocation20_spill] sm:$0xff]  ;;  %v4625_v57 = vsel %vm1095_vm11, %v7306_v4, %v13332_v38 }
 0x91e   : > { %v13330_v29 = vunpack.i.h.bf16 %v13716_v23  ;;  %v7266_v12 = vunpack.i.l.bf16 %v13716_v23  ;;  %v7577_v38 = vunpack.i.h.bf16 %v12428_v3 }
 0x91f   : > { %4858 = vmatpush.msra.mxu3 %v4631_v21  ;;  %v4622_v60 = vsel %vm1095_vm11, %v7286_v18, %v13717_v52 }
 0x921   : > { %4859 = vmatpush.msra.mxu3 %v4628_v42  ;;  %v4619_v42 = vsel %vm1095_vm11, %v7266_v12, %v13330_v29 }
 0x922   : > { %v12591_v63 = vpop.permute.xlu2 %7739  ;;  %v12593_v7 = vpop.permute.xlu1 %7714 }
 0x923   : > { %4860 = vmatpush.msra.mxu3 %v4625_v57  ;;  %v13328_v21 = vunpack.i.l.bf16 %v12591_v63  ;;  %v13329_v18 = vunpack.i.h.bf16 %v12593_v7  ;;  %v13341_v43 = vunpack.i.l.bf16 %v12593_v7 }
 0x925   : > { %v12604_v16 = vpop.permute.xlu0 %7689  ;;  %4861 = vmatpush.msra.mxu3 %v4622_v60  ;;  %v4713_v37 = vsel %vm1095_vm11, %v7652_v34, %v13328_v21  ;;  %v4662_v13 = vsel %vm1095_vm11, %v7622_v2, %v13329_v18 }
 0x926   : > { %v7691_v28 = vunpack.i.l.bf16 %v12604_v16 }
 0x927   : > { %4862 = vmatpush.msra.mxu3 %v4619_v42 }
 0x928   : > { %4863 = vmatmul.f32.vlgmr.msra.gmra.mxu3 %v12606_v32 }
 0x929   : > { %4951 = vmatpush.msrb.mxu3 %v4713_v37 }
 0x92a   : > { %v12617_v4 = vpop.permute.xlu2 %7744  ;;  %v12619_v52 = vpop.permute.xlu1 %7734 }
 0x92b   : > { %v13331_v57 = vunpack.i.h.bf16 %v12617_v4  ;;  %v13342_v18 = vunpack.i.l.bf16 %v12617_v4 }
 0x92d   : > { %v4665_v12 = vsel %vm1095_vm11, %v7647_v25, %v13331_v57  ;;  %v12628_v60 = vpop.permute.xlu0 %7694 }
 0x92e   : > { %4925 = vmatpush.msrb.mxu1 %v4665_v12  ;;  %v7607_v12 = vunpack.i.h.bf16 %v12380_v55 }
 0x930   : > { %4926 = vmatpush.msrb.mxu1 %v4662_v13  ;;  %4866 = vmatmul.f32.gmra.mxu3 %v12643_v46  ;;  %v7742_v13 = vunpack.i.h.bf16 %v12591_v63  ;;  %v4706_v3 = vsel %vm1095_vm11, %v7606_v5, %v7607_v12 }
 0x932   : > { %v12635_v34 = vpop.permute.xlu2 %7749  ;;  %v12637_v42 = vpop.permute.xlu1 %7754 }
 0x935   : > { %v12639_v37 = vpop.permute.xlu0 %7699 }
 0x938   : > { %4868 = vmatmul.f32.gmra.mxu3 %v12665_v19 }
 0x93a   : > { %v12641_v21 = vpop.permute.xlu2 %7759  ;;  %v12646_v25 = vpop.permute.xlu1 %7769 }
 0x93d   : > { %v12650_v2 = vpop.permute.xlu0 %7709 }
 0x93e   : > { %v13340_v29 = vunpack.i.h.bf16 %v12650_v2  ;;  %v7711_v57 = vunpack.i.l.bf16 %v12650_v2 }
 0x940   : > { %v4709_v56 = vsel %vm1095_vm11, %v7742_v13, %v7711_v57  ;;  %v4710_v55 = vsel %vm1095_vm11, %v7711_v57, %v13340_v29  ;;  %v4707_v13 = vsel %vm1095_vm11, %v7607_v12, %v13342_v18  ;;  %v7626_v57 = vunpack.i.l.bf16 %v12417_v54 }
 0x941   : > { %4874 = vmatpush.msrb.mxu2 %v4709_v56  ;;  %4952 = vmatpush.msrb.mxu3 %v4710_v55  ;;  %v4703_v56 = vsel %vm1095_vm11, %v7576_v8, %v7577_v38  ;;  %v4704_v55 = vsel %vm1095_vm11, %v7577_v38, %v13341_v43  ;;  %v4700_v12 = vsel %vm1095_vm11, %v7656_v49, %v7657_v33  ;;  %v12690_v38 = vld [vmem:[#allocation4 + $0x168] sm:$0xff] }
 0x942   : > { %v12663_v17 = vpop.permute.xlu2 %7774  ;;  %v12682_v5 = vpop.permute.xlu1 %7784  ;;  %v4697_v8 = vsel %vm1095_vm11, %v7626_v57, %v7627_v31  ;;  %13718 = vst [vmem:[#allocation12_spill] sm:$0xff] %v12690_v38  ;;  %4870 = vmatmul.f32.gmra.mxu3 %v12690_v38  ;;  %v13350_v38 = vunpack.i.l.bf16 %v12546_v62 }
 0x943   : > { %4875 = vmatpush.msrb.mxu2 %v4706_v3  ;;  %4953 = vmatpush.msrb.mxu3 %v4707_v13  ;;  %v7581_v3 = vunpack.i.l.bf16 %v12334_v30  ;;  %v7722_v13 = vunpack.i.h.bf16 %v12479_v61  ;;  %v7777_v54 = vunpack.i.h.bf16 %v12663_v17 }
 0x945   : > { %v12679_v29 = vpop.permute.xlu0 %7764  ;;  %4876 = vmatpush.msrb.mxu2 %v4703_v56  ;;  %4954 = vmatpush.msrb.mxu3 %v4704_v55  ;;  %v4694_v55 = vsel %vm1095_vm11, %v7722_v13, %v7691_v28  ;;  %v4691_v49 = vsel %vm1095_vm11, %v7581_v3, %v7582_v14  ;;  %v7787_v14 = vunpack.i.h.bf16 %v12682_v5 }
 0x947   : > { %4877 = vmatpush.msrb.mxu2 %v4700_v12 }
 0x949   : > { %4878 = vmatpush.msrb.mxu2 %v4697_v8  ;;  %v13346_v8 = vunpack.i.l.bf16 %v12682_v5 }
 0x94a   : > { %v12692_v56 = vpop.permute.xlu2 %7789  ;;  %v12706_v43 = vpop.permute.xlu1 %7814 }
 0x94b   : > { %4879 = vmatpush.msrb.mxu2 %v4694_v55  ;;  %v13347_v13 = vunpack.i.l.bf16 %v12692_v56 }
 0x94d   : > { %v12699_v12 = vpop.permute.xlu0 %7779  ;;  %4880 = vmatpush.msrb.mxu2 %v4691_v49  ;;  %v4718_v49 = vsel %vm1095_vm11, %v7787_v14, %v13347_v13  ;;  %v13720_v13 = vunpack.i.h.bf16 %v12320_v6  ;;  %v7631_v6 = vunpack.i.l.bf16 %v12434_v48 }
 0x94e   : > { %v7782_v31 = vunpack.i.h.bf16 %v12699_v12  ;;  %v13345_v57 = vunpack.i.l.bf16 %v12699_v12 }
 0x950   : > { %v4724_v30 = vsel %vm1095_vm11, %v7777_v54, %v13345_v57  ;;  %v4721_v3 = vsel %vm1095_vm11, %v7782_v31, %v13346_v8  ;;  %v13349_v31 = vunpack.i.l.bf16 %v12619_v52  ;;  %v4656_v57 = vsel %vm1095_vm11, %v13720_v13, %v13350_v38 }
 0x951   : > { %4911 = vmatpush.msrb.mxu0 %v4724_v30 }
 0x952   : > { %v12715_v55 = vpop.permute.xlu2 %7819 }
 0x953   : > { %4912 = vmatpush.msrb.mxu0 %v4721_v3  ;;  %v13719_v3 = vunpack.i.h.bf16 %v12368_v50  ;;  %v7686_v50 = vunpack.i.l.bf16 %v12580_v45 }
 0x955   : > { %v12720_v18 = vpop.permute.xlu0 %7794  ;;  %4913 = vmatpush.msrb.mxu0 %v4718_v49  ;;  %v12735_v49 = vpop.permute.xlu1 %7829 }
 0x956   : > { %v13351_v54 = vunpack.i.h.bf16 %v12720_v18  ;;  %v13348_v30 = vunpack.i.l.bf16 %v12720_v18 }
 0x958   : > { %v4659_v8 = vsel %vm1095_vm11, %v13719_v3, %v13351_v54  ;;  %v4701_v14 = vsel %vm1095_vm11, %v7657_v33, %v13348_v30  ;;  %v13721_v3 = vunpack.i.h.bf16 %v12506_v51 }
 0x959   : > { %4927 = vmatpush.msrb.mxu1 %v4659_v8  ;;  %4955 = vmatpush.msrb.mxu3 %v4701_v14  ;;  %v13722_v8 = vunpack.i.h.bf16 %v12604_v16 }
 0x95a   : > { %v4653_v33 = vsel %vm1095_vm11, %v13721_v3, %v13349_v31  ;;  %v7587_v3 = vunpack.i.h.bf16 %v12350_v44  ;;  %v7586_v31 = vunpack.i.l.bf16 %v12350_v44  ;;  %v13352_v44 = vunpack.i.h.bf16 %v12628_v60 }
 0x95b   : > { %4928 = vmatpush.msrb.mxu1 %v4656_v57  ;;  %4956 = vmatpush.msrb.mxu3 %v12503_v26  ;;  %v4695_v14 = vsel %vm1095_vm11, %v7691_v28, %v13722_v8  ;;  %v7677_v26 = vunpack.i.h.bf16 %v12436_v40  ;;  %v12756_v57 = vpop.permute.xlu2 %7834  ;;  %v7696_v28 = vunpack.i.l.bf16 %v12628_v60  ;;  %v13723_v8 = vunpack.i.h.bf16 %v12338_v35 }
 0x95c   : > { %v13353_v35 = vunpack.i.l.bf16 %v12635_v34 }
 0x95d   : > { %v12752_v30 = vpop.permute.xlu0 %7799  ;;  %4929 = vmatpush.msrb.mxu1 %v4653_v33  ;;  %4957 = vmatpush.msrb.mxu3 %v4695_v14  ;;  %v4647_v14 = vsel %vm1095_vm11, %v13723_v8, %v7686_v50  ;;  %v12782_v8 = vpop.permute.xlu1 %7854 }
 0x95e   : > { %v13354_v13 = vunpack.i.h.bf16 %v12752_v30  ;;  %v7801_v51 = vunpack.i.l.bf16 %v12752_v30 }
 0x95f   : > { %4930 = vmatpush.msrb.mxu1 %v12464_v24  ;;  %4958 = vmatpush.msrb.mxu3 %v12447_v20  ;;  %v7727_v20 = vunpack.i.h.bf16 %v12518_v10  ;;  %v7701_v24 = vunpack.i.l.bf16 %v12639_v37 }
 0x960   : > { %v4688_v33 = vsel %vm1095_vm11, %v7677_v26, %v7801_v51  ;;  %v4689_v38 = vsel %vm1095_vm11, %v7801_v51, %v13354_v13  ;;  %v13724_v26 = vunpack.i.h.bf16 %v12434_v48  ;;  %v7757_v48 = vunpack.i.h.bf16 %v12637_v42 }
 0x961   : > { %4881 = vmatpush.msrb.mxu2 %v4688_v33  ;;  %4931 = vmatpush.msrb.mxu1 %v4647_v14  ;;  %v4682_v51 = vsel %vm1095_vm11, %v7727_v20, %v7696_v28  ;;  %v4679_v33 = vsel %vm1095_vm11, %v7586_v31, %v7587_v3  ;;  %v7661_v14 = vunpack.i.l.bf16 %v12422_v59  ;;  %v13725_v20 = vunpack.i.h.bf16 %v12352_v41 }
 0x962   : > { %4959 = vmatpush.msrb.mxu3 %v4689_v38  ;;  %v4685_v54 = vsel %vm1095_vm11, %v7631_v6, %v13724_v26  ;;  %v7752_v38 = vunpack.i.h.bf16 %v12635_v34  ;;  %v7771_v13 = vunpack.i.l.bf16 %v12646_v25 }
 0x963   : > { %4882 = vmatpush.msrb.mxu2 %v4685_v54  ;;  %4932 = vmatpush.msrb.mxu1 %v12537_v27  ;;  %v4683_v27 = vsel %vm1095_vm11, %v7696_v28, %v13352_v44  ;;  %v4638_v26 = vsel %vm1095_vm11, %v13725_v20, %v7701_v24  ;;  %v7766_v28 = vunpack.i.l.bf16 %v12679_v29  ;;  %v12810_v44 = vpop.permute.xlu2 %7844  ;;  %v13726_v20 = vld [vmem:[#allocation9_spill] sm:$0xff] }
 0x964   : > { %4960 = vmatpush.msrb.mxu3 %v12544_v11  ;;  %v7756_v11 = vunpack.i.l.bf16 %v12637_v42  ;;  %v7556_v42 = vunpack.i.l.bf16 %v12398_v53 }
 0x965   : > { %v12790_v6 = vpop.permute.xlu0 %7804  ;;  %4883 = vmatpush.msrb.mxu2 %v4682_v51  ;;  %4933 = vmatpush.msrb.mxu1 %v12573_v22  ;;  %v7761_v51 = vunpack.i.l.bf16 %v12641_v21  ;;  %v4680_v22 = vsel %vm1095_vm11, %v7587_v3, %v13353_v35  ;;  %v13727_v3 = vunpack.i.h.bf16 %v12315_v47  ;;  %v7856_v47 = vunpack.i.l.bf16 %v12782_v8 }
 0x966   : > { %v13355_v54 = vunpack.i.h.bf16 %v12790_v6  ;;  %v7806_v31 = vunpack.i.l.bf16 %v12790_v6  ;;  %4961 = vmatpush.msrb.mxu3 %v4683_v27 }
 0x967   : > { %4884 = vmatpush.msrb.mxu2 %v4679_v33  ;;  %4934 = vmatpush.msrb.mxu1 %v4638_v26  ;;  %v7511_v33 = vunpack.i.l.bf16 %v13726_v20  ;;  %v13356_v26 = vunpack.i.h.bf16 %v12679_v29  ;;  %v4632_v35 = vsel %vm1095_vm11, %v13727_v3, %v7661_v14 }
 0x968   : > { %4962 = vmatpush.msrb.mxu3 %v4680_v22  ;;  %v4676_v27 = vsel %vm1095_vm11, %v7752_v38, %v7806_v31  ;;  %v4677_v41 = vsel %vm1095_vm11, %v7806_v31, %v13355_v54  ;;  %v7762_v22 = vunpack.i.h.bf16 %v12641_v21  ;;  %v7772_v38 = vunpack.i.h.bf16 %v12646_v25 }
 0x969   : > { %4885 = vmatpush.msrb.mxu2 %v4676_v27  ;;  %4935 = vmatpush.msrb.mxu1 %v12578_v15  ;;  %v4673_v31 = vsel %vm1095_vm11, %v7756_v11, %v7757_v48  ;;  %v13357_v54 = vunpack.i.l.bf16 %v12663_v17  ;;  %v4674_v15 = vsel %vm1095_vm11, %v7757_v48, %v7761_v51  ;;  %v13728_v25 = vunpack.i.h.bf16 %v13712_v58 }
 0x96a   : > { %4963 = vmatpush.msrb.mxu3 %v4677_v41  ;;  %v4670_v27 = vsel %vm1095_vm11, %v7762_v22, %v7766_v28  ;;  %v7857_v11 = vunpack.i.h.bf16 %v12782_v8  ;;  %v13729_v48 = vunpack.i.h.bf16 %v13714_v39  ;;  %v7792_v58 = vunpack.i.h.bf16 %v12692_v56 }
 0x96b   : > { %4886 = vmatpush.msrb.mxu2 %v4673_v31  ;;  %4936 = vmatpush.msrb.mxu1 %v4632_v35  ;;  %v4629_v41 = vsel %vm1095_vm11, %v13728_v25, %v7556_v42  ;;  %v4671_v35 = vsel %vm1095_vm11, %v7766_v28, %v13356_v26  ;;  %v12848_v31 = vld [vmem:[#allocation4 + $0x128] sm:$0xff]  ;;  %v4668_v39 = vsel %vm1095_vm11, %v7772_v38, %v13357_v54  ;;  %v13730_v28 = vld [vmem:[#allocation15_spill] sm:$0xff]  ;;  %v13731_v26 = vunpack.i.l.bf16 %v12699_v12 }
 0x96c   : > { %4964 = vmatpush.msrb.mxu3 %v4674_v15  ;;  %v4626_v22 = vsel %vm1095_vm11, %v13729_v48, %v7511_v33  ;;  %v12851_v15 = vpop.permute.xlu1 %7859  ;;  %v13358_v48 = vunpack.i.l.bf16 %v13730_v28  ;;  %v7817_v54 = vunpack.i.h.bf16 %v12706_v43  ;;  %v7816_v12 = vunpack.i.l.bf16 %v12706_v43 }
 0x96d   : > { %v7810_v3 = vpop.permute.xlu0 %7809  ;;  %4887 = vmatpush.msrb.mxu2 %v4670_v27  ;;  %4937 = vmatpush.msrb.mxu1 %v4629_v41  ;;  %v4667_v27 = vsel %vm1095_vm11, %v7771_v13, %v7772_v38  ;;  %v7847_v41 = vunpack.i.h.bf16 %v12810_v44  ;;  %v12864_v13 = vld [vmem:[#allocation4 + $0x130] sm:$0xff]  ;;  %v4726_v38 = vsel %vm1095_vm11, %v7856_v47, %v7857_v11  ;;  %v13735_v43 = vunpack.i.h.bf16 %v13716_v23 }
 0x96e   : > { %v7812_v8 = vunpack.i.h.bf16 %v7810_v3  ;;  %v7811_v25 = vunpack.i.l.bf16 %v7810_v3  ;;  %4965 = vmatpush.msrb.mxu3 %v4671_v35  ;;  %v4725_v3 = vsel %vm1095_vm11, %v13731_v26, %v7856_v47  ;;  %v12874_v26 = vpop.permute.xlu2 %7864  ;;  %v13734_v47 = vunpack.i.l.bf16 %v12682_v5 }
 0x96f   : > { %4888 = vmatpush.msrb.mxu2 %v4667_v27  ;;  %4938 = vmatpush.msrb.mxu1 %v4626_v22  ;;  %v7861_v27 = vunpack.i.l.bf16 %v12851_v15  ;;  %v13732_v22 = vunpack.i.h.bf16 %v12617_v4  ;;  %v13736_v5 = vunpack.i.l.bf16 %v12692_v56  ;;  %v13737_v23 = vunpack.i.h.bf16 %v12593_v7 }
 0x970   : > { %4966 = vmatpush.msrb.mxu3 %v4668_v39  ;;  %4889 = vmatmul.f32.vlgmr.msrb.gmra.mxu2 %v12848_v31  ;;  %v4715_v35 = vsel %vm1095_vm11, %v7792_v58, %v7811_v25  ;;  %v13733_v58 = vld [vmem:[#allocation21_spill] sm:$0xff]  ;;  %v4722_v11 = vsel %vm1095_vm11, %v13734_v47, %v7847_v41 }
 0x971   : > { %4967 = vmatmul.f32.vlgmr.msrb.gmra.mxu3 %v12848_v31  ;;  %4989 = vmatpush.msra.mxu2 %v4725_v3  ;;  %v4666_v39 = vsel %vm1095_vm11, %v13732_v22, %v7812_v8  ;;  %v7821_v8 = vunpack.i.l.bf16 %v12715_v55  ;;  %v4620_v3 = vsel %vm1095_vm11, %v13735_v43, %v13358_v48  ;;  %v4719_v22 = vsel %vm1095_vm11, %v13736_v5, %v7861_v27 }
 0x972   : > { %5067 = vmatpush.msra.mxu3 %v4726_v38  ;;  %4914 = vmatpush.msrb.mxu0 %v4715_v35  ;;  %v7672_v35 = vunpack.i.h.bf16 %v12546_v62  ;;  %v7867_v38 = vunpack.i.h.bf16 %v12874_v26  ;;  %v4663_v47 = vsel %vm1095_vm11, %v13737_v23, %v7817_v54  ;;  %v7737_v48 = vunpack.i.h.bf16 %v12619_v52 }
 0x973   : > { %4939 = vmatpush.msrb.mxu1 %v13733_v58  ;;  %5308 = vmatmul.msk.f32.vlgmr.msrb.gmra.mxu0 %vm1312_vm12, %v12864_v13  ;;  %v13741_v23 = vunpack.i.l.bf16 %v12617_v4  ;;  %v7832_v4 = vunpack.i.h.bf16 %v12735_v49 }
 0x974   : > { %4990 = vmatpush.msra.mxu2 %v4722_v11  ;;  %5003 = vmatpush.msra.mxu0 %v4666_v39  ;;  %v7822_v39 = vunpack.i.h.bf16 %v12715_v55  ;;  %v13738_v11 = vunpack.i.l.bf16 %v12591_v63  ;;  %v4716_v56 = vsel %vm1095_vm11, %v7811_v25, %v7867_v38  ;;  %v12909_v55 = vld [vmem:[#allocation4 + $0x140] sm:$0xff]  ;;  %v13740_v63 = vunpack.i.h.bf16 %v12650_v2 }
 0x975   : > { %4940 = vmatpush.msrb.mxu1 %v4620_v3  ;;  %v7825_v58 = vpop.permute.xlu0 %7824  ;;  %v7707_v25 = vunpack.i.h.bf16 %v12453_v0  ;;  %v7687_v2 = vunpack.i.h.bf16 %v12580_v45  ;;  %v13749_v45 = vunpack.i.h.bf16 %v12604_v16 }
 0x976   : > { %4941 = vmatmul.f32.vlgmr.msrb.gmra.mxu1 %v12606_v32  ;;  %4991 = vmatpush.msra.mxu2 %v4719_v22  ;;  %v4714_v43 = vsel %vm1095_vm11, %v13738_v11, %v7816_v12  ;;  %v7826_v3 = vunpack.i.l.bf16 %v7825_v58  ;;  %v7827_v5 = vunpack.i.h.bf16 %v7825_v58  ;;  %v13739_v22 = vunpack.i.h.bf16 %v12720_v18  ;;  %v12920_v11 = vld [vmem:[#allocation4 + $0x148] sm:$0xff] }
 0x977   : > { %5004 = vmatpush.msra.mxu0 %v4663_v47  ;;  %5029 = vmatpush.msra.mxu1 %v4714_v43  ;;  %v4711_v12 = vsel %vm1095_vm11, %v13740_v63, %v7821_v8  ;;  %v13742_v58 = vunpack.i.l.bf16 %v12546_v62  ;;  %v7831_v8 = vunpack.i.l.bf16 %v12735_v49  ;;  %v13743_v43 = vunpack.i.l.bf16 %v12619_v52 }
 0x978   : > { %4992 = vmatpush.msra.mxu2 %v4716_v56  ;;  %v4660_v54 = vsel %vm1095_vm11, %v13739_v22, %v7822_v39  ;;  %v4708_v47 = vsel %vm1095_vm11, %v13741_v23, %v7826_v3  ;;  %v13744_v62 = vunpack.i.l.bf16 %v12593_v7  ;;  %v7667_v22 = vunpack.i.h.bf16 %v12520_v1  ;;  %v12948_v7 = vld [vmem:[#allocation4 + $0x158] sm:$0xff] }
 0x979   : > { %5005 = vmatpush.msra.mxu0 %v4660_v54  ;;  %5030 = vmatpush.msra.mxu1 %v4711_v12  ;;  %v4657_v39 = vsel %vm1095_vm11, %v13742_v58, %v7672_v35  ;;  %v4654_v3 = vsel %vm1095_vm11, %v13743_v43, %v7737_v48  ;;  %v7836_v54 = vunpack.i.l.bf16 %v12756_v57  ;;  %v13745_v49 = vunpack.i.l.bf16 %v12453_v0 }
 0x97a   : > { %4892 = vmatmul.f32.gmra.mxu2 %v12909_v55  ;;  %4970 = vmatmul.f32.gmra.mxu3 %v12909_v55  ;;  %v4705_v35 = vsel %vm1095_vm11, %v13744_v62, %v7827_v5  ;;  %v13746_v12 = vunpack.i.l.bf16 %v12720_v18  ;;  %v7732_v48 = vunpack.i.h.bf16 %v12555_v9  ;;  %v7837_v5 = vunpack.i.h.bf16 %v12756_v57 }
 0x97b   : > { %5006 = vmatpush.msra.mxu0 %v4657_v39  ;;  %5031 = vmatpush.msra.mxu1 %v4708_v47  ;;  %v4651_v63 = vsel %vm1095_vm11, %v13745_v49, %v7707_v25  ;;  %v4648_v0 = vsel %vm1095_vm11, %v7686_v50, %v7687_v2  ;;  %v13747_v23 = vunpack.i.l.bf16 %v12479_v61  ;;  %v12958_v47 = vld [vmem:[#allocation4 + $0x160] sm:$0xff]  ;;  %v7702_v25 = vunpack.i.h.bf16 %v12639_v37 }
 0x97c   : > { %5309 = vmatmul.msk.f32.gmra.mxu0 %vm1312_vm12, %v12920_v11  ;;  %v4702_v52 = vsel %vm1095_vm11, %v13746_v12, %v7831_v8  ;;  %v13748_v39 = vunpack.i.l.bf16 %v12520_v1  ;;  %v4696_v50 = vsel %vm1095_vm11, %v13749_v45, %v7836_v54  ;;  %v7682_v61 = vunpack.i.h.bf16 %v12557_v36  ;;  %v12988_v54 = vld [vmem:[#allocation4 + $0x170] sm:$0xff] }
 0x97d   : > { %5007 = vmatpush.msra.mxu0 %v4654_v3  ;;  %5032 = vmatpush.msra.mxu1 %v4705_v35  ;;  %v7840_v56 = vpop.permute.xlu0 %7839  ;;  %v4699_v18 = vsel %vm1095_vm11, %v13747_v23, %v7832_v4  ;;  %v13750_v4 = vunpack.i.l.bf16 %v12555_v9  ;;  %v13751_v8 = vunpack.i.l.bf16 %v12436_v40  ;;  %v7662_v43 = vunpack.i.h.bf16 %v12422_v59  ;;  %v13756_v23 = vld [vmem:[#allocation22_spill] sm:$0xff] }
 0x97e   : > { %4944 = vmatmul.f32.gmra.mxu1 %v12643_v46  ;;  %v7841_v58 = vunpack.i.l.bf16 %v7840_v56  ;;  %v4645_v57 = vsel %vm1095_vm11, %v13748_v39, %v7667_v22  ;;  %v7842_v2 = vunpack.i.h.bf16 %v7840_v56  ;;  %v7846_v62 = vunpack.i.l.bf16 %v12810_v44 }
 0x97f   : > { %5008 = vmatpush.msra.mxu0 %v4651_v63  ;;  %5033 = vmatpush.msra.mxu1 %v4702_v52  ;;  %v4642_v1 = vsel %vm1095_vm11, %v13750_v4, %v7732_v48  ;;  %v4693_v16 = vsel %vm1095_vm11, %v13751_v8, %v7837_v5  ;;  %v4639_v35 = vsel %vm1095_vm11, %v7701_v24, %v7702_v25  ;;  %v13752_v9 = vunpack.i.h.bf16 %v12752_v30  ;;  %v4308_v5 = vld [vmem:[#allocation4 + $0x178] sm:$0xff] }
 0x980   : > { %v7557_v40 = vunpack.i.h.bf16 %v12398_v53  ;;  %v13753_v63 = vunpack.i.l.bf16 %v12557_v36  ;;  %v13754_v24 = vunpack.i.l.bf16 %v12518_v10  ;;  %v7512_v52 = vunpack.i.h.bf16 %v13726_v20 }
 0x981   : > { %5009 = vmatpush.msra.mxu0 %v4648_v0  ;;  %5034 = vmatpush.msra.mxu1 %v4699_v18  ;;  %v4690_v22 = vsel %vm1095_vm11, %v13752_v9, %v7841_v58  ;;  %v7862_v48 = vunpack.i.h.bf16 %v12851_v15  ;;  %v7866_v0 = vunpack.i.l.bf16 %v12874_v26  ;;  %v4633_v10 = vsel %vm1095_vm11, %v7661_v14, %v7662_v43 }
 0x982   : > { %4894 = vmatmul.f32.gmra.mxu2 %v12948_v7  ;;  %4972 = vmatmul.f32.gmra.mxu3 %v12948_v7  ;;  %v4636_v37 = vsel %vm1095_vm11, %v13753_v63, %v7682_v61  ;;  %v4687_v12 = vsel %vm1095_vm11, %v13754_v24, %v7842_v2  ;;  %v13755_v36 = vunpack.i.h.bf16 %v12628_v60  ;;  %v7467_v18 = vunpack.i.h.bf16 %v13756_v23  ;;  %v13759_v61 = vld [vmem:[#allocation12_spill] sm:$0xff] }
 0x983   : > { %5010 = vmatpush.msra.mxu0 %v4645_v57  ;;  %5035 = vmatpush.msra.mxu1 %v4696_v50  ;;  %v4630_v59 = vsel %vm1095_vm11, %v7556_v42, %v7557_v40  ;;  %v13757_v14 = vunpack.i.l.bf16 %v12635_v34  ;;  %v7422_v25 = vunpack.i.h.bf16 %v13730_v28  ;;  %v4720_v58 = vsel %vm1095_vm11, %v7861_v27, %v7862_v48 }
 0x984   : > { %5310 = vmatmul.msk.f32.gmra.mxu0 %vm1312_vm12, %v12958_v47  ;;  %v4684_v44 = vsel %vm1095_vm11, %v13755_v36, %v7846_v62  ;;  %v4627_v39 = vsel %vm1095_vm11, %v7511_v33, %v7512_v52  ;;  %v13758_v34 = vunpack.i.h.bf16 %v12790_v6  ;;  %v13760_v27 = vunpack.i.l.bf16 %v13756_v23 }
 0x985   : > { %5011 = vmatpush.msra.mxu0 %v4642_v1  ;;  %5036 = vmatpush.msra.mxu1 %v4693_v16  ;;  %v7850_v3 = vpop.permute.xlu0 %7849  ;;  %v13761_v6 = vunpack.i.l.bf16 %v13730_v28  ;;  %v13762_v1 = vunpack.i.h.bf16 %v12679_v29 }
 0x986   : > { %v7851_v56 = vunpack.i.l.bf16 %v7850_v3  ;;  %4946 = vmatmul.f32.gmra.mxu1 %v12665_v19  ;;  %v7852_v49 = vunpack.i.h.bf16 %v7850_v3  ;;  %v4678_v50 = vsel %vm1095_vm11, %v13758_v34, %v7866_v0  ;;  %v4624_v20 = vsel %vm1095_vm11, %v13760_v27, %v7467_v18 }
 0x987   : > { %5012 = vmatpush.msra.mxu0 %v4639_v35  ;;  %5037 = vmatpush.msra.mxu1 %v4690_v22  ;;  %v4621_v4 = vsel %vm1095_vm11, %v13761_v6, %v7422_v25 }
 0x988   : > { %v4723_v30 = vsel %vm1095_vm11, %v7847_v41, %v7851_v56  ;;  %v7875_v41 = vpop.permute.xlu1 %7874  ;;  %v4681_v60 = vsel %vm1095_vm11, %v13757_v14, %v7852_v49 }
 0x989   : > { %5013 = vmatpush.msra.mxu0 %v4636_v37  ;;  %5038 = vmatpush.msra.mxu1 %v4687_v12  ;;  %v7876_v53 = vunpack.i.l.bf16 %v7875_v41  ;;  %v7877_v15 = vunpack.i.h.bf16 %v7875_v41 }
 0x98a   : > { %4896 = vmatmul.f32.gmra.mxu2 %v12988_v54  ;;  %5068 = vmatpush.msra.mxu3 %v4723_v30 }
 0x98b   : > { %5014 = vmatpush.msra.mxu0 %v4633_v10  ;;  %5039 = vmatpush.msra.mxu1 %v4684_v44  ;;  %v4672_v21 = vsel %vm1095_vm11, %v13762_v1, %v7876_v53 }
 0x98c   : > { %5311 = vmatmul.msk.f32.gmra.mxu0 %vm1312_vm12, %v4308_v5  ;;  %4974 = vmatmul.f32.gmra.mxu3 %v12988_v54 }
 0x98d   : > { %5015 = vmatpush.msra.mxu0 %v4630_v59  ;;  %5040 = vmatpush.msra.mxu1 %v4681_v60  ;;  %v7870_v57 = vpop.permute.xlu0 %7869 }
 0x98e   : > { %5069 = vmatpush.msra.mxu3 %v4720_v58  ;;  %v7872_v42 = vunpack.i.h.bf16 %v7870_v57  ;;  %v7871_v45 = vunpack.i.l.bf16 %v7870_v57  ;;  %4948 = vmatmul.f32.gmra.mxu1 %v13759_v61 }
 0x98f   : > { %5016 = vmatpush.msra.mxu0 %v4627_v39  ;;  %5041 = vmatpush.msra.mxu1 %v4678_v50 }
 0x990   : > { %v4675_v33 = vsel %vm1095_vm11, %v7761_v51, %v7872_v42  ;;  %v4717_v2 = vsel %vm1095_vm11, %v7867_v38, %v7871_v45  ;;  %v13763_v51 = vunpack.i.l.bf16 %v12663_v17  ;;  %v5082_v38 = vld [vmem:[%s8002_s6 + $0x8] sm:$0x7] }
 0x991   : > { %5017 = vmatpush.msra.mxu0 %v4624_v20  ;;  %5042 = vmatpush.msra.mxu1 %v4675_v33  ;;  %5092 = vst [vmem:[#allocation1 + $0x10] ss:$2 sm:$0xff] %v5082_v38 }
 0x992   : > { %5312 = vmatmul.msk.f32.vlgmr.msra.gmra.mxu2 %vm1312_vm12, %v12864_v13  ;;  %5070 = vmatpush.msra.mxu3 %v4717_v2  ;;  %v4669_v26 = vsel %vm1095_vm11, %v13763_v51, %v7877_v15 }
 0x993   : > { %5018 = vmatpush.msra.mxu0 %v4621_v4  ;;  %5043 = vmatpush.msra.mxu1 %v4672_v21 }
 0x994   : > { %5019 = vmatmul.f32.vlgmr.msra.gmra.mxu0 %v12606_v32  ;;  %5316 = vmatmul.msk.f32.vlgmr.msra.gmra.mxu3 %vm1312_vm12, %v12864_v13 }
 0x995   : > { %5044 = vmatpush.msra.mxu1 %v4669_v26 }
 0x996   : > { %5045 = vmatmul.f32.vlgmr.msra.gmra.mxu1 %v12848_v31 }
 0x998   : > { %v5095_v8 = vld.sshfl [vmem:[#allocation1 + $0x10] sm:$0xff pattern:$0x75316420] }
 0x99a   : > { %5313 = vmatmul.msk.f32.gmra.mxu2 %vm1312_vm12, %v12920_v11 }
 0x99c   : > { %5317 = vmatmul.msk.f32.gmra.mxu3 %vm1312_vm12, %v12920_v11  ;;  %5022 = vmatmul.f32.gmra.mxu0 %v12643_v46  ;;  %v5081_v46 = vld [vmem:[%s8002_s6] sm:$0x77]  ;;  %v13764_v11 = vld [vmem:[#allocation16_spill] sm:$0xff] }
 0x99d   : > { %5090 = vst [vmem:[#allocation1] ss:$2 sm:$0xff] %v5081_v46 }
 0x99e   : > { %5048 = vmatmul.f32.gmra.mxu1 %v12909_v55 }
 0x9a2   : > { %5314 = vmatmul.msk.f32.gmra.mxu2 %vm1312_vm12, %v12958_v47 }
 0x9a4   : > { %5318 = vmatmul.msk.f32.gmra.mxu3 %vm1312_vm12, %v12958_v47  ;;  %5024 = vmatmul.f32.gmra.mxu0 %v12665_v19  ;;  %v5083_v19 = vld [vmem:[%s264_s8] sm:$0x77]  ;;  %v5094_v13 = vld.sshfl [vmem:[#allocation1 + $0x8] sm:$0xff pattern:$0x75316420] }
 0x9a5   : > { %v5093_v28 = vld.sshfl [vmem:[#allocation1] sm:$0xff pattern:$0x75316420]  ;;  %v5084_v47 = vld [vmem:[%s264_s8 + $0x8] sm:$0x7] }
 0x9a6   : > { %5050 = vmatmul.f32.gmra.mxu1 %v12948_v7  ;;  %5104 = vst [vmem:[#allocation1] ss:$2 sm:$0xff] %v5083_v19 }
 0x9a7   : > { %5106 = vst [vmem:[#allocation1 + $0x10] ss:$2 sm:$0xff] %v5084_v47 }
 0x9aa   : > { %5315 = vmatmul.msk.f32.gmra.mxu2 %vm1312_vm12, %v4308_v5 }
 0x9ab   : > { %v4864_v17 = vpop.f32.mrf.mxu3 }
 0x9ac   : > { %5319 = vmatmul.msk.f32.gmra.mxu3 %vm1312_vm12, %v4308_v5  ;;  %5026 = vmatmul.f32.gmra.mxu0 %v13759_v61  ;;  %v4865_v7 = vadd.f32 %v4864_v17, %v13764_v11 }
 0x9ad   : > { %v5107_v56 = vld.sshfl [vmem:[#allocation1] sm:$0xff pattern:$0x75316420]  ;;  %v5108_v58 = vld.sshfl [vmem:[#allocation1 + $0x8] sm:$0xff pattern:$0x75316420] }
 0x9ae   : > { %5052 = vmatmul.f32.gmra.mxu1 %v12988_v54  ;;  %v5109_v45 = vld.sshfl [vmem:[#allocation1 + $0x10] sm:$0xff pattern:$0x75316420] }
 0x9b3   : > { %v4867_v29 = vpop.f32.mrf.mxu3 }
 0x9bb   : > { %v4869_v32 = vpop.f32.mrf.mxu3 }
 0x9c5   : > { %v4871_v31 = vpop.f32.mrf.mxu3 }
 0x9f0   : > { %v4916_v55 = vpop.f32.mrf.mxu0 }
 0x9f3   : > { %v4942_v16 = vpop.f32.mrf.mxu1  ;;  %v4890_v43 = vpop.f32.mrf.mxu2 }
 0x9f4   : > { %v4891_v3 = vadd.f32 %v4890_v43, %v4865_v7  ;;  %v4968_v62 = vpop.f32.mrf.mxu3  ;;  %v4943_v44 = vadd.f32 %v4942_v16, %v13764_v11 }
 0x9f6   : > { %v4917_v35 = vadd.f32 %v4916_v55, %v4891_v3  ;;  %v4969_v59 = vadd.f32 %v4968_v62, %v4943_v44 }
 0x9f8   : > { %v5085_v9 = vsub.f32 1.0, %v4917_v35  ;;  %v5113_v54 = vmul.f32 %v5107_v56, %v4917_v35 }
 0x9f9   : > { %v4919_v22 = vpop.f32.mrf.mxu0 }
 0x9fa   : > { %v5099_v40 = vmul.f32 %v5093_v28, %v5085_v9 }
 0x9fb   : > { %v4945_v49 = vpop.f32.mrf.mxu1 }
 0x9fc   : > { %v5116_v63 = vadd.f32 %v5113_v54, %v5099_v40 }
 0x9fd   : > { %v4893_v37 = vpop.f32.mrf.mxu2  ;;  %v4971_v24 = vpop.f32.mrf.mxu3 }
 0xa01   : > { %v4921_v12 = vpop.f32.mrf.mxu0 }
 0xa03   : > { %v4947_v30 = vpop.f32.mrf.mxu1 }
 0xa05   : > { %v4895_v52 = vpop.f32.mrf.mxu2  ;;  %v4973_v48 = vpop.f32.mrf.mxu3 }
 0xa09   : > { %v4923_v5 = vpop.f32.mrf.mxu0 }
 0xa0b   : > { %v4949_v0 = vpop.f32.mrf.mxu1 }
 0xa0d   : > { %v4897_v10 = vpop.f32.mrf.mxu2 }
 0xa0f   : > { %v4975_v36 = vpop.f32.mrf.mxu3 }
 0xa11   : > { %v5020_v41 = vpop.f32.mrf.mxu0 }
 0xa12   : > { %v5021_v23 = vadd.f32 %v5020_v41, %v13764_v11 }
 0xa13   : > { %v5046_v18 = vpop.f32.mrf.mxu1 }
 0xa14   : > { %v5047_v14 = vadd.f32 %v5046_v18, %v5021_v23 }
 0xa15   : > { %v4994_v60 = vpop.f32.mrf.mxu2 }
 0xa16   : > { %v4995_v25 = vadd.f32 %v4994_v60, %v4969_v59 }
 0xa17   : > { %v5072_v39 = vpop.f32.mrf.mxu3 }
 0xa18   : > { %v5086_v57 = vsub.f32 1.0, %v4995_v25  ;;  %v5129_v53 = vrot.slane %v4995_v25, 4  ;;  %v5073_v42 = vadd.f32 %v5072_v39, %v5047_v14  ;;  %v5114_v61 = vmul.f32 %v5108_v58, %v4995_v25 }
 0xa19   : > { %v5023_v34 = vpop.f32.mrf.mxu0 }
 0xa1a   : > { %v5100_v50 = vmul.f32 %v5094_v13, %v5086_v57  ;;  %v5130_v15 = vsel %vm5122_vm3, %v4917_v35, %v5129_v53  ;;  %v5087_v27 = vsub.f32 1.0, %v5073_v42  ;;  %5133 = vst.msk [vmem:[%s274_s10 + $0x8] sm:$0x7] %vm13765_vm4, %v5073_v42  ;;  %v5115_v6 = vmul.f32 %v5109_v45, %v5073_v42 }
 0xa1b   : > { %5132 = vst [vmem:[%s274_s10] sm:$0x77] %v5130_v15  ;;  %v5049_v20 = vpop.f32.mrf.mxu1 }
 0xa1c   : > { %v5117_v33 = vadd.f32 %v5114_v61, %v5100_v50  ;;  %v5101_v2 = vmul.f32 %v5095_v8, %v5087_v27 }
 0xa1d   : > { %v4997_v4 = vpop.f32.mrf.mxu2 }
 0xa1e   : > { %v5121_v1 = vrot.slane %v5117_v33, 4  ;;  %v5118_v21 = vadd.f32 %v5115_v6, %v5101_v2 }
 0xa1f   : > { %v5075_v51 = vpop.f32.mrf.mxu3 }
 0xa20   : > { %v5123_v26 = vsel %vm5122_vm3, %v5116_v63, %v5121_v1  ;;  %5126 = vst.msk [vmem:[%s269_s13 + $0x8] sm:$0x7] %vm13766_vm5, %v5118_v21 }
 0xa21   : > { %5125 = vst [vmem:[%s269_s13] sm:$0x77] %v5123_v26  ;;  %v5025_v17 = vpop.f32.mrf.mxu0 }
 0xa23   : > { %v5051_v29 = vpop.f32.mrf.mxu1 }
 0xa25   : > { %v4999_v32 = vpop.f32.mrf.mxu2 }
 0xa27   : > { %v5077_v46 = vpop.f32.mrf.mxu3 }
 0xa29   : > { %v5027_v31 = vpop.f32.mrf.mxu0 }
 0xa2b   : > { %v5053_v19 = vpop.f32.mrf.mxu1 }
 0xa2d   : > { %v5001_v28 = vpop.f32.mrf.mxu2 }
 0xa2f   : > { %v5079_v13 = vpop.f32.mrf.mxu3 }
 0xa30 PF: > { %s17_s18 = sadd.s32 1, %s7921_s18  }
 0xa31   : > { %p14_p7 = scmp.ge.s32.totalorder %s17_s18, 4  }
 0xa33   :  { %16 = sbr.rel (!%p14_p7) target bundleno = 1 (0x1), region = 95 }
 0xa38   :  { %5171 = vsyncpa [#allocation5], 1 }
 0xa39   :  { %5173 = vsyncpa [#allocation5 + $0x1], 1 }

</bundles_post_ra>
